<compile_context>
chip_gen: v7x
topology: tpu7x:2x2x1
jax: 0.10.0
libtpu: 0.0.40
codegen_flags: <defaults>
</compile_context>

<pallas_src>
import functools
import numpy as np

import jax
import jax.numpy as jnp
from jax.experimental import pallas as pl
from jax.experimental.pallas import tpu as pltpu

# ----------------------------- model config ---------------------------------
FEATURE_VECTOR_SIZE = 8
D_IN = 3
D_OUT = 1
HIDDEN_DIMS = [32, 32, 32, 32]
SKIP_IN = (2,)
GEO_BIAS = 1.0

SOFTPLUS_BETA = 100.0
SOFTPLUS_INV_BETA = 1.0 / SOFTPLUS_BETA
SOFTPLUS_THRESHOLD = 20.0  # matches torch.nn.Softplus default

PARAM_SLAB_WIDTH = 128     # lane width of the packed parameter slab


def build_layer_dims():
    dims = [D_IN] + HIDDEN_DIMS + [D_OUT + FEATURE_VECTOR_SIZE]
    layer_io = []  # (in_dim, out_dim) per linear layer l = 0..num_layers-2
    for l in range(len(dims) - 1):
        out_dim = dims[l + 1] - dims[0] if (l + 1) in SKIP_IN else dims[l + 1]
        layer_io.append((dims[l], out_dim))
    return dims, layer_io


def init_params(key):
    """Geometric init; torch nn.Linear layout: W (out_dim, in_dim), b (out_dim,)."""
    dims, layer_io = build_layer_dims()
    num_layers = len(dims)
    params = []
    for l, (in_dim, out_dim) in enumerate(layer_io):
        key, wk = jax.random.split(key)
        if l == num_layers - 2:
            mean = np.sqrt(np.pi) / np.sqrt(dims[l])
            w = mean + 0.0001 * jax.random.normal(wk, (out_dim, in_dim), jnp.float32)
            b = jnp.full((out_dim,), -GEO_BIAS, jnp.float32)
        else:
            std = np.sqrt(2.0) / np.sqrt(out_dim)
            w = std * jax.random.normal(wk, (out_dim, in_dim), jnp.float32)
            b = jnp.zeros((out_dim,), jnp.float32)
        params.append((w, b))
    return params


# ------------------------------ softplus -------------------------------------
def _softplus100(x):
    # torch Softplus(beta=100): (1/beta)*log1p(exp(beta*x)), linear past threshold.
    # Mask computed once and reused; multiply by precomputed 1/beta (no divide).
    z = SOFTPLUS_BETA * x
    use_linear = z > SOFTPLUS_THRESHOLD
    soft = jnp.log1p(jnp.exp(jnp.where(use_linear, 0.0, z))) * SOFTPLUS_INV_BETA
    return jnp.where(use_linear, x, soft)


# ------------------------------ Pallas kernel --------------------------------
def _mlp_kernel(layout, bias_col, x_ref, p_ref, out_ref):
    """layout: static per-layer tuples describing where each layer lives in the
    packed parameter slab.  Activations h are (channels, tile_n) f32."""
    n_layers = len(layout)
    h = None
    for l, entry in enumerate(layout):
        if entry[0] == "skip":
            # Skip layer with the concat folded away: weights pre-split and
            # pre-scaled by 1/sqrt(2) host-side; bias added exactly once.
            # x is re-read at point of use from the already-resident VMEM block.
            _, r_h, r_x, out_d, in_h, in_x = entry
            w_h = p_ref[r_h:r_h + out_d, 0:in_h]
            w_x = p_ref[r_x:r_x + out_d, 0:in_x]
            b = p_ref[r_h:r_h + out_d, bias_col:bias_col + 1]
            h = (jnp.dot(w_h, h, preferred_element_type=jnp.float32)
                 + jnp.dot(w_x, x_ref[...], preferred_element_type=jnp.float32)
                 + b)
        else:
            _, r0, out_d, in_d = entry
            w = p_ref[r0:r0 + out_d, 0:in_d]
            b = p_ref[r0:r0 + out_d, bias_col:bias_col + 1]
            src = x_ref[...] if l == 0 else h
            h = jnp.dot(w, src, preferred_element_type=jnp.float32) + b
        if l < n_layers - 1:
            h = _softplus100(h)
    out_ref[...] = h                          # (out_dim, tile_n), lane-dense store


# --------------------------- parameter packing -------------------------------
def _prepare_param_slab(params):
    """Pack all weights/biases into ONE (rows, 128) f32 slab.

    Each layer's W occupies rows [r0, r0+out) x cols [0, in); its bias sits in
    column `bias_col` of the same rows.  Skip-layer weights are pre-split into
    hidden/input parts and pre-scaled by 1/sqrt(2) so the kernel never concats.
    Row blocks are 8-aligned (sublane tile) so in-kernel slices stay cheap.
    """
    inv_sqrt2 = np.float32(1.0 / np.sqrt(2.0))
    layout = []
    blocks = []          # (row_off, w_np, b_np_or_None)
    row = 0

    def alloc(nrows):
        nonlocal row
        r0 = row
        row += ((nrows + 7) // 8) * 8
        return r0

    for l, (w, b) in enumerate(params):
        w = np.asarray(w, np.float32)
        b = np.asarray(b, np.float32)
        if l in SKIP_IN:
            out_d = w.shape[0]
            in_h = w.shape[1] - D_IN
            r_h = alloc(out_d)
            r_x = alloc(out_d)
            blocks.append((r_h, w[:, :in_h] * inv_sqrt2, b))
            blocks.append((r_x, w[:, in_h:] * inv_sqrt2, None))
            layout.append(("skip", r_h, r_x, out_d, in_h, D_IN))
        else:
            out_d, in_d = w.shape
            r0 = alloc(out_d)
            blocks.append((r0, w, b))
            layout.append(("lin", r0, out_d, in_d))

    bias_col = 0
    for e in layout:
        bias_col = max(bias_col, *(e[4:6] if e[0] == "skip" else (e[3],)))
    assert bias_col < PARAM_SLAB_WIDTH

    total_rows = ((row + 7) // 8) * 8
    slab = np.zeros((total_rows, PARAM_SLAB_WIDTH), np.float32)
    for r0, w, b in blocks:
        slab[r0:r0 + w.shape[0], :w.shape[1]] = w
        if b is not None:
            slab[r0:r0 + w.shape[0], bias_col] = b
    return jnp.asarray(slab), tuple(layout), bias_col


# ------------------------------ tile selection --------------------------------
def _auto_tile_n(n, max_tile=8192, min_tile=512, min_grid=4):
    """Big tiles amortize the ~0.35us/step pipeline overhead, but keep at least
    `min_grid` grid steps so the 'parallel' axis can shard across v7x's 2 TCs."""
    tile = max_tile
    while tile > min_tile and (n + tile - 1) // tile < min_grid:
        tile //= 2
    return tile


# ------------------------------ forward wrapper -------------------------------
def implicit_network_forward(x_cn, params, *, tile_n=None):
    """x_cn: (D_IN, N) channel-major f32 -> (D_OUT+FEATURE_VECTOR_SIZE, N) f32.

    Channel-major layout is the API contract end-to-end: callers pass points on
    the last axis and consume the (9, N) result directly (no wrapper transposes,
    and no pad when N is a multiple of tile_n).
    """
    d_in, n = x_cn.shape
    assert d_in == D_IN
    out_dim = D_OUT + FEATURE_VECTOR_SIZE

    slab, layout, bias_col = _prepare_param_slab(params)

    if tile_n is None:
        tile_n = _auto_tile_n(n)
    assert tile_n % 128 == 0

    n_pad = ((n + tile_n - 1) // tile_n) * tile_n
    x_in = x_cn if n_pad == n else jnp.pad(x_cn, ((0, 0), (0, n_pad - n)))

    # VMEM @ tile_n=8192: ~0.2 MiB x2 input, ~0.3 MiB x2 output, ~0.2 MiB params,
    # ~3 MiB live f32 activations -> far under every chip's scoped default.
    # Only very large tiles (>=16K; relevant on v5e's 16 MiB default) need an
    # explicit limit.  v7x note: if HIDDEN_DIMS/tile_n grow, budget roughly
    # 3*hidden*tile_n*4B of live activations + double-buffered I/O against its
    # 64 MiB physical / 32 MiB scoped VMEM (half of v5e/v6e).
    vmem_limit = 32 * 1024 * 1024 if tile_n >= 16384 else None

    out = pl.pallas_call(
        functools.partial(_mlp_kernel, layout, bias_col),
        out_shape=jax.ShapeDtypeStruct((out_dim, n_pad), jnp.float32),
        grid=(n_pad // tile_n,),
        in_specs=[
            pl.BlockSpec((D_IN, tile_n), lambda i: (0, i)),
            # One packed parameter slab, constant index map: loaded once,
            # reused across all grid steps (one pipeline instead of eleven).
            pl.BlockSpec(slab.shape, lambda i: (0, 0)),
        ],
        out_specs=pl.BlockSpec((out_dim, tile_n), lambda i: (0, i)),
        compiler_params=pltpu.CompilerParams(
            dimension_semantics=("parallel",),
            vmem_limit_bytes=vmem_limit),
    )(x_in, slab)

    return out if n_pad == n else out[:, :n]


# ------------------------------ reference -----------------------------------
def implicit_network_reference(x_cn, params):
    """Pure-JAX mirror of the torch forward (cat + /sqrt(2) skip, softplus beta=100).
    Takes/returns the same channel-major layout as the kernel."""
    x = x_cn.T
    h = x
    for l, (w, b) in enumerate(params):
        if l in SKIP_IN:
            h = jnp.concatenate([h, x], axis=1) / np.sqrt(2.0)
        h = h @ w.T + b
        if l < len(params) - 1:
            h = _softplus100(h)
    return h.T


# --------------------------------- main --------------------------------------
if __name__ == "__main__":
    key = jax.random.PRNGKey(0)
    pkey, xkey = jax.random.split(key)

    params = init_params(pkey)

    # Channel-major (D_IN, N) input is the API contract: no wrapper transposes
    # or pads in the perf path.  N=8192 -> auto tile_n=2048 with 4 parallel
    # grid steps (keeps both v7x TensorCores busy; larger N auto-scales to
    # tile_n=8192).
    n_points = 8192
    x_cn = jax.random.normal(xkey, (D_IN, n_points), jnp.float32)

    out = implicit_network_forward(x_cn, params)
    out = jax.block_until_ready(out)

    ref = implicit_network_reference(x_cn, params)
    np.testing.assert_allclose(np.asarray(out), np.asarray(ref),
                               rtol=3e-5, atol=3e-5)

    assert out.shape == (D_OUT + FEATURE_VECTOR_SIZE, n_points)
    print("KERNEL_OK")
</pallas_src>

<mosaic_0001>
module attributes {stable_mosaic.version = 11 : i64} {
  func.func @_mlp_kernel(%arg0: i32, %arg1: memref<3x2048xf32, #tpu.memory_space<vmem>>, %arg2: memref<176x128xf32, #tpu.memory_space<vmem>>, %arg3: memref<9x2048xf32, #tpu.memory_space<vmem>>) attributes {dimension_semantics = [#tpu.dimension_semantics<parallel>], iteration_bounds = array<i64: 4>, scalar_prefetch = 0 : i64, scratch_operands = 0 : i64, tpu.core_type = #tpu.core_type<tc>, window_params = [{transform_indices = @transform_0, window_bounds = array<i64: 3, 2048>}, {pipeline_mode = #tpu.pipeline_mode<synchronous>, transform_indices = @transform_1, window_bounds = array<i64: 176, 128>}, {transform_indices = @transform_2, window_bounds = array<i64: 9, 2048>}]} {
    %c0 = arith.constant 0 : index
    %c0_0 = arith.constant 0 : index
    %0 = vector.load %arg2[%c0, %c0_0] : memref<176x128xf32, #tpu.memory_space<vmem>>, vector<32x3xf32>
    %c0_1 = arith.constant 0 : index
    %c32 = arith.constant 32 : index
    %1 = vector.load %arg2[%c0_1, %c32] : memref<176x128xf32, #tpu.memory_space<vmem>>, vector<32x1xf32>
    %c0_2 = arith.constant 0 : index
    %c0_3 = arith.constant 0 : index
    %2 = vector.load %arg1[%c0_2, %c0_3] : memref<3x2048xf32, #tpu.memory_space<vmem>>, vector<3x2048xf32>
    %cst = arith.constant dense<0.000000e+00> : vector<32x2048xf32>
    %3 = tpu.matmul %0, %2, %cst {dimension_numbers = #tpu.dot_dimension_numbers<[1], [0], [0], [1], [0, 0, 1, 1], [], []>} : vector<32x3xf32>, vector<3x2048xf32>, vector<32x2048xf32> -> vector<32x2048xf32>
    %4 = vector.broadcast %1 : vector<32x1xf32> to vector<32x2048xf32>
    %5 = arith.addf %3, %4 : vector<32x2048xf32>
    %cst_4 = arith.constant 1.000000e+02 : f32
    %6 = vector.broadcast %cst_4 : f32 to vector<32x2048xf32>
    %7 = arith.mulf %6, %5 : vector<32x2048xf32>
    %cst_5 = arith.constant 2.000000e+01 : f32
    %8 = vector.broadcast %cst_5 : f32 to vector<32x2048xf32>
    %9 = arith.cmpf ogt, %7, %8 : vector<32x2048xf32>
    %cst_6 = arith.constant 0.000000e+00 : f32
    %10 = vector.broadcast %cst_6 : f32 to vector<32x2048xf32>
    %11 = arith.select %9, %10, %7 : vector<32x2048xi1>, vector<32x2048xf32>
    %12 = math.exp %11 : vector<32x2048xf32>
    %13 = math.log1p %12 : vector<32x2048xf32>
    %cst_7 = arith.constant 0.00999999977 : f32
    %14 = vector.broadcast %cst_7 : f32 to vector<32x2048xf32>
    %15 = arith.mulf %13, %14 : vector<32x2048xf32>
    %16 = arith.select %9, %5, %15 : vector<32x2048xi1>, vector<32x2048xf32>
    %c32_8 = arith.constant 32 : index
    %c0_9 = arith.constant 0 : index
    %17 = vector.load %arg2[%c32_8, %c0_9] : memref<176x128xf32, #tpu.memory_space<vmem>>, vector<29x32xf32>
    %c32_10 = arith.constant 32 : index
    %c32_11 = arith.constant 32 : index
    %18 = vector.load %arg2[%c32_10, %c32_11] : memref<176x128xf32, #tpu.memory_space<vmem>>, vector<29x1xf32>
    %cst_12 = arith.constant dense<0.000000e+00> : vector<29x2048xf32>
    %19 = tpu.matmul %17, %16, %cst_12 {dimension_numbers = #tpu.dot_dimension_numbers<[1], [0], [0], [1], [0, 0, 1, 1], [], []>} : vector<29x32xf32>, vector<32x2048xf32>, vector<29x2048xf32> -> vector<29x2048xf32>
    %20 = vector.broadcast %18 : vector<29x1xf32> to vector<29x2048xf32>
    %21 = arith.addf %19, %20 : vector<29x2048xf32>
    %cst_13 = arith.constant 1.000000e+02 : f32
    %22 = vector.broadcast %cst_13 : f32 to vector<29x2048xf32>
    %23 = arith.mulf %22, %21 : vector<29x2048xf32>
    %cst_14 = arith.constant 2.000000e+01 : f32
    %24 = vector.broadcast %cst_14 : f32 to vector<29x2048xf32>
    %25 = arith.cmpf ogt, %23, %24 : vector<29x2048xf32>
    %cst_15 = arith.constant 0.000000e+00 : f32
    %26 = vector.broadcast %cst_15 : f32 to vector<29x2048xf32>
    %27 = arith.select %25, %26, %23 : vector<29x2048xi1>, vector<29x2048xf32>
    %28 = math.exp %27 : vector<29x2048xf32>
    %29 = math.log1p %28 : vector<29x2048xf32>
    %cst_16 = arith.constant 0.00999999977 : f32
    %30 = vector.broadcast %cst_16 : f32 to vector<29x2048xf32>
    %31 = arith.mulf %29, %30 : vector<29x2048xf32>
    %32 = arith.select %25, %21, %31 : vector<29x2048xi1>, vector<29x2048xf32>
    %c64 = arith.constant 64 : index
    %c0_17 = arith.constant 0 : index
    %33 = vector.load %arg2[%c64, %c0_17] : memref<176x128xf32, #tpu.memory_space<vmem>>, vector<32x29xf32>
    %c96 = arith.constant 96 : index
    %c0_18 = arith.constant 0 : index
    %34 = vector.load %arg2[%c96, %c0_18] : memref<176x128xf32, #tpu.memory_space<vmem>>, vector<32x3xf32>
    %c64_19 = arith.constant 64 : index
    %c32_20 = arith.constant 32 : index
    %35 = vector.load %arg2[%c64_19, %c32_20] : memref<176x128xf32, #tpu.memory_space<vmem>>, vector<32x1xf32>
    %cst_21 = arith.constant dense<0.000000e+00> : vector<32x2048xf32>
    %36 = tpu.matmul %33, %32, %cst_21 {dimension_numbers = #tpu.dot_dimension_numbers<[1], [0], [0], [1], [0, 0, 1, 1], [], []>} : vector<32x29xf32>, vector<29x2048xf32>, vector<32x2048xf32> -> vector<32x2048xf32>
    %c0_22 = arith.constant 0 : index
    %c0_23 = arith.constant 0 : index
    %37 = vector.load %arg1[%c0_22, %c0_23] : memref<3x2048xf32, #tpu.memory_space<vmem>>, vector<3x2048xf32>
    %cst_24 = arith.constant dense<0.000000e+00> : vector<32x2048xf32>
    %38 = tpu.matmul %34, %37, %cst_24 {dimension_numbers = #tpu.dot_dimension_numbers<[1], [0], [0], [1], [0, 0, 1, 1], [], []>} : vector<32x3xf32>, vector<3x2048xf32>, vector<32x2048xf32> -> vector<32x2048xf32>
    %39 = arith.addf %36, %38 : vector<32x2048xf32>
    %40 = vector.broadcast %35 : vector<32x1xf32> to vector<32x2048xf32>
    %41 = arith.addf %39, %40 : vector<32x2048xf32>
    %cst_25 = arith.constant 1.000000e+02 : f32
    %42 = vector.broadcast %cst_25 : f32 to vector<32x2048xf32>
    %43 = arith.mulf %42, %41 : vector<32x2048xf32>
    %cst_26 = arith.constant 2.000000e+01 : f32
    %44 = vector.broadcast %cst_26 : f32 to vector<32x2048xf32>
    %45 = arith.cmpf ogt, %43, %44 : vector<32x2048xf32>
    %cst_27 = arith.constant 0.000000e+00 : f32
    %46 = vector.broadcast %cst_27 : f32 to vector<32x2048xf32>
    %47 = arith.select %45, %46, %43 : vector<32x2048xi1>, vector<32x2048xf32>
    %48 = math.exp %47 : vector<32x2048xf32>
    %49 = math.log1p %48 : vector<32x2048xf32>
    %cst_28 = arith.constant 0.00999999977 : f32
    %50 = vector.broadcast %cst_28 : f32 to vector<32x2048xf32>
    %51 = arith.mulf %49, %50 : vector<32x2048xf32>
    %52 = arith.select %45, %41, %51 : vector<32x2048xi1>, vector<32x2048xf32>
    %c128 = arith.constant 128 : index
    %c0_29 = arith.constant 0 : index
    %53 = vector.load %arg2[%c128, %c0_29] : memref<176x128xf32, #tpu.memory_space<vmem>>, vector<32x32xf32>
    %c128_30 = arith.constant 128 : index
    %c32_31 = arith.constant 32 : index
    %54 = vector.load %arg2[%c128_30, %c32_31] : memref<176x128xf32, #tpu.memory_space<vmem>>, vector<32x1xf32>
    %cst_32 = arith.constant dense<0.000000e+00> : vector<32x2048xf32>
    %55 = tpu.matmul %53, %52, %cst_32 {dimension_numbers = #tpu.dot_dimension_numbers<[1], [0], [0], [1], [0, 0, 1, 1], [], []>} : vector<32x32xf32>, vector<32x2048xf32>, vector<32x2048xf32> -> vector<32x2048xf32>
    %56 = vector.broadcast %54 : vector<32x1xf32> to vector<32x2048xf32>
    %57 = arith.addf %55, %56 : vector<32x2048xf32>
    %cst_33 = arith.constant 1.000000e+02 : f32
    %58 = vector.broadcast %cst_33 : f32 to vector<32x2048xf32>
    %59 = arith.mulf %58, %57 : vector<32x2048xf32>
    %cst_34 = arith.constant 2.000000e+01 : f32
    %60 = vector.broadcast %cst_34 : f32 to vector<32x2048xf32>
    %61 = arith.cmpf ogt, %59, %60 : vector<32x2048xf32>
    %cst_35 = arith.constant 0.000000e+00 : f32
    %62 = vector.broadcast %cst_35 : f32 to vector<32x2048xf32>
    %63 = arith.select %61, %62, %59 : vector<32x2048xi1>, vector<32x2048xf32>
    %64 = math.exp %63 : vector<32x2048xf32>
    %65 = math.log1p %64 : vector<32x2048xf32>
    %cst_36 = arith.constant 0.00999999977 : f32
    %66 = vector.broadcast %cst_36 : f32 to vector<32x2048xf32>
    %67 = arith.mulf %65, %66 : vector<32x2048xf32>
    %68 = arith.select %61, %57, %67 : vector<32x2048xi1>, vector<32x2048xf32>
    %c160 = arith.constant 160 : index
    %c0_37 = arith.constant 0 : index
    %69 = vector.load %arg2[%c160, %c0_37] : memref<176x128xf32, #tpu.memory_space<vmem>>, vector<9x32xf32>
    %c160_38 = arith.constant 160 : index
    %c32_39 = arith.constant 32 : index
    %70 = vector.load %arg2[%c160_38, %c32_39] : memref<176x128xf32, #tpu.memory_space<vmem>>, vector<9x1xf32>
    %cst_40 = arith.constant dense<0.000000e+00> : vector<9x2048xf32>
    %71 = tpu.matmul %69, %68, %cst_40 {dimension_numbers = #tpu.dot_dimension_numbers<[1], [0], [0], [1], [0, 0, 1, 1], [], []>} : vector<9x32xf32>, vector<32x2048xf32>, vector<9x2048xf32> -> vector<9x2048xf32>
    %72 = vector.broadcast %70 : vector<9x1xf32> to vector<9x2048xf32>
    %73 = arith.addf %71, %72 : vector<9x2048xf32>
    %c0_41 = arith.constant 0 : index
    %c0_42 = arith.constant 0 : index
    %74 = vector.load %arg3[%c0_41, %c0_42] : memref<9x2048xf32, #tpu.memory_space<vmem>>, vector<9x2048xf32>
    tpu.vector_store %arg3[%c0_41, %c0_42], %73 {strides = array<i32>} : memref<9x2048xf32, #tpu.memory_space<vmem>>, vector<9x2048xf32>,
    return
  }
  func.func @transform_0(%arg0: i32) -> (i32, i32) {
    %c0_i32 = arith.constant 0 : i32
    %c0_i32_0 = arith.constant 0 : i32
    return %c0_i32, %arg0 : i32, i32
  }
  func.func @transform_1(%arg0: i32) -> (i32, i32) {
    %c0_i32 = arith.constant 0 : i32
    %c0_i32_0 = arith.constant 0 : i32
    %c0_i32_1 = arith.constant 0 : i32
    return %c0_i32, %c0_i32_0 : i32, i32
  }
  func.func @transform_2(%arg0: i32) -> (i32, i32) {
    %c0_i32 = arith.constant 0 : i32
    %c0_i32_0 = arith.constant 0 : i32
    return %c0_i32, %arg0 : i32, i32
  }
}

</mosaic_0001>

<bundles_post_ra>
// kernel: tpu_custom_call.1
= control target key start
LH: loop header
LB: loop body
LE: loop exit
PB: predicated region body
PF: predicated region fallthrough
CT: control target
= control target key end

     0   :  { %7 = vsyncpa [#allocation3], 0  ;;  %s18668_s0 = inlined_call_operand.hbm [shape: f32[3,8192], index: 0, kind: input, shape index: {}]   ;;  %s18669_s1 = inlined_call_operand.hbm [shape: f32[176,128], index: 1, kind: input, shape index: {}]   ;;  %s18670_s2 = inlined_call_operand.hbm [shape: f32[9,8192], index: 2, kind: output, shape index: {}]  }
   0x1   :  { %9 = vsyncpa [#allocation3 + $0x1], 0 }
   0x2   :  { %10 = vsyncpa [#allocation6], 0 }
   0x3   :  { %11 = vsyncpa [#allocation4], 0 }
   0x4   :  { %13 = vsyncpa [#allocation4 + $0x1], 0  ;;  %s10767_s9 = smov 0   ;;  %s10769_s10 = smov 0  }
   0x5   :  { %s10771_s11 = smov 0   ;;  %s10773_s12 = smov 0  }
   0x6 LB: > { %s10788_s13 = sadd.s32 4294967295, %s10739_s12   ;;  %s8911_s14 = sadd.s32 4294967294, %s10739_s12   ;;  %s10739_s12 = sphi %s10773_s12, %s20731_s12   ;;  %s10735_s11 = sphi %s10771_s11, %s20730_s11   ;;  %s10731_s10 = sphi %s10769_s10, %s20729_s10   ;;  %s10727_s9 = sphi %s10767_s9, %s20728_s9  }
   0x7   : > { %p39_p0 = scmp.ne.s32.totalorder %s10731_s10, %s10727_s9  ;;  %p18671_p1 = scmp.eq.s32.totalorder %s10788_s13, 0 }
   0x8   : > { %p90_p3 = scmp.eq.s32.totalorder %s8911_s14, 3  ;;  %p8912_p5 = scmp.ge.s32.totalorder %s10739_s12, 1 }
   0x9   : > { %p10797_p4 = por %p18671_p1, %p39_p0  ;;  %p97_p7 = scmp.lt.s32.totalorder %s10739_s12, 5 }
   0xa   : > { %p10802_p6 = por %p90_p3, %p39_p0  ;;  %s10741_s18 = smov [#allocation5]  }
   0xb   : > { %s19152_s15 = scalar_select %p10797_p4, 1, 0 }
   0xc   : > { %s19153_s16 = scalar_select %p10802_p6, 1, 0 }
   0xd   : > { %p10807_p8 = pnand %p8912_p5, %p97_p7  ;;  %s109_s19 = sshll.u32 %s10741_s18, 4  ;;  %s110_s19 = int_to_ptr.vmem [resolvable:$true] %s109_s19 }
   0xe   : > { %s10820_s21 = sadd.s32 1, %s10739_s12   ;;  %s26_s22 = sadd.s32 1, %s10735_s11 }
   0xf   : > { %s19154_s17 = scalar_select %p10807_p8, 1, 0 }
  0x10   : > { %p9497_p9 = pneg %p10807_p8  ;;  %s23_s23 = ssub.s32 %s10739_s12, %s10820_s21 }
  0x11   : > { %s10611_s26 = scalar_lea.hbm %s18669_s1, 2816 }
  0x12   : > { %p10815_p10 = pnand %p9497_p9, %p18671_p1  ;;  %p10612_p11 = scmp.ne.s32.totalorder %s18669_s1, %s10611_s26 }
  0x13   : > { %p10618_p3 = scmp.lt.u32.totalorder %s10611_s26, %s18669_s1 }
  0x14   : > { %p10613_p12 = pneg %p10815_p10 }
  0x16   : > { %p10614_p13 = pnand %p10613_p12, %p10612_p11 }
  0x18   : > { %p10615_p0 = pneg %p10614_p13 }
  0x1a   : > { %p10620_p5 = pnand %p10618_p3, %p10615_p0 }
  0x1c   : > { %10623 = shalt.err (!%p10620_p5)
}
  0x1d   : > { %s10624_s3 = scalar_lea.vmem %s110_s19, 2816  ;;  %p10632_p2 = scmp.lt.s32.totalorder %s110_s19, %s110_s19 }
  0x1e   : > { %p10625_p7 = scmp.ne.s32.totalorder %s110_s19, %s10624_s3  ;;  %p10633_p6 = scmp.lt.s32.totalorder %s10624_s3, %s10624_s3 }
  0x20   : > { %p10627_p9 = pnand %p10625_p7, %p10613_p12  ;;  %p10634_p4 = por %p10633_p6, %p10632_p2 }
  0x22   : > { %p10628_p1 = pneg %p10627_p9 }
  0x24   : > { %p10635_p8 = pnand %p10634_p4, %p10628_p1 }
  0x26   : > { %10638 = shalt.err (!%p10635_p8)
}
  0x27   : > { %s10742_s4 = smov 128   ;;  %s10743_s5 = smov 8  }
  0x28   : > { %9500 = dma.hbm_to_vmem [thread:$0]  (!%p10815_p10), %s18669_s1, 2816, %s110_s19, [#allocation6], %s10742_s4, %s10742_s4, %s10743_s5  }
  0x29   : > { %p24_p11 = scmp.eq.s32.totalorder %s23_s23, 0  ;;  %p33_p2 = scmp.ne.s32.totalorder %s10735_s11, %s10731_s10 }
  0x2a   : > { %p34_p1 = scmp.eq.s32.totalorder %s10739_s12, 0  ;;  %p9510_p4 = scmp.lt.s32.totalorder %s10739_s12, 4 }
  0x2b   : > { %s10846_s8 = scalar_select %p24_p11, %s10735_s11, %s26_s22  }
  0x2c   : > { %p35_p6 = por %p34_p1, %p33_p2  ;;  %p19156_p8 = scmp.eq.s32.totalorder %s10788_s13, 3 }
  0x2d   : > { %s123_s18 = sand.u32 1, %s10735_s11   ;;  %s9151_s24 = sshll.u32 %s10739_s12, 10 }
  0x2e   : > { %p10850_p12 = por %p19156_p8, %p33_p2  ;;  %s8915_s25 = sshll.u32 %s123_s18, 6 }
  0x2f   : > { %s10859_s27 = scalar_lea.hbm %s18668_s0, %s9151_s24  ;;  %s127_s19 = scalar_lea.vmem [#allocation2], %s8915_s25 }
  0x30   : > { %s135_s22 = sshll.u32 %s127_s19, 4  ;;  %p10861_p10 = pnand %p9510_p4, %p35_p6  ;;  %s10865_s22 = int_to_ptr.vmem [resolvable:$true] %s135_s22 }
  0x31   : > { %s124_s28 = scalar_lea.sflag [#allocation3], %s123_s18  ;;  %s10639_s29 = scalar_lea.hbm %s10859_s27, 1024 }
  0x32   : > { %p10640_p13 = scmp.ne.s32.totalorder %s10859_s27, %s10639_s29  ;;  %p10641_p0 = pneg %p10861_p10 }
  0x33   : > { %s10644_s4 = scalar_lea.hbm %s18668_s0, 4096  ;;  %p10645_p7 = scmp.lt.u32.totalorder %s10859_s27, %s18668_s0 }
  0x34   : > { %p10642_p3 = pnand %p10641_p0, %p10640_p13  ;;  %p10646_p9 = scmp.lt.u32.totalorder %s10644_s4, %s10639_s29 }
  0x35   : > { %p10648_p2 = scmp.lt.u32.totalorder %s10639_s29, %s10859_s27 }
  0x36   : > { %p10643_p5 = pneg %p10642_p3  ;;  %p10647_p11 = por %p10646_p9, %p10645_p7 }
  0x38   : > { %p10649_p1 = por %p10648_p2, %p10647_p11 }
  0x3a   : > { %p10650_p4 = pnand %p10649_p1, %p10643_p5 }
  0x3c   : > { %10653 = shalt.err (!%p10650_p4)
}
  0x3d   : > { %s10654_s7 = scalar_lea.vmem %s10865_s22, 1024  ;;  %s10744_s18 = smov [#allocation2]  }
  0x3e   : > { %p10655_p6 = scmp.ne.s32.totalorder %s10865_s22, %s10654_s7  ;;  %s10659_s24 = sshll.u32 %s10744_s18, 4  ;;  %s10660_s24 = int_to_ptr.vmem [resolvable:$false] %s10659_s24 }
  0x3f   : > { %s10661_s25 = scalar_lea.vmem %s10660_s24, 2048  ;;  %p10662_p3 = scmp.lt.s32.totalorder %s10865_s22, %s10660_s24 }
  0x40   : > { %p10657_p8 = pnand %p10655_p6, %p10641_p0  ;;  %p10663_p7 = scmp.lt.s32.totalorder %s10661_s25, %s10654_s7 }
  0x42   : > { %p10658_p13 = pneg %p10657_p8  ;;  %p10664_p9 = por %p10663_p7, %p10662_p3 }
  0x44   : > { %p10665_p11 = pnand %p10664_p9, %p10658_p13 }
  0x46   : > { %10668 = shalt.err (!%p10665_p11)
}
  0x47   : > { %9504 = dma.hbm_to_vmem [thread:$0]  (!%p10861_p10), %s10859_s27, 1024, %s10865_s22, %s124_s28  }
  0x48   : > { %p19159_p5 = scmp.ne.s32.totalorder %s19154_s17, 0 }
  0x4a   : > { %144 = sbr.rel (%p19159_p5) target bundleno = 2082 (0x822), region = 28 }
  0x51   : > { %s10895_s20 = sand.u32 1, %s10731_s10   ;;  %p19160_p0 = scmp.ne.s32.totalorder %s19152_s15, 0 }
  0x52   : > { %s8919_s26 = sshll.u32 %s10895_s20, 6  ;;  %s147_s19 = scalar_lea.sflag [#allocation3], %s10895_s20 }
  0x53   : > { %s10899_s29 = scalar_lea.vmem [#allocation2], %s8919_s26 }
  0x54   : > { %10714 = dma.done.wait (%p19160_p0), %s147_s19, 1024  }
  0x55   : > { %10716 = vsyncadd (%p19160_p0), %s147_s19, 4294966272  ;;  %p19161_p10 = scmp.eq.s32.totalorder %s10788_s13, 0 }
  0x57   : > { %10718 = dma.done.wait (%p19161_p10), [#allocation6], 2816   ;;  %p19162_p2 = pmov %p19161_p10 }
  0x58   : > { %v18674_v0 = vmov 0.0   ;;  %v10746_v1 = vmov 32   ;;  %v181_v2 = vld [vmem:[%s10899_s29] sm:$0x77]  ;;  %vm18690_vm0 = vcmask 1042432   ;;  %vm18686_vm1 = vcmask 23552  }
  0x59   : > { %10720 = vsyncadd (%p19162_p2), [#allocation6], 4294964480  ;;  %331 = vmatprep.mubr.f32.mxu0 %v18674_v0  ;;  %420 = vmatprep.mubr.f32.mxu1 %v18674_v0  ;;  %v182_v3 = vld [vmem:[%s10899_s29 + $0x8] sm:$0x77]  ;;  %v10913_v4 = vld [vmem:[#allocation5] sm:$0xff]  ;;  %v10915_v5 = vcombine.high %v181_v2, %v181_v2  ;;  %s8921_s15 = sshll.u32 %s10895_s20, 8 }
  0x5a   : > { %9554 = vset.pattern.permute.xlu0 %v10746_v1  ;;  %9555 = vset.pattern.permute.xlu1 %v10746_v1  ;;  %v10917_v6 = vcombine.high %v182_v3, %v182_v3  ;;  %v183_v7 = vld [vmem:[%s10899_s29 + $0x10] sm:$0x77]  ;;  %v184_v8 = vld [vmem:[%s10899_s29 + $0x18] sm:$0x77]  ;;  %v185_v11 = vld [vmem:[%s10899_s29 + $0x20] sm:$0x77] }
  0x5b   : > { %19163 = vst [vmem:[#allocation11_spill] sm:$0xff] %v10915_v5  ;;  %191 = vperm.xlu0 %9554, %v10913_v4   ;;  %8922 = vmatprep.subr.msk.mxu0 %vm18690_vm0, %v10915_v5  ;;  %v10926_v9 = vcombine.high %v183_v7, %v183_v7  ;;  %v10928_v10 = vcombine.high %v184_v8, %v184_v8  ;;  %v186_v12 = vld [vmem:[%s10899_s29 + $0x28] sm:$0x77]  ;;  %v10958_v16 = vld [vmem:[#allocation5 + $0x10] sm:$0xff]  ;;  %v2003_v17 = vld [vmem:[#allocation5 + $0x20] sm:$0xff]  ;;  %s18552_s17 = scalar_lea.vmem [#allocation7], %s8921_s15 }
  0x5c   : > { %19164 = vst [vmem:[#allocation12_spill] sm:$0xff] %v10917_v6  ;;  %8928 = vmatprep.subr.msk.mxu1 %vm18690_vm0, %v10917_v6  ;;  %8923 = vmatpush1.msk.msra.mxu0 %vm18690_vm0, %v181_v2  ;;  %v10940_v13 = vld [vmem:[#allocation5 + $0x8] sm:$0xff]  ;;  %v10946_v14 = vcombine.high %v185_v11, %v185_v11  ;;  %v10948_v15 = vcombine.high %v186_v12, %v186_v12  ;;  %v10972_v18 = vld [vmem:[#allocation5 + $0x18] sm:$0xff]  ;;  %v187_v19 = vld [vmem:[%s10899_s29 + $0x30] sm:$0x77]  ;;  %s9152_s27 = sshll.u32 %s10788_s13, 11 }
  0x5d   : > { %19165 = vst [vmem:[#allocation13_spill] sm:$0xff] %v10926_v9  ;;  %19166 = vst [vmem:[#allocation14_spill] sm:$0xff] %v10928_v10  ;;  %8929 = vmatpush1.msk.msra.mxu1 %vm18690_vm0, %v182_v3  ;;  %8924 = vmatmul.mubr.msk.f32.vlgmr.msra.gmra.mrb[0].mxu0 %vm18686_vm1, %v10913_v4  ;;  %v188_v20 = vld [vmem:[%s10899_s29 + $0x38] sm:$0x77]  ;;  %v2005_v21 = vld [vmem:[#allocation5 + $0x30] sm:$0xff]  ;;  %v10983_v23 = vcombine.high %v187_v19, %v187_v19  ;;  %s8828_s22 = sshll.u32 %s18552_s17, 4  ;;  %s18619_s30 = scalar_lea.hbm %s18670_s2, %s9152_s27  ;;  %s18622_s22 = int_to_ptr.vmem [resolvable:$true] %s8828_s22 }
  0x5e   : > { %8930 = vmatmul.mubr.msk.f32.vlgmr.msra.gmra.mrb[0].mxu1 %vm18686_vm1, %v10913_v4  ;;  %337 = vmatprep.mubr.f32.mxu0 %v18674_v0  ;;  %19167 = vst [vmem:[#allocation15_spill] sm:$0xff] %v10946_v14  ;;  %19168 = vst [vmem:[#allocation16_spill] sm:$0xff] %v10948_v15  ;;  %v2004_v22 = vld [vmem:[#allocation5 + $0x28] sm:$0xff]  ;;  %v10985_v24 = vcombine.high %v188_v20, %v188_v20  ;;  %v3772_v25 = vld [vmem:[#allocation5 + $0x40] sm:$0xff]  ;;  %s8815_s13 = scalar_lea.sflag [#allocation4], %s10895_s20  ;;  %s10669_s3 = scalar_lea.vmem %s18622_s22, 4096 }
  0x5f   : > { %426 = vmatprep.mubr.f32.mxu1 %v18674_v0  ;;  %8934 = vmatprep.subr.msk.mxu0 %vm18690_vm0, %v10926_v9  ;;  %19169 = vst [vmem:[#allocation17_spill] sm:$0xff] %v10983_v23  ;;  %v2006_v26 = vld [vmem:[#allocation5 + $0x38] sm:$0x1f]  ;;  %v3774_v27 = vld [vmem:[#allocation5 + $0x50] sm:$0xff]  ;;  %v3773_v28 = vld [vmem:[#allocation5 + $0x48] sm:$0xff]  ;;  %p10670_p1 = scmp.ne.s32.totalorder %s18622_s22, %s10669_s3  ;;  %s10748_s4 = smov [#allocation7]  }
  0x60   : > { %8940 = vmatprep.subr.msk.mxu1 %vm18690_vm0, %v10928_v10  ;;  %8935 = vmatpush1.msk.msra.mxu0 %vm18690_vm0, %v183_v7  ;;  %19170 = vst [vmem:[#allocation18_spill] sm:$0xff] %v10985_v24  ;;  %v6382_v29 = vld [vmem:[#allocation5 + $0x80] sm:$0xff]  ;;  %v3775_v30 = vld [vmem:[#allocation5 + $0x58] sm:$0xff]  ;;  %v6384_v31 = vld [vmem:[#allocation5 + $0x90] sm:$0xff]  ;;  %s10673_s5 = sshll.u32 %s10748_s4, 4  ;;  %s10674_s5 = int_to_ptr.vmem [resolvable:$false] %s10673_s5 }
  0x61   : > { %8941 = vmatpush1.msk.msra.mxu1 %vm18690_vm0, %v184_v8  ;;  %8925 = vmatmul.mubr.msk.f32.gmra.mrb[2].mxu0 %vm18686_vm1, %v10940_v13  ;;  %v6383_v32 = vld [vmem:[#allocation5 + $0x88] sm:$0xff]  ;;  %v8150_v33 = vld [vmem:[#allocation5 + $0xa0] sm:$0xff]  ;;  %v6385_v34 = vld [vmem:[#allocation5 + $0x98] sm:$0xff]  ;;  %p10671_p4 = pnand %p10670_p1, %p10850_p12  ;;  %s10675_s6 = scalar_lea.vmem %s10674_s5, 8192 }
  0x62   : > { %8931 = vmatmul.mubr.msk.f32.gmra.mrb[2].mxu1 %vm18686_vm1, %v10940_v13  ;;  %343 = vmatprep.mubr.f32.mxu0 %v18674_v0  ;;  %v8151_v35 = vld [vmem:[#allocation5 + $0xa8] sm:$0x1]  ;;  %p10676_p8 = scmp.lt.s32.totalorder %s18622_s22, %s10674_s5  ;;  %p10677_p13 = scmp.lt.s32.totalorder %s10675_s6, %s10669_s3 }
  0x63   : > { %432 = vmatprep.mubr.f32.mxu1 %v18674_v0  ;;  %8946 = vmatprep.subr.msk.mxu0 %vm18690_vm0, %v10946_v14  ;;  %p10672_p6 = pneg %p10671_p4 }
  0x64   : > { %8952 = vmatprep.subr.msk.mxu1 %vm18690_vm0, %v10948_v15  ;;  %196 = vperm.xlu0 %9554, %v10940_v13   ;;  %p10678_p3 = por %p10677_p13, %p10676_p8 }
  0x65   : > { %201 = vperm.xlu1 %9555, %v10958_v16   ;;  %8926 = vmatmul.mubr.msk.f32.gmra.mrb[4].mxu0 %vm18686_vm1, %v10958_v16 }
  0x66   : > { %8932 = vmatmul.mubr.msk.f32.gmra.mrb[4].mxu1 %vm18686_vm1, %v10958_v16  ;;  %349 = vmatprep.mubr.f32.mxu0 %v18674_v0  ;;  %p10679_p7 = pnand %p10678_p3, %p10672_p6 }
  0x67   : > { %438 = vmatprep.mubr.f32.mxu1 %v18674_v0 }
  0x68   : > { %2009 = vperm.xlu0 %9554, %v2003_v17  }
  0x69   : > { %206 = vperm.xlu1 %9555, %v10972_v18   ;;  %8927 = vmatmul.mubr.msk.f32.gmra.mrb[6].mxu0 %vm18686_vm1, %v10972_v18 }
  0x6a   : > { %8933 = vmatmul.mubr.msk.f32.gmra.mrb[6].mxu1 %vm18686_vm1, %v10972_v18  ;;  %509 = vmatprep.mubr.f32.mxu0 %v18674_v0 }
  0x6b   : > { %598 = vmatprep.mubr.f32.mxu1 %v18674_v0 }
  0x6c   : > { %2019 = vperm.xlu0 %9554, %v2005_v21  }
  0x6d   : > { %2014 = vperm.xlu1 %9555, %v2004_v22   ;;  %8936 = vmatmul.mubr.msk.f32.vlgmr.msra.gmra.mrb[8].mxu0 %vm18686_vm1, %v10913_v4 }
  0x6e   : > { %8942 = vmatmul.mubr.msk.f32.vlgmr.msra.gmra.mrb[8].mxu1 %vm18686_vm1, %v10913_v4  ;;  %515 = vmatprep.mubr.f32.mxu0 %v18674_v0 }
  0x6f   : > { %604 = vmatprep.mubr.f32.mxu1 %v18674_v0  ;;  %8947 = vmatpush1.msk.msra.mxu0 %vm18690_vm0, %v185_v11 }
  0x70   : > { %8953 = vmatpush1.msk.msra.mxu1 %vm18690_vm0, %v186_v12  ;;  %8958 = vmatprep.subr.msk.mxu0 %vm18690_vm0, %v10983_v23 }
  0x71   : > { %8964 = vmatprep.subr.msk.mxu1 %vm18690_vm0, %v10985_v24  ;;  %8937 = vmatmul.mubr.msk.f32.gmra.mrb[10].mxu0 %vm18686_vm1, %v10940_v13 }
  0x72   : > { %8943 = vmatmul.mubr.msk.f32.gmra.mrb[10].mxu1 %vm18686_vm1, %v10940_v13  ;;  %521 = vmatprep.mubr.f32.mxu0 %v18674_v0 }
  0x73   : > { %610 = vmatprep.mubr.f32.mxu1 %v18674_v0  ;;  %5279 = vperm.xlu0 %9554, %v3772_v25  }
  0x74   : > { %2024 = vperm.xlu1 %9555, %v2006_v26  }
  0x75   : > { %8938 = vmatmul.mubr.msk.f32.gmra.mrb[12].mxu0 %vm18686_vm1, %v10958_v16 }
  0x76   : > { %8944 = vmatmul.mubr.msk.f32.gmra.mrb[12].mxu1 %vm18686_vm1, %v10958_v16  ;;  %527 = vmatprep.mubr.f32.mxu0 %v18674_v0 }
  0x77   : > { %616 = vmatprep.mubr.f32.mxu1 %v18674_v0  ;;  %5287 = vperm.xlu0 %9554, %v3774_v27  }
  0x78   : > { %5283 = vperm.xlu1 %9555, %v3773_v28  }
  0x79   : > { %8939 = vmatmul.mubr.msk.f32.gmra.mrb[14].mxu0 %vm18686_vm1, %v10972_v18 }
  0x7a   : > { %8945 = vmatmul.mubr.msk.f32.gmra.mrb[14].mxu1 %vm18686_vm1, %v10972_v18  ;;  %687 = vmatprep.mubr.f32.mxu0 %v18674_v0 }
  0x7b   : > { %776 = vmatprep.mubr.f32.mxu1 %v18674_v0  ;;  %6388 = vperm.xlu0 %9554, %v6382_v29  }
  0x7c   : > { %5291 = vperm.xlu1 %9555, %v3775_v30  }
  0x7d   : > { %8948 = vmatmul.mubr.msk.f32.vlgmr.msra.gmra.mrb[16].mxu0 %vm18686_vm1, %v10913_v4 }
  0x7e   : > { %8954 = vmatmul.mubr.msk.f32.vlgmr.msra.gmra.mrb[16].mxu1 %vm18686_vm1, %v10913_v4  ;;  %693 = vmatprep.mubr.f32.mxu0 %v18674_v0 }
  0x7f   : > { %782 = vmatprep.mubr.f32.mxu1 %v18674_v0  ;;  %8959 = vmatpush1.msk.msra.mxu0 %vm18690_vm0, %v187_v19 }
  0x80   : > { %8965 = vmatpush1.msk.msra.mxu1 %vm18690_vm0, %v188_v20  ;;  %6398 = vperm.xlu0 %9554, %v6384_v31  }
  0x81   : > { %6393 = vperm.xlu1 %9555, %v6383_v32   ;;  %8949 = vmatmul.mubr.msk.f32.gmra.mrb[18].mxu0 %vm18686_vm1, %v10940_v13 }
  0x82   : > { %8955 = vmatmul.mubr.msk.f32.gmra.mrb[18].mxu1 %vm18686_vm1, %v10940_v13  ;;  %699 = vmatprep.mubr.f32.mxu0 %v18674_v0 }
  0x83   : > { %788 = vmatprep.mubr.f32.mxu1 %v18674_v0 }
  0x84   : > { %8154 = vperm.xlu0 %9554, %v8150_v33  }
  0x85   : > { %6403 = vperm.xlu1 %9555, %v6385_v34   ;;  %8950 = vmatmul.mubr.msk.f32.gmra.mrb[20].mxu0 %vm18686_vm1, %v10958_v16 }
  0x86   : > { %8956 = vmatmul.mubr.msk.f32.gmra.mrb[20].mxu1 %vm18686_vm1, %v10958_v16  ;;  %705 = vmatprep.mubr.f32.mxu0 %v18674_v0 }
  0x87   : > { %794 = vmatprep.mubr.f32.mxu1 %v18674_v0 }
  0x89   : > { %8159 = vperm.xlu1 %9555, %v8151_v35   ;;  %8951 = vmatmul.mubr.msk.f32.gmra.mrb[22].mxu0 %vm18686_vm1, %v10972_v18 }
  0x8a   : > { %8957 = vmatmul.mubr.msk.f32.gmra.mrb[22].mxu1 %vm18686_vm1, %v10972_v18  ;;  %865 = vmatprep.mubr.f32.mxu0 %v18674_v0 }
  0x8b   : > { %954 = vmatprep.mubr.f32.mxu1 %v18674_v0 }
  0x8d   : > { %8960 = vmatmul.mubr.msk.f32.vlgmr.msra.gmra.mrb[24].mxu0 %vm18686_vm1, %v10913_v4 }
  0x8e   : > { %8966 = vmatmul.mubr.msk.f32.vlgmr.msra.gmra.mrb[24].mxu1 %vm18686_vm1, %v10913_v4  ;;  %871 = vmatprep.mubr.f32.mxu0 %v18674_v0 }
  0x8f   : > { %960 = vmatprep.mubr.f32.mxu1 %v18674_v0 }
  0x91   : > { %8961 = vmatmul.mubr.msk.f32.gmra.mrb[26].mxu0 %vm18686_vm1, %v10940_v13 }
  0x92   : > { %8967 = vmatmul.mubr.msk.f32.gmra.mrb[26].mxu1 %vm18686_vm1, %v10940_v13  ;;  %877 = vmatprep.mubr.f32.mxu0 %v18674_v0 }
  0x93   : > { %966 = vmatprep.mubr.f32.mxu1 %v18674_v0 }
  0x95   : > { %8962 = vmatmul.mubr.msk.f32.gmra.mrb[28].mxu0 %vm18686_vm1, %v10958_v16 }
  0x96   : > { %8968 = vmatmul.mubr.msk.f32.gmra.mrb[28].mxu1 %vm18686_vm1, %v10958_v16  ;;  %883 = vmatprep.mubr.f32.mxu0 %v18674_v0 }
  0x97   : > { %972 = vmatprep.mubr.f32.mxu1 %v18674_v0 }
  0x99   : > { %8963 = vmatmul.mubr.msk.f32.gmra.mrb[30].mxu0 %vm18686_vm1, %v10972_v18 }
  0x9a   : > { %8969 = vmatmul.mubr.msk.f32.gmra.mrb[30].mxu1 %vm18686_vm1, %v10972_v18  ;;  %2100 = vmatprep.mubr.f32.mxu0 %v18674_v0 }
  0x9b   : > { %2189 = vmatprep.mubr.f32.mxu1 %v18674_v0 }
  0xda   : > { %v11067_v36 = vpop.permute.xlu0 %191 }
  0xe3   : > { %v11081_v45 = vpop.permute.xlu0 %196 }
  0xe4   : > { %v11111_v60 = vpop.permute.xlu1 %201 }
 0x130   : > { %v333_v37 = vpop.f32.mrb[0].mxu0 }
 0x131   : > { %v422_v38 = vpop.f32.mrb[0].mxu1  ;;  %v11070_v39 = vadd.f32 %v333_v37, %v11067_v36  ;;  %v335_v41 = vpop.f32.mrb[1].mxu0 }
 0x132   : > { %v11073_v40 = vadd.f32 %v422_v38, %v11067_v36  ;;  %v424_v42 = vpop.f32.mrb[1].mxu1  ;;  %v11076_v43 = vadd.f32 %v335_v41, %v11067_v36 }
 0x133   : > { %v11079_v44 = vadd.f32 %v424_v42, %v11067_v36  ;;  %v11084_v46 = vmul.f32 100.0, %v11070_v39 }
 0x134   : > { %19171 = vst [vmem:[#allocation19_spill] sm:$0xff] %v11076_v43  ;;  %v11087_v47 = vmul.f32 100.0, %v11073_v40  ;;  %v11090_v48 = vmul.f32 100.0, %v11076_v43  ;;  %v339_v50 = vpop.f32.mrb[2].mxu0 }
 0x135   : > { %19172 = vst [vmem:[#allocation20_spill] sm:$0xff] %v11079_v44  ;;  %v11093_v49 = vmul.f32 100.0, %v11079_v44  ;;  %v428_v51 = vpop.f32.mrb[2].mxu1  ;;  %vm1043_vm2 = vcmp.gt.f32.partialorder %v11084_v46, 20.0  ;;  %v11098_v52 = vadd.f32 %v339_v50, %v11081_v45  ;;  %v341_v54 = vpop.f32.mrb[3].mxu0 }
 0x136   : > { %19173 = vst [vmem:[#allocation21_spill] sm:$0xff] %v11090_v48  ;;  %vm1045_vm3 = vcmp.gt.f32.partialorder %v11087_v47, 20.0  ;;  %v11101_v53 = vadd.f32 %v428_v51, %v11081_v45  ;;  %v430_v55 = vpop.f32.mrb[3].mxu1  ;;  %v1107_v56 = vsel %vm1043_vm2, 0.0, %v11084_v46  ;;  %vm1044_vm4 = vcmp.gt.f32.partialorder %v11090_v48, 20.0 }
 0x137   : > { %19174 = vst [vmem:[#allocation22_spill] sm:$0xff] %v11093_v49  ;;  %v1109_v57 = vsel %vm1045_vm3, 0.0, %v11087_v47  ;;  %vm1046_vm5 = vcmp.gt.f32.partialorder %v11093_v49, 20.0  ;;  %v1171_v58 = vmul.f32 1.442695, %v1107_v56  ;;  %v1108_v61 = vsel %vm1044_vm4, 0.0, %v11090_v48  ;;  %v11192_v56 = vpop.permute.xlu1 %206 }
 0x138   : > { %v1175_v59 = vmul.f32 1.442695, %v1109_v57  ;;  %v11117_v62 = vmul.f32 100.0, %v11098_v52  ;;  %v11120_v63 = vmul.f32 100.0, %v11101_v53  ;;  %v1110_v1 = vsel %vm1046_vm5, 0.0, %v11093_v49  ;;  %v345_v4 = vpop.f32.mrb[4].mxu0 }
 0x139   : > { %9564 = vpow2.f32 %v1171_v58  ;;  %v11126_v2 = vadd.f32 %v341_v54, %v11081_v45  ;;  %v11129_v3 = vadd.f32 %v430_v55, %v11081_v45  ;;  %v434_v7 = vpop.f32.mrb[4].mxu1  ;;  %v11134_v8 = vadd.f32 %v345_v4, %v11111_v60  ;;  %v347_v11 = vpop.f32.mrb[5].mxu0 }
 0x13a   : > { %9566 = vpow2.f32 %v1175_v59  ;;  %vm1059_vm6 = vcmp.gt.f32.partialorder %v11117_v62, 20.0  ;;  %vm1061_vm7 = vcmp.gt.f32.partialorder %v11120_v63, 20.0  ;;  %v436_v12 = vpop.f32.mrb[5].mxu1  ;;  %v1173_v13 = vmul.f32 1.442695, %v1108_v61 }
 0x13b   : > { %19175 = vst [vmem:[#allocation23_spill] sm:$0xff] %v11126_v2  ;;  %19176 = vst [vmem:[#allocation24_spill] sm:$0xff] %v11129_v3  ;;  %v1123_v16 = vsel %vm1059_vm6, 0.0, %v11117_v62  ;;  %v1125_v17 = vsel %vm1061_vm7, 0.0, %v11120_v63  ;;  %v11143_v18 = vmul.f32 100.0, %v11126_v2  ;;  %v11146_v21 = vmul.f32 100.0, %v11129_v3 }
 0x13c   : > { %v1203_v19 = vmul.f32 1.442695, %v1123_v16  ;;  %v1207_v20 = vmul.f32 1.442695, %v1125_v17  ;;  %v351_v22 = vpop.f32.mrb[6].mxu0  ;;  %v11150_v25 = vmul.f32 100.0, %v11134_v8  ;;  %v11153_v26 = vadd.f32 %v434_v7, %v11111_v60 }
 0x13d   : > { %19177 = vst [vmem:[#allocation25_spill] sm:$0xff] %v11143_v18  ;;  %19178 = vst [vmem:[#allocation26_spill] sm:$0xff] %v11146_v21  ;;  %vm1060_vm8 = vcmp.gt.f32.partialorder %v11143_v18, 20.0  ;;  %v11156_v27 = vadd.f32 %v347_v11, %v11111_v60  ;;  %v440_v28 = vpop.f32.mrb[6].mxu1  ;;  %v11158_v29 = vpop.f32.mrb[7].mxu0  ;;  %v11161_v31 = vadd.f32 %v436_v12, %v11111_v60  ;;  %vm18705_vm10 = vcmp.gt.f32.partialorder %v11146_v21, 20.0 }
 0x13e   : > { %v1177_v30 = vmul.f32 1.442695, %v1110_v1  ;;  %9568 = vpow2.f32 %v1203_v19  ;;  %v11163_v32 = vpop.f32.mrb[7].mxu1  ;;  %vm1075_vm9 = vcmp.gt.f32.partialorder %v11150_v25, 20.0  ;;  %v1124_v33 = vsel %vm1060_vm8, 0.0, %v11143_v18 }
 0x13f   : > { %19179 = vst [vmem:[#allocation27_spill] sm:$0xff] %v11156_v27  ;;  %19180 = vst [vmem:[#allocation28_spill] sm:$0xff] %v11161_v31  ;;  %9570 = vpow2.f32 %v1207_v20  ;;  %v1139_v34 = vsel %vm1075_vm9, 0.0, %v11150_v25  ;;  %v11173_v35 = vmul.f32 100.0, %v11153_v26  ;;  %v11176_v37 = vmul.f32 100.0, %v11156_v27 }
 0x140   : > { %v11178_v38 = vpop.f32.mrb[8].mxu0  ;;  %9572 = vpow2.f32 %v1173_v13  ;;  %v1235_v41 = vmul.f32 1.442695, %v1139_v34  ;;  %v11182_v42 = vmul.f32 100.0, %v11161_v31  ;;  %v1205_v57 = vmul.f32 1.442695, %v1124_v33 }
 0x141   : > { %19181 = vst [vmem:[#allocation29_spill] sm:$0xff] %v11176_v37  ;;  %v11184_v50 = vpop.f32.mrb[8].mxu1  ;;  %v11186_v51 = vpop.f32.mrb[9].mxu0  ;;  %9574 = vpow2.f32 %v1177_v30  ;;  %vm1077_vm11 = vcmp.gt.f32.partialorder %v11173_v35, 20.0  ;;  %vm18699_vm12 = vcmp.gt.f32.partialorder %v11176_v37, 20.0  ;;  %v1126_v1 = vsel %vm18705_vm10, 0.0, %v11146_v21 }
 0x142   : > { %19182 = vst [vmem:[#allocation30_spill] sm:$0xff] %v11182_v42  ;;  %v11190_v54 = vpop.f32.mrb[9].mxu1  ;;  %9576 = vpow2.f32 %v1235_v41  ;;  %v1141_v58 = vsel %vm1077_vm11, 0.0, %v11173_v35  ;;  %v11201_v7 = vadd.f32 %v351_v22, %v11192_v56  ;;  %v1140_v12 = vsel %vm18699_vm12, 0.0, %v11176_v37 }
 0x143   : > { %v9565_v55 = vpop.eup %9564  ;;  %v1239_v4 = vmul.f32 1.442695, %v1141_v58  ;;  %vm18696_vm13 = vcmp.gt.f32.partialorder %v11182_v42, 20.0  ;;  %v11208_v13 = vadd.f32 %v440_v28, %v11192_v56  ;;  %v1209_v41 = vmul.f32 1.442695, %v1126_v1 }
 0x144   : > { %v9567_v59 = vpop.eup %9566  ;;  %v1299_v61 = vadd.f32 1.0, %v9565_v55  ;;  %v1302_v16 = vmul.f32 -0.5, %v9565_v55  ;;  %v1305_v17 = vand.u32 2147483647, %v9565_v55  ;;  %v11210_v20 = vpop.f32.mrb[10].mxu0  ;;  %v1142_v28 = vsel %vm18696_vm13, 0.0, %v11182_v42 }
 0x145   : > { %v1317_v11 = vadd.f32 1.0, %v9567_v59  ;;  %v1320_v19 = vmul.f32 -0.5, %v9567_v59  ;;  %v11212_v30 = vpop.f32.mrb[10].mxu1  ;;  %v1323_v22 = vand.u32 2147483647, %v9567_v59  ;;  %v11214_v33 = vpop.f32.mrb[11].mxu0  ;;  %v11285_v43 = vadd.f32 %v11163_v32, %v11192_v56 }
 0x146   : > { %9578 = vlog2.f32 %v1299_v61  ;;  %v11222_v58 = vmul.f32 100.0, %v11201_v7  ;;  %v11224_v61 = vpop.f32.mrb[11].mxu1  ;;  %v1237_v23 = vmul.f32 1.442695, %v1140_v12  ;;  %v11232_v1 = vmul.f32 100.0, %v11208_v13 }
 0x147   : > { %9580 = vlog2.f32 %v1317_v11  ;;  %v1303_v14 = vadd.f32 1.0, %v1302_v16  ;;  %vm11238_vm14 = vcmp.lt.f32.partialorder %v1305_v17, 0.0004427343  ;;  %v1321_v9 = vadd.f32 1.0, %v1320_v19  ;;  %19194 = vst [vmem:[#allocation36_spill] sm:$0xff] %v11285_v43 }
 0x148   : > { %v11216_v34 = vpop.eup %9568  ;;  %9582 = vpow2.f32 %v1239_v4  ;;  %v11226_v0 = vpop.f32.mrb[12].mxu0  ;;  %vm11247_vm15 = vcmp.lt.f32.partialorder %v1323_v22, 0.0004427343  ;;  %v11252_v31 = vmul.f32 1.442695, %v1142_v28  ;;  %vm1091_vm1 = vcmp.gt.f32.partialorder %v11222_v58, 20.0 }
 0x149   : > { %v11228_v24 = vpop.eup %9570  ;;  %v1443_v11 = vadd.f32 1.0, %v11216_v34  ;;  %9584 = vpow2.f32 %v1205_v57  ;;  %v11234_v4 = vpop.f32.mrb[12].mxu1  ;;  %v1449_v12 = vand.u32 2147483647, %v11216_v34  ;;  %v1446_v17 = vmul.f32 -0.5, %v11216_v34 }
 0x14a   : > { %v11236_v15 = vpop.f32.mrb[13].mxu0  ;;  %v1461_v6 = vadd.f32 1.0, %v11228_v24  ;;  %v11243_v5 = vpop.f32.mrb[13].mxu1  ;;  %v1467_v19 = vand.u32 2147483647, %v11228_v24  ;;  %v1155_v22 = vsel %vm1091_vm1, 0.0, %v11222_v58  ;;  %v1304_v49 = vmul.f32 %v9565_v55, %v1303_v14 }
 0x14b   : > { %v11245_v42 = vpop.eup %9572  ;;  %9586 = vlog2.f32 %v1443_v11  ;;  %v1464_v28 = vmul.f32 -0.5, %v11228_v24  ;;  %v1267_v21 = vmul.f32 1.442695, %v1155_v22  ;;  %vm1093_vm0 = vcmp.gt.f32.partialorder %v11232_v1, 20.0 }
 0x14c   : > { %19185 = vst [vmem:[#allocation31_spill] sm:$0xff] %v11245_v42  ;;  %v11255_v16 = vpop.eup %9574  ;;  %9588 = vlog2.f32 %v1461_v6  ;;  %v11262_v37 = vpop.f32.mrb[14].mxu0  ;;  %v1322_v44 = vmul.f32 %v9567_v59, %v1321_v9  ;;  %vm11272_vm13 = vcmp.lt.f32.partialorder %v1449_v12, 0.0004427343  ;;  %v11281_v22 = vadd.f32 %v11158_v29, %v11192_v56 }
 0x14d   : > { %19188 = vst [vmem:[#allocation32_spill] sm:$0xff] %v11255_v16  ;;  %v11264_v11 = vpop.f32.mrb[14].mxu1  ;;  %v9577_v27 = vpop.eup %9576  ;;  %9590 = vpow2.f32 %v1209_v41  ;;  %v1157_v41 = vsel %vm1093_vm0, 0.0, %v11232_v1  ;;  %v1447_v14 = vadd.f32 1.0, %v1446_v17  ;;  %vm11287_vm12 = vcmp.lt.f32.partialorder %v1467_v19, 0.0004427343 }
 0x14e   : > { %v11268_v3 = vpop.f32.mrb[15].mxu0  ;;  %v11270_v6 = vpop.f32.mrb[15].mxu1  ;;  %v1587_v18 = vadd.f32 1.0, %v9577_v27  ;;  %v1590_v2 = vmul.f32 -0.5, %v9577_v27  ;;  %9592 = vpow2.f32 %v1267_v21  ;;  %19193 = vst [vmem:[#allocation35_spill] sm:$0xff] %v11281_v22  ;;  %v1465_v42 = vadd.f32 1.0, %v1464_v28 }
 0x14f   : > { %19189 = vst [vmem:[#allocation33_spill] sm:$0xff] %v11268_v3  ;;  %19190 = vst [vmem:[#allocation34_spill] sm:$0xff] %v11270_v6  ;;  %v1271_v21 = vmul.f32 1.442695, %v1157_v41  ;;  %v11294_v29 = vmul.f32 100.0, %v11281_v22  ;;  %v11502_v25 = vadd.f32 %v11224_v61, %v11081_v45 }
 0x150   : > { %v9579_v9 = vpop.eup %9578  ;;  %9594 = vlog2.f32 %v1587_v18  ;;  %v11291_v59 = vpop.f32.mrb[16].mxu0  ;;  %v1593_v3 = vand.u32 2147483647, %v9577_v27  ;;  %v11303_v18 = vmul.f32 100.0, %v11285_v43  ;;  %v1591_v28 = vadd.f32 1.0, %v1590_v2 }
 0x151   : > { %v9581_v12 = vpop.eup %9580  ;;  %v1301_v16 = vmul.f32 0.6931472, %v9579_v9  ;;  %9596 = vpow2.f32 %v1237_v23  ;;  %19197 = vst [vmem:[#allocation37_spill] sm:$0xff] %v11294_v29  ;;  %v11296_v6 = vpop.f32.mrb[16].mxu1  ;;  %v11318_v43 = vadd.f32 %v11178_v38, %v11067_v36  ;;  %v1466_v2 = vmul.f32 %v11228_v24, %v1465_v42  ;;  %19228 = vst [vmem:[#allocation60_spill] sm:$0xff] %v11502_v25 }
 0x152   : > { %19198 = vst [vmem:[#allocation38_spill] sm:$0xff] %v11296_v6  ;;  %v11298_v32 = vpop.f32.mrb[17].mxu0  ;;  %v11300_v17 = vpop.eup %9582  ;;  %v1319_v19 = vmul.f32 0.6931472, %v9581_v12  ;;  %9598 = vpow2.f32 %v1271_v21  ;;  %19200 = vst [vmem:[#allocation40_spill] sm:$0xff] %v11303_v18  ;;  %v1448_v21 = vmul.f32 %v11216_v34, %v1447_v14  ;;  %vm18743_vm10 = vcmp.gt.f32.partialorder %v11303_v18, 20.0 }
 0x153   : > { %19199 = vst [vmem:[#allocation39_spill] sm:$0xff] %v11298_v32  ;;  %v11305_v41 = vpop.f32.mrb[17].mxu1  ;;  %v11307_v9 = vpop.eup %9584  ;;  %v1307_v23 = vsel %vm11238_vm14, %v1304_v49, %v1301_v16  ;;  %v1605_v22 = vadd.f32 1.0, %v11300_v17  ;;  %v1608_v32 = vmul.f32 -0.5, %v11300_v17  ;;  %vm18745_vm14 = vcmp.gt.f32.partialorder %v11294_v29, 20.0 }
 0x154   : > { %19201 = vst [vmem:[#allocation41_spill] sm:$0xff] %v11305_v41  ;;  %19202 = vst [vmem:[#allocation42_spill] sm:$0xff] %v11307_v9  ;;  %v1875_v6 = vmul.f32 0.01, %v1307_v23  ;;  %v1325_v12 = vsel %vm11247_vm15, %v1322_v44, %v1319_v19  ;;  %v11320_v41 = vpop.f32.mrb[18].mxu0  ;;  %v11335_v38 = vadd.f32 %v11184_v50, %v11067_v36  ;;  %v1156_v50 = vsel %vm18745_vm14, 0.0, %v11294_v29 }
 0x155   : > { %v11322_v9 = vpop.f32.mrb[18].mxu1  ;;  %v9587_v10 = vpop.eup %9586  ;;  %v1877_v49 = vmul.f32 0.01, %v1325_v12  ;;  %9600 = vlog2.f32 %v1605_v22  ;;  %vm11328_vm15 = vcmp.lt.f32.partialorder %v1593_v3, 0.0004427343  ;;  %v1592_v22 = vmul.f32 %v9577_v27, %v1591_v28 }
 0x156   : > { %v11326_v16 = vpop.f32.mrb[19].mxu0  ;;  %v9589_v44 = vpop.eup %9588  ;;  %v1445_v57 = vmul.f32 0.6931472, %v9587_v10  ;;  %v1609_v19 = vadd.f32 1.0, %v1608_v32  ;;  %v1611_v23 = vand.u32 2147483647, %v11300_v17  ;;  %v11345_v3 = vsel %vm1043_vm2, %v11070_v39, %v1875_v6 }
 0x157   : > { %v11337_v14 = vpop.f32.mrb[19].mxu1  ;;  %v11339_v24 = vpop.eup %9590  ;;  %v1463_v42 = vmul.f32 0.6931472, %v9589_v44  ;;  %19206 = vst [vmem:[#allocation44_spill] sm:$0xff] %v11345_v3  ;;  %v11353_v10 = vmul.f32 100.0, %v11318_v43  ;;  %v11364_v39 = vsel %vm1045_vm3, %v11073_v40, %v1877_v49  ;;  %v1158_v6 = vsel %vm18743_vm10, 0.0, %v11303_v18 }
 0x158   : > { %19205 = vst [vmem:[#allocation43_spill] sm:$0xff] %v11339_v24  ;;  %v1451_v12 = vsel %vm11272_vm13, %v1448_v21, %v1445_v57  ;;  %v11355_v44 = vpop.f32.mrb[20].mxu0  ;;  %v11359_v32 = vpop.eup %9592  ;;  %19207 = vst [vmem:[#allocation45_spill] sm:$0xff] %v11364_v39  ;;  %v11377_v47 = vmul.f32 100.0, %v11335_v38  ;;  %v11381_v40 = vadd.f32 %v11186_v51, %v11067_v36  ;;  %vm11408_vm3 = vcmp.lt.f32.partialorder %v1611_v23, 0.0004427343 }
 0x159   : > { %v11357_v27 = vpop.f32.mrb[20].mxu1  ;;  %v1891_v46 = vmul.f32 0.01, %v1451_v12  ;;  %v1469_v48 = vsel %vm11287_vm12, %v1466_v2, %v1463_v42  ;;  %v11371_v28 = vpop.f32.mrb[21].mxu0  ;;  %v1731_v24 = vadd.f32 1.0, %v11359_v32  ;;  %v1734_v42 = vmul.f32 -0.5, %v11359_v32 }
 0x15a   : > { %v11373_v21 = vpop.f32.mrb[21].mxu1  ;;  %v9595_v57 = vpop.eup %9594  ;;  %v1893_v29 = vmul.f32 0.01, %v1469_v48  ;;  %19208 = vst [vmem:[#allocation46_spill] sm:$0xff] %v11381_v40  ;;  %v1737_v12 = vand.u32 2147483647, %v11359_v32  ;;  %v11459_v18 = vadd.f32 %v11212_v30, %v11081_v45 }
 0x15b   : > { %v11383_v55 = vpop.eup %9596  ;;  %v11388_v49 = vsel %vm1059_vm6, %v11098_v52, %v1891_v46  ;;  %v1589_v2 = vmul.f32 0.6931472, %v9595_v57  ;;  %9602 = vlog2.f32 %v1731_v24  ;;  %vm1047_vm2 = vcmp.gt.f32.partialorder %v11353_v10, 20.0 }
 0x15c   : > { %19209 = vst [vmem:[#allocation47_spill] sm:$0xff] %v11383_v55  ;;  %19210 = vst [vmem:[#allocation48_spill] sm:$0xff] %v11388_v49  ;;  %v9599_v48 = vpop.eup %9598  ;;  %v11397_v51 = vsel %vm1061_vm7, %v11101_v53, %v1893_v29  ;;  %v11400_v62 = vpop.f32.mrb[22].mxu0  ;;  %9604 = vpow2.f32 %v11252_v31  ;;  %v1269_v55 = vmul.f32 1.442695, %v1156_v50  ;;  %v1111_v34 = vsel %vm1047_vm2, 0.0, %v11353_v10 }
 0x15d   : > { %19211 = vst [vmem:[#allocation49_spill] sm:$0xff] %v11397_v51  ;;  %v11402_v52 = vpop.f32.mrb[22].mxu1  ;;  %v1595_v57 = vsel %vm11328_vm15, %v1592_v22, %v1589_v2  ;;  %v1749_v63 = vadd.f32 1.0, %v9599_v48  ;;  %v11412_v53 = vpop.f32.mrb[23].mxu0  ;;  %v1752_v24 = vmul.f32 -0.5, %v9599_v48  ;;  %vm1049_vm6 = vcmp.gt.f32.partialorder %v11377_v47, 20.0 }
 0x15e   : > { %v11414_v29 = vpop.f32.mrb[23].mxu1  ;;  %v1273_v3 = vmul.f32 1.442695, %v1158_v6  ;;  %v11422_v22 = vmul.f32 100.0, %v11381_v40  ;;  %v1907_v23 = vmul.f32 0.01, %v1595_v57  ;;  %v1610_v46 = vmul.f32 %v11300_v17, %v1609_v19 }
 0x15f   : > { %v9601_v49 = vpop.eup %9600  ;;  %9606 = vlog2.f32 %v1749_v63  ;;  %v1735_v39 = vadd.f32 1.0, %v1734_v42  ;;  %vm11425_vm7 = vcmp.lt.f32.partialorder %v1737_v12, 0.0004427343  ;;  %v1179_v6 = vmul.f32 1.442695, %v1111_v34 }
 0x160   : > { %19214 = vst [vmem:[#allocation50_spill] sm:$0xff] %v11422_v22  ;;  %v1607_v2 = vmul.f32 0.6931472, %v9601_v49  ;;  %v11429_v50 = vpop.f32.mrb[24].mxu0  ;;  %v1113_v63 = vsel %vm1049_vm6, 0.0, %v11377_v47  ;;  %vm18739_vm12 = vcmp.gt.f32.partialorder %v11422_v22, 20.0  ;;  %v11437_v57 = vadd.f32 %v11190_v54, %v11067_v36 }
 0x161   : > { %v11439_v49 = vpop.f32.mrb[24].mxu1  ;;  %v11441_v17 = vpop.f32.mrb[25].mxu0  ;;  %v1755_v42 = vand.u32 2147483647, %v9599_v48  ;;  %9608 = vpow2.f32 %v1269_v55  ;;  %v1183_v12 = vmul.f32 1.442695, %v1113_v63  ;;  %v11463_v55 = vadd.f32 %v11214_v33, %v11081_v45 }
 0x162   : > { %19217 = vst [vmem:[#allocation51_spill] sm:$0xff] %v11437_v57  ;;  %19218 = vst [vmem:[#allocation52_spill] sm:$0xff] %v11441_v17  ;;  %v1613_v19 = vsel %vm11408_vm3, %v1610_v46, %v1607_v2  ;;  %v11445_v34 = vpop.f32.mrb[25].mxu1  ;;  %v1753_v40 = vadd.f32 1.0, %v1752_v24  ;;  %9610 = vpow2.f32 %v1179_v6  ;;  %v1112_v51 = vsel %vm18739_vm12, 0.0, %v11422_v22 }
 0x163   : > { %v11451_v54 = vmul.f32 100.0, %v11437_v57  ;;  %9612 = vpow2.f32 %v1183_v12  ;;  %v11455_v17 = vadd.f32 %v11210_v20, %v11081_v45  ;;  %19220 = vst [vmem:[#allocation54_spill] sm:$0xff] %v11463_v55  ;;  %v1909_v2 = vmul.f32 0.01, %v1613_v19 }
 0x164   : > { %v11465_v46 = vpop.f32.mrb[26].mxu0  ;;  %v1736_v6 = vmul.f32 %v11359_v32, %v1735_v39  ;;  %9614 = vpow2.f32 %v1273_v3  ;;  %v11478_v33 = vsel %vm1075_vm9, %v11134_v8, %v1907_v23  ;;  %vm11480_vm15 = vcmp.lt.f32.partialorder %v1755_v42, 0.0004427343 }
 0x165   : > { %19219 = vst [vmem:[#allocation53_spill] sm:$0xff] %v11451_v54  ;;  %v11467_v24 = vpop.f32.mrb[26].mxu1  ;;  %vm18722_vm13 = vcmp.gt.f32.partialorder %v11451_v54, 20.0  ;;  %v11471_v20 = vpop.f32.mrb[27].mxu0  ;;  %19223 = vst [vmem:[#allocation57_spill] sm:$0xff] %v11478_v33  ;;  %v11485_v19 = vmul.f32 100.0, %v11455_v17  ;;  %v1754_v39 = vmul.f32 %v9599_v48, %v1753_v40  ;;  %v11507_v40 = vsel %vm1077_vm11, %v11153_v26, %v1909_v2 }
 0x166   : > { %19221 = vst [vmem:[#allocation55_spill] sm:$0xff] %v11471_v20  ;;  %v11473_v63 = vpop.f32.mrb[27].mxu1  ;;  %v9603_v30 = vpop.eup %9602  ;;  %v11488_v3 = vmul.f32 100.0, %v11459_v18  ;;  %v1181_v57 = vmul.f32 1.442695, %v1112_v51  ;;  %v11491_v22 = vmul.f32 100.0, %v11463_v55  ;;  %v11519_v55 = vadd.f32 %v11226_v0, %v11111_v60 }
 0x167   : > { %19222 = vst [vmem:[#allocation56_spill] sm:$0xff] %v11473_v63  ;;  %v1733_v32 = vmul.f32 0.6931472, %v9603_v30  ;;  %v11493_v63 = vpop.eup %9604  ;;  %v1114_v8 = vsel %vm18722_vm13, 0.0, %v11451_v54  ;;  %vm1063_vm9 = vcmp.gt.f32.partialorder %v11485_v19, 20.0  ;;  %19229 = vst [vmem:[#allocation61_spill] sm:$0xff] %v11507_v40 }
 0x168   : > { %19226 = vst [vmem:[#allocation58_spill] sm:$0xff] %v11491_v22  ;;  %19227 = vst [vmem:[#allocation59_spill] sm:$0xff] %v11493_v63  ;;  %vm1065_vm3 = vcmp.gt.f32.partialorder %v11488_v3, 20.0  ;;  %v1127_v51 = vsel %vm1063_vm9, 0.0, %v11485_v19  ;;  %9616 = vpow2.f32 %v1181_v57  ;;  %v1185_v26 = vmul.f32 1.442695, %v1114_v8 }
 0x169   : > { %v9607_v23 = vpop.eup %9606  ;;  %v1739_v48 = vsel %vm11425_vm7, %v1736_v6, %v1733_v32  ;;  %v1129_v42 = vsel %vm1065_vm3, 0.0, %v11488_v3  ;;  %v1211_v54 = vmul.f32 1.442695, %v1127_v51  ;;  %vm18726_vm11 = vcmp.gt.f32.partialorder %v11491_v22, 20.0  ;;  %v19271_v3 = vld [vmem:[#allocation41_spill] sm:$0xff] }
 0x16a   : > { %v1923_v30 = vmul.f32 0.01, %v1739_v48  ;;  %v1751_v61 = vmul.f32 0.6931472, %v9607_v23  ;;  %v1215_v35 = vmul.f32 1.442695, %v1129_v42  ;;  %v11538_v23 = vadd.f32 %v11234_v4, %v11111_v60 }
 0x16b   : > { %v11522_v31 = vpop.eup %9608  ;;  %9618 = vpow2.f32 %v1211_v54  ;;  %v11532_v32 = vmul.f32 100.0, %v11502_v25  ;;  %v1128_v12 = vsel %vm18726_vm11, 0.0, %v11491_v22  ;;  %v11544_v54 = vmul.f32 100.0, %v11519_v55 }
 0x16c   : > { %19230 = vst [vmem:[#allocation62_spill] sm:$0xff] %v11522_v31  ;;  %v11527_v2 = vsel %vm1091_vm1, %v11201_v7, %v1923_v30  ;;  %v1757_v6 = vsel %vm11480_vm15, %v1754_v39, %v1751_v61  ;;  %v9611_v0 = vpop.eup %9610  ;;  %9620 = vpow2.f32 %v1215_v35  ;;  %v11548_v39 = vadd.f32 %v11236_v15, %v11111_v60 }
 0x16d   : > { %19231 = vst [vmem:[#allocation63_spill] sm:$0xff] %v11527_v2  ;;  %19232 = vst [vmem:[#allocation64_spill] sm:$0xff] %v11532_v32  ;;  %v1925_v8 = vmul.f32 0.01, %v1757_v6  ;;  %v9613_v58 = vpop.eup %9612  ;;  %v1335_v7 = vadd.f32 1.0, %v9611_v0  ;;  %v1338_v51 = vmul.f32 -0.5, %v9611_v0  ;;  %9622 = vpow2.f32 %v1185_v26 }
 0x16e   : > { %19233 = vst [vmem:[#allocation65_spill] sm:$0xff] %v11548_v39  ;;  %v11550_v48 = vpop.eup %9614  ;;  %v1353_v42 = vadd.f32 1.0, %v9613_v58  ;;  %vm18719_vm1 = vcmp.gt.f32.partialorder %v11532_v32, 20.0  ;;  %v1341_v61 = vand.u32 2147483647, %v9611_v0  ;;  %v1356_v15 = vmul.f32 -0.5, %v9613_v58 }
 0x16f   : > { %19234 = vst [vmem:[#allocation66_spill] sm:$0xff] %v11550_v48  ;;  %v11555_v4 = vsel %vm1093_vm0, %v11208_v13, %v1925_v8  ;;  %9624 = vlog2.f32 %v1335_v7  ;;  %v1213_v35 = vmul.f32 1.442695, %v1128_v12  ;;  %v1359_v6 = vand.u32 2147483647, %v9613_v58 }
 0x170   : > { %19235 = vst [vmem:[#allocation67_spill] sm:$0xff] %v11555_v4  ;;  %9626 = vlog2.f32 %v1353_v42  ;;  %vm1079_vm7 = vcmp.gt.f32.partialorder %v11544_v54, 20.0  ;;  %v11562_v1 = vmul.f32 100.0, %v11538_v23  ;;  %v11565_v13 = vmul.f32 100.0, %v11548_v39  ;;  %v11595_v39 = vpop.f32.mrb[28].mxu0 }
 0x171   : > { %v1339_v26 = vadd.f32 1.0, %v1338_v51  ;;  %v1130_v8 = vsel %vm18719_vm1, 0.0, %v11532_v32  ;;  %v1143_v7 = vsel %vm1079_vm7, 0.0, %v11544_v54  ;;  %v11575_v12 = vadd.f32 %v11243_v5, %v11111_v60  ;;  %19242 = vst [vmem:[#allocation72_spill] sm:$0xff] %v11595_v39  ;;  %v11640_v63 = vpop.f32.mrb[29].mxu0 }
 0x172   : > { %19236 = vst [vmem:[#allocation68_spill] sm:$0xff] %v11565_v13  ;;  %v1243_v42 = vmul.f32 1.442695, %v1143_v7  ;;  %vm1081_vm0 = vcmp.gt.f32.partialorder %v11562_v1, 20.0  ;;  %vm18734_vm15 = vcmp.gt.f32.partialorder %v11565_v13, 20.0  ;;  %v11581_v51 = vadd.f32 %v11262_v37, %v11192_v56  ;;  %v11583_v30 = vpop.eup %9616  ;;  %19249 = vst [vmem:[#allocation75_spill] sm:$0xff] %v11640_v63 }
 0x173   : > { %19237 = vst [vmem:[#allocation69_spill] sm:$0xff] %v11575_v12  ;;  %19238 = vst [vmem:[#allocation70_spill] sm:$0xff] %v11583_v30  ;;  %vm11585_vm1 = vcmp.lt.f32.partialorder %v1341_v61, 0.0004427343  ;;  %9628 = vpow2.f32 %v1213_v35  ;;  %v1145_v5 = vsel %vm1081_vm0, 0.0, %v11562_v1  ;;  %v11593_v7 = vmul.f32 100.0, %v11575_v12 }
 0x174   : > { %v1357_v37 = vadd.f32 1.0, %v1356_v15  ;;  %vm11599_vm13 = vcmp.lt.f32.partialorder %v1359_v6, 0.0004427343  ;;  %9630 = vpow2.f32 %v1243_v42  ;;  %v1247_v61 = vmul.f32 1.442695, %v1145_v5  ;;  %v11676_v25 = vpop.f32.mrb[30].mxu0 }
 0x175   : > { %19241 = vst [vmem:[#allocation71_spill] sm:$0xff] %v11593_v7  ;;  %v11597_v32 = vpop.eup %9618  ;;  %v1144_v12 = vsel %vm18734_vm15, 0.0, %v11565_v13  ;;  %vm18738_vm11 = vcmp.gt.f32.partialorder %v11593_v7, 20.0  ;;  %v11611_v30 = vmul.f32 100.0, %v11581_v51  ;;  %v1340_v15 = vmul.f32 %v9611_v0, %v1339_v26  ;;  %19259 = vst [vmem:[#allocation79_spill] sm:$0xff] %v11676_v25 }
 0x176   : > { %v11603_v22 = vpop.eup %9620  ;;  %v1479_v35 = vadd.f32 1.0, %v11597_v32  ;;  %v1217_v40 = vmul.f32 1.442695, %v1130_v8  ;;  %9632 = vpow2.f32 %v1247_v61  ;;  %v1482_v5 = vmul.f32 -0.5, %v11597_v32 }
 0x177   : > { %v1497_v6 = vadd.f32 1.0, %v11603_v22  ;;  %v11614_v42 = vpop.eup %9622  ;;  %v1146_v4 = vsel %vm18738_vm11, 0.0, %v11593_v7  ;;  %v11622_v13 = vadd.f32 %v11264_v11, %v11192_v56  ;;  %v1358_v2 = vmul.f32 %v9613_v58, %v1357_v37  ;;  %v11631_v58 = vpop.f32.mrb[28].mxu1 }
 0x178   : > { %19245 = vst [vmem:[#allocation73_spill] sm:$0xff] %v11614_v42  ;;  %9634 = vlog2.f32 %v1479_v35  ;;  %v1485_v0 = vand.u32 2147483647, %v11597_v32  ;;  %v1245_v26 = vmul.f32 1.442695, %v1144_v12  ;;  %v1500_v35 = vmul.f32 -0.5, %v11603_v22 }
 0x179   : > { %v9625_v33 = vpop.eup %9624  ;;  %9636 = vlog2.f32 %v1497_v6  ;;  %v1503_v42 = vand.u32 2147483647, %v11603_v22  ;;  %vm1095_vm15 = vcmp.gt.f32.partialorder %v11611_v30, 20.0  ;;  %v1249_v7 = vmul.f32 1.442695, %v1146_v4  ;;  %19246 = vst [vmem:[#allocation74_spill] sm:$0xff] %v11631_v58 }
 0x17a   : > { %v9627_v8 = vpop.eup %9626  ;;  %v1337_v61 = vmul.f32 0.6931472, %v9625_v33  ;;  %9638 = vpow2.f32 %v1217_v40  ;;  %v1159_v11 = vsel %vm1095_vm15, 0.0, %v11611_v30  ;;  %v1483_v37 = vadd.f32 1.0, %v1482_v5  ;;  %v19247_v33 = vld [vmem:[#allocation33_spill] sm:$0xff]  ;;  %v19253_v5 = vld [vmem:[#allocation34_spill] sm:$0xff] }
 0x17b   : > { %v1355_v39 = vmul.f32 0.6931472, %v9627_v8  ;;  %v1275_v6 = vmul.f32 1.442695, %v1159_v11  ;;  %v11634_v12 = vmul.f32 100.0, %v11622_v13  ;;  %v11638_v48 = vadd.f32 %v19247_v33, %v11192_v56  ;;  %v11642_v8 = vpop.f32.mrb[29].mxu1 }
 0x17c   : > { %19250 = vst [vmem:[#allocation76_spill] sm:$0xff] %v11642_v8  ;;  %v1343_v40 = vsel %vm11585_vm1, %v1340_v15, %v1337_v61  ;;  %vm11646_vm11 = vcmp.lt.f32.partialorder %v1485_v0, 0.0004427343  ;;  %v11652_v11 = vadd.f32 %v19253_v5, %v11192_v56  ;;  %v11656_v58 = vadd.f32 %v11291_v59, %v11067_v36 }
 0x17d   : > { %19248 = vst [vmem:[#allocation33_spill] sm:$0xff] %v11638_v48  ;;  %v11658_v33 = vpop.eup %9628  ;;  %v1361_v8 = vsel %vm11599_vm13, %v1358_v2, %v1355_v39  ;;  %9640 = vpow2.f32 %v1275_v6  ;;  %vm1097_vm1 = vcmp.gt.f32.partialorder %v11634_v12, 20.0  ;;  %v11664_v57 = vmul.f32 100.0, %v11638_v48  ;;  %v11678_v2 = vpop.f32.mrb[30].mxu1 }
 0x17e   : > { %19254 = vst [vmem:[#allocation34_spill] sm:$0xff] %v11652_v11  ;;  %19255 = vst [vmem:[#allocation77_spill] sm:$0xff] %v11658_v33  ;;  %v9631_v15 = vpop.eup %9630  ;;  %vm11666_vm12 = vcmp.lt.f32.partialorder %v1503_v42, 0.0004427343  ;;  %9642 = vpow2.f32 %v1245_v26  ;;  %v1161_v59 = vsel %vm1097_vm1, 0.0, %v11634_v12  ;;  %v11674_v61 = vmul.f32 100.0, %v11656_v58 }
 0x17f   : > { %19256 = vst [vmem:[#allocation78_spill] sm:$0xff] %v11664_v57  ;;  %19260 = vst [vmem:[#allocation80_spill] sm:$0xff] %v11678_v2  ;;  %v1879_v39 = vmul.f32 0.01, %v1343_v40  ;;  %v1501_v6 = vadd.f32 1.0, %v1500_v35  ;;  %v1623_v5 = vadd.f32 1.0, %v9631_v15  ;;  %9644 = vpow2.f32 %v1249_v7 }
 0x180   : > { %v11680_v42 = vpop.f32.mrb[31].mxu0  ;;  %v11682_v48 = vpop.f32.mrb[31].mxu1  ;;  %v1881_v33 = vmul.f32 0.01, %v1361_v8  ;;  %v1279_v63 = vmul.f32 1.442695, %v1161_v59  ;;  %v1484_v2 = vmul.f32 %v11597_v32, %v1483_v37 }
 0x181   : > { %19261 = vst [vmem:[#allocation81_spill] sm:$0xff] %v11680_v42  ;;  %19262 = vst [vmem:[#allocation82_spill] sm:$0xff] %v11682_v48  ;;  %v11684_v26 = vpop.eup %9632  ;;  %vm1096_vm13 = vcmp.gt.f32.partialorder %v11664_v57, 20.0  ;;  %v11688_v31 = vmul.f32 100.0, %v11652_v11  ;;  %9646 = vlog2.f32 %v1623_v5  ;;  %v1626_v35 = vmul.f32 -0.5, %v9631_v15  ;;  %v19268_v5 = vld [vmem:[#allocation39_spill] sm:$0xff] }
 0x182   : > { %v9635_v25 = vpop.eup %9634  ;;  %v1641_v7 = vadd.f32 1.0, %v11684_v26  ;;  %v1629_v20 = vand.u32 2147483647, %v9631_v15  ;;  %9648 = vpow2.f32 %v1279_v63  ;;  %vm1051_vm10 = vcmp.gt.f32.partialorder %v11674_v61, 20.0 }
 0x183   : > { %19263 = vst [vmem:[#allocation83_spill] sm:$0xff] %v11688_v31  ;;  %v9637_v40 = vpop.eup %9636  ;;  %v1481_v42 = vmul.f32 0.6931472, %v9635_v25  ;;  %v1502_v59 = vmul.f32 %v11603_v22, %v1501_v6  ;;  %v1160_v11 = vsel %vm1096_vm13, 0.0, %v11664_v57  ;;  %v11702_v32 = vsel %vm1047_vm2, %v11318_v43, %v1879_v39 }
 0x184   : > { %v1499_v8 = vmul.f32 0.6931472, %v9637_v40  ;;  %9650 = vlog2.f32 %v1641_v7  ;;  %v11697_v48 = vpop.eup %9638  ;;  %v11707_v63 = vsel %vm1049_vm6, %v11335_v38, %v1881_v33  ;;  %vm1098_vm14 = vcmp.gt.f32.partialorder %v11688_v31, 20.0 }
 0x185   : > { %19264 = vst [vmem:[#allocation84_spill] sm:$0xff] %v11707_v63  ;;  %v1487_v22 = vsel %vm11646_vm11, %v1484_v2, %v1481_v42  ;;  %v1277_v6 = vmul.f32 1.442695, %v1160_v11  ;;  %v1115_v43 = vsel %vm1051_vm10, 0.0, %v11674_v61  ;;  %v1627_v39 = vadd.f32 1.0, %v1626_v35  ;;  %v19267_v11 = vld [vmem:[#allocation38_spill] sm:$0xff] }
 0x186   : > { %v1895_v37 = vmul.f32 0.01, %v1487_v22  ;;  %v1505_v25 = vsel %vm11666_vm12, %v1502_v59, %v1499_v8  ;;  %vm11717_vm2 = vcmp.lt.f32.partialorder %v1629_v20, 0.0004427343  ;;  %v1644_v38 = vmul.f32 -0.5, %v11684_v26 }
 0x187   : > { %v1897_v10 = vmul.f32 0.01, %v1505_v25  ;;  %v9641_v4 = vpop.eup %9640  ;;  %v1187_v0 = vmul.f32 1.442695, %v1115_v43  ;;  %v11729_v2 = vadd.f32 %v19267_v11, %v11067_v36  ;;  %v11733_v42 = vadd.f32 %v19268_v5, %v11067_v36 }
 0x188   : > { %v11725_v33 = vsel %vm1063_vm9, %v11455_v17, %v1895_v37  ;;  %v11735_v20 = vpop.eup %9642  ;;  %v1647_v17 = vand.u32 2147483647, %v11684_v26  ;;  %v1767_v7 = vadd.f32 1.0, %v9641_v4  ;;  %9652 = vpow2.f32 %v1277_v6 }
 0x189   : > { %19269 = vst [vmem:[#allocation38_spill] sm:$0xff] %v11733_v42  ;;  %v11742_v19 = vsel %vm1065_vm3, %v11459_v18, %v1897_v10  ;;  %v11745_v40 = vpop.eup %9644  ;;  %v1162_v59 = vsel %vm1098_vm14, 0.0, %v11688_v31  ;;  %v11753_v22 = vmul.f32 100.0, %v11729_v2  ;;  %v1628_v37 = vmul.f32 %v9631_v15, %v1627_v39 }
 0x18a   : > { %9654 = vlog2.f32 %v1767_v7  ;;  %v11756_v18 = vmul.f32 100.0, %v11733_v42  ;;  %v11760_v25 = vadd.f32 %v19271_v3, %v11067_v36  ;;  %v1645_v10 = vadd.f32 1.0, %v1644_v38 }
 0x18b   : > { %v9647_v43 = vpop.eup %9646  ;;  %v1770_v11 = vmul.f32 -0.5, %v9641_v4  ;;  %9656 = vpow2.f32 %v1187_v0  ;;  %vm1053_vm6 = vcmp.gt.f32.partialorder %v11753_v22, 20.0  ;;  %v1281_v8 = vmul.f32 1.442695, %v1162_v59 }
 0x18c   : > { %19270 = vst [vmem:[#allocation39_spill] sm:$0xff] %v11756_v18  ;;  %19272 = vst [vmem:[#allocation41_spill] sm:$0xff] %v11760_v25  ;;  %v9649_v6 = vpop.eup %9648  ;;  %v1625_v5 = vmul.f32 0.6931472, %v9647_v43  ;;  %v1117_v15 = vsel %vm1053_vm6, 0.0, %v11753_v22  ;;  %vm1052_vm12 = vcmp.gt.f32.partialorder %v11756_v18, 20.0  ;;  %v11774_v59 = vadd.f32 %v11320_v41, %v11081_v45 }
 0x18d   : > { %v1773_v7 = vand.u32 2147483647, %v9641_v4  ;;  %v1785_v35 = vadd.f32 1.0, %v9649_v6  ;;  %v1788_v3 = vmul.f32 -0.5, %v9649_v6  ;;  %v1191_v42 = vmul.f32 1.442695, %v1117_v15 }
 0x18e   : > { %v9651_v39 = vpop.eup %9650  ;;  %v1631_v38 = vsel %vm11717_vm2, %v1628_v37, %v1625_v5  ;;  %v11770_v31 = vmul.f32 100.0, %v11760_v25  ;;  %v1771_v43 = vadd.f32 1.0, %v1770_v11  ;;  %v1791_v57 = vand.u32 2147483647, %v9649_v6 }
 0x18f   : > { %v1643_v0 = vmul.f32 0.6931472, %v9651_v39  ;;  %9658 = vlog2.f32 %v1785_v35  ;;  %v1116_v63 = vsel %vm1052_vm12, 0.0, %v11756_v18  ;;  %v1646_v15 = vmul.f32 %v11684_v26, %v1645_v10 }
 0x190   : > { %19273 = vst [vmem:[#allocation85_spill] sm:$0xff] %v11770_v31  ;;  %vm11780_vm9 = vcmp.lt.f32.partialorder %v1647_v17, 0.0004427343  ;;  %9660 = vpow2.f32 %v1191_v42  ;;  %v1911_v37 = vmul.f32 0.01, %v1631_v38  ;;  %v1789_v5 = vadd.f32 1.0, %v1788_v3 }
 0x191   : > { %9662 = vpow2.f32 %v1281_v8  ;;  %vm18751_vm3 = vcmp.gt.f32.partialorder %v11770_v31, 20.0  ;;  %v1649_v41 = vsel %vm11780_vm9, %v1646_v15, %v1643_v0  ;;  %v1189_v35 = vmul.f32 1.442695, %v1116_v63 }
 0x192   : > { %v11788_v11 = vmul.f32 100.0, %v11774_v59  ;;  %v11792_v26 = vadd.f32 %v11322_v9, %v11081_v45  ;;  %v11794_v17 = vpop.eup %9652  ;;  %v1772_v10 = vmul.f32 %v9641_v4, %v1771_v43  ;;  %vm11796_vm11 = vcmp.lt.f32.partialorder %v1773_v7, 0.0004427343 }
 0x193   : > { %vm11800_vm2 = vcmp.lt.f32.partialorder %v1791_v57, 0.0004427343  ;;  %v11806_v63 = vadd.f32 %v11326_v16, %v11081_v45  ;;  %v1118_v9 = vsel %vm18751_vm3, 0.0, %v11770_v31  ;;  %v11817_v57 = vadd.f32 %v11337_v14, %v11081_v45 }
 0x194   : > { %v9655_v39 = vpop.eup %9654  ;;  %vm1067_vm9 = vcmp.gt.f32.partialorder %v11788_v11, 20.0  ;;  %v11813_v4 = vmul.f32 100.0, %v11792_v26  ;;  %v11824_v16 = vsel %vm1079_vm7, %v11519_v55, %v1911_v37  ;;  %v1913_v3 = vmul.f32 0.01, %v1649_v41 }
 0x195   : > { %19280 = vst [vmem:[#allocation86_spill] sm:$0xff] %v11806_v63  ;;  %19281 = vst [vmem:[#allocation87_spill] sm:$0xff] %v11817_v57  ;;  %v11819_v7 = vpop.eup %9656  ;;  %v1769_v38 = vmul.f32 0.6931472, %v9655_v39  ;;  %v1131_v0 = vsel %vm1067_vm9, 0.0, %v11788_v11  ;;  %v1790_v43 = vmul.f32 %v9649_v6, %v1789_v5  ;;  %9664 = vpow2.f32 %v1189_v35 }
 0x196   : > { %19282 = vst [vmem:[#allocation88_spill] sm:$0xff] %v11824_v16  ;;  %v1371_v15 = vadd.f32 1.0, %v11819_v7  ;;  %v1219_v47 = vmul.f32 1.442695, %v1131_v0  ;;  %v1193_v31 = vmul.f32 1.442695, %v1118_v9  ;;  %v11841_v6 = vadd.f32 %v11355_v44, %v11111_v60 }
 0x197   : > { %v1775_v14 = vsel %vm11796_vm11, %v1772_v10, %v1769_v38  ;;  %vm1069_vm3 = vcmp.gt.f32.partialorder %v11813_v4, 20.0  ;;  %v11834_v55 = vmul.f32 100.0, %v11806_v63  ;;  %v11837_v37 = vmul.f32 100.0, %v11817_v57 }
 0x198   : > { %v1927_v54 = vmul.f32 0.01, %v1775_v14  ;;  %9666 = vlog2.f32 %v1371_v15  ;;  %v1374_v41 = vmul.f32 -0.5, %v11819_v7  ;;  %v1377_v35 = vand.u32 2147483647, %v11819_v7 }
 0x199   : > { %19283 = vst [vmem:[#allocation89_spill] sm:$0xff] %v11834_v55  ;;  %19284 = vst [vmem:[#allocation90_spill] sm:$0xff] %v11837_v37  ;;  %v9659_v5 = vpop.eup %9658  ;;  %9668 = vpow2.f32 %v1219_v47  ;;  %v1133_v10 = vsel %vm1069_vm3, 0.0, %v11813_v4  ;;  %v11857_v38 = vadd.f32 %v11357_v27, %v11111_v60  ;;  %vm18760_vm7 = vcmp.gt.f32.partialorder %v11834_v55, 20.0 }
 0x19a   : > { %v11848_v42 = vpop.eup %9660  ;;  %v11853_v39 = vsel %vm1095_vm15, %v11581_v51, %v1927_v54  ;;  %v1787_v9 = vmul.f32 0.6931472, %v9659_v5  ;;  %v1223_v44 = vmul.f32 1.442695, %v1133_v10  ;;  %9670 = vpow2.f32 %v1193_v31 }
 0x19b   : > { %19285 = vst [vmem:[#allocation91_spill] sm:$0xff] %v11853_v39  ;;  %v11859_v0 = vpop.eup %9662  ;;  %v1389_v47 = vadd.f32 1.0, %v11848_v42  ;;  %v11868_v30 = vsel %vm1081_vm0, %v11538_v23, %v1913_v3  ;;  %vm18758_vm15 = vcmp.gt.f32.partialorder %v11837_v37, 20.0  ;;  %v1375_v14 = vadd.f32 1.0, %v1374_v41 }
 0x19c   : > { %19286 = vst [vmem:[#allocation92_spill] sm:$0xff] %v11868_v30  ;;  %v1793_v51 = vsel %vm11800_vm2, %v1790_v43, %v1787_v9  ;;  %9672 = vpow2.f32 %v1223_v44  ;;  %vm11873_vm11 = vcmp.lt.f32.partialorder %v1377_v35, 0.0004427343  ;;  %v1132_v31 = vsel %vm18760_vm7, 0.0, %v11834_v55 }
 0x19d   : > { %v1929_v27 = vmul.f32 0.01, %v1793_v51  ;;  %9674 = vlog2.f32 %v1389_v47  ;;  %v11881_v23 = vmul.f32 100.0, %v11841_v6  ;;  %v11884_v1 = vmul.f32 100.0, %v11857_v38 }
 0x19e   : > { %v11888_v8 = vadd.f32 %v11371_v28, %v11111_v60  ;;  %v1392_v43 = vmul.f32 -0.5, %v11848_v42  ;;  %v1134_v5 = vsel %vm18758_vm15, 0.0, %v11837_v37  ;;  %v11901_v41 = vadd.f32 %v11373_v21, %v11111_v60 }
 0x19f   : > { %v11893_v3 = vsel %vm1097_vm1, %v11622_v13, %v1929_v27  ;;  %v11903_v35 = vpop.eup %9664  ;;  %vm1083_vm0 = vcmp.gt.f32.partialorder %v11881_v23, 20.0  ;;  %vm1085_vm1 = vcmp.gt.f32.partialorder %v11884_v1, 20.0  ;;  %v1395_v12 = vand.u32 2147483647, %v11848_v42 }
 0x1a0   : > { %19289 = vst [vmem:[#allocation93_spill] sm:$0xff] %v11888_v8  ;;  %19290 = vst [vmem:[#allocation94_spill] sm:$0xff] %v11893_v3  ;;  %v11910_v13 = vmul.f32 100.0, %v11888_v8  ;;  %v1147_v10 = vsel %vm1083_vm0, 0.0, %v11881_v23  ;;  %v1149_v21 = vsel %vm1085_vm1, 0.0, %v11884_v1  ;;  %v11921_v9 = vadd.f32 %v11400_v62, %v11192_v56 }
 0x1a1   : > { %19291 = vst [vmem:[#allocation95_spill] sm:$0xff] %v11901_v41  ;;  %v1251_v47 = vmul.f32 1.442695, %v1147_v10  ;;  %v1255_v51 = vmul.f32 1.442695, %v1149_v21  ;;  %v11925_v27 = vmul.f32 100.0, %v11901_v41  ;;  %v1376_v8 = vmul.f32 %v11819_v7, %v1375_v14 }
 0x1a2   : > { %19292 = vst [vmem:[#allocation96_spill] sm:$0xff] %v11910_v13  ;;  %v9667_v44 = vpop.eup %9666  ;;  %vm18759_vm2 = vcmp.gt.f32.partialorder %v11910_v13, 20.0  ;;  %v1221_v37 = vmul.f32 1.442695, %v1132_v31  ;;  %v1225_v57 = vmul.f32 1.442695, %v1134_v5  ;;  %v11943_v31 = vadd.f32 %v11402_v52, %v11192_v56 }
 0x1a3   : > { %19293 = vst [vmem:[#allocation97_spill] sm:$0xff] %v11925_v27  ;;  %v9669_v28 = vpop.eup %9668  ;;  %v1373_v15 = vmul.f32 0.6931472, %v9667_v44  ;;  %9676 = vpow2.f32 %v1251_v47  ;;  %v1148_v62 = vsel %vm18759_vm2, 0.0, %v11910_v13  ;;  %v1393_v41 = vadd.f32 1.0, %v1392_v43 }
 0x1a4   : > { %v1515_v25 = vadd.f32 1.0, %v9669_v28  ;;  %v1518_v55 = vmul.f32 -0.5, %v9669_v28  ;;  %v11931_v10 = vpop.eup %9670  ;;  %9678 = vpow2.f32 %v1255_v51  ;;  %v11936_v44 = vmul.f32 100.0, %v11921_v9 }
 0x1a5   : > { %v1379_v21 = vsel %vm11873_vm11, %v1376_v8, %v1373_v15  ;;  %v1521_v14 = vand.u32 2147483647, %v9669_v28  ;;  %vm18761_vm15 = vcmp.gt.f32.partialorder %v11925_v27, 20.0  ;;  %vm11945_vm2 = vcmp.lt.f32.partialorder %v1395_v12, 0.0004427343 }
 0x1a6   : > { %v11938_v7 = vpop.eup %9672  ;;  %9680 = vlog2.f32 %v1515_v25  ;;  %v1253_v54 = vmul.f32 1.442695, %v1148_v62  ;;  %v1883_v8 = vmul.f32 0.01, %v1379_v21  ;;  %v1519_v51 = vadd.f32 1.0, %v1518_v55 }
 0x1a7   : > { %v9675_v5 = vpop.eup %9674  ;;  %v1533_v15 = vadd.f32 1.0, %v11938_v7  ;;  %9682 = vpow2.f32 %v1221_v37  ;;  %v1394_v25 = vmul.f32 %v11848_v42, %v1393_v41  ;;  %v1150_v52 = vsel %vm18761_vm15, 0.0, %v11925_v27 }
 0x1a8   : > { %v1391_v43 = vmul.f32 0.6931472, %v9675_v5  ;;  %9684 = vpow2.f32 %v1225_v57  ;;  %vm1099_vm11 = vcmp.gt.f32.partialorder %v11936_v44, 20.0  ;;  %vm11955_vm7 = vcmp.lt.f32.partialorder %v1521_v14, 0.0004427343 }
 0x1a9   : > { %9686 = vlog2.f32 %v1533_v15  ;;  %v1536_v37 = vmul.f32 -0.5, %v11938_v7  ;;  %v1539_v62 = vand.u32 2147483647, %v11938_v7  ;;  %v1163_v57 = vsel %vm1099_vm11, 0.0, %v11936_v44  ;;  %v19300_v15 = vld [vmem:[#allocation31_spill] sm:$0xff]  ;;  %v19340_v44 = vld [vmem:[#allocation48_spill] sm:$0xff] }
 0x1aa   : > { %v11965_v55 = vmul.f32 100.0, %v11943_v31  ;;  %v1397_v42 = vsel %vm11945_vm2, %v1394_v25, %v1391_v43  ;;  %9688 = vpow2.f32 %v1253_v54  ;;  %v1283_v41 = vmul.f32 1.442695, %v1163_v57 }
 0x1ab   : > { %v11971_v21 = vadd.f32 %v11412_v53, %v11192_v56  ;;  %v11976_v14 = vsel %vm1051_vm10, %v11656_v58, %v1883_v8  ;;  %v1520_v5 = vmul.f32 %v9669_v28, %v1519_v51  ;;  %v1308_v27 = vadd.f32 1.0, %v19300_v15 }
 0x1ac   : > { %19299 = vst [vmem:[#allocation99_spill] sm:$0xff] %v11976_v14  ;;  %vm1101_vm15 = vcmp.gt.f32.partialorder %v11965_v55, 20.0  ;;  %v1257_v13 = vmul.f32 1.442695, %v1150_v52  ;;  %9690 = vpow2.f32 %v1283_v41  ;;  %v1885_v43 = vmul.f32 0.01, %v1397_v42 }
 0x1ad   : > { %19298 = vst [vmem:[#allocation98_spill] sm:$0xff] %v11971_v21  ;;  %v1165_v47 = vsel %vm1101_vm15, 0.0, %v11965_v55  ;;  %v11984_v54 = vmul.f32 100.0, %v11971_v21  ;;  %v9677_v53 = vpop.eup %9676  ;;  %v1537_v25 = vadd.f32 1.0, %v1536_v37  ;;  %9692 = vlog2.f32 %v1308_v27 }
 0x1ae   : > { %v1287_v61 = vmul.f32 1.442695, %v1165_v47  ;;  %v9679_v58 = vpop.eup %9678  ;;  %v1659_v28 = vadd.f32 1.0, %v9677_v53  ;;  %v1662_v8 = vmul.f32 -0.5, %v9677_v53  ;;  %v11989_v51 = vadd.f32 %v11414_v29, %v11192_v56 }
 0x1af   : > { %19301 = vst [vmem:[#allocation31_spill] sm:$0xff] %v11984_v54  ;;  %vm18772_vm10 = vcmp.gt.f32.partialorder %v11984_v54, 20.0  ;;  %v1677_v57 = vadd.f32 1.0, %v9679_v58  ;;  %v1680_v41 = vmul.f32 -0.5, %v9679_v58  ;;  %v1311_v21 = vmul.f32 -0.5, %v19300_v15 }
 0x1b0   : > { %19302 = vst [vmem:[#allocation100_spill] sm:$0xff] %v11989_v51  ;;  %v9681_v52 = vpop.eup %9680  ;;  %9694 = vpow2.f32 %v1287_v61  ;;  %v1663_v27 = vadd.f32 1.0, %v1662_v8  ;;  %v1665_v42 = vand.u32 2147483647, %v9677_v53  ;;  %vm11996_vm2 = vcmp.lt.f32.partialorder %v1539_v62, 0.0004427343 }
 0x1b1   : > { %v11992_v63 = vpop.eup %9682  ;;  %v1517_v37 = vmul.f32 0.6931472, %v9681_v52  ;;  %9696 = vlog2.f32 %v1659_v28  ;;  %v1683_v29 = vand.u32 2147483647, %v9679_v58  ;;  %v1164_v61 = vsel %vm18772_vm10, 0.0, %v11984_v54 }
 0x1b2   : > { %v11994_v47 = vpop.eup %9684  ;;  %9698 = vlog2.f32 %v1677_v57  ;;  %v1681_v52 = vadd.f32 1.0, %v1680_v41  ;;  %v12006_v28 = vmul.f32 100.0, %v11989_v51  ;;  %v12011_v62 = vsel %vm1053_vm6, %v11729_v2, %v1885_v43  ;;  %v19316_v51 = vld [vmem:[#allocation32_spill] sm:$0xff] }
 0x1b3   : > { %v9687_v30 = vpop.eup %9686  ;;  %v1523_v3 = vsel %vm11955_vm7, %v1520_v5, %v1517_v37  ;;  %9700 = vpow2.f32 %v1257_v13  ;;  %19306 = vst [vmem:[#allocation102_spill] sm:$0xff] %v12011_v62  ;;  %v1538_v16 = vmul.f32 %v11938_v7, %v1537_v25  ;;  %v1664_v54 = vmul.f32 %v9677_v53, %v1663_v27 }
 0x1b4   : > { %19305 = vst [vmem:[#allocation101_spill] sm:$0xff] %v12006_v28  ;;  %v1899_v8 = vmul.f32 0.01, %v1523_v3  ;;  %v1535_v57 = vmul.f32 0.6931472, %v9687_v30  ;;  %v12014_v39 = vpop.eup %9688  ;;  %v1312_v5 = vadd.f32 1.0, %v1311_v21  ;;  %v1682_v25 = vmul.f32 %v9679_v58, %v1681_v52 }
 0x1b5   : > { %vm12016_vm10 = vcmp.lt.f32.partialorder %v1665_v42, 0.0004427343  ;;  %v1285_v13 = vmul.f32 1.442695, %v1164_v61  ;;  %vm12027_vm6 = vcmp.lt.f32.partialorder %v1683_v29, 0.0004427343  ;;  %v12122_v1 = vadd.f32 %v11445_v34, %v11067_v36 }
 0x1b6   : > { %v12023_v41 = vsel %vm1067_vm9, %v11774_v59, %v1899_v8  ;;  %v1541_v2 = vsel %vm11996_vm2, %v1538_v16, %v1535_v57  ;;  %v1314_v30 = vand.u32 2147483647, %v19300_v15  ;;  %v19312_v3 = vld [vmem:[#allocation42_spill] sm:$0xff]  ;;  %v9691_v53 = vpop.eup %9690  ;;  %vm1102_vm9 = vcmp.gt.f32.partialorder %v12006_v28, 20.0 }
 0x1b7   : > { %19309 = vst [vmem:[#allocation103_spill] sm:$0xff] %v12023_v41  ;;  %v1452_v7 = vadd.f32 1.0, %v19312_v3  ;;  %v1901_v43 = vmul.f32 0.01, %v1541_v2  ;;  %v9693_v59 = vpop.eup %9692  ;;  %v1803_v11 = vadd.f32 1.0, %v9691_v53  ;;  %v1806_v18 = vmul.f32 -0.5, %v9691_v53 }
 0x1b8   : > { %v1455_v16 = vmul.f32 -0.5, %v19312_v3  ;;  %v1310_v27 = vmul.f32 0.6931472, %v9693_v59  ;;  %v1313_v42 = vmul.f32 %v19300_v15, %v1312_v5  ;;  %v1166_v61 = vsel %vm1102_vm9, 0.0, %v12006_v28  ;;  %19332 = vst [vmem:[#allocation21_spill] sm:$0xff] %v12122_v1 }
 0x1b9   : > { %9702 = vlog2.f32 %v1452_v7  ;;  %v12040_v37 = vsel %vm1069_vm3, %v11792_v26, %v1901_v43  ;;  %vm12048_vm7 = vcmp.lt.f32.partialorder %v1314_v30, 0.0004427343  ;;  %v1809_v26 = vand.u32 2147483647, %v9691_v53 }
 0x1ba   : > { %19313 = vst [vmem:[#allocation42_spill] sm:$0xff] %v12040_v37  ;;  %9704 = vpow2.f32 %v1285_v13  ;;  %v9695_v29 = vpop.eup %9694  ;;  %v1316_v15 = vsel %vm12048_vm7, %v1313_v42, %v1310_v27  ;;  %v1807_v2 = vadd.f32 1.0, %v1806_v18  ;;  %v1456_v7 = vadd.f32 1.0, %v1455_v16 }
 0x1bb   : > { %9706 = vlog2.f32 %v1803_v11  ;;  %v9697_v4 = vpop.eup %9696  ;;  %v1821_v8 = vadd.f32 1.0, %v9695_v29  ;;  %v1824_v57 = vmul.f32 -0.5, %v9695_v29  ;;  %v1458_v43 = vand.u32 2147483647, %v19312_v3 }
 0x1bc   : > { %v9699_v13 = vpop.eup %9698  ;;  %v1661_v5 = vmul.f32 0.6931472, %v9697_v4  ;;  %v1827_v58 = vand.u32 2147483647, %v9695_v29  ;;  %v1876_v28 = vmul.f32 0.01, %v1316_v15 }
 0x1bd   : > { %v12055_v59 = vpop.eup %9700  ;;  %v1679_v11 = vmul.f32 0.6931472, %v9699_v13  ;;  %9708 = vlog2.f32 %v1821_v8  ;;  %v1825_v30 = vadd.f32 1.0, %v1824_v57  ;;  %v1326_v62 = vadd.f32 1.0, %v19316_v51  ;;  %v19324_v15 = vld [vmem:[#allocation19_spill] sm:$0xff] }
 0x1be   : > { %v1667_v21 = vsel %vm12016_vm10, %v1664_v54, %v1661_v5  ;;  %v1329_v27 = vmul.f32 -0.5, %v19316_v51  ;;  %vm12063_vm3 = vcmp.lt.f32.partialorder %v1809_v26, 0.0004427343  ;;  %v12067_v52 = vmul.f32 1.442695, %v1166_v61 }
 0x1bf   : > { %v1915_v42 = vmul.f32 0.01, %v1667_v21  ;;  %v1685_v18 = vsel %vm12027_vm6, %v1682_v25, %v1679_v11  ;;  %v1808_v8 = vmul.f32 %v9691_v53, %v1807_v2  ;;  %9710 = vlog2.f32 %v1326_v62  ;;  %v19323_v25 = vld [vmem:[#allocation43_spill] sm:$0xff] }
 0x1c0   : > { %v1917_v4 = vmul.f32 0.01, %v1685_v18  ;;  %v1332_v54 = vand.u32 2147483647, %v19316_v51  ;;  %vm12070_vm10 = vcmp.lt.f32.partialorder %v1827_v58, 0.0004427343  ;;  %v1457_v21 = vmul.f32 %v19312_v3, %v1456_v7 }
 0x1c1   : > { %vm12075_vm2 = vcmp.lt.f32.partialorder %v1458_v43, 0.0004427343  ;;  %v1470_v26 = vadd.f32 1.0, %v19323_v25  ;;  %v1826_v61 = vmul.f32 %v9695_v29, %v1825_v30  ;;  %v1940_v62 = vsel %vm1044_vm4, %v19324_v15, %v1876_v28  ;;  %v19330_v43 = vld [vmem:[#allocation52_spill] sm:$0xff] }
 0x1c2   : > { %v1330_v53 = vadd.f32 1.0, %v1329_v27  ;;  %v12085_v58 = vadd.f32 %v11429_v50, %v11067_v36  ;;  %v12092_v3 = vsel %vm1083_vm0, %v11841_v6, %v1915_v42  ;;  %v12096_v29 = vadd.f32 %v11439_v49, %v11067_v36  ;;  %v19344_v50 = vld [vmem:[#allocation55_spill] sm:$0xff] }
 0x1c3   : > { %v9703_v57 = vpop.eup %9702  ;;  %19326 = vst [vmem:[#allocation32_spill] sm:$0xff] %v12092_v3  ;;  %9712 = vlog2.f32 %v1470_v26  ;;  %v12101_v28 = vsel %vm1085_vm1, %v11857_v38, %v1917_v4  ;;  %vm12103_vm4 = vcmp.lt.f32.partialorder %v1332_v54, 0.0004427343  ;;  %v1473_v23 = vmul.f32 -0.5, %v19323_v25  ;;  %v19334_v26 = vld [vmem:[#allocation23_spill] sm:$0xff]  ;;  %v19397_v3 = vld [vmem:[#allocation36_spill] sm:$0xff] }
 0x1c4   : > { %v12087_v5 = vpop.eup %9704  ;;  %v1454_v2 = vmul.f32 0.6931472, %v9703_v57  ;;  %19327 = vst [vmem:[#allocation43_spill] sm:$0xff] %v12101_v28  ;;  %v12109_v6 = vmul.f32 100.0, %v12085_v58  ;;  %v12113_v11 = vadd.f32 %v19330_v43, %v11067_v36  ;;  %v12118_v38 = vmul.f32 100.0, %v12096_v29 }
 0x1c5   : > { %v9707_v7 = vpop.eup %9706  ;;  %v1476_v42 = vand.u32 2147483647, %v19323_v25  ;;  %v12137_v36 = vadd.f32 %v11465_v46, %v11081_v45  ;;  %v1474_v16 = vadd.f32 1.0, %v1473_v23 }
 0x1c6   : > { %19331 = vst [vmem:[#allocation19_spill] sm:$0xff] %v12113_v11  ;;  %v1805_v49 = vmul.f32 0.6931472, %v9707_v7  ;;  %v1460_v30 = vsel %vm12075_vm2, %v1457_v21, %v1454_v2  ;;  %vm1055_vm0 = vcmp.gt.f32.partialorder %v12109_v6, 20.0  ;;  %v12127_v18 = vmul.f32 100.0, %v12113_v11 }
 0x1c7   : > { %v1892_v27 = vmul.f32 0.01, %v1460_v30  ;;  %v9709_v4 = vpop.eup %9708  ;;  %v1119_v21 = vsel %vm1055_vm0, 0.0, %v12109_v6  ;;  %vm1057_vm1 = vcmp.gt.f32.partialorder %v12118_v38, 20.0  ;;  %v12146_v7 = vmul.f32 100.0, %v12122_v1 }
 0x1c8   : > { %19333 = vst [vmem:[#allocation52_spill] sm:$0xff] %v12127_v18  ;;  %v1811_v54 = vsel %vm12063_vm3, %v1808_v8, %v1805_v49  ;;  %v1823_v22 = vmul.f32 0.6931472, %v9709_v4  ;;  %v1195_v13 = vmul.f32 1.442695, %v1119_v21  ;;  %v1121_v8 = vsel %vm1057_vm1, 0.0, %v12118_v38 }
 0x1c9   : > { %v1931_v34 = vmul.f32 0.01, %v1811_v54  ;;  %v1956_v15 = vsel %vm1060_vm8, %v19334_v26, %v1892_v27  ;;  %19336 = vst [vmem:[#allocation23_spill] sm:$0xff] %v12146_v7  ;;  %v9711_v43 = vpop.eup %9710  ;;  %v1199_v30 = vmul.f32 1.442695, %v1121_v8  ;;  %v1331_v4 = vmul.f32 %v19316_v51, %v1330_v53 }
 0x1ca   : > { %v9153_v2 = vpack.c.bf16 %v1956_v15, %v1940_v62  ;;  %v1829_v49 = vsel %vm12070_vm10, %v1826_v61, %v1823_v22  ;;  %9714 = vpow2.f32 %v1195_v13  ;;  %v1328_v27 = vmul.f32 0.6931472, %v9711_v43 }
 0x1cb   : > { %v12151_v46 = vsel %vm1099_vm11, %v11921_v9, %v1931_v34  ;;  %v1933_v23 = vmul.f32 0.01, %v1829_v49  ;;  %vm12158_vm8 = vcmp.lt.f32.partialorder %v1476_v42, 0.0004427343  ;;  %v19341_v9 = vld [vmem:[#allocation44_spill] sm:$0xff]  ;;  %9716 = vpow2.f32 %v1199_v30 }
 0x1cc   : > { %19337 = vst [vmem:[#allocation25_spill] sm:$0xff] %v12151_v46  ;;  %9154 = vmatprep.subr.bf16.mxu0 %v9153_v2  ;;  %v19342_v21 = vpack.c.bf16 %v19340_v44, %v19341_v9  ;;  %vm18793_vm11 = vcmp.gt.f32.partialorder %v12127_v18, 20.0  ;;  %v12167_v12 = vmul.f32 100.0, %v12137_v36  ;;  %v1334_v51 = vsel %vm12103_vm4, %v1331_v4, %v1328_v27  ;;  %v19346_v2 = vld [vmem:[#allocation56_spill] sm:$0xff] }
 0x1cd   : > { %v9713_v61 = vpop.eup %9712  ;;  %v12172_v34 = vsel %vm1101_vm15, %v11943_v31, %v1933_v23  ;;  %vm18788_vm6 = vcmp.gt.f32.partialorder %v12146_v7, 20.0  ;;  %v12179_v53 = vadd.f32 %v11467_v24, %v11081_v45  ;;  %v1475_v26 = vmul.f32 %v19323_v25, %v1474_v16  ;;  %v19349_v30 = vld [vmem:[#allocation20_spill] sm:$0xff]  ;;  %v19357_v23 = vld [vmem:[#allocation45_spill] sm:$0xff] }
 0x1ce   : > { %9156 = vmatpush1.bf16.msra.mxu0 %v19342_v21  ;;  %19343 = vst [vmem:[#allocation48_spill] sm:$0xff] %v12172_v34  ;;  %v1472_v22 = vmul.f32 0.6931472, %v9713_v61  ;;  %v1878_v57 = vmul.f32 0.01, %v1334_v51  ;;  %v1120_v31 = vsel %vm18793_vm11, 0.0, %v12127_v18  ;;  %v12193_v24 = vadd.f32 %v19344_v50, %v11081_v45 }
 0x1cf   : > { %vm1071_vm15 = vcmp.gt.f32.partialorder %v12167_v12, 20.0  ;;  %v12189_v55 = vmul.f32 100.0, %v12179_v53  ;;  %v1122_v25 = vsel %vm18788_vm6, 0.0, %v12146_v7  ;;  %v12205_v16 = vadd.f32 %v19346_v2, %v11081_v45  ;;  %v19352_v45 = vld [vmem:[#allocation47_spill] sm:$0xff]  ;;  %v19353_v9 = vld [vmem:[#allocation24_spill] sm:$0xff]  ;;  %v19354_v21 = vld [vmem:[#allocation26_spill] sm:$0xff] }
 0x1d0   : > { %19345 = vst [vmem:[#allocation44_spill] sm:$0xff] %v12193_v24  ;;  %v1478_v15 = vsel %vm12158_vm8, %v1475_v26, %v1472_v22  ;;  %v1135_v13 = vsel %vm1071_vm15, 0.0, %v12167_v12  ;;  %v12209_v49 = vmul.f32 100.0, %v12193_v24  ;;  %v1942_v27 = vsel %vm1046_vm5, %v19349_v30, %v1878_v57  ;;  %v19356_v30 = vld [vmem:[#allocation49_spill] sm:$0xff] }
 0x1d1   : > { %19347 = vst [vmem:[#allocation55_spill] sm:$0xff] %v12205_v16  ;;  %v1894_v8 = vmul.f32 0.01, %v1478_v15  ;;  %v1227_v43 = vmul.f32 1.442695, %v1135_v13  ;;  %vm1073_vm7 = vcmp.gt.f32.partialorder %v12189_v55, 20.0 }
 0x1d2   : > { %19348 = vst [vmem:[#allocation56_spill] sm:$0xff] %v12209_v49  ;;  %v1137_v4 = vsel %vm1073_vm7, 0.0, %v12189_v55  ;;  %v12218_v54 = vmul.f32 100.0, %v12205_v16  ;;  %v1596_v44 = vadd.f32 1.0, %v19352_v45  ;;  %vm19355_vm3 = vcmp.gt.f32.partialorder %v19354_v21, 20.0  ;;  %v12403_v55 = vld [vmem:[#allocation5 + $0x20] sm:$0xff] }
 0x1d3   : > { %v1958_v61 = vsel %vm19355_vm3, %v19353_v9, %v1894_v8  ;;  %9718 = vpow2.f32 %v1227_v43  ;;  %v1231_v51 = vmul.f32 1.442695, %v1137_v4  ;;  %vm18792_vm10 = vcmp.gt.f32.partialorder %v12209_v49, 20.0 }
 0x1d4   : > { %19351 = vst [vmem:[#allocation20_spill] sm:$0xff] %v12218_v54  ;;  %v9715_v22 = vpop.eup %9714  ;;  %v9161_v26 = vpack.c.bf16 %v1958_v61, %v1942_v27  ;;  %v1197_v57 = vmul.f32 1.442695, %v1120_v31  ;;  %vm18785_vm5 = vcmp.gt.f32.partialorder %v12218_v54, 20.0  ;;  %9720 = vlog2.f32 %v1596_v44 }
 0x1d5   : > { %v1407_v50 = vadd.f32 1.0, %v9715_v22  ;;  %v1410_v15 = vmul.f32 -0.5, %v9715_v22  ;;  %9722 = vpow2.f32 %v1231_v51  ;;  %v1599_v13 = vmul.f32 -0.5, %v19352_v45  ;;  %v9717_v2 = vpop.eup %9716 }
 0x1d6   : > { %9724 = vpow2.f32 %v12067_v52  ;;  %9162 = vmatprep.subr.bf16.mxu1 %v9161_v26  ;;  %v1201_v8 = vmul.f32 1.442695, %v1122_v25  ;;  %v1136_v43 = vsel %vm18792_vm10, 0.0, %v12209_v49  ;;  %v19358_v31 = vpack.c.bf16 %v19356_v30, %v19357_v23 }
 0x1d7   : > { %9726 = vlog2.f32 %v1407_v50  ;;  %v1413_v27 = vand.u32 2147483647, %v9715_v22  ;;  %v1425_v4 = vadd.f32 1.0, %v9717_v2  ;;  %v1138_v44 = vsel %vm18785_vm5, 0.0, %v12218_v54  ;;  %v19359_v50 = vld [vmem:[#allocation62_spill] sm:$0xff] }
 0x1d8   : > { %9164 = vmatpush1.bf16.msra.mxu1 %v19358_v31  ;;  %v1411_v9 = vadd.f32 1.0, %v1410_v15  ;;  %v1428_v21 = vmul.f32 -0.5, %v9717_v2  ;;  %9728 = vpow2.f32 %v1197_v57  ;;  %v12237_v52 = vmul.f32 1.442695, %v1136_v43  ;;  %v19362_v57 = vld [vmem:[#allocation59_spill] sm:$0xff] }
 0x1d9   : > { %9730 = vlog2.f32 %v1425_v4  ;;  %v1600_v25 = vadd.f32 1.0, %v1599_v13  ;;  %v1602_v61 = vand.u32 2147483647, %v19352_v45  ;;  %v1431_v51 = vand.u32 2147483647, %v9717_v2 }
 0x1da   : > { %9732 = vpow2.f32 %v1201_v8  ;;  %v12240_v26 = vmul.f32 1.442695, %v1138_v44  ;;  %v1740_v30 = vadd.f32 1.0, %v19359_v50  ;;  %vm12243_vm2 = vcmp.lt.f32.partialorder %v1413_v27, 0.0004427343  ;;  %v19363_v8 = vld [vmem:[#allocation66_spill] sm:$0xff] }
 0x1db   : > { %v1429_v31 = vadd.f32 1.0, %v1428_v21  ;;  %v1743_v15 = vmul.f32 -0.5, %v19359_v50  ;;  %v1614_v4 = vadd.f32 1.0, %v19362_v57  ;;  %v1617_v43 = vmul.f32 -0.5, %v19362_v57 }
 0x1dc   : > { %v1412_v13 = vmul.f32 %v9715_v22, %v1411_v9  ;;  %9734 = vlog2.f32 %v1740_v30  ;;  %v1746_v42 = vand.u32 2147483647, %v19359_v50  ;;  %v1758_v44 = vadd.f32 1.0, %v19363_v8 }
 0x1dd   : > { %v9719_v62 = vpop.eup %9718  ;;  %v1601_v54 = vmul.f32 %v19352_v45, %v1600_v25  ;;  %v1744_v27 = vadd.f32 1.0, %v1743_v15  ;;  %9736 = vlog2.f32 %v1614_v4  ;;  %v1620_v16 = vand.u32 2147483647, %v19362_v57  ;;  %v19390_v4 = vld [vmem:[#allocation35_spill] sm:$0xff] }
 0x1de   : > { %v9721_v21 = vpop.eup %9720  ;;  %vm12254_vm4 = vcmp.lt.f32.partialorder %v1431_v51, 0.0004427343  ;;  %v1551_v1 = vadd.f32 1.0, %v9719_v62  ;;  %v1554_v49 = vmul.f32 -0.5, %v9719_v62  ;;  %vm12258_vm8 = vcmp.lt.f32.partialorder %v1602_v61, 0.0004427343 }
 0x1df   : > { %v9723_v9 = vpop.eup %9722  ;;  %v1430_v30 = vmul.f32 %v9717_v2, %v1429_v31  ;;  %v1598_v24 = vmul.f32 0.6931472, %v9721_v21  ;;  %v1618_v18 = vadd.f32 1.0, %v1617_v43  ;;  %9738 = vlog2.f32 %v1758_v44 }
 0x1e0   : > { %v12262_v45 = vpop.eup %9724  ;;  %9740 = vlog2.f32 %v1551_v1  ;;  %v1557_v25 = vand.u32 2147483647, %v9719_v62  ;;  %v1569_v15 = vadd.f32 1.0, %v9723_v9  ;;  %v1745_v51 = vmul.f32 %v19359_v50, %v1744_v27 }
 0x1e1   : > { %vm12265_vm3 = vcmp.lt.f32.partialorder %v1746_v42, 0.0004427343  ;;  %v9727_v61 = vpop.eup %9726  ;;  %v1555_v11 = vadd.f32 1.0, %v1554_v49  ;;  %v1572_v28 = vmul.f32 -0.5, %v9723_v9  ;;  %v1604_v2 = vsel %vm12258_vm8, %v1601_v54, %v1598_v24 }
 0x1e2   : > { %vm12271_vm5 = vcmp.lt.f32.partialorder %v1620_v16, 0.0004427343  ;;  %v1761_v1 = vmul.f32 -0.5, %v19363_v8  ;;  %v12276_v43 = vpop.eup %9728  ;;  %v1409_v44 = vmul.f32 0.6931472, %v9727_v61  ;;  %9742 = vlog2.f32 %v1569_v15  ;;  %v19375_v15 = vld [vmem:[#allocation72_spill] sm:$0xff] }
 0x1e3   : > { %v1575_v42 = vand.u32 2147483647, %v9723_v9  ;;  %v1908_v50 = vmul.f32 0.01, %v1604_v2  ;;  %v9731_v27 = vpop.eup %9730  ;;  %v1573_v21 = vadd.f32 1.0, %v1572_v28  ;;  %v1619_v49 = vmul.f32 %v19362_v57, %v1618_v18  ;;  %v19376_v57 = vld [vmem:[#allocation27_spill] sm:$0xff] }
 0x1e4   : > { %v1762_v34 = vadd.f32 1.0, %v1761_v1  ;;  %v1764_v22 = vand.u32 2147483647, %v19363_v8  ;;  %v12280_v24 = vpop.eup %9732  ;;  %v1415_v16 = vsel %vm12243_vm2, %v1412_v13, %v1409_v44  ;;  %v1427_v54 = vmul.f32 0.6931472, %v9731_v27  ;;  %v19377_v1 = vld [vmem:[#allocation29_spill] sm:$0xff] }
 0x1e5   : > { %19372 = vst [vmem:[#allocation22_spill] sm:$0xff] %v12280_v24  ;;  %vm12284_vm8 = vcmp.lt.f32.partialorder %v1557_v25, 0.0004427343  ;;  %v12290_v61 = vadd.f32 %v19375_v15, %v11111_v60  ;;  %v1887_v28 = vmul.f32 0.01, %v1415_v16  ;;  %v1556_v2 = vmul.f32 %v9719_v62, %v1555_v11  ;;  %v19381_v44 = vld [vmem:[#allocation74_spill] sm:$0xff] }
 0x1e6   : > { %v1574_v18 = vmul.f32 %v9723_v9, %v1573_v21  ;;  %vm19378_vm6 = vcmp.gt.f32.partialorder %v19377_v1, 20.0  ;;  %v9735_v37 = vpop.eup %9734  ;;  %v1433_v23 = vsel %vm12254_vm4, %v1430_v30, %v1427_v54  ;;  %vm12297_vm2 = vcmp.lt.f32.partialorder %v1575_v42, 0.0004427343  ;;  %v19382_v11 = vld [vmem:[#allocation75_spill] sm:$0xff]  ;;  %v19386_v42 = vld [vmem:[#allocation76_spill] sm:$0xff]  ;;  %v19395_v30 = vld [vmem:[#allocation30_spill] sm:$0xff] }
 0x1e7   : > { %v1972_v46 = vsel %vm19378_vm6, %v19376_v57, %v1908_v50  ;;  %v12302_v25 = vmul.f32 100.0, %v12290_v61  ;;  %v12306_v27 = vadd.f32 %v19381_v44, %v11111_v60  ;;  %v12310_v62 = vadd.f32 %v19382_v11, %v11111_v60  ;;  %v9737_v9 = vpop.eup %9736  ;;  %v19401_v13 = vld [vmem:[#allocation63_spill] sm:$0xff] }
 0x1e8   : > { %v1742_v50 = vmul.f32 0.6931472, %v9735_v37  ;;  %v1763_v7 = vmul.f32 %v19363_v8, %v1762_v34  ;;  %vm12313_vm6 = vcmp.lt.f32.partialorder %v1764_v22, 0.0004427343  ;;  %v12319_v21 = vadd.f32 %v19386_v42, %v11111_v60 }
 0x1e9   : > { %19383 = vst [vmem:[#allocation47_spill] sm:$0xff] %v12310_v62  ;;  %v1616_v16 = vmul.f32 0.6931472, %v9737_v9  ;;  %vm1087_vm4 = vcmp.gt.f32.partialorder %v12302_v25, 20.0  ;;  %v12323_v54 = vmul.f32 100.0, %v12306_v27  ;;  %v12326_v15 = vmul.f32 100.0, %v12310_v62  ;;  %v9739_v37 = vpop.eup %9738 }
 0x1ea   : > { %19387 = vst [vmem:[#allocation24_spill] sm:$0xff] %v12319_v21  ;;  %v1889_v57 = vmul.f32 0.01, %v1433_v23  ;;  %v1748_v34 = vsel %vm12265_vm3, %v1745_v51, %v1742_v50  ;;  %v1151_v8 = vsel %vm1087_vm4, 0.0, %v12302_v25  ;;  %v12334_v60 = vmul.f32 100.0, %v12319_v21  ;;  %v9741_v22 = vpop.eup %9740  ;;  %v19391_v23 = vld [vmem:[#allocation37_spill] sm:$0xff] }
 0x1eb   : > { %19388 = vst [vmem:[#allocation26_spill] sm:$0xff] %v12326_v15  ;;  %v1924_v1 = vmul.f32 0.01, %v1748_v34  ;;  %v1622_v44 = vsel %vm12271_vm5, %v1619_v49, %v1616_v16  ;;  %v1760_v11 = vmul.f32 0.6931472, %v9739_v37  ;;  %vm1089_vm10 = vcmp.gt.f32.partialorder %v12323_v54, 20.0 }
 0x1ec   : > { %19389 = vst [vmem:[#allocation49_spill] sm:$0xff] %v12334_v60  ;;  %v1259_v9 = vmul.f32 1.442695, %v1151_v8  ;;  %v1553_v42 = vmul.f32 0.6931472, %v9741_v22  ;;  %vm1088_vm3 = vcmp.gt.f32.partialorder %v12326_v15, 20.0  ;;  %v9743_v51 = vpop.eup %9742  ;;  %v12353_v8 = vsel %vm1055_vm0, %v12085_v58, %v1887_v28 }
 0x1ed   : > { %v1910_v62 = vmul.f32 0.01, %v1622_v44  ;;  %vm19392_vm11 = vcmp.gt.f32.partialorder %v19391_v23, 20.0  ;;  %v1766_v21 = vsel %vm12313_vm6, %v1763_v7, %v1760_v11  ;;  %v1153_v31 = vsel %vm1089_vm10, 0.0, %v12323_v54  ;;  %19393 = vst [vmem:[#allocation45_spill] sm:$0xff] %v12353_v8 }
 0x1ee   : > { %v1988_v50 = vsel %vm19392_vm11, %v19390_v4, %v1924_v1  ;;  %9744 = vpow2.f32 %v1259_v9  ;;  %v1559_v49 = vsel %vm12284_vm8, %v1556_v2, %v1553_v42  ;;  %v1571_v16 = vmul.f32 0.6931472, %v9743_v51  ;;  %v19394_v1 = vld [vmem:[#allocation28_spill] sm:$0xff]  ;;  %v19406_v4 = vld [vmem:[#allocation79_spill] sm:$0xff] }
 0x1ef   : > { %v9157_v37 = vpack.c.bf16 %v1988_v50, %v1972_v46  ;;  %v1926_v34 = vmul.f32 0.01, %v1766_v21  ;;  %v1903_v22 = vmul.f32 0.01, %v1559_v49  ;;  %vm19396_vm11 = vcmp.gt.f32.partialorder %v19395_v30, 20.0  ;;  %v19398_v2 = vld [vmem:[#allocation40_spill] sm:$0xff] }
 0x1f0   : > { %v1974_v7 = vsel %vm19396_vm11, %v19394_v1, %v1910_v62  ;;  %v1263_v44 = vmul.f32 1.442695, %v1153_v31  ;;  %v1577_v11 = vsel %vm12297_vm2, %v1574_v18, %v1571_v16  ;;  %vm19399_vm5 = vcmp.gt.f32.partialorder %v19398_v2, 20.0  ;;  %v19402_v18 = vld [vmem:[#allocation57_spill] sm:$0xff]  ;;  %v19408_v50 = vld [vmem:[#allocation67_spill] sm:$0xff] }
 0x1f1   : > { %9158 = vmatprep.subr.bf16.mxu0 %v9157_v37  ;;  %v1990_v46 = vsel %vm19399_vm5, %v19397_v3, %v1926_v34  ;;  %v1152_v6 = vsel %vm1088_vm3, 0.0, %v12326_v15  ;;  %vm18813_vm0 = vcmp.gt.f32.partialorder %v12334_v60, 20.0  ;;  %v12370_v58 = vsel %vm1071_vm15, %v12137_v36, %v1903_v22  ;;  %v19409_v31 = vld [vmem:[#allocation61_spill] sm:$0xff]  ;;  %v19413_v37 = vld [vmem:[#allocation82_spill] sm:$0xff] }
 0x1f2   : > { %19400 = vst [vmem:[#allocation62_spill] sm:$0xff] %v12370_v58  ;;  %v1905_v28 = vmul.f32 0.01, %v1577_v11  ;;  %v9165_v62 = vpack.c.bf16 %v1990_v46, %v1974_v7  ;;  %v19403_v21 = vpack.c.bf16 %v19401_v13, %v19402_v18  ;;  %9746 = vpow2.f32 %v1263_v44  ;;  %v19415_v22 = vld [vmem:[#allocation70_spill] sm:$0xff] }
 0x1f3   : > { %v12378_v9 = vsel %vm1057_vm1, %v12096_v29, %v1889_v57  ;;  %v1154_v36 = vsel %vm18813_vm0, 0.0, %v12334_v60  ;;  %vm18815_vm15 = vcmask 261120   ;;  %v1261_v51 = vmul.f32 1.442695, %v1152_v6  ;;  %v19407_v29 = vld [vmem:[#allocation80_spill] sm:$0xff] }
 0x1f4   : > { %9160 = vmatpush1.bf16.msra.mxu0 %v19403_v21  ;;  %19404 = vst [vmem:[#allocation59_spill] sm:$0xff] %v12378_v9  ;;  %v12388_v12 = vsel %vm1073_vm7, %v12179_v53, %v1905_v28  ;;  %9166 = vmatprep.subr.bf16.mxu1 %v9165_v62  ;;  %v12392_v38 = vadd.f32 %v19406_v4, %v11192_v56  ;;  %v19411_v53 = vld [vmem:[#allocation81_spill] sm:$0xff]  ;;  %v1344_v1 = vadd.f32 1.0, %v19415_v22  ;;  %9748 = vpow2.f32 %v12237_v52 }
 0x1f5   : > { %19405 = vst [vmem:[#allocation66_spill] sm:$0xff] %v12388_v12  ;;  %v12396_v57 = vadd.f32 %v19407_v29, %v11192_v56  ;;  %v19410_v49 = vpack.c.bf16 %v19408_v50, %v19409_v31  ;;  %v12409_v16 = vadd.f32 %v19411_v53, %v11192_v56  ;;  %v12413_v34 = vadd.f32 %v19413_v37, %v11192_v56  ;;  %v12456_v31 = vld [vmem:[#allocation5 + $0x30] sm:$0xff] }
 0x1f6   : > { %v1265_v30 = vmul.f32 1.442695, %v1154_v36  ;;  %v12418_v7 = vmul.f32 100.0, %v12392_v38  ;;  %v19416_v11 = vmov 0.0   ;;  %9750 = vlog2.f32 %v1344_v1 }
 0x1f7   : > { %9168 = vmatpush1.bf16.msra.mxu1 %v19410_v49  ;;  %8970 = vmatmul.mubr.msk.f32.vlgmr.msra.gmra.mrb[32].mxu0 %vm18815_vm15, %v12403_v55  ;;  %19412 = vst [vmem:[#allocation72_spill] sm:$0xff] %v12409_v16  ;;  %19414 = vst [vmem:[#allocation27_spill] sm:$0xff] %v12413_v34  ;;  %v12421_v44 = vmul.f32 100.0, %v12396_v57  ;;  %v12425_v3 = vmul.f32 100.0, %v12409_v16  ;;  %9752 = vpow2.f32 %v12240_v26  ;;  %v1347_v56 = vmul.f32 -0.5, %v19415_v22  ;;  %v12440_v26 = vld [vmem:[#allocation5 + $0x28] sm:$0xff] }
 0x1f8   : > { %2106 = vmatprep.mubr.f32.mxu0 %v19416_v11  ;;  %v9745_v2 = vpop.eup %9744  ;;  %vm1103_vm1 = vcmp.gt.f32.partialorder %v12418_v7, 20.0  ;;  %9754 = vpow2.f32 %v1261_v51  ;;  %v12437_v6 = vmul.f32 100.0, %v12413_v34  ;;  %v19419_v49 = vld [vmem:[#allocation77_spill] sm:$0xff]  ;;  %v1350_v1 = vand.u32 2147483647, %v19415_v22 }
 0x1f9   : > { %19417 = vst [vmem:[#allocation29_spill] sm:$0xff] %v12425_v3  ;;  %vm1105_vm7 = vcmp.gt.f32.partialorder %v12421_v44, 20.0  ;;  %v1695_v52 = vadd.f32 1.0, %v9745_v2  ;;  %v1167_v46 = vsel %vm1103_vm1, 0.0, %v12418_v7  ;;  %9756 = vpow2.f32 %v1265_v30 }
 0x1fa   : > { %8974 = vmatmul.mubr.msk.f32.vlgmr.msra.gmra.mrb[32].mxu1 %vm18815_vm15, %v12403_v55  ;;  %19418 = vst [vmem:[#allocation74_spill] sm:$0xff] %v12437_v6  ;;  %v1291_v28 = vmul.f32 1.442695, %v1167_v46  ;;  %v1169_v62 = vsel %vm1105_vm7, 0.0, %v12421_v44  ;;  %vm18814_vm8 = vcmp.gt.f32.partialorder %v12425_v3, 20.0  ;;  %v1698_v13 = vmul.f32 -0.5, %v9745_v2 }
 0x1fb   : > { %2195 = vmatprep.mubr.f32.mxu1 %v19416_v11  ;;  %8971 = vmatmul.mubr.msk.f32.gmra.mrb[34].mxu0 %vm18815_vm15, %v12440_v26  ;;  %9758 = vlog2.f32 %v1695_v52  ;;  %v1295_v18 = vmul.f32 1.442695, %v1169_v62  ;;  %v1701_v36 = vand.u32 2147483647, %v9745_v2  ;;  %v1348_v51 = vadd.f32 1.0, %v1347_v56 }
 0x1fc   : > { %2112 = vmatprep.mubr.f32.mxu0 %v19416_v11  ;;  %v9747_v21 = vpop.eup %9746  ;;  %9760 = vpow2.f32 %v1291_v28  ;;  %v1168_v50 = vsel %vm18814_vm8, 0.0, %v12425_v3  ;;  %vm18801_vm2 = vcmp.gt.f32.partialorder %v12437_v6, 20.0  ;;  %v1488_v53 = vadd.f32 1.0, %v19419_v49  ;;  %v19421_v28 = vld [vmem:[#allocation73_spill] sm:$0xff] }
 0x1fd   : > { %v1713_v4 = vadd.f32 1.0, %v9747_v21  ;;  %v1716_v29 = vmul.f32 -0.5, %v9747_v21  ;;  %9762 = vpow2.f32 %v1295_v18  ;;  %v1699_v37 = vadd.f32 1.0, %v1698_v13 }
 0x1fe   : > { %8975 = vmatmul.mubr.msk.f32.gmra.mrb[34].mxu1 %vm18815_vm15, %v12440_v26  ;;  %v12463_v30 = vpop.eup %9748  ;;  %v1293_v52 = vmul.f32 1.442695, %v1168_v50  ;;  %v1170_v46 = vsel %vm18801_vm2, 0.0, %v12437_v6  ;;  %v1362_v62 = vadd.f32 1.0, %v19421_v28  ;;  %vm12471_vm6 = vcmp.lt.f32.partialorder %v1701_v36, 0.0004427343 }
 0x1ff   : > { %2201 = vmatprep.mubr.f32.mxu1 %v19416_v11  ;;  %8972 = vmatmul.mubr.msk.f32.gmra.mrb[36].mxu0 %vm18815_vm15, %v12456_v31  ;;  %9764 = vlog2.f32 %v1713_v4  ;;  %19420 = vst [vmem:[#allocation75_spill] sm:$0xff] %v12463_v30  ;;  %v1717_v56 = vadd.f32 1.0, %v1716_v29  ;;  %v1719_v13 = vand.u32 2147483647, %v9747_v21  ;;  %v1349_v4 = vmul.f32 %v19415_v22, %v1348_v51  ;;  %v12478_v50 = vld [vmem:[#allocation5 + $0x38] sm:$0x1f] }
 0x200   : > { %2118 = vmatprep.mubr.f32.mxu0 %v19416_v11  ;;  %v9751_v18 = vpop.eup %9750  ;;  %v1491_v29 = vmul.f32 -0.5, %v19419_v49  ;;  %9766 = vlog2.f32 %v1488_v53  ;;  %v1494_v36 = vand.u32 2147483647, %v19419_v49  ;;  %v1365_v34 = vmul.f32 -0.5, %v19421_v28 }
 0x201   : > { %v12482_v42 = vpop.eup %9752  ;;  %v1346_v6 = vmul.f32 0.6931472, %v9751_v18  ;;  %v1700_v51 = vmul.f32 %v9745_v2, %v1699_v37  ;;  %v12489_v60 = vmul.f32 1.442695, %v1170_v46  ;;  %9768 = vlog2.f32 %v1362_v62 }
 0x202   : > { %8976 = vmatmul.mubr.msk.f32.gmra.mrb[36].mxu1 %vm18815_vm15, %v12456_v31  ;;  %19424 = vst [vmem:[#allocation76_spill] sm:$0xff] %v12482_v42  ;;  %v12487_v22 = vpop.eup %9754  ;;  %v1506_v3 = vadd.f32 1.0, %v11697_v48  ;;  %v12494_v15 = vmul.f32 %v9747_v21, %v1717_v56  ;;  %9770 = vpow2.f32 %v1293_v52  ;;  %vm12496_vm11 = vcmp.lt.f32.partialorder %v1350_v1, 0.0004427343 }
 0x203   : > { %2207 = vmatprep.mubr.f32.mxu1 %v19416_v11  ;;  %8973 = vmatmul.mubr.msk.f32.gmra.mrb[38].mxu0 %vm18815_vm15, %v12478_v50  ;;  %19425 = vst [vmem:[#allocation35_spill] sm:$0xff] %v12487_v22  ;;  %v12492_v16 = vpop.eup %9756  ;;  %v1509_v18 = vmul.f32 -0.5, %v11697_v48  ;;  %vm12503_vm5 = vcmp.lt.f32.partialorder %v1719_v13, 0.0004427343  ;;  %v1352_v46 = vsel %vm12496_vm11, %v1349_v4, %v1346_v6  ;;  %v1368_v21 = vand.u32 2147483647, %v19421_v28 }
 0x204   : > { %2278 = vmatprep.mubr.f32.mxu0 %v19416_v11  ;;  %19426 = vst [vmem:[#allocation37_spill] sm:$0xff] %v12492_v16  ;;  %9772 = vlog2.f32 %v1506_v3  ;;  %v1632_v1 = vadd.f32 1.0, %v11735_v20  ;;  %v1492_v62 = vadd.f32 1.0, %v1491_v29  ;;  %vm12512_vm2 = vcmp.lt.f32.partialorder %v1494_v36, 0.0004427343 }
 0x205   : > { %v9759_v2 = vpop.eup %9758  ;;  %v1366_v13 = vadd.f32 1.0, %v1365_v34  ;;  %v1512_v53 = vand.u32 2147483647, %v11697_v48  ;;  %v1635_v6 = vmul.f32 -0.5, %v11735_v20  ;;  %v1880_v58 = vmul.f32 0.01, %v1352_v46 }
 0x206   : > { %8977 = vmatmul.mubr.msk.f32.gmra.mrb[38].mxu1 %vm18815_vm15, %v12478_v50  ;;  %v9761_v56 = vpop.eup %9760  ;;  %v1697_v52 = vmul.f32 0.6931472, %v9759_v2  ;;  %v1510_v16 = vadd.f32 1.0, %v1509_v18  ;;  %9774 = vlog2.f32 %v1632_v1  ;;  %v1776_v22 = vadd.f32 1.0, %v11794_v17  ;;  %v19435_v46 = vld [vmem:[#allocation46_spill] sm:$0xff] }
 0x207   : > { %2367 = vmatprep.mubr.f32.mxu1 %v19416_v11  ;;  %v1839_v12 = vadd.f32 1.0, %v9761_v56  ;;  %v1842_v8 = vmul.f32 -0.5, %v9761_v56  ;;  %v9763_v4 = vpop.eup %9762  ;;  %v1845_v36 = vand.u32 2147483647, %v9761_v56  ;;  %v1493_v30 = vmul.f32 %v19419_v49, %v1492_v62 }
 0x208   : > { %v1703_v3 = vsel %vm12471_vm6, %v1700_v51, %v1697_v52  ;;  %v1857_v24 = vadd.f32 1.0, %v9763_v4  ;;  %v1860_v14 = vmul.f32 -0.5, %v9763_v4  ;;  %v1367_v41 = vmul.f32 %v19421_v28, %v1366_v13 }
 0x209   : > { %v9765_v2 = vpop.eup %9764  ;;  %v1919_v29 = vmul.f32 0.01, %v1703_v3  ;;  %9776 = vlog2.f32 %v1839_v12  ;;  %v1843_v42 = vadd.f32 1.0, %v1842_v8  ;;  %vm12523_vm11 = vcmp.lt.f32.partialorder %v1368_v21, 0.0004427343  ;;  %v19436_v12 = vld [vmem:[#allocation50_spill] sm:$0xff] }
 0x20a   : > { %v1715_v34 = vmul.f32 0.6931472, %v9765_v2  ;;  %v1636_v51 = vadd.f32 1.0, %v1635_v6  ;;  %v9767_v18 = vpop.eup %9766  ;;  %9778 = vlog2.f32 %v1857_v24  ;;  %vm19437_vm6 = vcmp.gt.f32.partialorder %v19436_v12, 20.0 }
 0x20b   : > { %v1944_v1 = vsel %vm19437_vm6, %v19435_v46, %v1880_v58  ;;  %v1511_v52 = vmul.f32 %v11697_v48, %v1510_v16  ;;  %vm12531_vm0 = vcmp.lt.f32.partialorder %v1512_v53, 0.0004427343  ;;  %v9769_v49 = vpop.eup %9768  ;;  %v12538_v28 = vsel %vm1087_vm4, %v12290_v61, %v1919_v29 }
 0x20c   : > { %vm12540_vm8 = vcmp.lt.f32.partialorder %v1845_v36, 0.0004427343  ;;  %v1863_v24 = vand.u32 2147483647, %v9763_v4  ;;  %v1490_v62 = vmul.f32 0.6931472, %v9767_v18  ;;  %9780 = vlog2.f32 %v1776_v22  ;;  %v12544_v58 = vpop.eup %9770 }
 0x20d   : > { %v1721_v48 = vsel %vm12503_vm5, %v12494_v15, %v1715_v34  ;;  %v1844_v16 = vmul.f32 %v9761_v56, %v1843_v42  ;;  %v1364_v13 = vmul.f32 0.6931472, %v9769_v49  ;;  %v1638_v53 = vand.u32 2147483647, %v11735_v20 }
 0x20e   : > { %v9773_v25 = vpop.eup %9772  ;;  %v1861_v61 = vadd.f32 1.0, %v1860_v14  ;;  %v1496_v6 = vsel %vm12512_vm2, %v1493_v30, %v1490_v62  ;;  %v1637_v3 = vmul.f32 %v11735_v20, %v1636_v51  ;;  %v1650_v2 = vadd.f32 1.0, %v11745_v40  ;;  %v19444_v20 = vld [vmem:[#allocation54_spill] sm:$0xff] }
 0x20f   : > { %v1896_v22 = vmul.f32 0.01, %v1496_v6  ;;  %v1370_v29 = vsel %vm12523_vm11, %v1367_v41, %v1364_v13  ;;  %v1508_v36 = vmul.f32 0.6931472, %v9773_v25  ;;  %v1779_v15 = vmul.f32 -0.5, %v11794_v17  ;;  %v19445_v30 = vld [vmem:[#allocation58_spill] sm:$0xff] }
 0x210   : > { %v1921_v42 = vmul.f32 0.01, %v1721_v48  ;;  %v1882_v37 = vmul.f32 0.01, %v1370_v29  ;;  %v1782_v56 = vand.u32 2147483647, %v11794_v17  ;;  %9782 = vlog2.f32 %v1650_v2  ;;  %v9775_v14 = vpop.eup %9774 }
 0x211   : > { %vm12558_vm4 = vcmp.lt.f32.partialorder %v1863_v24, 0.0004427343  ;;  %vm19446_vm2 = vcmp.gt.f32.partialorder %v19445_v30, 20.0  ;;  %v1514_v41 = vsel %vm12531_vm0, %v1511_v52, %v1508_v36  ;;  %vm12567_vm5 = vcmp.lt.f32.partialorder %v1638_v53, 0.0004427343  ;;  %v19449_v52 = vld [vmem:[#allocation51_spill] sm:$0xff] }
 0x212   : > { %v1960_v34 = vsel %vm19446_vm2, %v19444_v20, %v1896_v22  ;;  %v1898_v46 = vmul.f32 0.01, %v1514_v41  ;;  %v1634_v12 = vmul.f32 0.6931472, %v9775_v14  ;;  %v1653_v49 = vmul.f32 -0.5, %v11745_v40  ;;  %v19450_v53 = vld [vmem:[#allocation53_spill] sm:$0xff] }
 0x213   : > { %v9777_v51 = vpop.eup %9776  ;;  %v9169_v18 = vpack.c.bf16 %v1960_v34, %v1944_v1  ;;  %v1862_v62 = vmul.f32 %v9763_v4, %v1861_v61  ;;  %v1780_v48 = vadd.f32 1.0, %v1779_v15  ;;  %v1794_v13 = vadd.f32 1.0, %v11859_v0  ;;  %v19452_v1 = vld [vmem:[#allocation60_spill] sm:$0xff] }
 0x214   : > { %v1841_v24 = vmul.f32 0.6931472, %v9777_v51  ;;  %v12576_v8 = vsel %vm1089_vm10, %v12306_v27, %v1921_v42  ;;  %vm19451_vm0 = vcmp.gt.f32.partialorder %v19450_v53, 20.0  ;;  %v19453_v6 = vld [vmem:[#allocation64_spill] sm:$0xff]  ;;  %vm12584_vm6 = vcmp.lt.f32.partialorder %v1782_v56, 0.0004427343  ;;  %v9779_v4 = vpop.eup %9778 }
 0x215   : > { %9170 = vmatprep.subr.bf16.mxu0 %v9169_v18  ;;  %v1946_v25 = vsel %vm19451_vm0, %v19449_v52, %v1882_v37  ;;  %vm19454_vm11 = vcmp.gt.f32.partialorder %v19453_v6, 20.0  ;;  %v19457_v27 = vpack.c.bf16 %v11725_v33, %v11702_v32  ;;  %v1640_v29 = vsel %vm12567_vm5, %v1637_v3, %v1634_v12  ;;  %v19458_v3 = vld [vmem:[#allocation84_spill] sm:$0xff]  ;;  %v19463_v52 = vld [vmem:[#allocation33_spill] sm:$0xff]  ;;  %v19498_v53 = vld [vmem:[#allocation99_spill] sm:$0xff] }
 0x216   : > { %v1962_v2 = vsel %vm19454_vm11, %v19452_v1, %v1898_v46  ;;  %v1847_v61 = vsel %vm12540_vm8, %v1844_v16, %v1841_v24  ;;  %9784 = vlog2.f32 %v1794_v13  ;;  %v9781_v36 = vpop.eup %9780  ;;  %v1859_v42 = vmul.f32 0.6931472, %v9779_v4  ;;  %v19461_v13 = vld [vmem:[#allocation68_spill] sm:$0xff] }
 0x217   : > { %v9177_v54 = vpack.c.bf16 %v1962_v2, %v1946_v25  ;;  %9172 = vmatpush1.bf16.msra.mxu0 %v19457_v27  ;;  %v1935_v15 = vmul.f32 0.01, %v1847_v61  ;;  %v1654_v37 = vadd.f32 1.0, %v1653_v49  ;;  %v1380_v56 = vadd.f32 1.0, %v11903_v35 }
 0x218   : > { %v1778_v14 = vmul.f32 0.6931472, %v9781_v36  ;;  %v1781_v21 = vmul.f32 %v11794_v17, %v1780_v48  ;;  %v1656_v16 = vand.u32 2147483647, %v11745_v40  ;;  %v1797_v20 = vmul.f32 -0.5, %v11859_v0  ;;  %v19460_v48 = vld [vmem:[#allocation65_spill] sm:$0xff] }
 0x219   : > { %9178 = vmatprep.subr.bf16.mxu1 %v9177_v54  ;;  %v12602_v32 = vsel %vm1103_vm1, %v12392_v38, %v1935_v15  ;;  %v1865_v33 = vsel %vm12558_vm4, %v1862_v62, %v1859_v42  ;;  %v19459_v30 = vpack.c.bf16 %v11742_v19, %v19458_v3  ;;  %v1912_v34 = vmul.f32 0.01, %v1640_v29  ;;  %v19469_v15 = vld [vmem:[#allocation91_spill] sm:$0xff]  ;;  %v19470_v42 = vld [vmem:[#allocation88_spill] sm:$0xff] }
 0x21a   : > { %9786 = vlog2.f32 %v1380_v56  ;;  %v9207_v17 = vpack.c.bf16 %v12602_v32, %v12538_v28  ;;  %v1937_v41 = vmul.f32 0.01, %v1865_v33  ;;  %v1784_v23 = vsel %vm12584_vm6, %v1781_v21, %v1778_v14  ;;  %v9783_v38 = vpop.eup %9782  ;;  %v10592_v28 = vld [vmem:[%s10899_s29] sm:$0x77]  ;;  %v19573_v32 = vld [vmem:[#allocation12_spill] sm:$0xff] }
 0x21b   : > { %9180 = vmatpush1.bf16.msra.mxu1 %v19459_v30  ;;  %v1383_v7 = vmul.f32 -0.5, %v11903_v35  ;;  %v1928_v51 = vmul.f32 0.01, %v1784_v23  ;;  %v1655_v9 = vmul.f32 %v11745_v40, %v1654_v37  ;;  %v1800_v18 = vand.u32 2147483647, %v11859_v0 }
 0x21c   : > { %v1524_v19 = vadd.f32 1.0, %v11992_v63  ;;  %v12620_v46 = vsel %vm1105_vm7, %v12396_v57, %v1937_v41  ;;  %v1652_v12 = vmul.f32 0.6931472, %v9783_v38  ;;  %v1798_v49 = vadd.f32 1.0, %v1797_v20 }
 0x21d   : > { %v1527_v24 = vmul.f32 -0.5, %v11992_v63  ;;  %v9215_v62 = vpack.c.bf16 %v12620_v46, %v12576_v8  ;;  %vm19462_vm10 = vcmp.gt.f32.partialorder %v19461_v13, 20.0  ;;  %v1992_v25 = vsel %vm1096_vm13, %v19463_v52, %v1928_v51  ;;  %v10593_v8 = vld [vmem:[%s10899_s29 + $0x8] sm:$0x77] }
 0x21e   : > { %v1976_v40 = vsel %vm19462_vm10, %v19460_v48, %v1912_v34  ;;  %9788 = vlog2.f32 %v1524_v19  ;;  %vm12632_vm1 = vcmp.lt.f32.partialorder %v1656_v16, 0.0004427343  ;;  %v1384_v1 = vadd.f32 1.0, %v1383_v7  ;;  %v19477_v19 = vld [vmem:[#allocation71_spill] sm:$0xff]  ;;  %v19578_v46 = vld [vmem:[#allocation14_spill] sm:$0xff] }
 0x21f   : > { %9790 = vpow2.f32 %v12489_v60  ;;  %v9173_v57 = vpack.c.bf16 %v1992_v25, %v1976_v40  ;;  %v1658_v6 = vsel %vm12632_vm1, %v1655_v9, %v1652_v12  ;;  %vm12638_vm7 = vcmp.lt.f32.partialorder %v1800_v18, 0.0004427343  ;;  %v19476_v18 = vld [vmem:[#allocation69_spill] sm:$0xff] }
 0x220   : > { %v1386_v22 = vand.u32 2147483647, %v11903_v35  ;;  %v1398_v4 = vadd.f32 1.0, %v11931_v10  ;;  %v9785_v61 = vpop.eup %9784  ;;  %v1799_v60 = vmul.f32 %v11859_v0, %v1798_v49  ;;  %v1528_v54 = vadd.f32 1.0, %v1527_v24  ;;  %v19479_v49 = vld [vmem:[#allocation34_spill] sm:$0xff] }
 0x221   : > { %9174 = vmatprep.subr.bf16.mxu0 %v9173_v57  ;;  %v1530_v27 = vand.u32 2147483647, %v11992_v63  ;;  %v1542_v29 = vadd.f32 1.0, %v11994_v47  ;;  %v1796_v36 = vmul.f32 0.6931472, %v9785_v61  ;;  %v19471_v37 = vpack.c.bf16 %v19469_v15, %v19470_v42 }
 0x222   : > { %9792 = vlog2.f32 %v1398_v4  ;;  %v1401_v56 = vmul.f32 -0.5, %v11931_v10  ;;  %v1545_v14 = vmul.f32 -0.5, %v11994_v47  ;;  %v1914_v21 = vmul.f32 0.01, %v1658_v6 }
 0x223   : > { %9176 = vmatpush1.bf16.msra.mxu0 %v19471_v37  ;;  %v1385_v16 = vmul.f32 %v11903_v35, %v1384_v1  ;;  %v1404_v0 = vand.u32 2147483647, %v11931_v10  ;;  %9794 = vlog2.f32 %v1542_v29  ;;  %v1802_v33 = vsel %vm12638_vm7, %v1799_v60, %v1796_v36 }
 0x224   : > { %v9787_v20 = vpop.eup %9786  ;;  %vm12656_vm13 = vcmp.lt.f32.partialorder %v1386_v22, 0.0004427343  ;;  %v1548_v30 = vand.u32 2147483647, %v11994_v47  ;;  %v1668_v34 = vadd.f32 1.0, %v12014_v39  ;;  %v1529_v23 = vmul.f32 %v11992_v63, %v1528_v54  ;;  %v19485_v54 = vld [vmem:[#allocation94_spill] sm:$0xff] }
 0x225   : > { %v1930_v41 = vmul.f32 0.01, %v1802_v33  ;;  %v1382_v35 = vmul.f32 0.6931472, %v9787_v20  ;;  %vm12665_vm8 = vcmp.lt.f32.partialorder %v1530_v27, 0.0004427343 }
 0x226   : > { %8978 = vmatmul.mubr.msk.f32.vlgmr.msra.gmra.mrb[40].mxu0 %vm18815_vm15, %v12403_v55  ;;  %v1402_v38 = vadd.f32 1.0, %v1401_v56  ;;  %v1546_v51 = vadd.f32 1.0, %v1545_v14  ;;  %9796 = vlog2.f32 %v1668_v34  ;;  %v1812_v9 = vadd.f32 1.0, %v12087_v5  ;;  %v19486_v27 = vld [vmem:[#allocation92_spill] sm:$0xff]  ;;  %v19490_v33 = vld [vmem:[#allocation38_spill] sm:$0xff] }
 0x227   : > { %2284 = vmatprep.mubr.f32.mxu0 %v19416_v11  ;;  %vm19478_vm4 = vcmp.gt.f32.partialorder %v19477_v19, 20.0  ;;  %v1994_v48 = vsel %vm1098_vm14, %v19479_v49, %v1930_v41  ;;  %v1388_v63 = vsel %vm12656_vm13, %v1385_v16, %v1382_v35  ;;  %vm12679_vm2 = vcmp.lt.f32.partialorder %v1404_v0, 0.0004427343  ;;  %v19492_v34 = vld [vmem:[#allocation86_spill] sm:$0xff]  ;;  %v19493_v41 = vld [vmem:[#allocation89_spill] sm:$0xff] }
 0x228   : > { %v1978_v12 = vsel %vm19478_vm4, %v19476_v18, %v1914_v21  ;;  %v9789_v40 = vpop.eup %9788  ;;  %vm12683_vm5 = vcmp.lt.f32.partialorder %v1548_v30, 0.0004427343  ;;  %v1671_v25 = vmul.f32 -0.5, %v12014_v39  ;;  %9798 = vlog2.f32 %v1812_v9  ;;  %v19518_v9 = vld [vmem:[#allocation98_spill] sm:$0xff] }
 0x229   : > { %v9181_v52 = vpack.c.bf16 %v1994_v48, %v1978_v12  ;;  %v12688_v57 = vpop.eup %9790  ;;  %v1526_v44 = vmul.f32 0.6931472, %v9789_v40  ;;  %v1674_v1 = vand.u32 2147483647, %v12014_v39  ;;  %v1815_v6 = vmul.f32 -0.5, %v12087_v5 }
 0x22a   : > { %8979 = vmatmul.mubr.msk.f32.gmra.mrb[42].mxu0 %vm18815_vm15, %v12440_v26  ;;  %v1686_v2 = vadd.f32 1.0, %v12055_v59  ;;  %v1884_v22 = vmul.f32 0.01, %v1388_v63  ;;  %v1403_v4 = vmul.f32 %v11931_v10, %v1402_v38  ;;  %v1547_v61 = vmul.f32 %v11994_v47, %v1546_v51 }
 0x22b   : > { %9182 = vmatprep.subr.bf16.mxu1 %v9181_v52  ;;  %2290 = vmatprep.mubr.f32.mxu0 %v19416_v11  ;;  %v1830_v60 = vadd.f32 1.0, %v12262_v45  ;;  %v19487_v29 = vpack.c.bf16 %v19485_v54, %v19486_v27  ;;  %v1532_v36 = vsel %vm12665_vm8, %v1529_v23, %v1526_v44  ;;  %v1818_v15 = vand.u32 2147483647, %v12087_v5  ;;  %v19506_v54 = vld [vmem:[#allocation87_spill] sm:$0xff]  ;;  %v19507_v27 = vld [vmem:[#allocation90_spill] sm:$0xff] }
 0x22c   : > { %9800 = vlog2.f32 %v1686_v2  ;;  %v1689_v42 = vmul.f32 -0.5, %v12055_v59  ;;  %v9793_v37 = vpop.eup %9792  ;;  %v1900_v10 = vmul.f32 0.01, %v1532_v36  ;;  %v1672_v56 = vadd.f32 1.0, %v1671_v25  ;;  %v19497_v25 = vld [vmem:[#allocation103_spill] sm:$0xff] }
 0x22d   : > { %9184 = vmatpush1.bf16.msra.mxu1 %v19487_v29  ;;  %9802 = vlog2.f32 %v1830_v60  ;;  %v1833_v47 = vmul.f32 -0.5, %v12262_v45  ;;  %v9795_v14 = vpop.eup %9794  ;;  %v1400_v21 = vmul.f32 0.6931472, %v9793_v37  ;;  %vm12709_vm14 = vcmp.lt.f32.partialorder %v1674_v1, 0.0004427343 }
 0x22e   : > { %8980 = vmatmul.mubr.msk.f32.gmra.mrb[44].mxu0 %vm18815_vm15, %v12456_v31  ;;  %v1816_v0 = vadd.f32 1.0, %v1815_v6  ;;  %v1416_v20 = vadd.f32 1.0, %v12276_v43  ;;  %v1948_v30 = vsel %vm1052_vm12, %v19490_v33, %v1884_v22  ;;  %vm19494_vm0 = vcmp.gt.f32.partialorder %v19493_v41, 20.0  ;;  %v19502_v22 = vld [vmem:[#allocation75_spill] sm:$0xff] }
 0x22f   : > { %v1964_v35 = vsel %vm19494_vm0, %v19492_v34, %v1900_v10  ;;  %v1544_v23 = vmul.f32 0.6931472, %v9795_v14  ;;  %2296 = vmatprep.mubr.f32.mxu0 %v19416_v11  ;;  %v1692_v7 = vand.u32 2147483647, %v12055_v59  ;;  %v1406_v51 = vsel %vm12679_vm2, %v1403_v4, %v1400_v21  ;;  %v19503_v4 = vld [vmem:[#allocation41_spill] sm:$0xff]  ;;  %v19511_v21 = vld [vmem:[#allocation22_spill] sm:$0xff] }
 0x230   : > { %8982 = vmatmul.mubr.msk.f32.vlgmr.msra.gmra.mrb[40].mxu1 %vm18815_vm15, %v12403_v55  ;;  %v9185_v38 = vpack.c.bf16 %v1964_v35, %v1948_v30  ;;  %vm12727_vm11 = vcmp.lt.f32.partialorder %v1818_v15, 0.0004427343  ;;  %v1690_v18 = vadd.f32 1.0, %v1689_v42  ;;  %v9797_v19 = vpop.eup %9796  ;;  %v1886_v49 = vmul.f32 0.01, %v1406_v51  ;;  %v19512_v30 = vld [vmem:[#allocation42_spill] sm:$0xff] }
 0x231   : > { %2373 = vmatprep.mubr.f32.mxu1 %v19416_v11  ;;  %v1550_v12 = vsel %vm12683_vm5, %v1547_v61, %v1544_v23  ;;  %v1834_v24 = vadd.f32 1.0, %v1833_v47  ;;  %9804 = vlog2.f32 %v1416_v20  ;;  %v1670_v63 = vmul.f32 0.6931472, %v9797_v19  ;;  %v19504_v61 = vld [vmem:[#allocation85_spill] sm:$0xff]  ;;  %v19513_v34 = vld [vmem:[#allocation102_spill] sm:$0xff]  ;;  %v19524_v6 = vld [vmem:[#allocation35_spill] sm:$0xff] }
 0x232   : > { %9186 = vmatprep.subr.bf16.mxu0 %v9185_v38  ;;  %v1902_v48 = vmul.f32 0.01, %v1550_v12  ;;  %8981 = vmatmul.mubr.msk.f32.gmra.mrb[46].mxu0 %vm18815_vm15, %v12478_v50  ;;  %v1673_v13 = vmul.f32 %v12014_v39, %v1672_v56  ;;  %v1836_v40 = vand.u32 2147483647, %v12262_v45  ;;  %v9799_v52 = vpop.eup %9798  ;;  %v19499_v44 = vpack.c.bf16 %v19497_v25, %v19498_v53  ;;  %v19516_v38 = vld [vmem:[#allocation96_spill] sm:$0xff] }
 0x233   : > { %v1817_v1 = vmul.f32 %v12087_v5, %v1816_v0  ;;  %vm12743_vm12 = vcmp.lt.f32.partialorder %v1692_v7, 0.0004427343  ;;  %v1419_v2 = vmul.f32 -0.5, %v12276_v43  ;;  %v1560_v39 = vadd.f32 1.0, %v19502_v22  ;;  %2456 = vmatprep.mubr.f32.mxu0 %v19416_v11  ;;  %v19515_v7 = vld [vmem:[#allocation93_spill] sm:$0xff] }
 0x234   : > { %8983 = vmatmul.mubr.msk.f32.gmra.mrb[42].mxu1 %vm18815_vm15, %v12440_v26  ;;  %9188 = vmatpush1.bf16.msra.mxu0 %v19499_v44  ;;  %vm19505_vm6 = vcmp.gt.f32.partialorder %v19504_v61, 20.0  ;;  %vm19508_vm10 = vcmp.gt.f32.partialorder %v19507_v27, 20.0  ;;  %v1676_v5 = vsel %vm12709_vm14, %v1673_v13, %v1670_v63  ;;  %v1814_v36 = vmul.f32 0.6931472, %v9799_v52 }
 0x235   : > { %v1950_v60 = vsel %vm19505_vm6, %v19503_v4, %v1886_v49  ;;  %v1966_v29 = vsel %vm19508_vm10, %v19506_v54, %v1902_v48  ;;  %2379 = vmatprep.mubr.f32.mxu1 %v19416_v11  ;;  %v1916_v42 = vmul.f32 0.01, %v1676_v5  ;;  %v1691_v37 = vmul.f32 %v12055_v59, %v1690_v18  ;;  %v19519_v18 = vld [vmem:[#allocation31_spill] sm:$0xff]  ;;  %v19521_v49 = vld [vmem:[#allocation76_spill] sm:$0xff]  ;;  %v19526_v4 = vld [vmem:[#allocation97_spill] sm:$0xff] }
 0x236   : > { %v9193_v15 = vpack.c.bf16 %v1966_v29, %v1950_v60  ;;  %9806 = vlog2.f32 %v1560_v39  ;;  %v9801_v10 = vpop.eup %9800  ;;  %v1820_v56 = vsel %vm12727_vm11, %v1817_v1, %v1814_v36  ;;  %v1835_v47 = vmul.f32 %v12262_v45, %v1834_v24  ;;  %v19525_v39 = vld [vmem:[#allocation95_spill] sm:$0xff]  ;;  %v19528_v60 = vld [vmem:[#allocation100_spill] sm:$0xff]  ;;  %v19530_v29 = vld [vmem:[#allocation25_spill] sm:$0xff] }
 0x237   : > { %vm12763_vm1 = vcmp.lt.f32.partialorder %v1836_v40, 0.0004427343  ;;  %v1434_v16 = vadd.f32 1.0, %v19511_v21  ;;  %v9803_v0 = vpop.eup %9802  ;;  %v1932_v20 = vmul.f32 0.01, %v1820_v56  ;;  %v1420_v33 = vadd.f32 1.0, %v1419_v2 }
 0x238   : > { %9194 = vmatprep.subr.bf16.mxu1 %v9193_v15  ;;  %8984 = vmatmul.mubr.msk.f32.gmra.mrb[44].mxu1 %vm18815_vm15, %v12456_v31  ;;  %v1688_v59 = vmul.f32 0.6931472, %v9801_v10  ;;  %v1563_v3 = vmul.f32 -0.5, %v19502_v22  ;;  %v19514_v41 = vpack.c.bf16 %v19512_v30, %v19513_v34  ;;  %v1832_v45 = vmul.f32 0.6931472, %v9803_v0  ;;  %v19531_v5 = vld [vmem:[#allocation32_spill] sm:$0xff] }
 0x239   : > { %2385 = vmatprep.mubr.f32.mxu1 %v19416_v11  ;;  %v1422_v35 = vand.u32 2147483647, %v12276_v43  ;;  %9808 = vlog2.f32 %v1434_v16  ;;  %v1437_v23 = vmul.f32 -0.5, %v19511_v21  ;;  %vm19517_vm7 = vcmp.gt.f32.partialorder %v19516_v38, 20.0 }
 0x23a   : > { %9196 = vmatpush1.bf16.msra.mxu1 %v19514_v41  ;;  %v1980_v51 = vsel %vm19517_vm7, %v19515_v7, %v1916_v42  ;;  %vm19520_vm13 = vcmp.gt.f32.partialorder %v19519_v18, 20.0  ;;  %v1694_v12 = vsel %vm12743_vm12, %v1691_v37, %v1688_v59  ;;  %v1578_v24 = vadd.f32 1.0, %v19521_v49  ;;  %v19533_v59 = vld [vmem:[#allocation48_spill] sm:$0xff] }
 0x23b   : > { %v1996_v19 = vsel %vm19520_vm13, %v19518_v9, %v1932_v20  ;;  %v1838_v63 = vsel %vm12763_vm1, %v1835_v47, %v1832_v45  ;;  %v1918_v13 = vmul.f32 0.01, %v1694_v12  ;;  %v9805_v40 = vpop.eup %9804  ;;  %v1564_v25 = vadd.f32 1.0, %v1563_v3 }
 0x23c   : > { %v9189_v48 = vpack.c.bf16 %v1996_v19, %v1980_v51  ;;  %8985 = vmatmul.mubr.msk.f32.gmra.mrb[46].mxu1 %vm18815_vm15, %v12478_v50  ;;  %v1934_v52 = vmul.f32 0.01, %v1838_v63  ;;  %9810 = vlog2.f32 %v1578_v24  ;;  %v1418_v53 = vmul.f32 0.6931472, %v9805_v40  ;;  %v19539_v24 = vld [vmem:[#allocation19_spill] sm:$0xff]  ;;  %v19543_v40 = vld [vmem:[#allocation56_spill] sm:$0xff] }
 0x23d   : > { %2545 = vmatprep.mubr.f32.mxu1 %v19416_v11  ;;  %v1421_v44 = vmul.f32 %v12276_v43, %v1420_v33  ;;  %vm12792_vm8 = vcmp.lt.f32.partialorder %v1422_v35, 0.0004427343  ;;  %v1704_v2 = vadd.f32 1.0, %v19524_v6  ;;  %vm19527_vm4 = vcmp.gt.f32.partialorder %v19526_v4, 20.0  ;;  %v19534_v33 = vld [vmem:[#allocation43_spill] sm:$0xff] }
 0x23e   : > { %9190 = vmatprep.subr.bf16.mxu0 %v9189_v48  ;;  %v1982_v61 = vsel %vm19527_vm4, %v19525_v39, %v1918_v13  ;;  %v1998_v27 = vsel %vm1102_vm9, %v19528_v60, %v1934_v52  ;;  %v19532_v36 = vpack.c.bf16 %v19530_v29, %v19531_v5  ;;  %v1566_v43 = vand.u32 2147483647, %v19502_v22  ;;  %v19540_v48 = vld [vmem:[#allocation52_spill] sm:$0xff]  ;;  %v19545_v29 = vld [vmem:[#allocation62_spill] sm:$0xff]  ;;  %v19546_v5 = vld [vmem:[#allocation45_spill] sm:$0xff] }
 0x23f   : > { %v1438_v15 = vadd.f32 1.0, %v1437_v23  ;;  %v9197_v42 = vpack.c.bf16 %v1998_v27, %v1982_v61  ;;  %v1424_v37 = vsel %vm12792_vm8, %v1421_v44, %v1418_v53  ;;  %v1581_v10 = vmul.f32 -0.5, %v19521_v49  ;;  %v19542_v13 = vld [vmem:[#allocation44_spill] sm:$0xff] }
 0x240   : > { %9192 = vmatpush1.bf16.msra.mxu0 %v19532_v36  ;;  %9812 = vlog2.f32 %v1704_v2  ;;  %v9807_v56 = vpop.eup %9806  ;;  %v1565_v47 = vmul.f32 %v19502_v22, %v1564_v25  ;;  %v1440_v16 = vand.u32 2147483647, %v19511_v21  ;;  %v1707_v0 = vmul.f32 -0.5, %v19524_v6  ;;  %v19536_v22 = vld [vmem:[#allocation37_spill] sm:$0xff] }
 0x241   : > { %9198 = vmatprep.subr.bf16.mxu1 %v9197_v42  ;;  %v1562_v14 = vmul.f32 0.6931472, %v9807_v56  ;;  %v1848_v20 = vadd.f32 1.0, %v12544_v58  ;;  %v19535_v3 = vpack.c.bf16 %v19533_v59, %v19534_v33  ;;  %vm1567_vm9 = vcmp.lt.f32.partialorder %v1566_v43, 0.0004427343  ;;  %v19550_v56 = vld [vmem:[#allocation21_spill] sm:$0xff] }
 0x242   : > { %v1888_v30 = vmul.f32 0.01, %v1424_v37  ;;  %v1722_v34 = vadd.f32 1.0, %v19536_v22  ;;  %v1439_v35 = vmul.f32 %v19511_v21, %v1438_v15  ;;  %v1582_v23 = vadd.f32 1.0, %v1581_v10  ;;  %v19597_v42 = vld [vmem:[#allocation17_spill] sm:$0xff] }
 0x243   : > { %8986 = vmatmul.mubr.msk.f32.vlgmr.msra.gmra.mrb[48].mxu0 %vm18815_vm15, %v12403_v55  ;;  %9200 = vmatpush1.bf16.msra.mxu1 %v19535_v3  ;;  %v9809_v41 = vpop.eup %9808  ;;  %v1568_v45 = vsel %vm1567_vm9, %v1565_v47, %v1562_v14  ;;  %9814 = vlog2.f32 %v1848_v20  ;;  %v1584_v51 = vand.u32 2147483647, %v19521_v49  ;;  %vm12827_vm2 = vcmp.lt.f32.partialorder %v1440_v16, 0.0004427343  ;;  %v19551_v47 = vld [vmem:[#allocation23_spill] sm:$0xff] }
 0x244   : > { %2462 = vmatprep.mubr.f32.mxu0 %v19416_v11  ;;  %v1904_v7 = vmul.f32 0.01, %v1568_v45  ;;  %v1436_v38 = vmul.f32 0.6931472, %v9809_v41  ;;  %9816 = vlog2.f32 %v1722_v34  ;;  %v1708_v18 = vadd.f32 1.0, %v1707_v0  ;;  %v19553_v16 = vld [vmem:[#allocation55_spill] sm:$0xff] }
 0x245   : > { %v1710_v21 = vand.u32 2147483647, %v19524_v6  ;;  %v1866_v19 = vadd.f32 1.0, %v12688_v57  ;;  %vm19541_vm5 = vcmp.gt.f32.partialorder %v19540_v48, 20.0  ;;  %vm19544_vm14 = vcmp.gt.f32.partialorder %v19543_v40, 20.0  ;;  %v19554_v0 = vld [vmem:[#allocation20_spill] sm:$0xff] }
 0x246   : > { %8990 = vmatmul.mubr.msk.f32.vlgmr.msra.gmra.mrb[48].mxu1 %vm18815_vm15, %v12403_v55  ;;  %v9811_v12 = vpop.eup %9810  ;;  %v1952_v63 = vsel %vm19541_vm5, %v19539_v24, %v1888_v30  ;;  %v1968_v52 = vsel %vm19544_vm14, %v19542_v13, %v1904_v7  ;;  %v1442_v25 = vsel %vm12827_vm2, %v1439_v35, %v1436_v38  ;;  %v1851_v53 = vmul.f32 -0.5, %v12544_v58  ;;  %v19556_v38 = vld [vmem:[#allocation66_spill] sm:$0xff]  ;;  %v19562_v13 = vld [vmem:[#allocation29_spill] sm:$0xff] }
 0x247   : > { %8987 = vmatmul.mubr.msk.f32.gmra.mrb[50].mxu0 %vm18815_vm15, %v12440_v26  ;;  %2551 = vmatprep.mubr.f32.mxu1 %v19416_v11  ;;  %v9201_v44 = vpack.c.bf16 %v1968_v52, %v1952_v63  ;;  %v1580_v1 = vmul.f32 0.6931472, %v9811_v12  ;;  %v1583_v2 = vmul.f32 %v19521_v49, %v1582_v23  ;;  %v1725_v39 = vmul.f32 -0.5, %v19536_v22  ;;  %v19561_v63 = vld [vmem:[#allocation72_spill] sm:$0xff] }
 0x248   : > { %2468 = vmatprep.mubr.f32.mxu0 %v19416_v11  ;;  %vm1585_vm0 = vcmp.lt.f32.partialorder %v1584_v51, 0.0004427343  ;;  %v1890_v4 = vmul.f32 0.01, %v1442_v25  ;;  %9818 = vlog2.f32 %v1866_v19  ;;  %v1854_v54 = vand.u32 2147483647, %v12544_v58 }
 0x249   : > { %9202 = vmatprep.subr.bf16.mxu0 %v9201_v44  ;;  %v1586_v60 = vsel %vm1585_vm0, %v1583_v2, %v1580_v1  ;;  %v19547_v36 = vpack.c.bf16 %v19545_v29, %v19546_v5  ;;  %v1709_v43 = vmul.f32 %v19524_v6, %v1708_v18  ;;  %v1852_v15 = vadd.f32 1.0, %v1851_v53  ;;  %v19557_v51 = vld [vmem:[#allocation59_spill] sm:$0xff]  ;;  %v19587_v5 = vld [vmem:[#allocation16_spill] sm:$0xff] }
 0x24a   : > { %v9813_v61 = vpop.eup %9812  ;;  %8991 = vmatmul.mubr.msk.f32.gmra.mrb[50].mxu1 %vm18815_vm15, %v12440_v26  ;;  %v1906_v27 = vmul.f32 0.01, %v1586_v60  ;;  %vm12856_vm11 = vcmp.lt.f32.partialorder %v1710_v21, 0.0004427343  ;;  %v1726_v37 = vadd.f32 1.0, %v1725_v39  ;;  %v1869_v10 = vmul.f32 -0.5, %v12688_v57 }
 0x24b   : > { %9204 = vmatpush1.bf16.msra.mxu0 %v19547_v36  ;;  %2557 = vmatprep.mubr.f32.mxu1 %v19416_v11  ;;  %v1706_v49 = vmul.f32 0.6931472, %v9813_v61  ;;  %vm19552_vm12 = vcmp.gt.f32.partialorder %v19551_v47, 20.0  ;;  %vm19555_vm6 = vcmp.gt.f32.partialorder %v19554_v0, 20.0  ;;  %v1728_v59 = vand.u32 2147483647, %v19536_v22  ;;  %v13045_v47 = vpop.permute.xlu0 %2009 }
 0x24c   : > { %8988 = vmatmul.mubr.msk.f32.gmra.mrb[52].mxu0 %vm18815_vm15, %v12456_v31  ;;  %v1954_v14 = vsel %vm19552_vm12, %v19550_v56, %v1890_v4  ;;  %v1970_v20 = vsel %vm19555_vm6, %v19553_v16, %v1906_v27  ;;  %v1853_v41 = vmul.f32 %v12544_v58, %v1852_v15  ;;  %vm1855_vm10 = vcmp.lt.f32.partialorder %v1854_v54, 0.0004427343  ;;  %v19564_v39 = vld [vmem:[#allocation24_spill] sm:$0xff]  ;;  %v19565_v4 = vld [vmem:[#allocation49_spill] sm:$0xff]  ;;  %v19567_v60 = vld [vmem:[#allocation27_spill] sm:$0xff] }
 0x24d   : > { %2474 = vmatprep.mubr.f32.mxu0 %v19416_v11  ;;  %v1712_v6 = vsel %vm12856_vm11, %v1709_v43, %v1706_v49  ;;  %v9815_v33 = vpop.eup %9814  ;;  %v9209_v3 = vpack.c.bf16 %v1970_v20, %v1954_v14  ;;  %v1727_v23 = vmul.f32 %v19536_v22, %v1726_v37  ;;  %v1870_v7 = vadd.f32 1.0, %v1869_v10  ;;  %v19559_v22 = vld [vmem:[#allocation47_spill] sm:$0xff]  ;;  %v19568_v54 = vld [vmem:[#allocation74_spill] sm:$0xff]  ;;  %v3779_v49 = vld [vmem:[#allocation5 + $0x78] sm:$0xff] }
 0x24e   : > { %8992 = vmatmul.mubr.msk.f32.gmra.mrb[52].mxu1 %vm18815_vm15, %v12456_v31  ;;  %v9817_v30 = vpop.eup %9816  ;;  %v1850_v34 = vmul.f32 0.6931472, %v9815_v33  ;;  %v1920_v45 = vmul.f32 0.01, %v1712_v6  ;;  %v19558_v9 = vpack.c.bf16 %v19556_v38, %v19557_v51  ;;  %vm1729_vm1 = vcmp.lt.f32.partialorder %v1728_v59, 0.0004427343  ;;  %v13053_v6 = vpop.permute.xlu1 %2014 }
 0x24f   : > { %2563 = vmatprep.mubr.f32.mxu1 %v19416_v11  ;;  %9210 = vmatprep.subr.bf16.mxu1 %v9209_v3  ;;  %v1724_v35 = vmul.f32 0.6931472, %v9817_v30  ;;  %v1872_v21 = vand.u32 2147483647, %v12688_v57  ;;  %vm19563_vm7 = vcmp.gt.f32.partialorder %v19562_v13, 20.0  ;;  %v1871_v25 = vmul.f32 %v12688_v57, %v1870_v7  ;;  %v19570_v27 = vld [vmem:[#allocation11_spill] sm:$0xff] }
 0x250   : > { %8989 = vmatmul.mubr.msk.f32.gmra.mrb[54].mxu0 %vm18815_vm15, %v12478_v50  ;;  %9212 = vmatpush1.bf16.msra.mxu1 %v19558_v9  ;;  %v1856_v18 = vsel %vm1855_vm10, %v1853_v41, %v1850_v34  ;;  %v1984_v48 = vsel %vm1088_vm3, %v19559_v22, %v1920_v45  ;;  %vm19566_vm3 = vcmp.gt.f32.partialorder %v19565_v4, 20.0  ;;  %vm19569_vm8 = vcmp.gt.f32.partialorder %v19568_v54, 20.0  ;;  %v3778_v36 = vld [vmem:[#allocation5 + $0x70] sm:$0xff]  ;;  %v10596_v43 = vld [vmem:[%s10899_s29 + $0x20] sm:$0x77]  ;;  %v19599_v37 = vld [vmem:[#allocation18_spill] sm:$0xff] }
 0x251   : > { %2634 = vmatprep.mubr.f32.mxu0 %v19416_v11  ;;  %v1936_v58 = vmul.f32 0.01, %v1856_v18  ;;  %v1730_v19 = vsel %vm1729_vm1, %v1727_v23, %v1724_v35  ;;  %vm1873_vm13 = vcmp.lt.f32.partialorder %v1872_v21, 0.0004427343  ;;  %vm19571_vm4 = vcmask 1042432  }
 0x252   : > { %8993 = vmatmul.mubr.msk.f32.gmra.mrb[54].mxu1 %vm18815_vm15, %v12478_v50  ;;  %v9819_v12 = vpop.eup %9818  ;;  %v1922_v44 = vmul.f32 0.01, %v1730_v19  ;;  %vm19572_vm9 = vmmov %vm19571_vm4  ;;  %vm19580_vm11 = vcmask 23552   ;;  %v10597_v15 = vld [vmem:[%s10899_s29 + $0x28] sm:$0x77] }
 0x253   : > { %2723 = vmatprep.mubr.f32.mxu1 %v19416_v11  ;;  %v2000_v40 = vsel %vm19563_vm7, %v19561_v63, %v1936_v58  ;;  %v1868_v52 = vmul.f32 0.6931472, %v9819_v12  ;;  %vm19574_vm2 = vmmov %vm19571_vm4  ;;  %v10598_v10 = vld [vmem:[%s10899_s29 + $0x30] sm:$0x77]  ;;  %v10599_v56 = vld [vmem:[%s10899_s29 + $0x38] sm:$0x77] }
 0x254   : > { %v9205_v53 = vpack.c.bf16 %v2000_v40, %v1984_v48  ;;  %v1986_v61 = vsel %vm19566_vm3, %v19564_v39, %v1922_v44  ;;  %vm19576_vm5 = vmmov %vm19574_vm2 }
 0x255   : > { %v1874_v1 = vsel %vm1873_vm13, %v1871_v25, %v1868_v52  ;;  %vm19577_vm14 = vmmov %vm19574_vm2  ;;  %v13105_v25 = vpop.permute.xlu0 %2019 }
 0x256   : > { %9206 = vmatprep.subr.bf16.mxu0 %v9205_v53  ;;  %v1938_v2 = vmul.f32 0.01, %v1874_v1  ;;  %vm19579_vm0 = vmmov %vm19574_vm2 }
 0x257   : > { %9208 = vmatpush1.bf16.msra.mxu0 %v9207_v17  ;;  %v19575_v17 = vld [vmem:[#allocation13_spill] sm:$0xff]  ;;  %vm19581_vm12 = vmmov %vm19579_vm0 }
 0x258   : > { %v2002_v57 = vsel %vm19569_vm8, %v19567_v60, %v1938_v2  ;;  %9002 = vmatprep.subr.msk.mxu0 %vm19571_vm4, %v19570_v27  ;;  %vm19583_vm6 = vmmov %vm19579_vm0 }
 0x259   : > { %v9213_v29 = vpack.c.bf16 %v2002_v57, %v1986_v61  ;;  %vm19584_vm10 = vmmov %vm19580_vm11 }
 0x25a   : > { %8994 = vmatmul.mubr.msk.f32.vlgmr.msra.gmra.mrb[56].mxu0 %vm18815_vm15, %v12403_v55  ;;  %vm19585_vm1 = vmmov %vm19584_vm10 }
 0x25b   : > { %9214 = vmatprep.subr.bf16.mxu1 %v9213_v29  ;;  %2640 = vmatprep.mubr.f32.mxu0 %v19416_v11  ;;  %vm19586_vm7 = vmmov %vm19579_vm0 }
 0x25c   : > { %9216 = vmatpush1.bf16.msra.mxu1 %v9215_v62  ;;  %9003 = vmatpush1.msk.msra.mxu0 %vm19572_vm9, %v10592_v28  ;;  %v19582_v62 = vld [vmem:[#allocation15_spill] sm:$0xff]  ;;  %vm19588_vm13 = vmmov %vm19579_vm0 }
 0x25d   : > { %9008 = vmatprep.subr.msk.mxu1 %vm19574_vm2, %v19573_v32  ;;  %9014 = vmatprep.subr.msk.mxu0 %vm19576_vm5, %v19575_v17  ;;  %vm19589_vm3 = vmmov %vm19585_vm1 }
 0x25e   : > { %8995 = vmatmul.mubr.msk.f32.gmra.mrb[58].mxu0 %vm18815_vm15, %v12440_v26  ;;  %vm19590_vm8 = vmmov %vm19585_vm1 }
 0x25f   : > { %8998 = vmatmul.mubr.msk.f32.vlgmr.msra.gmra.mrb[56].mxu1 %vm18815_vm15, %v12403_v55  ;;  %2646 = vmatprep.mubr.f32.mxu0 %v19416_v11  ;;  %v12937_v55 = vld [vmem:[#allocation5 + $0x60] sm:$0xff]  ;;  %vm19591_vm4 = vmmov %vm19585_vm1 }
 0x260   : > { %2729 = vmatprep.mubr.f32.mxu1 %v19416_v11  ;;  %9009 = vmatpush1.msk.msra.mxu1 %vm19577_vm14, %v10593_v8  ;;  %vm19592_vm9 = vmmov %vm19585_vm1  ;;  %v13138_v8 = vpop.permute.xlu1 %2024 }
 0x261   : > { %9020 = vmatprep.subr.msk.mxu1 %vm19579_vm0, %v19578_v46  ;;  %vm19593_vm2 = vmmov %vm19585_vm1  ;;  %19632 = vst [vmem:[#allocation67_spill] sm:$0xff] %v13138_v8 }
 0x262   : > { %8996 = vmatmul.mubr.msk.f32.gmra.mrb[60].mxu0 %vm18815_vm15, %v12456_v31  ;;  %vm19594_vm5 = vmmov %vm19585_vm1 }
 0x263   : > { %8999 = vmatmul.mubr.msk.f32.gmra.mrb[58].mxu1 %vm18815_vm15, %v12440_v26  ;;  %2652 = vmatprep.mubr.f32.mxu0 %v19416_v11  ;;  %v12945_v26 = vld [vmem:[#allocation5 + $0x68] sm:$0xff]  ;;  %vm19595_vm14 = vmmov %vm19585_vm1 }
 0x264   : > { %2735 = vmatprep.mubr.f32.mxu1 %v19416_v11 }
 0x266   : > { %8997 = vmatmul.mubr.msk.f32.gmra.mrb[62].mxu0 %vm18815_vm15, %v12478_v50 }
 0x267   : > { %9000 = vmatmul.mubr.msk.f32.gmra.mrb[60].mxu1 %vm18815_vm15, %v12456_v31  ;;  %3856 = vmatprep.mubr.f32.mxu0 %v19416_v11  ;;  %v10594_v31 = vld [vmem:[%s10899_s29 + $0x10] sm:$0x77] }
 0x268   : > { %2741 = vmatprep.mubr.f32.mxu1 %v19416_v11 }
 0x26a   : > { %9004 = vmatmul.mubr.msk.f32.vlgmr.msra.gmra.mrb[64].mxu0 %vm19580_vm11, %v12937_v55  ;;  %vm19596_vm11 = vmmov %vm19579_vm0 }
 0x26b   : > { %9001 = vmatmul.mubr.msk.f32.gmra.mrb[62].mxu1 %vm18815_vm15, %v12478_v50  ;;  %3862 = vmatprep.mubr.f32.mxu0 %v19416_v11  ;;  %v10595_v50 = vld [vmem:[%s10899_s29 + $0x18] sm:$0x77] }
 0x26c   : > { %3945 = vmatprep.mubr.f32.mxu1 %v19416_v11  ;;  %9015 = vmatpush1.msk.msra.mxu0 %vm19581_vm12, %v10594_v31  ;;  %vm19598_vm12 = vmmov %vm19579_vm0 }
 0x26d   : > { %9026 = vmatprep.subr.msk.mxu0 %vm19583_vm6, %v19582_v62  ;;  %vm19600_vm6 = vmmov %vm19579_vm0 }
 0x26e   : > { %9005 = vmatmul.mubr.msk.f32.gmra.mrb[66].mxu0 %vm19584_vm10, %v12945_v26  ;;  %vm19601_vm10 = vmmov %vm19585_vm1 }
 0x26f   : > { %9010 = vmatmul.mubr.msk.f32.vlgmr.msra.gmra.mrb[64].mxu1 %vm19585_vm1, %v12937_v55  ;;  %3868 = vmatprep.mubr.f32.mxu0 %v19416_v11 }
 0x270   : > { %3951 = vmatprep.mubr.f32.mxu1 %v19416_v11  ;;  %9021 = vmatpush1.msk.msra.mxu1 %vm19586_vm7, %v10595_v50  ;;  %vm19602_vm7 = vmmov %vm19585_vm1 }
 0x271   : > { %9032 = vmatprep.subr.msk.mxu1 %vm19588_vm13, %v19587_v5  ;;  %vm19603_vm13 = vmmov %vm19585_vm1 }
 0x272   : > { %9006 = vmatmul.mubr.msk.f32.gmra.mrb[68].mxu0 %vm19590_vm8, %v3778_v36  ;;  %vm19605_vm8 = vmmov %vm19585_vm1 }
 0x273   : > { %9011 = vmatmul.mubr.msk.f32.gmra.mrb[66].mxu1 %vm19589_vm3, %v12945_v26  ;;  %3874 = vmatprep.mubr.f32.mxu0 %v19416_v11  ;;  %vm19604_vm3 = vmmov %vm19585_vm1 }
 0x274   : > { %3957 = vmatprep.mubr.f32.mxu1 %v19416_v11 }
 0x276   : > { %9007 = vmatmul.mubr.msk.f32.gmra.mrb[70].mxu0 %vm19592_vm9, %v3779_v49  ;;  %vm19607_vm9 = vmmov %vm19585_vm1 }
 0x277   : > { %9012 = vmatmul.mubr.msk.f32.gmra.mrb[68].mxu1 %vm19591_vm4, %v3778_v36  ;;  %4034 = vmatprep.mubr.f32.mxu0 %v19416_v11  ;;  %vm19606_vm4 = vmmov %vm19585_vm1 }
 0x278   : > { %3963 = vmatprep.mubr.f32.mxu1 %v19416_v11 }
 0x27a   : > { %9016 = vmatmul.mubr.msk.f32.vlgmr.msra.gmra.mrb[72].mxu0 %vm19594_vm5, %v12937_v55  ;;  %vm19609_vm5 = vmmov %vm19579_vm0 }
 0x27b   : > { %9013 = vmatmul.mubr.msk.f32.gmra.mrb[70].mxu1 %vm19593_vm2, %v3779_v49  ;;  %4040 = vmatprep.mubr.f32.mxu0 %v19416_v11  ;;  %vm19608_vm2 = vmmov %vm19579_vm0 }
 0x27c   : > { %4123 = vmatprep.mubr.f32.mxu1 %v19416_v11  ;;  %9027 = vmatpush1.msk.msra.mxu0 %vm19579_vm0, %v10596_v43  ;;  %vm19611_vm0 = vmmov %vm19585_vm1 }
 0x27d   : > { %9038 = vmatprep.subr.msk.mxu0 %vm19598_vm12, %v19597_v42  ;;  %vm19613_vm12 = vmmov %vm19611_vm0 }
 0x27e   : > { %9017 = vmatmul.mubr.msk.f32.gmra.mrb[74].mxu0 %vm19601_vm10, %v12945_v26  ;;  %vm19615_vm10 = vmmov %vm19611_vm0 }
 0x27f   : > { %9022 = vmatmul.mubr.msk.f32.vlgmr.msra.gmra.mrb[72].mxu1 %vm19595_vm14, %v12937_v55  ;;  %4046 = vmatprep.mubr.f32.mxu0 %v19416_v11  ;;  %vm19610_vm14 = vmmov %vm19585_vm1 }
 0x280   : > { %4129 = vmatprep.mubr.f32.mxu1 %v19416_v11  ;;  %9033 = vmatpush1.msk.msra.mxu1 %vm19596_vm11, %v10597_v15  ;;  %vm19612_vm11 = vmmov %vm19611_vm0 }
 0x281   : > { %9044 = vmatprep.subr.msk.mxu1 %vm19600_vm6, %v19599_v37  ;;  %vm19614_vm6 = vmmov %vm19611_vm0 }
 0x282   : > { %9018 = vmatmul.mubr.msk.f32.gmra.mrb[76].mxu0 %vm19602_vm7, %v3778_v36  ;;  %vm19617_vm7 = vmmov %vm19611_vm0 }
 0x283   : > { %9023 = vmatmul.mubr.msk.f32.gmra.mrb[74].mxu1 %vm19585_vm1, %v12945_v26  ;;  %4052 = vmatprep.mubr.f32.mxu0 %v19416_v11  ;;  %vm19616_vm1 = vmmov %vm19611_vm0 }
 0x284   : > { %4135 = vmatprep.mubr.f32.mxu1 %v19416_v11 }
 0x286   : > { %9019 = vmatmul.mubr.msk.f32.gmra.mrb[78].mxu0 %vm19604_vm3, %v3779_v49  ;;  %vm19619_vm3 = vmmov %vm19611_vm0 }
 0x287   : > { %9024 = vmatmul.mubr.msk.f32.gmra.mrb[76].mxu1 %vm19603_vm13, %v3778_v36  ;;  %4212 = vmatprep.mubr.f32.mxu0 %v19416_v11  ;;  %vm19618_vm13 = vmmov %vm19611_vm0 }
 0x288   : > { %4141 = vmatprep.mubr.f32.mxu1 %v19416_v11 }
 0x28a   : > { %9028 = vmatmul.mubr.msk.f32.vlgmr.msra.gmra.mrb[80].mxu0 %vm19606_vm4, %v12937_v55  ;;  %vm19621_vm4 = vmmov %vm19611_vm0 }
 0x28b   : > { %9025 = vmatmul.mubr.msk.f32.gmra.mrb[78].mxu1 %vm19605_vm8, %v3779_v49  ;;  %4218 = vmatprep.mubr.f32.mxu0 %v19416_v11  ;;  %vm19620_vm8 = vmmov %vm19611_vm0 }
 0x28c   : > { %4301 = vmatprep.mubr.f32.mxu1 %v19416_v11  ;;  %9039 = vmatpush1.msk.msra.mxu0 %vm19608_vm2, %v10598_v10  ;;  %vm19623_vm2 = vmmov %vm19611_vm0 }
 0x28e   : > { %9029 = vmatmul.mubr.msk.f32.gmra.mrb[82].mxu0 %vm19610_vm14, %v12945_v26 }
 0x28f   : > { %9034 = vmatmul.mubr.msk.f32.vlgmr.msra.gmra.mrb[80].mxu1 %vm19607_vm9, %v12937_v55  ;;  %4224 = vmatprep.mubr.f32.mxu0 %v19416_v11  ;;  %vm19622_vm9 = vmmov %vm19611_vm0 }
 0x290   : > { %4307 = vmatprep.mubr.f32.mxu1 %v19416_v11  ;;  %9045 = vmatpush1.msk.msra.mxu1 %vm19609_vm5, %v10599_v56 }
 0x292   : > { %9030 = vmatmul.mubr.msk.f32.gmra.mrb[84].mxu0 %vm19612_vm11, %v3778_v36 }
 0x293   : > { %9035 = vmatmul.mubr.msk.f32.gmra.mrb[82].mxu1 %vm19611_vm0, %v12945_v26  ;;  %4230 = vmatprep.mubr.f32.mxu0 %v19416_v11 }
 0x294   : > { %4313 = vmatprep.mubr.f32.mxu1 %v19416_v11 }
 0x296   : > { %9031 = vmatmul.mubr.msk.f32.gmra.mrb[86].mxu0 %vm19614_vm6, %v3779_v49 }
 0x297   : > { %9036 = vmatmul.mubr.msk.f32.gmra.mrb[84].mxu1 %vm19613_vm12, %v3778_v36  ;;  %4390 = vmatprep.mubr.f32.mxu0 %v19416_v11 }
 0x298   : > { %4319 = vmatprep.mubr.f32.mxu1 %v19416_v11 }
 0x29a   : > { %9040 = vmatmul.mubr.msk.f32.vlgmr.msra.gmra.mrb[88].mxu0 %vm19616_vm1, %v12937_v55 }
 0x29b   : > { %9037 = vmatmul.mubr.msk.f32.gmra.mrb[86].mxu1 %vm19615_vm10, %v3779_v49  ;;  %4396 = vmatprep.mubr.f32.mxu0 %v19416_v11 }
 0x29c   : > { %4479 = vmatprep.mubr.f32.mxu1 %v19416_v11 }
 0x29e   : > { %9041 = vmatmul.mubr.msk.f32.gmra.mrb[90].mxu0 %vm19618_vm13, %v12945_v26 }
 0x29f   : > { %9046 = vmatmul.mubr.msk.f32.vlgmr.msra.gmra.mrb[88].mxu1 %vm19617_vm7, %v12937_v55  ;;  %4402 = vmatprep.mubr.f32.mxu0 %v19416_v11 }
 0x2a0   : > { %4485 = vmatprep.mubr.f32.mxu1 %v19416_v11 }
 0x2a2   : > { %9042 = vmatmul.mubr.msk.f32.gmra.mrb[92].mxu0 %vm19620_vm8, %v3778_v36 }
 0x2a3   : > { %9047 = vmatmul.mubr.msk.f32.gmra.mrb[90].mxu1 %vm19619_vm3, %v12945_v26  ;;  %4408 = vmatprep.mubr.f32.mxu0 %v19416_v11 }
 0x2a4   : > { %4491 = vmatprep.mubr.f32.mxu1 %v19416_v11 }
 0x2a6   : > { %9043 = vmatmul.mubr.msk.f32.gmra.mrb[94].mxu0 %vm19622_vm9, %v3779_v49 }
 0x2a7   : > { %9048 = vmatmul.mubr.msk.f32.gmra.mrb[92].mxu1 %vm19621_vm4, %v3778_v36  ;;  %4630 = vmatprep.mubr.f32.mxu0 %v19416_v11 }
 0x2a8   : > { %4497 = vmatprep.mubr.f32.mxu1 %v19416_v11 }
 0x2ab   : > { %9049 = vmatmul.mubr.msk.f32.gmra.mrb[94].mxu1 %vm19623_vm2, %v3779_v49 }
 0x2ac   : > { %4719 = vmatprep.mubr.f32.mxu1 %v19416_v11 }
 0x2ca   : > { %v2102_v14 = vpop.f32.mrb[32].mxu0 }
 0x2cb   : > { %v13048_v16 = vadd.f32 %v2102_v14, %v13045_v47  ;;  %v2104_v0 = vpop.f32.mrb[33].mxu0 }
 0x2cc   : > { %v13051_v20 = vadd.f32 %v2104_v0, %v13045_v47 }
 0x2cd   : > { %v13056_v59 = vmul.f32 100.0, %v13048_v16  ;;  %v2191_v33 = vpop.f32.mrb[32].mxu1 }
 0x2ce   : > { %19624 = vst [vmem:[#allocation28_spill] sm:$0xff] %v13051_v20  ;;  %v13059_v3 = vadd.f32 %v2191_v33, %v13045_v47  ;;  %v13062_v30 = vmul.f32 100.0, %v13051_v20  ;;  %v2193_v34 = vpop.f32.mrb[33].mxu1  ;;  %v2108_v41 = vpop.f32.mrb[34].mxu0 }
 0x2cf   : > { %vm2812_vm5 = vcmp.gt.f32.partialorder %v13056_v59, 20.0  ;;  %v13066_v45 = vadd.f32 %v2193_v34, %v13045_v47  ;;  %v13069_v35 = vadd.f32 %v2108_v41, %v13053_v6  ;;  %v2110_v23 = vpop.f32.mrb[35].mxu0 }
 0x2d0   : > { %19625 = vst [vmem:[#allocation30_spill] sm:$0xff] %v13062_v30  ;;  %v2876_v7 = vsel %vm2812_vm5, 0.0, %v13056_v59  ;;  %v13075_v38 = vmul.f32 100.0, %v13059_v3  ;;  %v13078_v51 = vadd.f32 %v2110_v23, %v13053_v6  ;;  %vm18822_vm14 = vcmp.gt.f32.partialorder %v13062_v30, 20.0 }
 0x2d1   : > { %19626 = vst [vmem:[#allocation36_spill] sm:$0xff] %v13066_v45  ;;  %v2940_v9 = vmul.f32 1.442695, %v2876_v7  ;;  %v13082_v18 = vmul.f32 100.0, %v13066_v45  ;;  %v13085_v21 = vmul.f32 100.0, %v13069_v35  ;;  %v2197_v58 = vpop.f32.mrb[34].mxu1 }
 0x2d2   : > { %19627 = vst [vmem:[#allocation40_spill] sm:$0xff] %v13078_v51  ;;  %vm2814_vm0 = vcmp.gt.f32.partialorder %v13075_v38, 20.0  ;;  %v13089_v19 = vadd.f32 %v2197_v58, %v13053_v6  ;;  %v13092_v12 = vmul.f32 100.0, %v13078_v51  ;;  %v2199_v22 = vpop.f32.mrb[35].mxu1  ;;  %v2114_v24 = vpop.f32.mrb[36].mxu0  ;;  %v2877_v40 = vsel %vm18822_vm14, 0.0, %v13062_v30 }
 0x2d3   : > { %19628 = vst [vmem:[#allocation63_spill] sm:$0xff] %v13082_v18  ;;  %9820 = vpow2.f32 %v2940_v9  ;;  %v2878_v48 = vsel %vm2814_vm0, 0.0, %v13075_v38  ;;  %vm18818_vm11 = vcmp.gt.f32.partialorder %v13082_v18, 20.0  ;;  %vm2828_vm12 = vcmp.gt.f32.partialorder %v13085_v21, 20.0  ;;  %v2116_v63 = vpop.f32.mrb[37].mxu0 }
 0x2d4   : > { %19629 = vst [vmem:[#allocation57_spill] sm:$0xff] %v13092_v12  ;;  %v2944_v13 = vmul.f32 1.442695, %v2878_v48  ;;  %v2892_v52 = vsel %vm2828_vm12, 0.0, %v13085_v21  ;;  %v13108_v44 = vmul.f32 100.0, %v13089_v19  ;;  %vm18820_vm6 = vcmp.gt.f32.partialorder %v13092_v12, 20.0 }
 0x2d5   : > { %v2972_v53 = vmul.f32 1.442695, %v2892_v52  ;;  %v2879_v1 = vsel %vm18818_vm11, 0.0, %v13082_v18  ;;  %v13115_v2 = vadd.f32 %v2199_v22, %v13053_v6  ;;  %v13118_v39 = vadd.f32 %v2114_v24, %v13105_v25  ;;  %v2203_v4 = vpop.f32.mrb[36].mxu1 }
 0x2d6   : > { %9822 = vpow2.f32 %v2944_v13  ;;  %v2120_v61 = vpop.f32.mrb[38].mxu0  ;;  %v2942_v60 = vmul.f32 1.442695, %v2877_v40  ;;  %vm2830_vm10 = vcmp.gt.f32.partialorder %v13108_v44, 20.0  ;;  %v2893_v54 = vsel %vm18820_vm6, 0.0, %v13092_v12  ;;  %v2205_v27 = vpop.f32.mrb[37].mxu1 }
 0x2d7   : > { %19630 = vst [vmem:[#allocation79_spill] sm:$0xff] %v13115_v2  ;;  %v13125_v57 = vadd.f32 %v2203_v4, %v13105_v25  ;;  %v13127_v29 = vpop.f32.mrb[39].mxu0  ;;  %9824 = vpow2.f32 %v2972_v53  ;;  %v2894_v28 = vsel %vm2830_vm10, 0.0, %v13108_v44  ;;  %v13133_v32 = vmul.f32 100.0, %v13115_v2 }
 0x2d8   : > { %v13136_v17 = vmul.f32 100.0, %v13118_v39  ;;  %v2946_v46 = vmul.f32 1.442695, %v2879_v1  ;;  %v2976_v55 = vmul.f32 1.442695, %v2894_v28  ;;  %v13144_v31 = vadd.f32 %v2116_v63, %v13105_v25 }
 0x2d9   : > { %19631 = vst [vmem:[#allocation80_spill] sm:$0xff] %v13133_v32  ;;  %v13141_v26 = vmul.f32 100.0, %v13125_v57  ;;  %v2209_v62 = vpop.f32.mrb[38].mxu1  ;;  %v2974_v50 = vmul.f32 1.442695, %v2893_v54  ;;  %v13148_v5 = vadd.f32 %v2205_v27, %v13105_v25  ;;  %v13151_v36 = vadd.f32 %v2120_v61, %v13138_v8 }
 0x2da   : > { %vm2844_vm1 = vcmp.gt.f32.partialorder %v13136_v17, 20.0  ;;  %v13153_v49 = vpop.f32.mrb[39].mxu1  ;;  %9826 = vpow2.f32 %v2976_v55  ;;  %vm18817_vm7 = vcmp.gt.f32.partialorder %v13133_v32, 20.0  ;;  %v13164_v37 = vmul.f32 100.0, %v13144_v31 }
 0x2db   : > { %v2908_v43 = vsel %vm2844_vm1, 0.0, %v13136_v17  ;;  %vm2846_vm13 = vcmp.gt.f32.partialorder %v13141_v26, 20.0  ;;  %9828 = vpow2.f32 %v2942_v60  ;;  %v13167_v14 = vmul.f32 100.0, %v13148_v5 }
 0x2dc   : > { %v3004_v15 = vmul.f32 1.442695, %v2908_v43  ;;  %v2910_v42 = vsel %vm2846_vm13, 0.0, %v13141_v26  ;;  %9830 = vpow2.f32 %v2946_v46  ;;  %v13170_v0 = vmul.f32 100.0, %v13151_v36 }
 0x2dd   : > { %v9821_v10 = vpop.eup %9820  ;;  %v3008_v56 = vmul.f32 1.442695, %v2910_v42  ;;  %9832 = vpow2.f32 %v2974_v50  ;;  %v2895_v34 = vsel %vm18817_vm7, 0.0, %v13133_v32  ;;  %vm2845_vm3 = vcmp.gt.f32.partialorder %v13164_v37, 20.0 }
 0x2de   : > { %v3068_v33 = vadd.f32 1.0, %v9821_v10  ;;  %9834 = vpow2.f32 %v3004_v15  ;;  %vm2847_vm8 = vcmp.gt.f32.partialorder %v13167_v14, 20.0  ;;  %vm2860_vm4 = vcmp.gt.f32.partialorder %v13170_v0, 20.0 }
 0x2df   : > { %v2909_v23 = vsel %vm2845_vm3, 0.0, %v13164_v37  ;;  %v2978_v9 = vmul.f32 1.442695, %v2895_v34  ;;  %v13182_v58 = vadd.f32 %v2209_v62, %v13138_v8  ;;  %v3071_v24 = vmul.f32 -0.5, %v9821_v10 }
 0x2e0   : > { %v9823_v41 = vpop.eup %9822  ;;  %9836 = vlog2.f32 %v3068_v33  ;;  %v3006_v48 = vmul.f32 1.442695, %v2909_v23  ;;  %v2911_v63 = vsel %vm2847_vm8, 0.0, %v13167_v14  ;;  %v2924_v13 = vsel %vm2860_vm4, 0.0, %v13170_v0 }
 0x2e1   : > { %v3086_v7 = vadd.f32 1.0, %v9823_v41  ;;  %9838 = vpow2.f32 %v3008_v56  ;;  %v9825_v22 = vpop.eup %9824  ;;  %v3074_v52 = vand.u32 2147483647, %v9821_v10  ;;  %v3089_v53 = vmul.f32 -0.5, %v9823_v41 }
 0x2e2   : > { %v3212_v40 = vadd.f32 1.0, %v9825_v22  ;;  %v3010_v1 = vmul.f32 1.442695, %v2911_v63  ;;  %v3215_v61 = vmul.f32 -0.5, %v9825_v22  ;;  %v3036_v60 = vmul.f32 1.442695, %v2924_v13 }
 0x2e3   : > { %9840 = vlog2.f32 %v3086_v7  ;;  %v13191_v54 = vmul.f32 100.0, %v13182_v58  ;;  %v3072_v28 = vadd.f32 1.0, %v3071_v24  ;;  %v3092_v46 = vand.u32 2147483647, %v9823_v41 }
 0x2e4   : > { %9842 = vpow2.f32 %v3006_v48  ;;  %v9827_v4 = vpop.eup %9826  ;;  %v13200_v43 = vadd.f32 %v13127_v29, %v13138_v8  ;;  %v3090_v42 = vadd.f32 1.0, %v3089_v53  ;;  %v3218_v56 = vand.u32 2147483647, %v9825_v22 }
 0x2e5   : > { %9844 = vlog2.f32 %v3212_v40  ;;  %v13193_v27 = vpop.eup %9828  ;;  %v3230_v55 = vadd.f32 1.0, %v9827_v4  ;;  %v3233_v50 = vmul.f32 -0.5, %v9827_v4  ;;  %vm2862_vm9 = vcmp.gt.f32.partialorder %v13191_v54, 20.0 }
 0x2e6   : > { %19633 = vst [vmem:[#allocation61_spill] sm:$0xff] %v13193_v27  ;;  %9846 = vpow2.f32 %v2978_v9  ;;  %v13195_v62 = vpop.eup %9830  ;;  %v2926_v33 = vsel %vm2862_vm9, 0.0, %v13191_v54  ;;  %v3216_v23 = vadd.f32 1.0, %v3215_v61  ;;  %v13208_v9 = vmul.f32 100.0, %v13200_v43 }
 0x2e7   : > { %19634 = vst [vmem:[#allocation81_spill] sm:$0xff] %v13195_v62  ;;  %9848 = vpow2.f32 %v3010_v1  ;;  %v13202_v15 = vpop.eup %9832  ;;  %v3040_v7 = vmul.f32 1.442695, %v2926_v33  ;;  %v3073_v48 = vmul.f32 %v9821_v10, %v3072_v28  ;;  %vm13210_vm2 = vcmp.lt.f32.partialorder %v3074_v52, 0.0004427343 }
 0x2e8   : > { %19635 = vst [vmem:[#allocation82_spill] sm:$0xff] %v13202_v15  ;;  %9850 = vlog2.f32 %v3230_v55  ;;  %v9835_v34 = vpop.eup %9834  ;;  %v3236_v63 = vand.u32 2147483647, %v9827_v4  ;;  %v3234_v1 = vadd.f32 1.0, %v3233_v50  ;;  %vm13214_vm15 = vcmp.lt.f32.partialorder %v3092_v46, 0.0004427343 }
 0x2e9   : > { %9852 = vpow2.f32 %v3036_v60  ;;  %v3356_v13 = vadd.f32 1.0, %v9835_v34  ;;  %v3359_v55 = vmul.f32 -0.5, %v9835_v34  ;;  %v3362_v60 = vand.u32 2147483647, %v9835_v34 }
 0x2ea   : > { %v9837_v24 = vpop.eup %9836  ;;  %9854 = vpow2.f32 %v3040_v7  ;;  %v3091_v10 = vmul.f32 %v9823_v41, %v3090_v42  ;;  %v3217_v52 = vmul.f32 %v9825_v22, %v3216_v23  ;;  %vm13218_vm7 = vcmp.lt.f32.partialorder %v3218_v56, 0.0004427343 }
 0x2eb   : > { %v9839_v40 = vpop.eup %9838  ;;  %v3070_v53 = vmul.f32 0.6931472, %v9837_v24  ;;  %9856 = vlog2.f32 %v3356_v13  ;;  %vm2861_vm11 = vcmp.gt.f32.partialorder %v13208_v9, 20.0  ;;  %v3235_v13 = vmul.f32 %v9827_v4, %v3234_v1 }
 0x2ec   : > { %v3374_v33 = vadd.f32 1.0, %v9839_v40  ;;  %v3377_v7 = vmul.f32 -0.5, %v9839_v40  ;;  %vm13225_vm6 = vcmp.lt.f32.partialorder %v3236_v63, 0.0004427343  ;;  %v3360_v41 = vadd.f32 1.0, %v3359_v55 }
 0x2ed   : > { %v9841_v11 = vpop.eup %9840  ;;  %v3076_v50 = vsel %vm13210_vm2, %v3073_v48, %v3070_v53  ;;  %vm13231_vm14 = vcmp.lt.f32.partialorder %v3362_v60, 0.0004427343  ;;  %v3380_v29 = vand.u32 2147483647, %v9839_v40 }
 0x2ee   : > { %v9843_v24 = vpop.eup %9842  ;;  %v3088_v46 = vmul.f32 0.6931472, %v9841_v11  ;;  %9858 = vlog2.f32 %v3374_v33  ;;  %v13237_v11 = vadd.f32 %v13153_v49, %v13138_v8  ;;  %v3644_v63 = vmul.f32 0.01, %v3076_v50 }
 0x2ef   : > { %v9845_v32 = vpop.eup %9844  ;;  %v3365_v22 = vadd.f32 1.0, %v9843_v24  ;;  %v3368_v48 = vmul.f32 -0.5, %v9843_v24  ;;  %v3378_v60 = vadd.f32 1.0, %v3377_v7  ;;  %v3361_v12 = vmul.f32 %v9835_v34, %v3360_v41 }
 0x2f0   : > { %v13229_v42 = vpop.eup %9846  ;;  %v3214_v56 = vmul.f32 0.6931472, %v9845_v32  ;;  %v3094_v53 = vsel %vm13214_vm15, %v3091_v10, %v3088_v46  ;;  %v2925_v32 = vsel %vm2861_vm11, 0.0, %v13208_v9  ;;  %v3371_v61 = vand.u32 2147483647, %v9843_v24 }
 0x2f1   : > { %19644 = vst [vmem:[#allocation70_spill] sm:$0xff] %v13229_v42  ;;  %v13239_v4 = vpop.eup %9848  ;;  %9860 = vlog2.f32 %v3365_v22  ;;  %v3646_v10 = vmul.f32 0.01, %v3094_v53  ;;  %v3369_v46 = vadd.f32 1.0, %v3368_v48  ;;  %vm13264_vm15 = vcmp.lt.f32.partialorder %v3380_v29, 0.0004427343 }
 0x2f2   : > { %v9851_v1 = vpop.eup %9850  ;;  %v3220_v55 = vsel %vm13218_vm7, %v3217_v52, %v3214_v56  ;;  %v3383_v33 = vadd.f32 1.0, %v13239_v4  ;;  %v3386_v49 = vmul.f32 -0.5, %v13239_v4  ;;  %v13255_v52 = vsel %vm2812_vm5, %v13048_v16, %v3644_v63 }
 0x2f3   : > { %v9853_v18 = vpop.eup %9852  ;;  %v3660_v45 = vmul.f32 0.01, %v3220_v55  ;;  %v3232_v50 = vmul.f32 0.6931472, %v9851_v1  ;;  %19647 = vst [vmem:[#allocation77_spill] sm:$0xff] %v13255_v52  ;;  %v3379_v53 = vmul.f32 %v9839_v40, %v3378_v60 }
 0x2f4   : > { %9862 = vlog2.f32 %v3383_v33  ;;  %v3500_v22 = vadd.f32 1.0, %v9853_v18  ;;  %v13250_v51 = vpop.eup %9854  ;;  %v3387_v59 = vadd.f32 1.0, %v3386_v49  ;;  %v3503_v16 = vmul.f32 -0.5, %v9853_v18 }
 0x2f5   : > { %v13260_v28 = vsel %vm2828_vm12, %v13069_v35, %v3660_v45  ;;  %v3238_v34 = vsel %vm13225_vm6, %v3235_v13, %v3232_v50  ;;  %v9857_v41 = vpop.eup %9856  ;;  %vm13270_vm5 = vcmp.lt.f32.partialorder %v3371_v61, 0.0004427343  ;;  %v13277_v35 = vsel %vm2814_vm0, %v13059_v3, %v3646_v10 }
 0x2f6   : > { %19648 = vst [vmem:[#allocation73_spill] sm:$0xff] %v13260_v28  ;;  %v3662_v48 = vmul.f32 0.01, %v3238_v34  ;;  %v3358_v63 = vmul.f32 0.6931472, %v9857_v41  ;;  %9864 = vlog2.f32 %v3500_v22  ;;  %19653 = vst [vmem:[#allocation46_spill] sm:$0xff] %v13277_v35  ;;  %v3370_v13 = vmul.f32 %v9843_v24, %v3369_v46 }
 0x2f7   : > { %v3518_v29 = vadd.f32 1.0, %v13250_v51  ;;  %v3389_v60 = vand.u32 2147483647, %v13239_v4  ;;  %v13291_v3 = vmul.f32 %v13239_v4, %v3387_v59  ;;  %v3504_v33 = vadd.f32 1.0, %v3503_v16 }
 0x2f8   : > { %v9859_v45 = vpop.eup %9858  ;;  %v13282_v2 = vsel %vm2830_vm10, %v13089_v19, %v3662_v48  ;;  %v3364_v1 = vsel %vm13231_vm14, %v3361_v12, %v3358_v63  ;;  %v3506_v44 = vand.u32 2147483647, %v9853_v18  ;;  %v3521_v49 = vmul.f32 -0.5, %v13250_v51 }
 0x2f9   : > { %19654 = vst [vmem:[#allocation50_spill] sm:$0xff] %v13282_v2  ;;  %v3376_v55 = vmul.f32 0.6931472, %v9859_v45  ;;  %v2280_v38 = vpop.f32.mrb[40].mxu0  ;;  %9866 = vlog2.f32 %v3518_v29  ;;  %v3038_v50 = vmul.f32 1.442695, %v2925_v32  ;;  %v3505_v45 = vmul.f32 %v9853_v18, %v3504_v33 }
 0x2fa   : > { %v2282_v19 = vpop.f32.mrb[41].mxu0  ;;  %v13295_v61 = vmul.f32 100.0, %v13237_v11  ;;  %v13298_v12 = vadd.f32 %v2280_v38, %v13045_v47  ;;  %v3676_v23 = vmul.f32 0.01, %v3364_v1  ;;  %v3524_v46 = vand.u32 2147483647, %v13250_v51 }
 0x2fb   : > { %v9861_v24 = vpop.eup %9860  ;;  %v3382_v10 = vsel %vm13264_vm15, %v3379_v53, %v3376_v55  ;;  %9868 = vpow2.f32 %v3038_v50  ;;  %v13308_v32 = vadd.f32 %v2282_v19, %v13045_v47  ;;  %vm13310_vm0 = vcmp.lt.f32.partialorder %v3389_v60, 0.0004427343 }
 0x2fc   : > { %v3367_v4 = vmul.f32 0.6931472, %v9861_v24  ;;  %vm2863_vm14 = vcmp.gt.f32.partialorder %v13295_v61, 20.0  ;;  %v13305_v22 = vmul.f32 100.0, %v13298_v12  ;;  %vm13314_vm12 = vcmp.lt.f32.partialorder %v3506_v44, 0.0004427343 }
 0x2fd   : > { %19655 = vst [vmem:[#allocation54_spill] sm:$0xff] %v13308_v32  ;;  %v2286_v34 = vpop.f32.mrb[42].mxu0  ;;  %v2927_v59 = vsel %vm2863_vm14, 0.0, %v13295_v61  ;;  %v3678_v53 = vmul.f32 0.01, %v3382_v10  ;;  %v3522_v29 = vadd.f32 1.0, %v3521_v49  ;;  %v13337_v19 = vsel %vm2844_vm1, %v13118_v39, %v3676_v23 }
 0x2fe   : > { %v9863_v41 = vpop.eup %9862  ;;  %v13322_v16 = vadd.f32 %v2286_v34, %v13053_v6  ;;  %v2288_v63 = vpop.f32.mrb[43].mxu0  ;;  %v3042_v1 = vmul.f32 1.442695, %v2927_v59  ;;  %v3373_v55 = vsel %vm13270_vm5, %v3370_v13, %v3367_v4  ;;  %vm13326_vm6 = vcmp.lt.f32.partialorder %v3524_v46, 0.0004427343  ;;  %19663 = vst [vmem:[#allocation51_spill] sm:$0xff] %v13337_v19 }
 0x2ff   : > { %vm2816_vm10 = vcmp.gt.f32.partialorder %v13305_v22, 20.0  ;;  %v13332_v38 = vmul.f32 100.0, %v13308_v32  ;;  %v13339_v18 = vmul.f32 0.6931472, %v9863_v41  ;;  %v13348_v50 = vadd.f32 %v2288_v63, %v13053_v6 }
 0x300   : > { %v9865_v44 = vpop.eup %9864  ;;  %9870 = vpow2.f32 %v3042_v1  ;;  %v2880_v21 = vsel %vm2816_vm10, 0.0, %v13305_v22  ;;  %v13345_v49 = vmul.f32 100.0, %v13322_v16  ;;  %v13353_v39 = vsel %vm2846_vm13, %v13125_v57, %v3678_v53 }
 0x301   : > { %19662 = vst [vmem:[#allocation58_spill] sm:$0xff] %v13332_v38  ;;  %v2292_v13 = vpop.f32.mrb[44].mxu0  ;;  %v3502_v33 = vmul.f32 0.6931472, %v9865_v44  ;;  %v2948_v24 = vmul.f32 1.442695, %v2880_v21  ;;  %v3523_v23 = vmul.f32 %v13250_v51, %v3522_v29  ;;  %v3391_v7 = vsel %vm13310_vm0, %v13291_v3, %v13339_v18 }
 0x302   : > { %19664 = vst [vmem:[#allocation53_spill] sm:$0xff] %v13348_v50  ;;  %19665 = vst [vmem:[#allocation60_spill] sm:$0xff] %v13353_v39  ;;  %v3677_v17 = vmul.f32 0.01, %v3373_v55  ;;  %vm2817_vm1 = vcmp.gt.f32.partialorder %v13332_v38, 20.0  ;;  %v13357_v4 = vpop.f32.mrb[45].mxu0 }
 0x303   : > { %v2369_v10 = vpop.f32.mrb[40].mxu1  ;;  %v9867_v46 = vpop.eup %9866  ;;  %v3508_v34 = vsel %vm13314_vm12, %v3505_v45, %v3502_v33  ;;  %9872 = vpow2.f32 %v2948_v24  ;;  %v3077_v57 = vadd.f32 1.0, %v13193_v27  ;;  %v2881_v51 = vsel %vm2817_vm1, 0.0, %v13332_v38 }
 0x304   : > { %v13362_v41 = vadd.f32 %v2369_v10, %v13045_v47  ;;  %v2371_v59 = vpop.f32.mrb[41].mxu1  ;;  %v3692_v26 = vmul.f32 0.01, %v3508_v34  ;;  %v3520_v63 = vmul.f32 0.6931472, %v9867_v46  ;;  %vm2832_vm7 = vcmp.gt.f32.partialorder %v13345_v49, 20.0 }
 0x305   : > { %v13369_v53 = vadd.f32 %v2371_v59, %v13045_v47  ;;  %v13371_v29 = vpop.f32.mrb[46].mxu0  ;;  %v13382_v55 = vmul.f32 100.0, %v13348_v50  ;;  %v9869_v44 = vpop.eup %9868  ;;  %v2950_v48 = vmul.f32 1.442695, %v2881_v51  ;;  %9874 = vlog2.f32 %v3077_v57 }
 0x306   : > { %v13378_v45 = vmul.f32 100.0, %v13362_v41  ;;  %v13387_v21 = vsel %vm2860_vm4, %v13151_v36, %v3692_v26  ;;  %v3526_v33 = vsel %vm13326_vm6, %v3523_v23, %v3520_v63  ;;  %v13394_v24 = vpop.f32.mrb[47].mxu0  ;;  %v3509_v34 = vadd.f32 1.0, %v9869_v44 }
 0x307   : > { %19666 = vst [vmem:[#allocation64_spill] sm:$0xff] %v13369_v53  ;;  %v2375_v1 = vpop.f32.mrb[42].mxu1  ;;  %19667 = vst [vmem:[#allocation84_spill] sm:$0xff] %v13382_v55  ;;  %v13392_v3 = vmul.f32 100.0, %v13369_v53  ;;  %v3694_v46 = vmul.f32 0.01, %v3526_v33 }
 0x308   : > { %19668 = vst [vmem:[#allocation65_spill] sm:$0xff] %v13387_v21  ;;  %v2377_v18 = vpop.f32.mrb[43].mxu1  ;;  %v3512_v59 = vmul.f32 -0.5, %v9869_v44  ;;  %vm2818_vm13 = vcmp.gt.f32.partialorder %v13378_v45, 20.0  ;;  %v2896_v36 = vsel %vm2832_vm7, 0.0, %v13345_v49  ;;  %9876 = vlog2.f32 %v3509_v34 }
 0x309   : > { %19669 = vst [vmem:[#allocation68_spill] sm:$0xff] %v13392_v3  ;;  %vm18859_vm4 = vcmp.gt.f32.partialorder %v13392_v3, 20.0  ;;  %v13406_v0 = vsel %vm2862_vm9, %v13182_v58, %v3694_v46  ;;  %v2882_v60 = vsel %vm2818_vm13, 0.0, %v13378_v45  ;;  %vm18903_vm2 = vcmp.gt.f32.partialorder %v13382_v55, 20.0 }
 0x30a   : > { %19670 = vst [vmem:[#allocation33_spill] sm:$0xff] %v13406_v0  ;;  %v13412_v26 = vpop.eup %9870  ;;  %v3513_v51 = vadd.f32 1.0, %v3512_v59  ;;  %v3515_v57 = vand.u32 2147483647, %v9869_v44  ;;  %v2952_v33 = vmul.f32 1.442695, %v2882_v60  ;;  %9878 = vpow2.f32 %v2950_v48 }
 0x30b   : > { %v2381_v23 = vpop.f32.mrb[44].mxu1  ;;  %v3527_v58 = vadd.f32 1.0, %v13412_v26  ;;  %v2883_v54 = vsel %vm18859_vm4, 0.0, %v13392_v3  ;;  %v2980_v46 = vmul.f32 1.442695, %v2896_v36  ;;  %v3530_v34 = vmul.f32 -0.5, %v13412_v26 }
 0x30c   : > { %v13416_v10 = vpop.f32.mrb[45].mxu1  ;;  %9880 = vpow2.f32 %v2952_v33  ;;  %v13424_v40 = vadd.f32 %v2375_v1, %v13053_v6  ;;  %v13427_v59 = vadd.f32 %v2292_v13, %v13105_v25  ;;  %v13434_v48 = vsel %vm2845_vm3, %v13144_v31, %v3677_v17 }
 0x30d   : > { %v13429_v60 = vpop.eup %9872  ;;  %19671 = vst [vmem:[#allocation78_spill] sm:$0xff] %v13434_v48  ;;  %v13436_v63 = vmul.f32 0.01, %v3391_v7  ;;  %9882 = vlog2.f32 %v3527_v58  ;;  %v2897_v36 = vsel %vm18903_vm2, 0.0, %v13382_v55  ;;  %v3514_v1 = vmul.f32 %v9869_v44, %v3513_v51 }
 0x30e   : > { %vm13443_vm9 = vcmp.lt.f32.partialorder %v3515_v57, 0.0004427343  ;;  %v3104_v56 = vadd.f32 1.0, %v13429_v60  ;;  %v2954_v3 = vmul.f32 1.442695, %v2883_v54  ;;  %9884 = vpow2.f32 %v2980_v46 }
 0x30f   : > { %v13441_v33 = vpop.f32.mrb[46].mxu1  ;;  %v3533_v31 = vand.u32 2147483647, %v13412_v26  ;;  %v13452_v17 = vmul.f32 100.0, %v13424_v40  ;;  %v13455_v7 = vadd.f32 %v2377_v18, %v13053_v6  ;;  %v3531_v58 = vadd.f32 1.0, %v3530_v34  ;;  %v13468_v53 = vpop.eup %9874 }
 0x310   : > { %v13448_v37 = vpop.f32.mrb[47].mxu1  ;;  %9886 = vlog2.f32 %v3104_v56  ;;  %v2982_v44 = vmul.f32 1.442695, %v2897_v36  ;;  %v13458_v51 = vmul.f32 100.0, %v13427_v59  ;;  %v3107_v57 = vmul.f32 -0.5, %v13429_v60  ;;  %19676 = vst [vmem:[#allocation69_spill] sm:$0xff] %v13468_v53 }
 0x311   : > { %19674 = vst [vmem:[#allocation91_spill] sm:$0xff] %v13455_v7  ;;  %vm2834_vm3 = vcmp.gt.f32.partialorder %v13452_v17, 20.0  ;;  %v13463_v54 = vmul.f32 100.0, %v13455_v7  ;;  %v13466_v46 = vadd.f32 %v2381_v23, %v13105_v25  ;;  %9888 = vpow2.f32 %v2954_v3 }
 0x312   : > { %v2898_v56 = vsel %vm2834_vm3, 0.0, %v13452_v17  ;;  %vm2848_vm15 = vcmp.gt.f32.partialorder %v13458_v51, 20.0  ;;  %v13476_v18 = vadd.f32 %v13357_v4, %v13105_v25  ;;  %v9877_v36 = vpop.eup %9876  ;;  %vm13497_vm0 = vcmp.lt.f32.partialorder %v3533_v31, 0.0004427343 }
 0x313   : > { %19675 = vst [vmem:[#allocation88_spill] sm:$0xff] %v13463_v54  ;;  %v2984_v7 = vmul.f32 1.442695, %v2898_v56  ;;  %vm18858_vm5 = vcmp.gt.f32.partialorder %v13463_v54, 20.0  ;;  %v2912_v3 = vsel %vm2848_vm15, 0.0, %v13458_v51  ;;  %v13485_v23 = vmul.f32 100.0, %v13466_v46 }
 0x314   : > { %v3511_v50 = vmul.f32 0.6931472, %v9877_v36  ;;  %v2899_v4 = vsel %vm18858_vm5, 0.0, %v13463_v54  ;;  %v3012_v38 = vmul.f32 1.442695, %v2912_v3  ;;  %v13493_v32 = vmul.f32 100.0, %v13476_v18  ;;  %v13495_v56 = vpop.eup %9878 }
 0x315   : > { %19677 = vst [vmem:[#allocation71_spill] sm:$0xff] %v13495_v56  ;;  %v3110_v0 = vand.u32 2147483647, %v13429_v60  ;;  %9890 = vpow2.f32 %v2984_v7  ;;  %vm2850_vm12 = vcmp.gt.f32.partialorder %v13485_v23, 20.0  ;;  %v3532_v21 = vmul.f32 %v13412_v26, %v3531_v58 }
 0x316   : > { %v13478_v34 = vpop.f32.mrb[48].mxu0  ;;  %v13503_v36 = vpop.eup %9880  ;;  %v3517_v54 = vsel %vm13443_vm9, %v3514_v1, %v3511_v50  ;;  %9892 = vpow2.f32 %v3012_v38  ;;  %v2914_v3 = vsel %vm2850_vm12, 0.0, %v13485_v23  ;;  %vm2849_vm6 = vcmp.gt.f32.partialorder %v13493_v32, 20.0 }
 0x317   : > { %v13487_v55 = vpop.f32.mrb[49].mxu0  ;;  %v9883_v19 = vpop.eup %9882  ;;  %v3693_v7 = vmul.f32 0.01, %v3517_v54  ;;  %v3122_v35 = vadd.f32 1.0, %v13503_v36  ;;  %v2986_v2 = vmul.f32 1.442695, %v2899_v4  ;;  %9894 = vpow2.f32 %v2982_v44 }
 0x318   : > { %v3529_v13 = vmul.f32 0.6931472, %v9883_v19  ;;  %v3108_v50 = vadd.f32 1.0, %v3107_v57  ;;  %v13519_v38 = vadd.f32 %v13416_v10, %v13105_v25  ;;  %v13523_v52 = vpop.eup %9884  ;;  %v3016_v26 = vmul.f32 1.442695, %v2914_v3 }
 0x319   : > { %v13511_v31 = vpop.f32.mrb[48].mxu1  ;;  %v13528_v54 = vsel %vm2861_vm11, %v13200_v43, %v3693_v7  ;;  %9896 = vlog2.f32 %v3122_v35  ;;  %v2913_v19 = vsel %vm2849_vm6, 0.0, %v13493_v32  ;;  %v3125_v4 = vmul.f32 -0.5, %v13503_v36 }
 0x31a   : > { %v13513_v56 = vpop.f32.mrb[50].mxu0  ;;  %v13521_v1 = vpop.f32.mrb[49].mxu1  ;;  %19680 = vst [vmem:[#allocation34_spill] sm:$0xff] %v13528_v54  ;;  %v3535_v57 = vsel %vm13497_vm0, %v3532_v21, %v3529_v13  ;;  %v3248_v43 = vadd.f32 1.0, %v13523_v52  ;;  %v3128_v7 = vand.u32 2147483647, %v13503_v36  ;;  %9898 = vpow2.f32 %v2986_v2 }
 0x31b   : > { %v13533_v58 = vpop.f32.mrb[51].mxu0  ;;  %v9887_v44 = vpop.eup %9886  ;;  %v3695_v35 = vmul.f32 0.01, %v3535_v57  ;;  %v3014_v30 = vmul.f32 1.442695, %v2913_v19  ;;  %v13547_v10 = vmul.f32 100.0, %v13519_v38  ;;  %v13557_v13 = vsel %vm2847_vm8, %v13148_v5, %v13436_v63 }
 0x31c   : > { %v3106_v3 = vmul.f32 0.6931472, %v9887_v44  ;;  %v13544_v28 = vpop.eup %9888  ;;  %9900 = vlog2.f32 %v3248_v43  ;;  %19682 = vst [vmem:[#allocation94_spill] sm:$0xff] %v13557_v13  ;;  %v3109_v19 = vmul.f32 %v13429_v60, %v3108_v50  ;;  %vm13569_vm11 = vcmp.lt.f32.partialorder %v3110_v0, 0.0004427343 }
 0x31d   : > { %v13541_v9 = vpop.f32.mrb[50].mxu1  ;;  %19681 = vst [vmem:[#allocation83_spill] sm:$0xff] %v13544_v28  ;;  %v13562_v2 = vsel %vm2863_vm14, %v13237_v11, %v3695_v35  ;;  %9902 = vpow2.f32 %v3016_v26  ;;  %v3251_v5 = vmul.f32 -0.5, %v13523_v52  ;;  %v3126_v63 = vadd.f32 1.0, %v3125_v4 }
 0x31e   : > { %v13549_v39 = vpop.f32.mrb[51].mxu1  ;;  %19683 = vst [vmem:[#allocation92_spill] sm:$0xff] %v13562_v2  ;;  %9904 = vpow2.f32 %v3014_v30  ;;  %v3112_v11 = vsel %vm13569_vm11, %v3109_v19, %v3106_v3  ;;  %vm2851_vm8 = vcmp.gt.f32.partialorder %v13547_v10, 20.0  ;;  %v13581_v60 = vadd.f32 %v13371_v29, %v13138_v8 }
 0x31f   : > { %v13551_v21 = vpop.f32.mrb[52].mxu0  ;;  %v9891_v61 = vpop.eup %9890  ;;  %vm13585_vm14 = vcmp.lt.f32.partialorder %v3128_v7, 0.0004427343  ;;  %v13591_v43 = vadd.f32 %v13441_v33, %v13138_v8  ;;  %v3254_v3 = vand.u32 2147483647, %v13523_v52  ;;  %v2915_v57 = vsel %vm2851_vm8, 0.0, %v13547_v10 }
 0x320   : > { %v13565_v44 = vpop.f32.mrb[53].mxu0  ;;  %v9893_v50 = vpop.eup %9892  ;;  %v3266_v30 = vadd.f32 1.0, %v9891_v61  ;;  %v3269_v35 = vmul.f32 -0.5, %v9891_v61  ;;  %v3648_v13 = vmul.f32 0.01, %v3112_v11  ;;  %v3252_v2 = vadd.f32 1.0, %v3251_v5 }
 0x321   : > { %v13574_v14 = vpop.f32.mrb[52].mxu1  ;;  %v3392_v19 = vadd.f32 1.0, %v9893_v50  ;;  %v3395_v29 = vmul.f32 -0.5, %v9893_v50  ;;  %v13601_v28 = vpop.eup %9894  ;;  %v3018_v48 = vmul.f32 1.442695, %v2915_v57  ;;  %v13606_v62 = vmul.f32 100.0, %v13581_v60 }
 0x322   : > { %v13583_v0 = vpop.f32.mrb[53].mxu1  ;;  %19689 = vst [vmem:[#allocation39_spill] sm:$0xff] %v13601_v28  ;;  %9906 = vlog2.f32 %v3266_v30  ;;  %v3270_v20 = vadd.f32 1.0, %v3269_v35  ;;  %v3272_v42 = vand.u32 2147483647, %v9891_v61  ;;  %v13611_v53 = vmul.f32 100.0, %v13591_v43 }
 0x323   : > { %v13593_v4 = vpop.f32.mrb[54].mxu0  ;;  %v9897_v54 = vpop.eup %9896  ;;  %9908 = vlog2.f32 %v3392_v19  ;;  %v3398_v27 = vand.u32 2147483647, %v9893_v50  ;;  %v13615_v5 = vadd.f32 %v13394_v24, %v13138_v8  ;;  %v3127_v30 = vmul.f32 %v13503_v36, %v3126_v63 }
 0x324   : > { %v13599_v7 = vpop.f32.mrb[55].mxu0  ;;  %9910 = vpow2.f32 %v3018_v48  ;;  %v13617_v57 = vpop.eup %9898  ;;  %v3124_v11 = vmul.f32 0.6931472, %v9897_v54  ;;  %v3396_v35 = vadd.f32 1.0, %v3395_v29  ;;  %vm2864_vm9 = vcmp.gt.f32.partialorder %v13606_v62, 20.0 }
 0x325   : > { %19688 = vst [vmem:[#allocation38_spill] sm:$0xff] %v13599_v7  ;;  %v13603_v33 = vpop.f32.mrb[54].mxu1  ;;  %19691 = vst [vmem:[#allocation89_spill] sm:$0xff] %v13617_v57  ;;  %v3253_v28 = vmul.f32 %v13523_v52, %v3252_v2  ;;  %vm13622_vm0 = vcmp.lt.f32.partialorder %v3254_v3, 0.0004427343  ;;  %v2928_v24 = vsel %vm2864_vm9, 0.0, %v13606_v62  ;;  %v13635_v36 = vsel %vm2816_vm10, %v13298_v12, %v3648_v13 }
 0x326   : > { %v13608_v15 = vpop.f32.mrb[55].mxu1  ;;  %v9901_v19 = vpop.eup %9900  ;;  %vm2866_vm11 = vcmp.gt.f32.partialorder %v13611_v53, 20.0  ;;  %19694 = vst [vmem:[#allocation103_spill] sm:$0xff] %v13635_v36  ;;  %v3271_v63 = vmul.f32 %v9891_v61, %v3270_v20  ;;  %vm13637_vm5 = vcmp.lt.f32.partialorder %v3272_v42, 0.0004427343  ;;  %v13652_v22 = vmul.f32 100.0, %v13615_v5 }
 0x327   : > { %19690 = vst [vmem:[#allocation86_spill] sm:$0xff] %v13608_v15  ;;  %v13630_v57 = vpop.eup %9902  ;;  %v3250_v54 = vmul.f32 0.6931472, %v9901_v19  ;;  %vm13643_vm4 = vcmp.lt.f32.partialorder %v3398_v27, 0.0004427343  ;;  %v2930_v12 = vsel %vm2866_vm11, 0.0, %v13611_v53  ;;  %v3130_v20 = vsel %vm13585_vm14, %v3127_v30, %v3124_v11 }
 0x328   : > { %v13641_v2 = vpop.eup %9904  ;;  %v3410_v29 = vadd.f32 1.0, %v13630_v57  ;;  %v3044_v15 = vmul.f32 1.442695, %v2928_v24  ;;  %v3397_v27 = vmul.f32 %v9893_v50, %v3396_v35  ;;  %v13661_v19 = vadd.f32 %v13448_v37, %v13138_v8 }
 0x329   : > { %v3256_v42 = vsel %vm13622_vm0, %v3253_v28, %v3250_v54  ;;  %v3401_v13 = vadd.f32 1.0, %v13641_v2  ;;  %v13665_v24 = vadd.f32 %v13478_v34, %v13045_v47  ;;  %v3413_v7 = vmul.f32 -0.5, %v13630_v57 }
 0x32a   : > { %v3664_v61 = vmul.f32 0.01, %v3256_v42  ;;  %9912 = vlog2.f32 %v3410_v29  ;;  %v3416_v26 = vand.u32 2147483647, %v13630_v57  ;;  %v3048_v11 = vmul.f32 1.442695, %v2930_v12 }
 0x32b   : > { %9914 = vlog2.f32 %v3401_v13  ;;  %v3650_v30 = vmul.f32 0.01, %v3130_v20  ;;  %vm2865_vm10 = vcmp.gt.f32.partialorder %v13652_v22, 20.0  ;;  %v3404_v29 = vmul.f32 -0.5, %v13641_v2 }
 0x32c   : > { %v9907_v50 = vpop.eup %9906  ;;  %v13674_v35 = vsel %vm2832_vm7, %v13322_v16, %v3664_v61  ;;  %9916 = vpow2.f32 %v3044_v15  ;;  %v13684_v12 = vadd.f32 %v13511_v31, %v13045_v47  ;;  %v2929_v15 = vsel %vm2865_vm10, 0.0, %v13652_v22 }
 0x32d   : > { %v13669_v28 = vpop.f32.mrb[56].mxu0  ;;  %19699 = vst [vmem:[#allocation99_spill] sm:$0xff] %v13674_v35  ;;  %v9909_v34 = vpop.eup %9908  ;;  %v3268_v54 = vmul.f32 0.6931472, %v9907_v50  ;;  %9918 = vpow2.f32 %v3048_v11  ;;  %v13692_v49 = vmul.f32 100.0, %v13661_v19  ;;  %v3414_v13 = vadd.f32 1.0, %v3413_v7 }
 0x32e   : > { %v13677_v37 = vpop.f32.mrb[57].mxu0  ;;  %v13686_v20 = vpop.eup %9910  ;;  %v3394_v16 = vmul.f32 0.6931472, %v9909_v34  ;;  %vm13696_vm7 = vcmp.lt.f32.partialorder %v3416_v26, 0.0004427343  ;;  %v13706_v11 = vsel %vm2818_vm13, %v13362_v41, %v3650_v30  ;;  %v13726_v3 = vmul.f32 100.0, %v13665_v24 }
 0x32f   : > { %v3274_v42 = vsel %vm13637_vm5, %v3271_v63, %v3268_v54  ;;  %v3419_v31 = vadd.f32 1.0, %v13686_v20  ;;  %19703 = vst [vmem:[#allocation41_spill] sm:$0xff] %v13706_v11  ;;  %v3046_v48 = vmul.f32 1.442695, %v2929_v15  ;;  %vm2867_vm14 = vcmp.gt.f32.partialorder %v13692_v49, 20.0 }
 0x330   : > { %v3666_v34 = vmul.f32 0.01, %v3274_v42  ;;  %v3400_v7 = vsel %vm13643_vm4, %v3397_v27, %v3394_v16  ;;  %v3407_v63 = vand.u32 2147483647, %v13641_v2  ;;  %v3422_v26 = vmul.f32 -0.5, %v13686_v20 }
 0x331   : > { %v13701_v50 = vpop.f32.mrb[58].mxu0  ;;  %9920 = vlog2.f32 %v3419_v31  ;;  %v2931_v45 = vsel %vm2867_vm14, 0.0, %v13692_v49  ;;  %v3405_v16 = vadd.f32 1.0, %v3404_v29  ;;  %v3425_v15 = vand.u32 2147483647, %v13686_v20 }
 0x332   : > { %19702 = vst [vmem:[#allocation75_spill] sm:$0xff] %v13701_v50  ;;  %v13709_v52 = vpop.f32.mrb[56].mxu1  ;;  %v13720_v41 = vsel %vm2834_vm3, %v13424_v40, %v3666_v34  ;;  %9922 = vpow2.f32 %v3046_v48  ;;  %v13728_v27 = vpop.f32.mrb[59].mxu0  ;;  %v3050_v42 = vmul.f32 1.442695, %v2931_v45  ;;  %v3415_v31 = vmul.f32 %v13630_v57, %v3414_v13 }
 0x333   : > { %v13715_v54 = vpop.f32.mrb[57].mxu1  ;;  %19704 = vst [vmem:[#allocation85_spill] sm:$0xff] %v13720_v41  ;;  %19705 = vst [vmem:[#allocation87_spill] sm:$0xff] %v13728_v27  ;;  %v3680_v48 = vmul.f32 0.01, %v3400_v7  ;;  %vm2820_vm13 = vcmp.gt.f32.partialorder %v13726_v3, 20.0  ;;  %v13749_v7 = vadd.f32 %v13487_v55, %v13045_v47  ;;  %v13793_v51 = vadd.f32 %v13513_v56, %v13053_v6 }
 0x334   : > { %v9913_v40 = vpop.eup %9912  ;;  %v13738_v34 = vmul.f32 100.0, %v13684_v12  ;;  %9924 = vpow2.f32 %v3050_v42  ;;  %v2884_v45 = vsel %vm2820_vm13, 0.0, %v13726_v3  ;;  %v3423_v41 = vadd.f32 1.0, %v3422_v26 }
 0x335   : > { %v13733_v17 = vpop.f32.mrb[60].mxu0  ;;  %v9915_v30 = vpop.eup %9914  ;;  %v3412_v29 = vmul.f32 0.6931472, %v9913_v40  ;;  %19709 = vst [vmem:[#allocation102_spill] sm:$0xff] %v13749_v7  ;;  %vm13755_vm3 = vcmp.lt.f32.partialorder %v3407_v63, 0.0004427343  ;;  %v13864_v56 = vadd.f32 %v13533_v58, %v13053_v6  ;;  %v13903_v53 = vadd.f32 %v13549_v39, %v13053_v6 }
 0x336   : > { %19706 = vst [vmem:[#allocation90_spill] sm:$0xff] %v13733_v17  ;;  %v13740_v36 = vpop.f32.mrb[58].mxu1  ;;  %v13742_v35 = vpop.f32.mrb[61].mxu0  ;;  %v3403_v11 = vmul.f32 0.6931472, %v9915_v30  ;;  %vm2822_vm4 = vcmp.gt.f32.partialorder %v13738_v34, 20.0  ;;  %v13922_v39 = vadd.f32 %v13565_v44, %v13105_v25  ;;  %v13953_v49 = vadd.f32 %v13583_v0, %v13105_v25 }
 0x337   : > { %19707 = vst [vmem:[#allocation22_spill] sm:$0xff] %v13740_v36  ;;  %19708 = vst [vmem:[#allocation42_spill] sm:$0xff] %v13742_v35  ;;  %v13751_v57 = vpop.f32.mrb[59].mxu1  ;;  %v9917_v13 = vpop.eup %9916  ;;  %v2956_v17 = vmul.f32 1.442695, %v2884_v45  ;;  %v3406_v35 = vmul.f32 %v13641_v2, %v3405_v16  ;;  %v3418_v26 = vsel %vm13696_vm7, %v3415_v31, %v3412_v29  ;;  %v2886_v2 = vsel %vm2822_vm4, 0.0, %v13738_v34 }
 0x338   : > { %19710 = vst [vmem:[#allocation93_spill] sm:$0xff] %v13751_v57  ;;  %vm13759_vm5 = vcmp.lt.f32.partialorder %v3425_v15, 0.0004427343  ;;  %v3536_v55 = vadd.f32 1.0, %v9917_v13  ;;  %v9919_v57 = vpop.eup %9918  ;;  %v3539_v30 = vmul.f32 -0.5, %v9917_v13  ;;  %v13777_v15 = vsel %vm2848_vm15, %v13427_v59, %v3680_v48  ;;  %19735 = vst [vmem:[#allocation43_spill] sm:$0xff] %v13864_v56 }
 0x339   : > { %v13763_v27 = vpop.f32.mrb[62].mxu0  ;;  %9926 = vpow2.f32 %v2956_v17  ;;  %19718 = vst [vmem:[#allocation76_spill] sm:$0xff] %v13777_v15  ;;  %v3409_v45 = vsel %vm13755_vm3, %v3406_v35, %v3403_v11  ;;  %v13782_v61 = vmul.f32 100.0, %v13749_v7  ;;  %v3424_v31 = vmul.f32 %v13686_v20, %v3423_v41  ;;  %19739 = vst [vmem:[#allocation44_spill] sm:$0xff] %v13903_v53 }
 0x33a   : > { %19715 = vst [vmem:[#allocation96_spill] sm:$0xff] %v13763_v27  ;;  %v13770_v63 = vpop.f32.mrb[60].mxu1  ;;  %v13772_v16 = vpop.f32.mrb[63].mxu0  ;;  %9928 = vlog2.f32 %v3536_v55  ;;  %v3542_v29 = vand.u32 2147483647, %v9917_v13  ;;  %v3554_v27 = vadd.f32 1.0, %v9919_v57  ;;  %v13789_v59 = vadd.f32 %v13521_v1, %v13045_v47 }
 0x33b   : > { %19716 = vst [vmem:[#allocation98_spill] sm:$0xff] %v13770_v63  ;;  %19717 = vst [vmem:[#allocation31_spill] sm:$0xff] %v13772_v16  ;;  %v13784_v17 = vpop.f32.mrb[61].mxu1  ;;  %v3557_v63 = vmul.f32 -0.5, %v9919_v57  ;;  %v9921_v16 = vpop.eup %9920  ;;  %v3682_v36 = vmul.f32 0.01, %v3418_v26 }
 0x33c   : > { %19719 = vst [vmem:[#allocation35_spill] sm:$0xff] %v13782_v61  ;;  %v2960_v50 = vmul.f32 1.442695, %v2886_v2  ;;  %19720 = vst [vmem:[#allocation95_spill] sm:$0xff] %v13789_v59  ;;  %v9923_v35 = vpop.eup %9922  ;;  %v3681_v11 = vmul.f32 0.01, %v3409_v45  ;;  %9930 = vlog2.f32 %v3554_v27 }
 0x33d   : > { %v3421_v48 = vmul.f32 0.6931472, %v9921_v16  ;;  %v3540_v42 = vadd.f32 1.0, %v3539_v30  ;;  %v3545_v41 = vadd.f32 1.0, %v9923_v35  ;;  %v3548_v55 = vmul.f32 -0.5, %v9923_v35 }
 0x33e   : > { %v13795_v20 = vpop.f32.mrb[62].mxu1  ;;  %9932 = vpow2.f32 %v2960_v50  ;;  %vm18888_vm15 = vcmp.gt.f32.partialorder %v13782_v61, 20.0  ;;  %vm13802_vm0 = vcmp.lt.f32.partialorder %v3542_v29, 0.0004427343  ;;  %v3558_v2 = vadd.f32 1.0, %v3557_v63  ;;  %v9925_v30 = vpop.eup %9924 }
 0x33f   : > { %19721 = vst [vmem:[#allocation97_spill] sm:$0xff] %v13795_v20  ;;  %v13798_v26 = vpop.f32.mrb[63].mxu1  ;;  %v3427_v1 = vsel %vm13759_vm5, %v3424_v31, %v3421_v48  ;;  %v3560_v16 = vand.u32 2147483647, %v9919_v57  ;;  %v13809_v27 = vsel %vm2850_vm12, %v13466_v46, %v3682_v36  ;;  %9934 = vlog2.f32 %v3545_v41 }
 0x340   : > { %19722 = vst [vmem:[#allocation100_spill] sm:$0xff] %v13798_v26  ;;  %19725 = vst [vmem:[#allocation101_spill] sm:$0xff] %v13809_v27  ;;  %v3683_v50 = vmul.f32 0.01, %v3427_v1  ;;  %v3551_v45 = vand.u32 2147483647, %v9923_v35  ;;  %v13814_v40 = vsel %vm2849_vm6, %v13476_v18, %v3681_v11  ;;  %v3541_v48 = vmul.f32 %v9917_v13, %v3540_v42 }
 0x341   : > { %19726 = vst [vmem:[#allocation25_spill] sm:$0xff] %v13814_v40  ;;  %v3563_v31 = vadd.f32 1.0, %v9925_v30  ;;  %v2885_v63 = vsel %vm18888_vm15, 0.0, %v13782_v61  ;;  %v13820_v29 = vmul.f32 100.0, %v13789_v59  ;;  %v3549_v23 = vadd.f32 1.0, %v3548_v55 }
 0x342   : > { %v3566_v46 = vmul.f32 -0.5, %v9925_v30  ;;  %v13823_v36 = vmul.f32 100.0, %v13793_v51  ;;  %v3559_v1 = vmul.f32 %v9919_v57, %v3558_v2  ;;  %vm13827_vm12 = vcmp.lt.f32.partialorder %v3560_v16, 0.0004427343 }
 0x343   : > { %19727 = vst [vmem:[#allocation32_spill] sm:$0xff] %v13820_v29  ;;  %v13825_v41 = vpop.eup %9926  ;;  %9936 = vlog2.f32 %v3563_v31  ;;  %v3569_v18 = vand.u32 2147483647, %v9925_v30  ;;  %v13834_v59 = vsel %vm2851_vm8, %v13519_v38, %v3683_v50  ;;  %vm13836_vm6 = vcmp.lt.f32.partialorder %v3551_v45, 0.0004427343 }
 0x344   : > { %v9929_v11 = vpop.eup %9928  ;;  %19730 = vst [vmem:[#allocation48_spill] sm:$0xff] %v13834_v59  ;;  %v3140_v42 = vadd.f32 1.0, %v13825_v41  ;;  %v2958_v55 = vmul.f32 1.442695, %v2885_v63  ;;  %v3143_v2 = vmul.f32 -0.5, %v13825_v41  ;;  %vm18884_vm7 = vcmp.gt.f32.partialorder %v13820_v29, 20.0 }
 0x345   : > { %v3538_v57 = vmul.f32 0.6931472, %v9929_v11  ;;  %vm2836_vm3 = vcmp.gt.f32.partialorder %v13823_v36, 20.0  ;;  %v3550_v16 = vmul.f32 %v9923_v35, %v3549_v23  ;;  %v3567_v31 = vadd.f32 1.0, %v3566_v46 }
 0x346   : > { %9938 = vlog2.f32 %v3140_v42  ;;  %v2900_v38 = vsel %vm2836_vm3, 0.0, %v13823_v36  ;;  %v9931_v10 = vpop.eup %9930  ;;  %vm13849_vm8 = vcmp.lt.f32.partialorder %v3569_v18, 0.0004427343  ;;  %v13855_v11 = vadd.f32 %v13541_v9, %v13053_v6 }
 0x347   : > { %v3544_v50 = vsel %vm13802_vm0, %v3541_v48, %v3538_v57  ;;  %v2988_v63 = vmul.f32 1.442695, %v2900_v38  ;;  %v3556_v46 = vmul.f32 0.6931472, %v9931_v10  ;;  %v2887_v42 = vsel %vm18884_vm7, 0.0, %v13820_v29 }
 0x348   : > { %v13857_v35 = vpop.eup %9932  ;;  %v3696_v23 = vmul.f32 0.01, %v3544_v50  ;;  %v3144_v48 = vadd.f32 1.0, %v3143_v2  ;;  %v3146_v18 = vand.u32 2147483647, %v13825_v41  ;;  %v13876_v50 = vmul.f32 100.0, %v13855_v11 }
 0x349   : > { %v3158_v57 = vadd.f32 1.0, %v13857_v35  ;;  %9940 = vpow2.f32 %v2988_v63  ;;  %v9935_v9 = vpop.eup %9934  ;;  %v3562_v10 = vsel %vm13827_vm12, %v3559_v1, %v3556_v46  ;;  %v13879_v58 = vmul.f32 100.0, %v13864_v56 }
 0x34a   : > { %v13871_v38 = vsel %vm2864_vm9, %v13581_v60, %v3696_v23  ;;  %v3698_v29 = vmul.f32 0.01, %v3562_v10  ;;  %v3547_v63 = vmul.f32 0.6931472, %v9935_v9  ;;  %v3568_v61 = vmul.f32 %v9925_v30, %v3567_v31 }
 0x34b   : > { %19736 = vst [vmem:[#allocation37_spill] sm:$0xff] %v13871_v38  ;;  %19737 = vst [vmem:[#allocation19_spill] sm:$0xff] %v13879_v58  ;;  %9942 = vlog2.f32 %v3158_v57  ;;  %v13883_v62 = vmul.f32 1.442695, %v2887_v42  ;;  %vm2838_vm9 = vcmp.gt.f32.partialorder %v13876_v50, 20.0  ;;  %v3145_v23 = vmul.f32 %v13825_v41, %v3144_v48 }
 0x34c   : > { %9944 = vpow2.f32 %v2958_v55  ;;  %v13889_v1 = vsel %vm2866_vm11, %v13591_v43, %v3698_v29  ;;  %v3553_v32 = vsel %vm13836_vm6, %v3550_v16, %v3547_v63  ;;  %v2902_v30 = vsel %vm2838_vm9, 0.0, %v13876_v50 }
 0x34d   : > { %v9937_v60 = vpop.eup %9936  ;;  %19738 = vst [vmem:[#allocation52_spill] sm:$0xff] %v13889_v1  ;;  %v3697_v31 = vmul.f32 0.01, %v3553_v32  ;;  %v3161_v42 = vmul.f32 -0.5, %v13857_v35  ;;  %v2992_v57 = vmul.f32 1.442695, %v2902_v30  ;;  %v13907_v43 = vadd.f32 %v13551_v21, %v13105_v25 }
 0x34e   : > { %v3565_v46 = vmul.f32 0.6931472, %v9937_v60  ;;  %vm18885_vm11 = vcmp.gt.f32.partialorder %v13879_v58, 20.0  ;;  %v13918_v16 = vadd.f32 %v13574_v14, %v13105_v25  ;;  %vm3147_vm5 = vcmp.lt.f32.partialorder %v3146_v18, 0.0004427343  ;;  %v19755_v21 = vld [vmem:[#allocation61_spill] sm:$0xff] }
 0x34f   : > { %v13912_v41 = vsel %vm2865_vm10, %v13615_v5, %v3697_v31  ;;  %9946 = vpow2.f32 %v2992_v57  ;;  %v3164_v5 = vand.u32 2147483647, %v13857_v35  ;;  %v13928_v22 = vmul.f32 100.0, %v13907_v43 }
 0x350   : > { %v9939_v29 = vpop.eup %9938  ;;  %19740 = vst [vmem:[#allocation56_spill] sm:$0xff] %v13912_v41  ;;  %v3571_v13 = vsel %vm13849_vm8, %v3568_v61, %v3565_v46  ;;  %v13931_v61 = vmul.f32 100.0, %v13918_v16  ;;  %v3162_v10 = vadd.f32 1.0, %v3161_v42  ;;  %v2901_v18 = vsel %vm18885_vm11, 0.0, %v13879_v58 }
 0x351   : > { %v3699_v48 = vmul.f32 0.01, %v3571_v13  ;;  %v3142_v9 = vmul.f32 0.6931472, %v9939_v29  ;;  %v13944_v30 = vmul.f32 100.0, %v13903_v53  ;;  %vm2852_vm10 = vcmp.gt.f32.partialorder %v13928_v22, 20.0 }
 0x352   : > { %vm13957_vm0 = vcmp.lt.f32.partialorder %v3164_v5, 0.0004427343  ;;  %v3163_v29 = vmul.f32 %v13857_v35, %v3162_v10  ;;  %v13962_v13 = vmul.f32 1.442695, %v2901_v18  ;;  %v13980_v18 = vmul.f32 100.0, %v13953_v49 }
 0x353   : > { %v9941_v14 = vpop.eup %9940  ;;  %v13936_v44 = vsel %vm2867_vm14, %v13661_v19, %v3699_v48  ;;  %v3148_v45 = vsel %vm3147_vm5, %v3145_v23, %v3142_v9  ;;  %19742 = vst [vmem:[#allocation45_spill] sm:$0xff] %v13944_v30  ;;  %vm2854_vm14 = vcmp.gt.f32.partialorder %v13931_v61, 20.0  ;;  %v13949_v19 = vmul.f32 100.0, %v13922_v39 }
 0x354   : > { %19741 = vst [vmem:[#allocation62_spill] sm:$0xff] %v13936_v44  ;;  %v3652_v60 = vmul.f32 0.01, %v3148_v45  ;;  %v3284_v32 = vadd.f32 1.0, %v9941_v14  ;;  %v3287_v57 = vmul.f32 -0.5, %v9941_v14  ;;  %v2916_v48 = vsel %vm2852_vm10, 0.0, %v13928_v22 }
 0x355   : > { %v9943_v31 = vpop.eup %9942  ;;  %v2918_v0 = vsel %vm2854_vm14, 0.0, %v13931_v61  ;;  %v3290_v5 = vand.u32 2147483647, %v9941_v14  ;;  %vm18871_vm12 = vcmp.gt.f32.partialorder %v13944_v30, 20.0  ;;  %v3020_v45 = vmul.f32 1.442695, %v2916_v48 }
 0x356   : > { %v13955_v23 = vpop.eup %9944  ;;  %v3160_v46 = vmul.f32 0.6931472, %v9943_v31  ;;  %9948 = vlog2.f32 %v3284_v32  ;;  %v13973_v9 = vsel %vm2820_vm13, %v13665_v24, %v3652_v60  ;;  %v3024_v10 = vmul.f32 1.442695, %v2918_v0 }
 0x357   : > { %19743 = vst [vmem:[#allocation21_spill] sm:$0xff] %v13955_v23  ;;  %19746 = vst [vmem:[#allocation23_spill] sm:$0xff] %v13973_v9  ;;  %vm2853_vm6 = vcmp.gt.f32.partialorder %v13949_v19, 20.0  ;;  %v3288_v32 = vadd.f32 1.0, %v3287_v57  ;;  %v13987_v24 = vadd.f32 %v13593_v4, %v13138_v8  ;;  %v13991_v60 = vadd.f32 %v13603_v33, %v13138_v8 }
 0x358   : > { %v3166_v35 = vsel %vm13957_vm0, %v3163_v29, %v3160_v46  ;;  %v2917_v3 = vsel %vm2853_vm6, 0.0, %v13949_v19  ;;  %v2903_v46 = vsel %vm18871_vm12, 0.0, %v13944_v30  ;;  %9950 = vpow2.f32 %v3020_v45 }
 0x359   : > { %v9947_v31 = vpop.eup %9946  ;;  %v3022_v42 = vmul.f32 1.442695, %v2917_v3  ;;  %vm2855_vm13 = vcmp.gt.f32.partialorder %v13980_v18, 20.0  ;;  %v3654_v57 = vmul.f32 0.01, %v3166_v35  ;;  %9952 = vpow2.f32 %v3024_v10  ;;  %v19747_v35 = vld [vmem:[#allocation38_spill] sm:$0xff] }
 0x35a   : > { %v3302_v29 = vadd.f32 1.0, %v9947_v31  ;;  %v3305_v48 = vmul.f32 -0.5, %v9947_v31  ;;  %v2919_v4 = vsel %vm2855_vm13, 0.0, %v13980_v18  ;;  %v14001_v33 = vmul.f32 100.0, %v13987_v24 }
 0x35b   : > { %9954 = vpow2.f32 %v3022_v42  ;;  %v14004_v0 = vmul.f32 100.0, %v13991_v60  ;;  %v3308_v3 = vand.u32 2147483647, %v9947_v31  ;;  %v3026_v55 = vmul.f32 1.442695, %v2919_v4  ;;  %v19748_v42 = vld [vmem:[#allocation86_spill] sm:$0xff] }
 0x35c   : > { %9956 = vlog2.f32 %v3302_v29  ;;  %v3306_v45 = vadd.f32 1.0, %v3305_v48  ;;  %vm2868_vm8 = vcmp.gt.f32.partialorder %v14001_v33, 20.0  ;;  %v14010_v10 = vadd.f32 %v19747_v35, %v13138_v8 }
 0x35d   : > { %vm2870_vm5 = vcmp.gt.f32.partialorder %v14004_v0, 20.0  ;;  %v14014_v63 = vadd.f32 %v19748_v42, %v13138_v8  ;;  %vm14016_vm0 = vcmp.lt.f32.partialorder %v3290_v5, 0.0004427343  ;;  %9958 = vpow2.f32 %v3026_v55 }
 0x35e   : > { %v2932_v29 = vsel %vm2868_vm8, 0.0, %v14001_v33  ;;  %v2934_v48 = vsel %vm2870_vm5, 0.0, %v14004_v0  ;;  %v3289_v35 = vmul.f32 %v9941_v14, %v3288_v32  ;;  %v14029_v5 = vsel %vm2822_vm4, %v13684_v12, %v3654_v57 }
 0x35f   : > { %v3052_v30 = vmul.f32 1.442695, %v2932_v29  ;;  %v3056_v53 = vmul.f32 1.442695, %v2934_v48  ;;  %19751 = vst [vmem:[#allocation55_spill] sm:$0xff] %v14029_v5  ;;  %v14034_v55 = vmul.f32 100.0, %v14010_v10  ;;  %v14048_v12 = vadd.f32 %v13669_v28, %v13045_v47 }
 0x360   : > { %v9949_v2 = vpop.eup %9948  ;;  %v14031_v42 = vmul.f32 1.442695, %v2903_v46  ;;  %v14037_v27 = vmul.f32 100.0, %v14014_v63  ;;  %vm14041_vm12 = vcmp.lt.f32.partialorder %v3308_v3, 0.0004427343  ;;  %v19754_v46 = vld [vmem:[#allocation69_spill] sm:$0xff]  ;;  %v14198_v0 = vadd.f32 %v13709_v52, %v13045_v47 }
 0x361   : > { %v3286_v4 = vmul.f32 0.6931472, %v9949_v2  ;;  %v3307_v2 = vmul.f32 %v9947_v31, %v3306_v45  ;;  %9960 = vpow2.f32 %v3052_v30  ;;  %vm2869_vm4 = vcmp.gt.f32.partialorder %v14034_v55, 20.0  ;;  %v19756_v45 = vld [vmem:[#allocation82_spill] sm:$0xff] }
 0x362   : > { %9962 = vpow2.f32 %v3056_v53  ;;  %v9951_v32 = vpop.eup %9950  ;;  %v14051_v57 = vmul.f32 0.6931472, %v19754_v46  ;;  %v3080_v29 = vmul.f32 -0.5, %v19755_v21  ;;  %v3083_v31 = vand.u32 2147483647, %v19755_v21 }
 0x363   : > { %v3292_v1 = vsel %vm14016_vm0, %v3289_v35, %v3286_v4  ;;  %v14056_v3 = vadd.f32 1.0, %v19756_v45  ;;  %v9953_v30 = vpop.eup %9952  ;;  %v3428_v53 = vadd.f32 1.0, %v9951_v32  ;;  %v3431_v28 = vmul.f32 -0.5, %v9951_v32 }
 0x364   : > { %v3668_v34 = vmul.f32 0.01, %v3292_v1  ;;  %vm2871_vm0 = vcmp.gt.f32.partialorder %v14037_v27, 20.0  ;;  %v3446_v35 = vadd.f32 1.0, %v9953_v30  ;;  %v3449_v46 = vmul.f32 -0.5, %v9953_v30 }
 0x365   : > { %v9955_v48 = vpop.eup %9954  ;;  %v2933_v59 = vsel %vm2869_vm4, 0.0, %v14034_v55  ;;  %9964 = vlog2.f32 %v3428_v53  ;;  %v3432_v58 = vadd.f32 1.0, %v3431_v28  ;;  %v3434_v36 = vand.u32 2147483647, %v9951_v32 }
 0x366   : > { %v14061_v1 = vsel %vm2836_vm3, %v13793_v51, %v3668_v34  ;;  %v9957_v44 = vpop.eup %9956  ;;  %v3437_v51 = vadd.f32 1.0, %v9955_v48  ;;  %9966 = vlog2.f32 %v3446_v35  ;;  %v3452_v56 = vand.u32 2147483647, %v9953_v30 }
 0x367   : > { %19757 = vst [vmem:[#allocation20_spill] sm:$0xff] %v14061_v1  ;;  %v3304_v34 = vmul.f32 0.6931472, %v9957_v44  ;;  %v2935_v7 = vsel %vm2871_vm0, 0.0, %v14037_v27  ;;  %v9959_v15 = vpop.eup %9958  ;;  %v3450_v4 = vadd.f32 1.0, %v3449_v46  ;;  %v3440_v9 = vmul.f32 -0.5, %v9955_v48  ;;  %v14922_v27 = vpop.permute.xlu0 %5279 }
 0x368   : > { %9968 = vlog2.f32 %v3437_v51  ;;  %v3081_v1 = vadd.f32 1.0, %v3080_v29  ;;  %v3443_v40 = vand.u32 2147483647, %v9955_v48  ;;  %v3455_v53 = vadd.f32 1.0, %v9959_v15 }
 0x369   : > { %v3310_v38 = vsel %vm14041_vm12, %v3307_v2, %v3304_v34  ;;  %v3458_v28 = vmul.f32 -0.5, %v9959_v15  ;;  %v3433_v23 = vmul.f32 %v9951_v32, %v3432_v58  ;;  %vm14074_vm3 = vcmp.lt.f32.partialorder %v3434_v36, 0.0004427343 }
 0x36a   : > { %v3670_v41 = vmul.f32 0.01, %v3310_v38  ;;  %vm14078_vm7 = vcmp.lt.f32.partialorder %v3083_v31, 0.0004427343  ;;  %vm14082_vm11 = vcmp.lt.f32.partialorder %v3452_v56, 0.0004427343  ;;  %9970 = vlog2.f32 %v3455_v53 }
 0x36b   : > { %v9961_v46 = vpop.eup %9960  ;;  %v3441_v14 = vadd.f32 1.0, %v3440_v9  ;;  %v3459_v2 = vadd.f32 1.0, %v3458_v28  ;;  %v3054_v29 = vmul.f32 1.442695, %v2933_v59  ;;  %v3461_v58 = vand.u32 2147483647, %v9959_v15 }
 0x36c   : > { %v9963_v34 = vpop.eup %9962  ;;  %v14089_v38 = vsel %vm2838_vm9, %v13855_v11, %v3670_v41  ;;  %v3572_v32 = vadd.f32 1.0, %v9961_v46  ;;  %v3575_v31 = vmul.f32 -0.5, %v9961_v46  ;;  %v3451_v56 = vmul.f32 %v9953_v30, %v3450_v4 }
 0x36d   : > { %19764 = vst [vmem:[#allocation66_spill] sm:$0xff] %v14089_v38  ;;  %vm14093_vm12 = vcmp.lt.f32.partialorder %v3443_v40, 0.0004427343  ;;  %v3082_v9 = vmul.f32 %v19755_v21, %v3081_v1  ;;  %v3578_v59 = vand.u32 2147483647, %v9961_v46  ;;  %v3590_v53 = vadd.f32 1.0, %v9963_v34 }
 0x36e   : > { %9972 = vlog2.f32 %v3572_v32  ;;  %v3593_v28 = vmul.f32 -0.5, %v9963_v34  ;;  %v3442_v50 = vmul.f32 %v9955_v48, %v3441_v14  ;;  %v3460_v11 = vmul.f32 %v9959_v15, %v3459_v2 }
 0x36f   : > { %9974 = vpow2.f32 %v3054_v29  ;;  %v3058_v41 = vmul.f32 1.442695, %v2935_v7  ;;  %v9965_v20 = vpop.eup %9964  ;;  %vm14098_vm9 = vcmp.lt.f32.partialorder %v3461_v58, 0.0004427343  ;;  %v3576_v30 = vadd.f32 1.0, %v3575_v31  ;;  %v19771_v31 = vld [vmem:[#allocation81_spill] sm:$0xff] }
 0x370   : > { %9976 = vlog2.f32 %v3590_v53  ;;  %v3596_v40 = vand.u32 2147483647, %v9963_v34  ;;  %v9967_v4 = vpop.eup %9966  ;;  %v3430_v36 = vmul.f32 0.6931472, %v9965_v20  ;;  %v3085_v21 = vsel %vm14078_vm7, %v3082_v9, %v14051_v57 }
 0x371   : > { %9978 = vpow2.f32 %v3058_v41  ;;  %v3224_v1 = vmul.f32 -0.5, %v19756_v45  ;;  %v3448_v48 = vmul.f32 0.6931472, %v9967_v4  ;;  %vm14106_vm15 = vcmp.lt.f32.partialorder %v3578_v59, 0.0004427343 }
 0x372   : > { %v9969_v15 = vpop.eup %9968  ;;  %v3594_v14 = vadd.f32 1.0, %v3593_v28  ;;  %9980 = vlog2.f32 %v14056_v3  ;;  %v3436_v2 = vsel %vm14074_vm3, %v3433_v23, %v3430_v36  ;;  %v3227_v58 = vand.u32 2147483647, %v19756_v45 }
 0x373   : > { %v3439_v20 = vmul.f32 0.6931472, %v9969_v15  ;;  %v3225_v29 = vadd.f32 1.0, %v3224_v1  ;;  %v3684_v35 = vmul.f32 0.01, %v3436_v2  ;;  %v3454_v57 = vsel %vm14082_vm11, %v3451_v56, %v3448_v48 }
 0x374   : > { %v3645_v32 = vmul.f32 0.01, %v3085_v21  ;;  %v3095_v9 = vadd.f32 1.0, %v19771_v31  ;;  %v9971_v59 = vpop.eup %9970  ;;  %v3686_v53 = vmul.f32 0.01, %v3454_v57  ;;  %v3577_v3 = vmul.f32 %v9961_v46, %v3576_v30  ;;  %v19776_v21 = vld [vmem:[#allocation70_spill] sm:$0xff] }
 0x375   : > { %v3445_v28 = vsel %vm14093_vm12, %v3442_v50, %v3439_v20  ;;  %vm14119_vm7 = vcmp.lt.f32.partialorder %v3596_v40, 0.0004427343  ;;  %v3457_v36 = vmul.f32 0.6931472, %v9971_v59  ;;  %v3595_v41 = vmul.f32 %v9963_v34, %v3594_v14  ;;  %v19779_v30 = vld [vmem:[#allocation28_spill] sm:$0xff]  ;;  %v19780_v40 = vld [vmem:[#allocation30_spill] sm:$0xff] }
 0x376   : > { %v3685_v23 = vmul.f32 0.01, %v3445_v28  ;;  %9982 = vlog2.f32 %v3095_v9  ;;  %v3226_v51 = vmul.f32 %v19756_v45, %v3225_v29  ;;  %vm14124_vm11 = vcmp.lt.f32.partialorder %v3227_v58, 0.0004427343  ;;  %v19800_v28 = vld [vmem:[#allocation36_spill] sm:$0xff] }
 0x377   : > { %v3098_v4 = vmul.f32 -0.5, %v19771_v31  ;;  %v3239_v26 = vadd.f32 1.0, %v19776_v21  ;;  %v14133_v46 = vsel %vm2852_vm10, %v13907_v43, %v3684_v35  ;;  %v14138_v34 = vsel %vm2854_vm14, %v13918_v16, %v3686_v53 }
 0x378   : > { %v9973_v50 = vpop.eup %9972  ;;  %19777 = vst [vmem:[#allocation59_spill] sm:$0xff] %v14133_v46  ;;  %19778 = vst [vmem:[#allocation47_spill] sm:$0xff] %v14138_v34  ;;  %v3463_v45 = vsel %vm14098_vm9, %v3460_v11, %v3457_v36  ;;  %vm19781_vm3 = vcmp.gt.f32.partialorder %v19780_v40, 20.0  ;;  %v14148_v48 = vsel %vm2853_vm6, %v13922_v39, %v3685_v23  ;;  %v3101_v22 = vand.u32 2147483647, %v19771_v31  ;;  %v19859_v46 = vld [vmem:[#allocation39_spill] sm:$0xff] }
 0x379   : > { %v3709_v1 = vsel %vm19781_vm3, %v19779_v30, %v3645_v32  ;;  %v9975_v15 = vpop.eup %9974  ;;  %v3574_v43 = vmul.f32 0.6931472, %v9973_v50  ;;  %9984 = vlog2.f32 %v3239_v26  ;;  %v3687_v16 = vmul.f32 0.01, %v3463_v45  ;;  %v14425_v45 = vld [vmem:[#allocation5 + $0x48] sm:$0xff] }
 0x37a   : > { %v9977_v61 = vpop.eup %9976  ;;  %v3581_v14 = vadd.f32 1.0, %v9975_v15  ;;  %v3584_v2 = vmul.f32 -0.5, %v9975_v15  ;;  %v3242_v8 = vmul.f32 -0.5, %v19776_v21  ;;  %v3099_v58 = vadd.f32 1.0, %v3098_v4 }
 0x37b   : > { %v14152_v11 = vpop.eup %9978  ;;  %v3580_v20 = vsel %vm14106_vm15, %v3577_v3, %v3574_v43  ;;  %v3592_v29 = vmul.f32 0.6931472, %v9977_v61  ;;  %v3245_v39 = vand.u32 2147483647, %v19776_v21  ;;  %v3587_v32 = vand.u32 2147483647, %v9975_v15 }
 0x37c   : > { %v9981_v19 = vpop.eup %9980  ;;  %v3700_v35 = vmul.f32 0.01, %v3580_v20  ;;  %9986 = vlog2.f32 %v3581_v14  ;;  %v3585_v57 = vadd.f32 1.0, %v3584_v2  ;;  %v3599_v59 = vadd.f32 1.0, %v14152_v11  ;;  %v19794_v14 = vld [vmem:[#allocation75_spill] sm:$0xff] }
 0x37d   : > { %v3598_v9 = vsel %vm14119_vm7, %v3595_v41, %v3592_v29  ;;  %v3602_v53 = vmul.f32 -0.5, %v14152_v11  ;;  %vm14161_vm10 = vcmp.lt.f32.partialorder %v3101_v22, 0.0004427343  ;;  %v14168_v7 = vsel %vm2855_vm13, %v13953_v49, %v3687_v16  ;;  %v19791_v22 = vld [vmem:[#allocation57_spill] sm:$0xff] }
 0x37e   : > { %19784 = vst [vmem:[#allocation26_spill] sm:$0xff] %v14168_v7  ;;  %v14173_v3 = vsel %vm2868_vm8, %v13987_v24, %v3700_v35  ;;  %v3702_v44 = vmul.f32 0.01, %v3598_v9  ;;  %v3223_v23 = vmul.f32 0.6931472, %v9981_v19  ;;  %9988 = vlog2.f32 %v3599_v59  ;;  %v19798_v9 = vld [vmem:[#allocation77_spill] sm:$0xff] }
 0x37f   : > { %19785 = vst [vmem:[#allocation72_spill] sm:$0xff] %v14173_v3  ;;  %v3605_v41 = vand.u32 2147483647, %v14152_v11  ;;  %v3100_v4 = vmul.f32 %v19771_v31, %v3099_v58  ;;  %v3586_v18 = vmul.f32 %v9975_v15, %v3585_v57  ;;  %vm14184_vm15 = vcmp.lt.f32.partialorder %v3587_v32, 0.0004427343  ;;  %v19790_v15 = vld [vmem:[#allocation40_spill] sm:$0xff] }
 0x380   : > { %v9983_v26 = vpop.eup %9982  ;;  %v14182_v49 = vsel %vm2870_vm5, %v13991_v60, %v3702_v44  ;;  %v3229_v33 = vsel %vm14124_vm11, %v3226_v51, %v3223_v23  ;;  %v3243_v50 = vadd.f32 1.0, %v3242_v8  ;;  %v3603_v30 = vadd.f32 1.0, %v3602_v53  ;;  %v19797_v32 = vld [vmem:[#allocation73_spill] sm:$0xff]  ;;  %v19801_v44 = vld [vmem:[#allocation63_spill] sm:$0xff] }
 0x381   : > { %19786 = vst [vmem:[#allocation29_spill] sm:$0xff] %v14182_v49  ;;  %v3661_v31 = vmul.f32 0.01, %v3229_v33  ;;  %v3097_v40 = vmul.f32 0.6931472, %v9983_v26  ;;  %v14194_v60 = vmul.f32 100.0, %v14048_v12  ;;  %v14202_v56 = vadd.f32 %v13677_v37, %v13045_v47 }
 0x382   : > { %v3244_v43 = vmul.f32 %v19776_v21, %v3243_v50  ;;  %vm19792_vm14 = vcmp.gt.f32.partialorder %v19791_v22, 20.0  ;;  %v14211_v21 = vadd.f32 %v13715_v54, %v13045_v47  ;;  %v14215_v52 = vadd.f32 %v19794_v14, %v13053_v6  ;;  %v19803_v50 = vld [vmem:[#allocation79_spill] sm:$0xff] }
 0x383   : > { %19789 = vst [vmem:[#allocation24_spill] sm:$0xff] %v14202_v56  ;;  %v9985_v51 = vpop.eup %9984  ;;  %v3725_v61 = vsel %vm19792_vm14, %v19790_v15, %v3661_v31  ;;  %v3103_v16 = vsel %vm14161_vm10, %v3100_v4, %v3097_v40  ;;  %vm2824_vm6 = vcmp.gt.f32.partialorder %v14194_v60, 20.0  ;;  %vm3246_vm13 = vcmp.lt.f32.partialorder %v3245_v39, 0.0004427343  ;;  %v19804_v31 = vld [vmem:[#allocation80_spill] sm:$0xff] }
 0x384   : > { %19793 = vst [vmem:[#allocation49_spill] sm:$0xff] %v14211_v21  ;;  %v9217_v2 = vpack.c.bf16 %v3725_v61, %v3709_v1  ;;  %v3241_v8 = vmul.f32 0.6931472, %v9985_v51  ;;  %v3647_v37 = vmul.f32 0.01, %v3103_v16  ;;  %v2888_v20 = vsel %vm2824_vm6, 0.0, %v14194_v60 }
 0x385   : > { %v14222_v29 = vmul.f32 100.0, %v14198_v0  ;;  %v14225_v47 = vmul.f32 100.0, %v14202_v56  ;;  %v2964_v19 = vmul.f32 1.442695, %v2888_v20  ;;  %v14228_v1 = vmul.f32 100.0, %v14211_v21  ;;  %v14483_v56 = vld [vmem:[#allocation5 + $0x58] sm:$0xff] }
 0x386   : > { %v9987_v54 = vpop.eup %9986  ;;  %9218 = vmatprep.subr.bf16.mxu0 %v9217_v2  ;;  %v3247_v58 = vsel %vm3246_vm13, %v3244_v43, %v3241_v8  ;;  %v14231_v35 = vmul.f32 100.0, %v14215_v52  ;;  %v19799_v59 = vpack.c.bf16 %v19797_v32, %v19798_v9  ;;  %v3604_v53 = vmul.f32 %v14152_v11, %v3603_v30  ;;  %v19807_v8 = vld [vmem:[#allocation50_spill] sm:$0xff] }
 0x387   : > { %19795 = vst [vmem:[#allocation27_spill] sm:$0xff] %v14225_v47  ;;  %19796 = vst [vmem:[#allocation74_spill] sm:$0xff] %v14228_v1  ;;  %v3583_v39 = vmul.f32 0.6931472, %v9987_v54  ;;  %v3663_v57 = vmul.f32 0.01, %v3247_v58  ;;  %9990 = vpow2.f32 %v2964_v19 }
 0x388   : > { %9220 = vmatpush1.bf16.msra.mxu0 %v19799_v59  ;;  %vm2826_vm8 = vcmp.gt.f32.partialorder %v14222_v29, 20.0  ;;  %vm18897_vm5 = vcmp.gt.f32.partialorder %v14225_v47, 20.0  ;;  %vm19802_vm12 = vcmp.gt.f32.partialorder %v19801_v44, 20.0  ;;  %v9989_v26 = vpop.eup %9988  ;;  %vm19805_vm9 = vcmp.gt.f32.partialorder %v19804_v31, 20.0  ;;  %v19810_v58 = vld [vmem:[#allocation87_spill] sm:$0xff]  ;;  %v19815_v9 = vld [vmem:[#allocation90_spill] sm:$0xff] }
 0x389   : > { %v3711_v23 = vsel %vm19802_vm12, %v19800_v28, %v3647_v37  ;;  %v2890_v4 = vsel %vm2826_vm8, 0.0, %v14222_v29  ;;  %v3589_v33 = vsel %vm14184_vm15, %v3586_v18, %v3583_v39  ;;  %v3727_v40 = vsel %vm19805_vm9, %v19803_v50, %v3663_v57  ;;  %v19806_v18 = vld [vmem:[#allocation22_spill] sm:$0xff]  ;;  %v19812_v39 = vld [vmem:[#allocation93_spill] sm:$0xff] }
 0x38a   : > { %v2968_v43 = vmul.f32 1.442695, %v2890_v4  ;;  %v2889_v11 = vsel %vm18897_vm5, 0.0, %v14225_v47  ;;  %v3701_v30 = vmul.f32 0.01, %v3589_v33  ;;  %v9227_v15 = vpack.c.bf16 %v3727_v40, %v3711_v23  ;;  %v19808_v37 = vld [vmem:[#allocation46_spill] sm:$0xff] }
 0x38b   : > { %v3601_v51 = vmul.f32 0.6931472, %v9989_v26  ;;  %vm18891_vm7 = vcmp.gt.f32.partialorder %v14228_v1, 20.0  ;;  %vm3606_vm11 = vcmp.lt.f32.partialorder %v3605_v41, 0.0004427343  ;;  %vm2840_vm3 = vcmp.gt.f32.partialorder %v14231_v35, 20.0 }
 0x38c   : > { %9992 = vpow2.f32 %v2968_v43  ;;  %v14257_v24 = vadd.f32 %v19806_v18, %v13053_v6  ;;  %v14262_v22 = vsel %vm2869_vm4, %v14010_v10, %v3701_v30  ;;  %9228 = vmatprep.subr.bf16.mxu1 %v9227_v15  ;;  %v2966_v16 = vmul.f32 1.442695, %v2889_v11  ;;  %v19820_v28 = vld [vmem:[#allocation34_spill] sm:$0xff]  ;;  %v19823_v4 = vld [vmem:[#allocation92_spill] sm:$0xff]  ;;  %v19826_v43 = vld [vmem:[#allocation65_spill] sm:$0xff] }
 0x38d   : > { %v3607_v61 = vsel %vm3606_vm11, %v3604_v53, %v3601_v51  ;;  %v2904_v14 = vsel %vm2840_vm3, 0.0, %v14231_v35  ;;  %v19809_v20 = vpack.c.bf16 %v19807_v8, %v19808_v37  ;;  %v2891_v10 = vsel %vm18891_vm7, 0.0, %v14228_v1  ;;  %v19821_v44 = vld [vmem:[#allocation78_spill] sm:$0xff]  ;;  %v19827_v11 = vld [vmem:[#allocation51_spill] sm:$0xff]  ;;  %v19829_v51 = vld [vmem:[#allocation33_spill] sm:$0xff] }
 0x38e   : > { %v3703_v2 = vmul.f32 0.01, %v3607_v61  ;;  %v2996_v55 = vmul.f32 1.442695, %v2904_v14  ;;  %v14276_v54 = vmul.f32 100.0, %v14257_v24  ;;  %v14280_v19 = vadd.f32 %v19810_v58, %v13053_v6  ;;  %v19824_v26 = vld [vmem:[#allocation94_spill] sm:$0xff] }
 0x38f   : > { %9230 = vmatpush1.bf16.msra.mxu1 %v19809_v20  ;;  %v14284_v57 = vadd.f32 %v19812_v39, %v13053_v6  ;;  %vm4517_vm4 = vcmask 1044480   ;;  %v14293_v59 = vadd.f32 %v19815_v9, %v13105_v25  ;;  %vm10747_vm15 = vmmov 1   ;;  %v19830_v15 = vld [vmem:[#allocation60_spill] sm:$0xff]  ;;  %v19832_v14 = vld [vmem:[#allocation98_spill] sm:$0xff] }
 0x390   : > { %19811 = vst [vmem:[#allocation11_spill] sm:$0xff] %v14280_v19  ;;  %v14289_v32 = vsel %vm2871_vm0, %v14014_v63, %v3703_v2  ;;  %9994 = vpow2.f32 %v2996_v55  ;;  %vm2842_vm10 = vcmp.gt.f32.partialorder %v14276_v54, 20.0  ;;  %v14300_v6 = vmul.f32 100.0, %v14280_v19  ;;  %vm14302_vm14 = vmpackc.low %vm4517_vm4, %vm10747_vm15  ;;  %v19833_v37 = vld [vmem:[#allocation42_spill] sm:$0xff] }
 0x391   : > { %19813 = vst [vmem:[#allocation12_spill] sm:$0xff] %v14284_v57  ;;  %19814 = vst [vmem:[#allocation13_spill] sm:$0xff] %v14289_v32  ;;  %9996 = vpow2.f32 %v13883_v62  ;;  %v2906_v63 = vsel %vm2842_vm10, 0.0, %v14276_v54  ;;  %v14311_v62 = vmul.f32 100.0, %v14284_v57  ;;  %v19822_v23 = vpack.c.bf16 %v19820_v28, %v19821_v44  ;;  %v14326_v50 = vpop.eup %9990 }
 0x392   : > { %19816 = vst [vmem:[#allocation14_spill] sm:$0xff] %v14300_v6  ;;  %9998 = vpow2.f32 %v13962_v13  ;;  %v19825_v33 = vpack.c.bf16 %v19823_v4, %v19824_v26  ;;  %v14324_v13 = vmul.f32 100.0, %v14293_v59  ;;  %v2970_v31 = vmul.f32 1.442695, %v2891_v10 }
 0x393   : > { %19819 = vst [vmem:[#allocation15_spill] sm:$0xff] %v14311_v62  ;;  %9223 = vmatprep.subr.msk.bf16.mxu0 %vm14302_vm14, %v19822_v23  ;;  %10000 = vpow2.f32 %v14031_v42  ;;  %v3000_v40 = vmul.f32 1.442695, %v2906_v63  ;;  %vm18895_vm0 = vcmp.gt.f32.partialorder %v14300_v6, 20.0  ;;  %v19828_v30 = vpack.c.bf16 %v19826_v43, %v19827_v11 }
 0x394   : > { %9233 = vmatprep.subr.msk.bf16.mxu1 %vm14302_vm14, %v19825_v33  ;;  %v19831_v18 = vpack.c.bf16 %v19829_v51, %v19830_v15  ;;  %v3176_v61 = vadd.f32 1.0, %v14326_v50  ;;  %10002 = vpow2.f32 %v2966_v16  ;;  %v2905_v42 = vsel %vm18895_vm0, 0.0, %v14300_v6 }
 0x395   : > { %9226 = vmatpush1.bf16.msk.msra.mxu0 %vm14302_vm14, %v19828_v30  ;;  %v14346_v2 = vadd.f32 %v19832_v14, %v13105_v25  ;;  %10004 = vpow2.f32 %v3000_v40  ;;  %vm2856_vm13 = vcmp.gt.f32.partialorder %v14324_v13, 20.0  ;;  %vm18889_vm12 = vcmp.gt.f32.partialorder %v14311_v62, 20.0  ;;  %v14388_v40 = vld [vmem:[#allocation5 + $0x40] sm:$0xff] }
 0x396   : > { %9236 = vmatpush1.bf16.msk.msra.mxu1 %vm14302_vm14, %v19831_v18  ;;  %v14349_v8 = vpop.eup %9992  ;;  %10006 = vlog2.f32 %v3176_v61  ;;  %v14354_v20 = vadd.f32 %v19833_v37, %v13105_v25  ;;  %v14358_v16 = vadd.f32 %v13784_v17, %v13105_v25  ;;  %v3179_v10 = vmul.f32 -0.5, %v14326_v50 }
 0x397   : > { %v3182_v55 = vand.u32 2147483647, %v14326_v50  ;;  %v3194_v58 = vadd.f32 1.0, %v14349_v8  ;;  %v2998_v39 = vmul.f32 1.442695, %v2905_v42  ;;  %10008 = vpow2.f32 %v2970_v31 }
 0x398   : > { %v2920_v9 = vsel %vm2856_vm13, 0.0, %v14324_v13  ;;  %v14367_v63 = vmul.f32 100.0, %v14346_v2  ;;  %v2907_v25 = vsel %vm18889_vm12, 0.0, %v14311_v62  ;;  %v14376_v44 = vmul.f32 100.0, %v14354_v20 }
 0x399   : > { %10010 = vlog2.f32 %v3194_v58  ;;  %v3028_v17 = vmul.f32 1.442695, %v2920_v9  ;;  %v14379_v23 = vmul.f32 100.0, %v14358_v16  ;;  %vm4504_vm11 = vcmask 236544  }
 0x39a   : > { %v14372_v28 = vpop.eup %9994  ;;  %vm2858_vm9 = vcmp.gt.f32.partialorder %v14367_v63, 20.0  ;;  %v3180_v26 = vadd.f32 1.0, %v3179_v10  ;;  %vm14383_vm4 = vcmp.lt.f32.partialorder %v3182_v55, 0.0004427343  ;;  %10012 = vpow2.f32 %v2998_v39  ;;  %9052 = vmatmul.mubr.msk.f32.vlgmr.msra.gmra.mrb[64].mxu0 %vm4504_vm11, %v14388_v40  ;;  %9058 = vmatmul.mubr.msk.f32.vlgmr.msra.gmra.mrb[64].mxu1 %vm4504_vm11, %v14388_v40  ;;  %v19837_v10 = vld [vmem:[#allocation67_spill] sm:$0xff]  ;;  %v19838_v55 = vld [vmem:[#allocation96_spill] sm:$0xff] }
 0x39b   : > { %v14381_v4 = vpop.eup %9996  ;;  %v3320_v31 = vadd.f32 1.0, %v14372_v28  ;;  %10014 = vpow2.f32 %v3028_v17  ;;  %v2922_v11 = vsel %vm2858_vm9, 0.0, %v14367_v63  ;;  %vm2857_vm15 = vcmp.gt.f32.partialorder %v14376_v44, 20.0  ;;  %v19839_v39 = vld [vmem:[#allocation97_spill] sm:$0xff] }
 0x39c   : > { %v14394_v43 = vpop.eup %9998  ;;  %vm2859_vm12 = vcmp.gt.f32.partialorder %v14379_v23, 20.0  ;;  %v19836_v30 = vmov 0.0   ;;  %v3197_v15 = vmul.f32 -0.5, %v14349_v8  ;;  %v3002_v18 = vmul.f32 1.442695, %v2907_v25 }
 0x39d   : > { %4636 = vmatprep.mubr.f32.mxu0 %v19836_v30  ;;  %4725 = vmatprep.mubr.f32.mxu1 %v19836_v30  ;;  %v14403_v51 = vpop.eup %10000  ;;  %10016 = vlog2.f32 %v3320_v31  ;;  %v3032_v61 = vmul.f32 1.442695, %v2922_v11  ;;  %v2921_v14 = vsel %vm2857_vm15, 0.0, %v14376_v44  ;;  %v2923_v37 = vsel %vm2859_vm12, 0.0, %v14379_v23 }
 0x39e   : > { %v14406_v42 = vpop.eup %10002  ;;  %v14416_v58 = vadd.f32 %v19838_v55, %v19837_v10  ;;  %v14420_v9 = vadd.f32 %v19839_v39, %v19837_v10  ;;  %v3200_v17 = vand.u32 2147483647, %v14349_v8  ;;  %v3030_v31 = vmul.f32 1.442695, %v2921_v14  ;;  %9053 = vmatmul.mubr.msk.f32.gmra.mrb[66].mxu0 %vm4504_vm11, %v14425_v45  ;;  %9059 = vmatmul.mubr.msk.f32.gmra.mrb[66].mxu1 %vm4504_vm11, %v14425_v45 }
 0x39f   : > { %v14422_v25 = vpop.eup %10004  ;;  %10018 = vpow2.f32 %v3032_v61  ;;  %v3034_v11 = vmul.f32 1.442695, %v2923_v37  ;;  %v3181_v53 = vmul.f32 %v14326_v50, %v3180_v26  ;;  %v3323_v39 = vmul.f32 -0.5, %v14372_v28  ;;  %4642 = vmatprep.mubr.f32.mxu0 %v19836_v30  ;;  %4731 = vmatprep.mubr.f32.mxu1 %v19836_v30  ;;  %v19840_v26 = vld [vmem:[#allocation31_spill] sm:$0xff] }
 0x3a0   : > { %v10007_v55 = vpop.eup %10006  ;;  %v3338_v36 = vadd.f32 1.0, %v14422_v25  ;;  %v14435_v41 = vmul.f32 100.0, %v14416_v58  ;;  %v3341_v14 = vmul.f32 -0.5, %v14422_v25  ;;  %10020 = vpow2.f32 %v3030_v31 }
 0x3a1   : > { %v3178_v61 = vmul.f32 0.6931472, %v10007_v55  ;;  %v14441_v37 = vmul.f32 100.0, %v14420_v9  ;;  %v14443_v62 = vpop.eup %10008  ;;  %v3198_v50 = vadd.f32 1.0, %v3197_v15  ;;  %v14448_v57 = vadd.f32 %v19840_v26, %v19837_v10  ;;  %v14455_v55 = vld [vmem:[#allocation5 + $0x50] sm:$0xff] }
 0x3a2   : > { %10022 = vlog2.f32 %v3338_v36  ;;  %vm2872_vm7 = vcmp.gt.f32.partialorder %v14435_v41, 20.0  ;;  %v3326_v21 = vand.u32 2147483647, %v14372_v28  ;;  %9054 = vmatmul.mubr.msk.f32.gmra.mrb[68].mxu0 %vm4504_vm11, %v14455_v55  ;;  %9060 = vmatmul.mubr.msk.f32.gmra.mrb[68].mxu1 %vm4504_vm11, %v14455_v55  ;;  %v3324_v26 = vadd.f32 1.0, %v3323_v39 }
 0x3a3   : > { %v10011_v1 = vpop.eup %10010  ;;  %10024 = vpow2.f32 %v3034_v11  ;;  %v2936_v31 = vsel %vm2872_vm7, 0.0, %v14435_v41  ;;  %vm2874_vm0 = vcmp.gt.f32.partialorder %v14441_v37, 20.0  ;;  %v3184_v36 = vsel %vm14383_vm4, %v3181_v53, %v3178_v61  ;;  %4648 = vmatprep.mubr.f32.mxu0 %v19836_v30  ;;  %4737 = vmatprep.mubr.f32.mxu1 %v19836_v30 }
 0x3a4   : > { %v3196_v15 = vmul.f32 0.6931472, %v10011_v1  ;;  %v3060_v11 = vmul.f32 1.442695, %v2936_v31  ;;  %v14465_v34 = vpop.eup %10012  ;;  %vm14467_vm5 = vcmp.lt.f32.partialorder %v3200_v17, 0.0004427343  ;;  %v3199_v33 = vmul.f32 %v14349_v8, %v3198_v50 }
 0x3a5   : > { %v3342_v6 = vadd.f32 1.0, %v3341_v14  ;;  %v3344_v19 = vand.u32 2147483647, %v14422_v25  ;;  %v2938_v53 = vsel %vm2874_vm0, 0.0, %v14441_v37  ;;  %v10015_v1 = vpop.eup %10014  ;;  %v14477_v61 = vmul.f32 100.0, %v14448_v57 }
 0x3a6   : > { %10026 = vpow2.f32 %v3060_v11  ;;  %v3064_v39 = vmul.f32 1.442695, %v2938_v53  ;;  %v3656_v17 = vmul.f32 0.01, %v3184_v36  ;;  %vm14479_vm4 = vcmp.lt.f32.partialorder %v3326_v21, 0.0004427343  ;;  %9055 = vmatmul.mubr.msk.f32.gmra.mrb[70].mxu0 %vm4504_vm11, %v14483_v56  ;;  %9061 = vmatmul.mubr.msk.f32.gmra.mrb[70].mxu1 %vm4504_vm11, %v14483_v56 }
 0x3a7   : > { %v10017_v31 = vpop.eup %10016  ;;  %10028 = vpow2.f32 %v3002_v18  ;;  %v3464_v14 = vadd.f32 1.0, %v10015_v1  ;;  %v3202_v8 = vsel %vm14467_vm5, %v3199_v33, %v3196_v15  ;;  %v3325_v36 = vmul.f32 %v14372_v28, %v3324_v26  ;;  %4808 = vmatprep.mubr.f32.mxu0 %v19836_v30  ;;  %4897 = vmatprep.mubr.f32.mxu1 %v19836_v30  ;;  %v19847_v28 = vld [vmem:[#allocation100_spill] sm:$0xff] }
 0x3a8   : > { %v3322_v50 = vmul.f32 0.6931472, %v10017_v31  ;;  %10030 = vpow2.f32 %v3064_v39  ;;  %v3343_v18 = vmul.f32 %v14422_v25, %v3342_v6  ;;  %vm14495_vm2 = vcmp.lt.f32.partialorder %v3344_v19, 0.0004427343  ;;  %v19849_v39 = vld [vmem:[#allocation71_spill] sm:$0xff] }
 0x3a9   : > { %v10019_v21 = vpop.eup %10018  ;;  %10032 = vlog2.f32 %v3464_v14  ;;  %v3467_v53 = vmul.f32 -0.5, %v10015_v1  ;;  %vm2873_vm5 = vcmp.gt.f32.partialorder %v14477_v61, 20.0  ;;  %v14504_v26 = vadd.f32 %v19847_v28, %v19837_v10 }
 0x3aa   : > { %v3328_v49 = vsel %vm14479_vm4, %v3325_v36, %v3322_v50  ;;  %v3482_v15 = vadd.f32 1.0, %v10019_v21  ;;  %v10021_v33 = vpop.eup %10020  ;;  %v14509_v19 = vsel %vm2824_vm6, %v14048_v12, %v3656_v17  ;;  %v3658_v6 = vmul.f32 0.01, %v3202_v8 }
 0x3ab   : > { %19848 = vst [vmem:[#allocation16_spill] sm:$0xff] %v14509_v19  ;;  %v3672_v25 = vmul.f32 0.01, %v3328_v49  ;;  %v3113_v31 = vadd.f32 1.0, %v19849_v39  ;;  %v3470_v47 = vand.u32 2147483647, %v10015_v1 }
 0x3ac   : > { %v10023_v14 = vpop.eup %10022  ;;  %10034 = vlog2.f32 %v3482_v15  ;;  %v3485_v50 = vmul.f32 -0.5, %v10019_v21  ;;  %v3473_v36 = vadd.f32 1.0, %v10021_v33  ;;  %v3468_v60 = vadd.f32 1.0, %v3467_v53 }
 0x3ad   : > { %v14512_v7 = vpop.eup %10024  ;;  %v14517_v10 = vsel %vm2840_vm3, %v14215_v52, %v3672_v25  ;;  %v3340_v28 = vmul.f32 0.6931472, %v10023_v14  ;;  %v2937_v12 = vsel %vm2873_vm5, 0.0, %v14477_v61  ;;  %v14526_v49 = vmul.f32 100.0, %v14504_v26 }
 0x3ae   : > { %19850 = vst [vmem:[#allocation17_spill] sm:$0xff] %v14517_v10  ;;  %10036 = vlog2.f32 %v3473_v36  ;;  %v3491_v8 = vadd.f32 1.0, %v14512_v7  ;;  %v14531_v52 = vsel %vm2826_vm8, %v14198_v0, %v3658_v6  ;;  %v3488_v53 = vand.u32 2147483647, %v10019_v21 }
 0x3af   : > { %19851 = vst [vmem:[#allocation18_spill] sm:$0xff] %v14531_v52  ;;  %v3346_v35 = vsel %vm14495_vm2, %v3343_v18, %v3340_v28  ;;  %v3476_v15 = vmul.f32 -0.5, %v10021_v33  ;;  %v3486_v32 = vadd.f32 1.0, %v3485_v50  ;;  %v3062_v36 = vmul.f32 1.442695, %v2937_v12 }
 0x3b0   : > { %v10027_v25 = vpop.eup %10026  ;;  %v3674_v14 = vmul.f32 0.01, %v3346_v35  ;;  %10038 = vlog2.f32 %v3491_v8  ;;  %v3469_v19 = vmul.f32 %v10015_v1, %v3468_v60  ;;  %vm14537_vm6 = vcmp.lt.f32.partialorder %v3470_v47, 0.0004427343 }
 0x3b1   : > { %v14535_v17 = vpop.eup %10028  ;;  %v3479_v29 = vand.u32 2147483647, %v10021_v33  ;;  %v3608_v0 = vadd.f32 1.0, %v10027_v25  ;;  %v3494_v11 = vmul.f32 -0.5, %v14512_v7  ;;  %10040 = vpow2.f32 %v3062_v36 }
 0x3b2   : > { %v10031_v6 = vpop.eup %10030  ;;  %v14544_v18 = vsel %vm2842_vm10, %v14257_v24, %v3674_v14  ;;  %vm2875_vm2 = vcmp.gt.f32.partialorder %v14526_v49, 20.0  ;;  %vm14550_vm8 = vcmp.lt.f32.partialorder %v3488_v53, 0.0004427343  ;;  %v3477_v28 = vadd.f32 1.0, %v3476_v15 }
 0x3b3   : > { %19854 = vst [vmem:[#allocation38_spill] sm:$0xff] %v14544_v18  ;;  %v10033_v50 = vpop.eup %10032  ;;  %10042 = vlog2.f32 %v3608_v0  ;;  %v3487_v12 = vmul.f32 %v10019_v21, %v3486_v32  ;;  %v3611_v54 = vmul.f32 -0.5, %v10027_v25  ;;  %v3626_v24 = vadd.f32 1.0, %v10031_v6 }
 0x3b4   : > { %v3466_v60 = vmul.f32 0.6931472, %v10033_v50  ;;  %vm14554_vm3 = vcmp.lt.f32.partialorder %v3479_v29, 0.0004427343  ;;  %v3629_v35 = vmul.f32 -0.5, %v10031_v6  ;;  %v2939_v14 = vsel %vm2875_vm2, 0.0, %v14526_v49 }
 0x3b5   : > { %10044 = vlog2.f32 %v3113_v31  ;;  %v3495_v36 = vadd.f32 1.0, %v3494_v11  ;;  %v3497_v1 = vand.u32 2147483647, %v14512_v7  ;;  %v3066_v15 = vmul.f32 1.442695, %v2939_v14  ;;  %v19900_v49 = vld [vmem:[#allocation91_spill] sm:$0xff] }
 0x3b6   : > { %v10035_v53 = vpop.eup %10034  ;;  %10046 = vlog2.f32 %v3626_v24  ;;  %v3472_v32 = vsel %vm14537_vm6, %v3469_v19, %v3466_v60  ;;  %v3478_v29 = vmul.f32 %v10021_v33, %v3477_v28  ;;  %v3614_v0 = vand.u32 2147483647, %v10027_v25 }
 0x3b7   : > { %v3484_v21 = vmul.f32 0.6931472, %v10035_v53  ;;  %v3612_v52 = vadd.f32 1.0, %v3611_v54  ;;  %v3632_v18 = vand.u32 2147483647, %v10031_v6  ;;  %10048 = vpow2.f32 %v3066_v15 }
 0x3b8   : > { %v10037_v50 = vpop.eup %10036  ;;  %v3116_v5 = vmul.f32 -0.5, %v19849_v39  ;;  %v3630_v31 = vadd.f32 1.0, %v3629_v35  ;;  %v3119_v11 = vand.u32 2147483647, %v19849_v39  ;;  %v3257_v3 = vadd.f32 1.0, %v19859_v46 }
 0x3b9   : > { %v3475_v38 = vmul.f32 0.6931472, %v10037_v50  ;;  %v3688_v14 = vmul.f32 0.01, %v3472_v32  ;;  %v3490_v19 = vsel %vm14550_vm8, %v3487_v12, %v3484_v21  ;;  %v3496_v33 = vmul.f32 %v14512_v7, %v3495_v36 }
 0x3ba   : > { %v10039_v24 = vpop.eup %10038  ;;  %vm14570_vm10 = vcmp.lt.f32.partialorder %v3497_v1, 0.0004427343  ;;  %vm14574_vm4 = vcmp.lt.f32.partialorder %v3614_v0, 0.0004427343  ;;  %v3117_v54 = vadd.f32 1.0, %v3116_v5  ;;  %10050 = vlog2.f32 %v3257_v3 }
 0x3bb   : > { %v3493_v28 = vmul.f32 0.6931472, %v10039_v24  ;;  %v10041_v35 = vpop.eup %10040  ;;  %v3481_v53 = vsel %vm14554_vm3, %v3478_v29, %v3475_v38  ;;  %v3613_v15 = vmul.f32 %v10027_v25, %v3612_v52  ;;  %vm14580_vm6 = vcmp.lt.f32.partialorder %v3632_v18, 0.0004427343 }
 0x3bc   : > { %v3260_v7 = vmul.f32 -0.5, %v19859_v46  ;;  %v3690_v12 = vmul.f32 0.01, %v3490_v19  ;;  %v3631_v36 = vmul.f32 %v10031_v6, %v3630_v31  ;;  %v3617_v32 = vadd.f32 1.0, %v10041_v35 }
 0x3bd   : > { %v10043_v1 = vpop.eup %10042  ;;  %vm14585_vm8 = vcmp.lt.f32.partialorder %v3119_v11, 0.0004427343  ;;  %v14592_v5 = vsel %vm2856_vm13, %v14293_v59, %v3688_v14  ;;  %v3620_v3 = vmul.f32 -0.5, %v10041_v35  ;;  %v3263_v52 = vand.u32 2147483647, %v19859_v46  ;;  %v19868_v59 = vld [vmem:[#allocation83_spill] sm:$0xff] }
 0x3be   : > { %v3610_v38 = vmul.f32 0.6931472, %v10043_v1  ;;  %v3689_v18 = vmul.f32 0.01, %v3481_v53  ;;  %v3499_v8 = vsel %vm14570_vm10, %v3496_v33, %v3493_v28  ;;  %10052 = vlog2.f32 %v3617_v32 }
 0x3bf   : > { %v10045_v25 = vpop.eup %10044  ;;  %v3118_v6 = vmul.f32 %v19849_v39, %v3117_v54  ;;  %v3261_v13 = vadd.f32 1.0, %v3260_v7  ;;  %v3131_v31 = vadd.f32 1.0, %v19868_v59  ;;  %v14604_v11 = vsel %vm2858_vm9, %v14346_v2, %v3690_v12  ;;  %v19869_v54 = vld [vmem:[#allocation89_spill] sm:$0xff] }
 0x3c0   : > { %v10047_v29 = vpop.eup %10046  ;;  %v3616_v0 = vsel %vm14574_vm4, %v3613_v15, %v3610_v38  ;;  %v3115_v50 = vmul.f32 0.6931472, %v10045_v25  ;;  %v3623_v19 = vand.u32 2147483647, %v10041_v35  ;;  %v3691_v10 = vmul.f32 0.01, %v3499_v8 }
 0x3c1   : > { %v3704_v24 = vmul.f32 0.01, %v3616_v0  ;;  %v3628_v14 = vmul.f32 0.6931472, %v10047_v29  ;;  %v10049_v33 = vpop.eup %10048  ;;  %v3621_v28 = vadd.f32 1.0, %v3620_v3  ;;  %10054 = vlog2.f32 %v3131_v31  ;;  %v19873_v0 = vld [vmem:[#allocation54_spill] sm:$0xff] }
 0x3c2   : > { %v3121_v39 = vsel %vm14585_vm8, %v3118_v6, %v3115_v50  ;;  %v3635_v2 = vadd.f32 1.0, %v10049_v33  ;;  %v3275_v53 = vadd.f32 1.0, %v19869_v54  ;;  %v14619_v15 = vsel %vm2857_vm15, %v14354_v20, %v3689_v18  ;;  %v19875_v31 = vld [vmem:[#allocation53_spill] sm:$0xff] }
 0x3c3   : > { %v14611_v60 = vsel %vm2872_vm7, %v14416_v58, %v3704_v24  ;;  %v3634_v63 = vsel %vm14580_vm6, %v3631_v36, %v3628_v14  ;;  %v3262_v12 = vmul.f32 %v19859_v46, %v3261_v13  ;;  %vm14624_vm7 = vcmp.lt.f32.partialorder %v3623_v19, 0.0004427343  ;;  %v19876_v24 = vld [vmem:[#allocation84_spill] sm:$0xff] }
 0x3c4   : > { %v9284_v7 = vpack.c.bf16 %v14611_v60, %v14592_v5  ;;  %v3706_v1 = vmul.f32 0.01, %v3634_v63  ;;  %v10051_v41 = vpop.eup %10050  ;;  %10056 = vlog2.f32 %v3635_v2  ;;  %v3638_v47 = vmul.f32 -0.5, %v10049_v33 }
 0x3c5   : > { %vm3264_vm13 = vcmp.lt.f32.partialorder %v3263_v52, 0.0004427343  ;;  %v3259_v20 = vmul.f32 0.6931472, %v10051_v41  ;;  %v3649_v36 = vmul.f32 0.01, %v3121_v39  ;;  %v14637_v46 = vsel %vm2859_vm12, %v14358_v16, %v3691_v10 }
 0x3c6   : > { %v14631_v44 = vsel %vm2874_vm0, %v14420_v9, %v3706_v1  ;;  %v3134_v32 = vmul.f32 -0.5, %v19868_v59  ;;  %v3622_v38 = vmul.f32 %v10041_v35, %v3621_v28  ;;  %10058 = vlog2.f32 %v3275_v53  ;;  %v19872_v9 = vld [vmem:[#allocation21_spill] sm:$0xff] }
 0x3c7   : > { %v9294_v21 = vpack.c.bf16 %v14631_v44, %v14604_v11  ;;  %v3641_v3 = vand.u32 2147483647, %v10049_v33  ;;  %v3265_v52 = vsel %vm3264_vm13, %v3262_v12, %v3259_v20  ;;  %v3137_v37 = vand.u32 2147483647, %v19868_v59 }
 0x3c8   : > { %v3149_v25 = vadd.f32 1.0, %v19872_v9  ;;  %v10053_v18 = vpop.eup %10052  ;;  %v3639_v8 = vadd.f32 1.0, %v3638_v47  ;;  %v3665_v6 = vmul.f32 0.01, %v3265_v52  ;;  %v3278_v29 = vmul.f32 -0.5, %v19869_v54 }
 0x3c9   : > { %v3293_v23 = vadd.f32 1.0, %v14394_v43  ;;  %v3619_v16 = vmul.f32 0.6931472, %v10053_v18  ;;  %v3713_v13 = vsel %vm2817_vm1, %v19873_v0, %v3649_v36  ;;  %v3135_v35 = vadd.f32 1.0, %v3134_v32 }
 0x3ca   : > { %10060 = vlog2.f32 %v3149_v25  ;;  %vm19877_vm0 = vcmp.gt.f32.partialorder %v19876_v24, 20.0  ;;  %v3281_v19 = vand.u32 2147483647, %v19869_v54  ;;  %v3152_v10 = vmul.f32 -0.5, %v19872_v9 }
 0x3cb   : > { %v3729_v14 = vsel %vm19877_vm0, %v19875_v31, %v3665_v6  ;;  %10062 = vlog2.f32 %v3293_v23  ;;  %v10055_v28 = vpop.eup %10054  ;;  %v3625_v39 = vsel %vm14624_vm7, %v3622_v38, %v3619_v16  ;;  %vm14655_vm12 = vcmp.lt.f32.partialorder %v3137_v37, 0.0004427343 }
 0x3cc   : > { %v9237_v63 = vpack.c.bf16 %v3729_v14, %v3713_v13  ;;  %v3155_v53 = vand.u32 2147483647, %v19872_v9  ;;  %v3705_v1 = vmul.f32 0.01, %v3625_v39  ;;  %v3133_v12 = vmul.f32 0.6931472, %v10055_v28 }
 0x3cd   : > { %v3279_v41 = vadd.f32 1.0, %v3278_v29  ;;  %v3296_v47 = vmul.f32 -0.5, %v14394_v43  ;;  %v3640_v20 = vmul.f32 %v10049_v33, %v3639_v8  ;;  %vm14661_vm1 = vcmp.lt.f32.partialorder %v3641_v3, 0.0004427343  ;;  %v19884_v33 = vld [vmem:[#allocation99_spill] sm:$0xff]  ;;  %v19888_v29 = vld [vmem:[#allocation25_spill] sm:$0xff] }
 0x3ce   : > { %9238 = vmatprep.subr.bf16.mxu0 %v9237_v63  ;;  %v3136_v58 = vmul.f32 %v19868_v59, %v3135_v35  ;;  %v3167_v32 = vadd.f32 1.0, %v14381_v4  ;;  %v10057_v38 = vpop.eup %10056  ;;  %v14670_v52 = vsel %vm2873_vm5, %v14448_v57, %v3705_v1  ;;  %vm14672_vm9 = vcmp.lt.f32.partialorder %v3281_v19, 0.0004427343  ;;  %v19885_v3 = vld [vmem:[#allocation103_spill] sm:$0xff]  ;;  %v19887_v57 = vld [vmem:[#allocation56_spill] sm:$0xff]  ;;  %v19892_v28 = vld [vmem:[#allocation37_spill] sm:$0xff] }
 0x3cf   : > { %v19886_v25 = vpack.c.bf16 %v19884_v33, %v19885_v3  ;;  %v3153_v18 = vadd.f32 1.0, %v3152_v10  ;;  %v3311_v8 = vadd.f32 1.0, %v14403_v51  ;;  %v9281_v59 = vpack.c.bf16 %v14670_v52, %v14619_v15  ;;  %v19893_v39 = vld [vmem:[#allocation76_spill] sm:$0xff] }
 0x3d0   : > { %v3637_v6 = vmul.f32 0.6931472, %v10057_v38  ;;  %v3139_v61 = vsel %vm14655_vm12, %v3136_v58, %v3133_v12  ;;  %v19889_v23 = vpack.c.bf16 %v19887_v57, %v19888_v29  ;;  %v3299_v16 = vand.u32 2147483647, %v14394_v43  ;;  %v10059_v0 = vpop.eup %10058  ;;  %v19897_v3 = vld [vmem:[#allocation64_spill] sm:$0xff] }
 0x3d1   : > { %9240 = vmatpush1.bf16.msra.mxu0 %v19886_v25  ;;  %v3280_v50 = vmul.f32 %v19869_v54, %v3279_v41  ;;  %vm14691_vm15 = vcmp.lt.f32.partialorder %v3155_v53, 0.0004427343  ;;  %v3297_v35 = vadd.f32 1.0, %v3296_v47  ;;  %10064 = vlog2.f32 %v3167_v32  ;;  %v19898_v25 = vld [vmem:[#allocation68_spill] sm:$0xff] }
 0x3d2   : > { %9243 = vmatprep.subr.msk.bf16.mxu0 %vm14302_vm14, %v19889_v23  ;;  %v3643_v31 = vsel %vm14661_vm1, %v3640_v20, %v3637_v6  ;;  %v3277_v24 = vmul.f32 0.6931472, %v10059_v0  ;;  %v3170_v14 = vmul.f32 -0.5, %v14381_v4  ;;  %10066 = vlog2.f32 %v3311_v8 }
 0x3d3   : > { %v3707_v19 = vmul.f32 0.01, %v3643_v31  ;;  %v3651_v10 = vmul.f32 0.01, %v3139_v61  ;;  %v19894_v63 = vpack.c.bf16 %v19892_v28, %v19893_v39  ;;  %v3154_v54 = vmul.f32 %v19872_v9, %v3153_v18  ;;  %v19909_v28 = vld [vmem:[#allocation35_spill] sm:$0xff] }
 0x3d4   : > { %v3314_v2 = vmul.f32 -0.5, %v14403_v51  ;;  %v10061_v53 = vpop.eup %10060  ;;  %v3283_v1 = vsel %vm14672_vm9, %v3280_v50, %v3277_v24  ;;  %vm14707_vm5 = vcmp.lt.f32.partialorder %v3299_v16, 0.0004427343  ;;  %v3173_v41 = vand.u32 2147483647, %v14381_v4  ;;  %v19905_v24 = vld [vmem:[#allocation85_spill] sm:$0xff] }
 0x3d5   : > { %9246 = vmatpush1.bf16.msk.msra.mxu0 %vm14302_vm14, %v19894_v63  ;;  %v3185_v47 = vadd.f32 1.0, %v14406_v42  ;;  %v10063_v20 = vpop.eup %10062  ;;  %v14716_v36 = vsel %vm2875_vm2, %v14504_v26, %v3707_v19  ;;  %v3667_v9 = vmul.f32 0.01, %v3283_v1  ;;  %v3151_v58 = vmul.f32 0.6931472, %v10061_v53  ;;  %v19901_v26 = vld [vmem:[#allocation88_spill] sm:$0xff] }
 0x3d6   : > { %v3298_v32 = vmul.f32 %v14394_v43, %v3297_v35  ;;  %v9291_v38 = vpack.c.bf16 %v14716_v36, %v14637_v46  ;;  %v3295_v37 = vmul.f32 0.6931472, %v10063_v20  ;;  %v3171_v33 = vadd.f32 1.0, %v3170_v14  ;;  %v19906_v14 = vld [vmem:[#allocation41_spill] sm:$0xff]  ;;  %v19911_v63 = vld [vmem:[#allocation43_spill] sm:$0xff] }
 0x3d7   : > { %10068 = vlog2.f32 %v3185_v47  ;;  %vm19899_vm3 = vcmp.gt.f32.partialorder %v19898_v25, 20.0  ;;  %vm19902_vm2 = vcmp.gt.f32.partialorder %v19901_v26, 20.0  ;;  %v3157_v43 = vsel %vm14691_vm15, %v3154_v54, %v3151_v58  ;;  %v19912_v54 = vld [vmem:[#allocation19_spill] sm:$0xff]  ;;  %v19915_v47 = vld [vmem:[#allocation48_spill] sm:$0xff] }
 0x3d8   : > { %9064 = vmatmul.mubr.msk.f32.vlgmr.msra.gmra.mrb[72].mxu0 %vm4504_vm11, %v14388_v40  ;;  %v3715_v18 = vsel %vm19899_vm3, %v19897_v3, %v3651_v10  ;;  %v3731_v8 = vsel %vm19902_vm2, %v19900_v49, %v3667_v9  ;;  %v3315_v6 = vadd.f32 1.0, %v3314_v2  ;;  %v3301_v57 = vsel %vm14707_vm5, %v3298_v32, %v3295_v37  ;;  %v19908_v10 = vld [vmem:[#allocation102_spill] sm:$0xff]  ;;  %v19918_v49 = vld [vmem:[#allocation101_spill] sm:$0xff] }
 0x3d9   : > { %4814 = vmatprep.mubr.f32.mxu0 %v19836_v30  ;;  %v9247_v61 = vpack.c.bf16 %v3731_v8, %v3715_v18  ;;  %v3653_v29 = vmul.f32 0.01, %v3157_v43  ;;  %v3329_v23 = vadd.f32 1.0, %v14465_v34  ;;  %v3669_v16 = vmul.f32 0.01, %v3301_v57  ;;  %v19917_v18 = vld [vmem:[#allocation52_spill] sm:$0xff] }
 0x3da   : > { %v3188_v0 = vmul.f32 -0.5, %v14406_v42  ;;  %vm14738_vm10 = vcmp.lt.f32.partialorder %v3173_v41, 0.0004427343  ;;  %v3317_v13 = vand.u32 2147483647, %v14403_v51  ;;  %v3203_v35 = vadd.f32 1.0, %v14443_v62 }
 0x3db   : > { %9248 = vmatprep.subr.bf16.mxu1 %v9247_v61  ;;  %10070 = vlog2.f32 %v3329_v23  ;;  %v10065_v31 = vpop.eup %10064  ;;  %v19907_v19 = vpack.c.bf16 %v19905_v24, %v19906_v14  ;;  %vm19910_vm4 = vcmp.gt.f32.partialorder %v19909_v28, 20.0  ;;  %vm19913_vm6 = vcmp.gt.f32.partialorder %v19912_v54, 20.0  ;;  %v19914_v41 = vld [vmem:[#allocation62_spill] sm:$0xff]  ;;  %v19920_v43 = vld [vmem:[#allocation20_spill] sm:$0xff] }
 0x3dc   : > { %9065 = vmatmul.mubr.msk.f32.gmra.mrb[74].mxu0 %vm4504_vm11, %v14425_v45  ;;  %v3717_v39 = vsel %vm19910_vm4, %v19908_v10, %v3653_v29  ;;  %v3733_v2 = vsel %vm19913_vm6, %v19911_v63, %v3669_v16  ;;  %v3172_v53 = vmul.f32 %v14381_v4, %v3171_v33  ;;  %v3191_v1 = vand.u32 2147483647, %v14406_v42  ;;  %v10067_v12 = vpop.eup %10066  ;;  %v19927_v24 = vld [vmem:[#allocation32_spill] sm:$0xff]  ;;  %v19933_v63 = vld [vmem:[#allocation59_spill] sm:$0xff] }
 0x3dd   : > { %9250 = vmatpush1.bf16.msra.mxu1 %v19907_v19  ;;  %4820 = vmatprep.mubr.f32.mxu0 %v19836_v30  ;;  %v19916_v20 = vpack.c.bf16 %v19914_v41, %v19915_v47  ;;  %v9257_v9 = vpack.c.bf16 %v3733_v2, %v3717_v39  ;;  %v3169_v58 = vmul.f32 0.6931472, %v10065_v31  ;;  %v3316_v32 = vmul.f32 %v14403_v51, %v3315_v6  ;;  %v19921_v6 = vld [vmem:[#allocation23_spill] sm:$0xff]  ;;  %v19929_v19 = vld [vmem:[#allocation44_spill] sm:$0xff] }
 0x3de   : > { %10072 = vlog2.f32 %v3203_v35  ;;  %v3313_v37 = vmul.f32 0.6931472, %v10067_v12  ;;  %v3189_v3 = vadd.f32 1.0, %v3188_v0  ;;  %v3332_v4 = vmul.f32 -0.5, %v14465_v34  ;;  %v19926_v31 = vld [vmem:[#allocation95_spill] sm:$0xff]  ;;  %v19932_v39 = vld [vmem:[#allocation72_spill] sm:$0xff] }
 0x3df   : > { %9253 = vmatprep.subr.msk.bf16.mxu1 %vm14302_vm14, %v19916_v20  ;;  %v3347_v33 = vadd.f32 1.0, %v14535_v17  ;;  %9258 = vmatprep.subr.bf16.mxu0 %v9257_v9  ;;  %v3175_v25 = vsel %vm14738_vm10, %v3172_v53, %v3169_v58  ;;  %vm3318_vm8 = vcmp.lt.f32.partialorder %v3317_v13, 0.0004427343  ;;  %v19919_v26 = vpack.c.bf16 %v19917_v18, %v19918_v49  ;;  %v19938_v18 = vld [vmem:[#allocation13_spill] sm:$0xff]  ;;  %v19939_v49 = vld [vmem:[#allocation26_spill] sm:$0xff]  ;;  %v19948_v13 = vld [vmem:[#allocation47_spill] sm:$0xff] }
 0x3e0   : > { %9066 = vmatmul.mubr.msk.f32.gmra.mrb[76].mxu0 %vm4504_vm11, %v14455_v55  ;;  %v3319_v51 = vsel %vm3318_vm8, %v3316_v32, %v3313_v37  ;;  %v3655_v8 = vmul.f32 0.01, %v3175_v25  ;;  %v19922_v61 = vpack.c.bf16 %v19920_v43, %v19921_v6  ;;  %v3206_v57 = vmul.f32 -0.5, %v14443_v62  ;;  %v19935_v32 = vld [vmem:[#allocation66_spill] sm:$0xff]  ;;  %v19936_v37 = vld [vmem:[#allocation55_spill] sm:$0xff] }
 0x3e1   : > { %9256 = vmatpush1.bf16.msk.msra.mxu1 %vm14302_vm14, %v19919_v26  ;;  %10074 = vlog2.f32 %v3347_v33  ;;  %v10069_v29 = vpop.eup %10068  ;;  %v3671_v23 = vmul.f32 0.01, %v3319_v51  ;;  %4826 = vmatprep.mubr.f32.mxu0 %v19836_v30  ;;  %v19923_v16 = vpack.c.bf16 %v14262_v22, %v14148_v48  ;;  %v3190_v50 = vmul.f32 %v14406_v42, %v3189_v3  ;;  %v19930_v48 = vld [vmem:[#allocation45_spill] sm:$0xff]  ;;  %v19942_v6 = vld [vmem:[#allocation27_spill] sm:$0xff] }
 0x3e2   : > { %9260 = vmatpush1.bf16.msra.mxu0 %v19922_v61  ;;  %v3187_v0 = vmul.f32 0.6931472, %v10069_v29  ;;  %vm14784_vm7 = vcmp.lt.f32.partialorder %v3191_v1, 0.0004427343  ;;  %v3333_v35 = vadd.f32 1.0, %v3332_v4  ;;  %vm19928_vm13 = vcmp.gt.f32.partialorder %v19927_v24, 20.0 }
 0x3e3   : > { %9263 = vmatprep.subr.msk.bf16.mxu0 %vm14302_vm14, %v19923_v16  ;;  %v3719_v14 = vsel %vm19928_vm13, %v19926_v31, %v3655_v8  ;;  %vm19931_vm0 = vcmp.gt.f32.partialorder %v19930_v48, 20.0  ;;  %v3335_v42 = vand.u32 2147483647, %v14465_v34  ;;  %v3350_v10 = vmul.f32 -0.5, %v14535_v17  ;;  %v19945_v29 = vld [vmem:[#allocation14_spill] sm:$0xff]  ;;  %v19951_v48 = vld [vmem:[#allocation16_spill] sm:$0xff] }
 0x3e4   : > { %9070 = vmatmul.mubr.msk.f32.vlgmr.msra.gmra.mrb[72].mxu1 %vm4504_vm11, %v14388_v40  ;;  %v3735_v22 = vsel %vm19931_vm0, %v19929_v19, %v3671_v23  ;;  %9067 = vmatmul.mubr.msk.f32.gmra.mrb[78].mxu0 %vm4504_vm11, %v14483_v56  ;;  %v19934_v54 = vpack.c.bf16 %v19932_v39, %v19933_v63  ;;  %v3193_v2 = vsel %vm14784_vm7, %v3190_v50, %v3187_v0  ;;  %v3207_v53 = vadd.f32 1.0, %v3206_v57  ;;  %v19944_v57 = vld [vmem:[#allocation11_spill] sm:$0xff]  ;;  %v19947_v50 = vld [vmem:[#allocation29_spill] sm:$0xff]  ;;  %v19956_v39 = vld [vmem:[#allocation12_spill] sm:$0xff] }
 0x3e5   : > { %4903 = vmatprep.mubr.f32.mxu1 %v19836_v30  ;;  %v9267_v28 = vpack.c.bf16 %v3735_v22, %v3719_v14  ;;  %v10071_v1 = vpop.eup %10070  ;;  %4986 = vmatprep.mubr.f32.mxu0 %v19836_v30  ;;  %v3209_v12 = vand.u32 2147483647, %v14443_v62  ;;  %v3334_v47 = vmul.f32 %v14465_v34, %v3333_v35  ;;  %vm3336_vm12 = vcmp.lt.f32.partialorder %v3335_v42, 0.0004427343  ;;  %v19953_v42 = vld [vmem:[#allocation49_spill] sm:$0xff]  ;;  %v19957_v63 = vld [vmem:[#allocation15_spill] sm:$0xff] }
 0x3e6   : > { %9266 = vmatpush1.bf16.msk.msra.mxu0 %vm14302_vm14, %v19934_v54  ;;  %v3331_v41 = vmul.f32 0.6931472, %v10071_v1  ;;  %v3657_v9 = vmul.f32 0.01, %v3193_v2  ;;  %v3351_v58 = vadd.f32 1.0, %v3350_v10  ;;  %v19937_v3 = vpack.c.bf16 %v19935_v32, %v19936_v37  ;;  %v19954_v10 = vld [vmem:[#allocation74_spill] sm:$0xff] }
 0x3e7   : > { %9268 = vmatprep.subr.bf16.mxu1 %v9267_v28  ;;  %v3208_v34 = vmul.f32 %v14443_v62, %v3207_v53  ;;  %v3353_v25 = vand.u32 2147483647, %v14535_v17  ;;  %v19940_v26 = vpack.c.bf16 %v19938_v18, %v19939_v49  ;;  %vm3210_vm1 = vcmp.lt.f32.partialorder %v3209_v12, 0.0004427343  ;;  %v19941_v62 = vld [vmem:[#allocation24_spill] sm:$0xff]  ;;  %v19959_v53 = vld [vmem:[#allocation38_spill] sm:$0xff] }
 0x3e8   : > { %v10073_v20 = vpop.eup %10072  ;;  %9071 = vmatmul.mubr.msk.f32.gmra.mrb[74].mxu1 %vm4504_vm11, %v14425_v45  ;;  %v3337_v4 = vsel %vm3336_vm12, %v3334_v47, %v3331_v41  ;;  %vm19943_vm9 = vcmp.gt.f32.partialorder %v19942_v6, 20.0  ;;  %vm19946_vm15 = vcmp.gt.f32.partialorder %v19945_v29, 20.0  ;;  %v3352_v0 = vmul.f32 %v14535_v17, %v3351_v58  ;;  %v19950_v17 = vld [vmem:[#allocation17_spill] sm:$0xff]  ;;  %v19960_v1 = vld [vmem:[#allocation18_spill] sm:$0xff] }
 0x3e9   : > { %9076 = vmatmul.mubr.msk.f32.vlgmr.msra.gmra.mrb[80].mxu0 %vm4504_vm11, %v14388_v40  ;;  %9270 = vmatpush1.bf16.msra.mxu1 %v19937_v3  ;;  %v3205_v33 = vmul.f32 0.6931472, %v10073_v20  ;;  %v3673_v51 = vmul.f32 0.01, %v3337_v4  ;;  %v3721_v61 = vsel %vm19943_vm9, %v19941_v62, %v3657_v9  ;;  %v19949_v35 = vpack.c.bf16 %v19947_v50, %v19948_v13  ;;  %v14965_v3 = vpop.permute.xlu0 %5287 }
 0x3ea   : > { %4909 = vmatprep.mubr.f32.mxu1 %v19836_v30  ;;  %9273 = vmatprep.subr.msk.bf16.mxu1 %vm14302_vm14, %v19940_v26  ;;  %vm3354_vm5 = vcmp.lt.f32.partialorder %v3353_v25, 0.0004427343  ;;  %v19952_v22 = vpack.c.bf16 %v19950_v17, %v19951_v48  ;;  %vm19955_vm3 = vcmp.gt.f32.partialorder %v19954_v10, 20.0  ;;  %vm19958_vm2 = vcmp.gt.f32.partialorder %v19957_v63, 20.0 }
 0x3eb   : > { %4992 = vmatprep.mubr.f32.mxu0 %v19836_v30  ;;  %v10075_v8 = vpop.eup %10074  ;;  %v3211_v43 = vsel %vm3210_vm1, %v3208_v34, %v3205_v33  ;;  %v3737_v23 = vsel %vm19946_vm15, %v19944_v57, %v3673_v51  ;;  %v19961_v12 = vpack.c.bf16 %v19959_v53, %v19960_v1 }
 0x3ec   : > { %9072 = vmatmul.mubr.msk.f32.gmra.mrb[76].mxu1 %vm4504_vm11, %v14455_v55  ;;  %v3349_v16 = vmul.f32 0.6931472, %v10075_v8  ;;  %v9277_v31 = vpack.c.bf16 %v3737_v23, %v3721_v61  ;;  %v3659_v24 = vmul.f32 0.01, %v3211_v43 }
 0x3ed   : > { %9077 = vmatmul.mubr.msk.f32.gmra.mrb[82].mxu0 %vm4504_vm11, %v14425_v45  ;;  %4915 = vmatprep.mubr.f32.mxu1 %v19836_v30 }
 0x3ee   : > { %9276 = vmatpush1.bf16.msk.msra.mxu1 %vm14302_vm14, %v19949_v35  ;;  %v3355_v14 = vsel %vm3354_vm5, %v3352_v0, %v3349_v16  ;;  %4998 = vmatprep.mubr.f32.mxu0 %v19836_v30  ;;  %v3723_v28 = vsel %vm19955_vm3, %v19953_v42, %v3659_v24 }
 0x3ef   : > { %9278 = vmatprep.subr.bf16.mxu0 %v9277_v31  ;;  %v3675_v19 = vmul.f32 0.01, %v3355_v14 }
 0x3f0   : > { %9073 = vmatmul.mubr.msk.f32.gmra.mrb[78].mxu1 %vm4504_vm11, %v14483_v56  ;;  %9280 = vmatpush1.bf16.msra.mxu0 %v19952_v22 }
 0x3f1   : > { %5075 = vmatprep.mubr.f32.mxu1 %v19836_v30  ;;  %v3739_v54 = vsel %vm19958_vm2, %v19956_v39, %v3675_v19  ;;  %9078 = vmatmul.mubr.msk.f32.gmra.mrb[84].mxu0 %vm4504_vm11, %v14455_v55 }
 0x3f2   : > { %v9287_v2 = vpack.c.bf16 %v3739_v54, %v3723_v28  ;;  %5004 = vmatprep.mubr.f32.mxu0 %v19836_v30  ;;  %9283 = vmatprep.subr.msk.bf16.mxu0 %vm14302_vm14, %v9281_v59 }
 0x3f4   : > { %9082 = vmatmul.mubr.msk.f32.vlgmr.msra.gmra.mrb[80].mxu1 %vm4504_vm11, %v14388_v40  ;;  %9288 = vmatprep.subr.bf16.mxu1 %v9287_v2 }
 0x3f5   : > { %5081 = vmatprep.mubr.f32.mxu1 %v19836_v30  ;;  %9290 = vmatpush1.bf16.msra.mxu1 %v19961_v12 }
 0x3f6   : > { %9079 = vmatmul.mubr.msk.f32.gmra.mrb[86].mxu0 %vm4504_vm11, %v14483_v56  ;;  %9293 = vmatprep.subr.msk.bf16.mxu1 %vm14302_vm14, %v9291_v38 }
 0x3f7   : > { %9286 = vmatpush1.bf16.msk.msra.mxu0 %vm14302_vm14, %v9284_v7  ;;  %5164 = vmatprep.mubr.f32.mxu0 %v19836_v30 }
 0x3f8   : > { %9083 = vmatmul.mubr.msk.f32.gmra.mrb[82].mxu1 %vm4504_vm11, %v14425_v45 }
 0x3f9   : > { %5087 = vmatprep.mubr.f32.mxu1 %v19836_v30  ;;  %9296 = vmatpush1.bf16.msk.msra.mxu1 %vm14302_vm14, %v9294_v21 }
 0x3fa   : > { %9088 = vmatmul.mubr.msk.f32.vlgmr.msra.gmra.mrb[88].mxu0 %vm4504_vm11, %v14388_v40 }
 0x3fb   : > { %5170 = vmatprep.mubr.f32.mxu0 %v19836_v30 }
 0x3fc   : > { %9084 = vmatmul.mubr.msk.f32.gmra.mrb[84].mxu1 %vm4504_vm11, %v14455_v55 }
 0x3fd   : > { %5093 = vmatprep.mubr.f32.mxu1 %v19836_v30 }
 0x3fe   : > { %9089 = vmatmul.mubr.msk.f32.gmra.mrb[90].mxu0 %vm4504_vm11, %v14425_v45 }
 0x3ff   : > { %5176 = vmatprep.mubr.f32.mxu0 %v19836_v30 }
 0x400   : > { %9085 = vmatmul.mubr.msk.f32.gmra.mrb[86].mxu1 %vm4504_vm11, %v14483_v56 }
 0x401   : > { %5253 = vmatprep.mubr.f32.mxu1 %v19836_v30 }
 0x402   : > { %9090 = vmatmul.mubr.msk.f32.gmra.mrb[92].mxu0 %vm4504_vm11, %v14455_v55 }
 0x403   : > { %5182 = vmatprep.mubr.f32.mxu0 %v19836_v30 }
 0x404   : > { %9094 = vmatmul.mubr.msk.f32.vlgmr.msra.gmra.mrb[88].mxu1 %vm4504_vm11, %v14388_v40 }
 0x405   : > { %5259 = vmatprep.mubr.f32.mxu1 %v19836_v30 }
 0x406   : > { %9091 = vmatmul.mubr.msk.f32.gmra.mrb[94].mxu0 %vm4504_vm11, %v14483_v56 }
 0x407   : > { %6478 = vmatprep.mubr.f32.mxu0 %v19836_v30 }
 0x408   : > { %9095 = vmatmul.mubr.msk.f32.gmra.mrb[90].mxu1 %vm4504_vm11, %v14425_v45 }
 0x409   : > { %5265 = vmatprep.mubr.f32.mxu1 %v19836_v30 }
 0x40c   : > { %9096 = vmatmul.mubr.msk.f32.gmra.mrb[92].mxu1 %vm4504_vm11, %v14455_v55 }
 0x40d   : > { %5271 = vmatprep.mubr.f32.mxu1 %v19836_v30 }
 0x410   : > { %9097 = vmatmul.mubr.msk.f32.gmra.mrb[94].mxu1 %vm4504_vm11, %v14483_v56  ;;  %v14936_v56 = vpop.permute.xlu1 %5283 }
 0x411   : > { %6567 = vmatprep.mubr.f32.mxu1 %v19836_v30 }
 0x414   : > { %v15035_v2 = vpop.permute.xlu1 %5291 }
 0x415   : > { %19967 = vst [vmem:[#allocation70_spill] sm:$0xff] %v15035_v2 }
 0x46d   : > { %v4632_v40 = vpop.f32.mrb[64].mxu0  ;;  %v4721_v5 = vpop.f32.mrb[64].mxu1 }
 0x46e   : > { %v14925_v11 = vadd.f32 %v14922_v27, %v4632_v40  ;;  %v14928_v45 = vadd.f32 %v14922_v27, %v4721_v5  ;;  %v4634_v60 = vpop.f32.mrb[65].mxu0  ;;  %v4723_v15 = vpop.f32.mrb[65].mxu1 }
 0x46f   : > { %v14931_v55 = vadd.f32 %v14922_v27, %v4634_v60  ;;  %v14934_v7 = vadd.f32 %v14922_v27, %v4723_v15 }
 0x470   : > { %v14939_v44 = vmul.f32 100.0, %v14925_v11  ;;  %v14942_v46 = vmul.f32 100.0, %v14928_v45 }
 0x471   : > { %v14945_v21 = vmul.f32 100.0, %v14931_v55  ;;  %v14948_v52 = vmul.f32 100.0, %v14934_v7  ;;  %v4638_v59 = vpop.f32.mrb[66].mxu0  ;;  %v4727_v36 = vpop.f32.mrb[66].mxu1 }
 0x472   : > { %vm5422_vm14 = vcmp.gt.f32.partialorder %v14939_v44, 20.0  ;;  %vm5424_vm11 = vcmp.gt.f32.partialorder %v14942_v46, 20.0  ;;  %v14953_v38 = vadd.f32 %v14936_v56, %v4638_v59  ;;  %v14956_v41 = vadd.f32 %v14936_v56, %v4727_v36  ;;  %v4640_v47 = vpop.f32.mrb[67].mxu0  ;;  %v4729_v20 = vpop.f32.mrb[67].mxu1 }
 0x473   : > { %v5486_v9 = vsel %vm5422_vm14, 0.0, %v14939_v44  ;;  %v5488_v58 = vsel %vm5424_vm11, 0.0, %v14942_v46  ;;  %vm5423_vm10 = vcmp.gt.f32.partialorder %v14945_v21, 20.0  ;;  %vm5425_vm4 = vcmp.gt.f32.partialorder %v14948_v52, 20.0 }
 0x474   : > { %v5550_v32 = vmul.f32 1.442695, %v5486_v9  ;;  %v5554_v37 = vmul.f32 1.442695, %v5488_v58  ;;  %v14969_v4 = vmul.f32 100.0, %v14953_v38  ;;  %v14972_v33 = vmul.f32 100.0, %v14956_v41 }
 0x475   : > { %v5487_v34 = vsel %vm5423_vm10, 0.0, %v14945_v21  ;;  %v14978_v25 = vadd.f32 %v14936_v56, %v4640_v47  ;;  %v14981_v18 = vadd.f32 %v14936_v56, %v4729_v20  ;;  %v4644_v49 = vpop.f32.mrb[68].mxu0  ;;  %v4733_v26 = vpop.f32.mrb[68].mxu1  ;;  %v5489_v62 = vsel %vm5425_vm4, 0.0, %v14948_v52 }
 0x476   : > { %10076 = vpow2.f32 %v5550_v32  ;;  %vm5438_vm6 = vcmp.gt.f32.partialorder %v14969_v4, 20.0  ;;  %vm5440_vm8 = vcmp.gt.f32.partialorder %v14972_v33, 20.0  ;;  %v14986_v51 = vadd.f32 %v14965_v3, %v4644_v49  ;;  %v4646_v8 = vpop.f32.mrb[69].mxu0  ;;  %v4735_v43 = vpop.f32.mrb[69].mxu1 }
 0x477   : > { %19962 = vst [vmem:[#allocation86_spill] sm:$0xff] %v14981_v18  ;;  %10078 = vpow2.f32 %v5554_v37  ;;  %v5502_v6 = vsel %vm5438_vm6, 0.0, %v14969_v4  ;;  %v5504_v61 = vsel %vm5440_vm8, 0.0, %v14972_v33  ;;  %v14998_v57 = vmul.f32 100.0, %v14978_v25 }
 0x478   : > { %v5582_v29 = vmul.f32 1.442695, %v5502_v6  ;;  %v5586_v23 = vmul.f32 1.442695, %v5504_v61  ;;  %v15001_v16 = vmul.f32 100.0, %v14981_v18  ;;  %v15005_v13 = vmul.f32 100.0, %v14986_v51 }
 0x479   : > { %v4650_v0 = vpop.f32.mrb[70].mxu0  ;;  %v5552_v50 = vmul.f32 1.442695, %v5487_v34  ;;  %vm5439_vm7 = vcmp.gt.f32.partialorder %v14998_v57, 20.0  ;;  %v15008_v35 = vadd.f32 %v14965_v3, %v4733_v26  ;;  %v4739_v31 = vpop.f32.mrb[70].mxu1  ;;  %v15016_v17 = vadd.f32 %v14965_v3, %v4646_v8 }
 0x47a   : > { %19963 = vst [vmem:[#allocation69_spill] sm:$0xff] %v15001_v16  ;;  %v15010_v24 = vpop.f32.mrb[71].mxu0  ;;  %v5556_v14 = vmul.f32 1.442695, %v5489_v62  ;;  %10080 = vpow2.f32 %v5582_v29  ;;  %v5503_v19 = vsel %vm5439_vm7, 0.0, %v14998_v57  ;;  %v15018_v48 = vpop.f32.mrb[71].mxu1  ;;  %v15029_v10 = vadd.f32 %v14965_v3, %v4735_v43 }
 0x47b   : > { %19964 = vst [vmem:[#allocation61_spill] sm:$0xff] %v15016_v17  ;;  %10082 = vpow2.f32 %v5586_v23  ;;  %vm5454_vm13 = vcmp.gt.f32.partialorder %v15005_v13, 20.0  ;;  %vm5441_vm0 = vcmp.gt.f32.partialorder %v15001_v16, 20.0  ;;  %v15026_v42 = vmul.f32 100.0, %v15008_v35 }
 0x47c   : > { %v5518_v22 = vsel %vm5454_vm13, 0.0, %v15005_v13  ;;  %19965 = vst [vmem:[#allocation82_spill] sm:$0xff] %v15029_v10  ;;  %10084 = vpow2.f32 %v5552_v50  ;;  %v5584_v28 = vmul.f32 1.442695, %v5503_v19  ;;  %v15033_v63 = vmul.f32 100.0, %v15016_v17 }
 0x47d   : > { %v5614_v39 = vmul.f32 1.442695, %v5518_v22  ;;  %10086 = vpow2.f32 %v5556_v14  ;;  %vm5456_vm12 = vcmp.gt.f32.partialorder %v15026_v42, 20.0  ;;  %v5505_v53 = vsel %vm5441_vm0, 0.0, %v15001_v16 }
 0x47e   : > { %19966 = vst [vmem:[#allocation81_spill] sm:$0xff] %v15033_v63  ;;  %v5520_v1 = vsel %vm5456_vm12, 0.0, %v15026_v42  ;;  %v15044_v60 = vmul.f32 100.0, %v15029_v10  ;;  %v15047_v15 = vadd.f32 %v15035_v2, %v4650_v0  ;;  %v15050_v36 = vadd.f32 %v15035_v2, %v4739_v31 }
 0x47f   : > { %10088 = vpow2.f32 %v5614_v39  ;;  %v5618_v5 = vmul.f32 1.442695, %v5520_v1  ;;  %v5588_v47 = vmul.f32 1.442695, %v5505_v53  ;;  %vm18917_vm1 = vcmp.gt.f32.partialorder %v15033_v63, 20.0 }
 0x480   : > { %v10077_v54 = vpop.eup %10076  ;;  %19968 = vst [vmem:[#allocation28_spill] sm:$0xff] %v15044_v60  ;;  %10090 = vpow2.f32 %v5584_v28  ;;  %vm18916_vm9 = vcmp.gt.f32.partialorder %v15044_v60, 20.0  ;;  %v15057_v58 = vmul.f32 100.0, %v15047_v15  ;;  %v5519_v49 = vsel %vm18917_vm1, 0.0, %v15033_v63 }
 0x481   : > { %v10079_v12 = vpop.eup %10078  ;;  %v5678_v40 = vadd.f32 1.0, %v10077_v54  ;;  %v5681_v9 = vmul.f32 -0.5, %v10077_v54  ;;  %v5684_v37 = vand.u32 2147483647, %v10077_v54  ;;  %v15066_v26 = vmul.f32 100.0, %v15050_v36 }
 0x482   : > { %v5696_v59 = vadd.f32 1.0, %v10079_v12  ;;  %v5699_v8 = vmul.f32 -0.5, %v10079_v12  ;;  %v5702_v43 = vand.u32 2147483647, %v10079_v12  ;;  %v5521_v61 = vsel %vm18916_vm9, 0.0, %v15044_v60 }
 0x483   : > { %10092 = vlog2.f32 %v5678_v40  ;;  %vm5470_vm15 = vcmp.gt.f32.partialorder %v15057_v58, 20.0  ;;  %v5682_v23 = vadd.f32 1.0, %v5681_v9  ;;  %v5616_v0 = vmul.f32 1.442695, %v5519_v49 }
 0x484   : > { %10094 = vlog2.f32 %v5696_v59  ;;  %v15053_v20 = vpop.eup %10080  ;;  %v5534_v50 = vsel %vm5470_vm15, 0.0, %v15057_v58  ;;  %vm15082_vm5 = vcmp.lt.f32.partialorder %v5684_v37, 0.0004427343  ;;  %vm5472_vm3 = vcmp.gt.f32.partialorder %v15066_v26, 20.0 }
 0x485   : > { %10096 = vpow2.f32 %v5618_v5  ;;  %v15059_v32 = vpop.eup %10082  ;;  %v5822_v34 = vadd.f32 1.0, %v15053_v20  ;;  %v5825_v19 = vmul.f32 -0.5, %v15053_v20  ;;  %v5646_v22 = vmul.f32 1.442695, %v5534_v50 }
 0x486   : > { %v5840_v62 = vadd.f32 1.0, %v15059_v32  ;;  %10098 = vpow2.f32 %v5588_v47  ;;  %v15069_v6 = vpop.eup %10084  ;;  %v5700_v28 = vadd.f32 1.0, %v5699_v8  ;;  %vm15088_vm2 = vcmp.lt.f32.partialorder %v5702_v43, 0.0004427343 }
 0x487   : > { %10100 = vlog2.f32 %v5822_v34  ;;  %v15075_v29 = vpop.eup %10086  ;;  %v15093_v1 = vmul.f32 1.442695, %v5521_v61  ;;  %v5843_v5 = vmul.f32 -0.5, %v15059_v32  ;;  %v5536_v59 = vsel %vm5472_vm3, 0.0, %v15066_v26 }
 0x488   : > { %10102 = vlog2.f32 %v5840_v62  ;;  %v15103_v47 = vadd.f32 %v15035_v2, %v15010_v24  ;;  %v5828_v37 = vand.u32 2147483647, %v15053_v20  ;;  %v5650_v34 = vmul.f32 1.442695, %v5536_v59 }
 0x489   : > { %v15080_v31 = vpop.eup %10088  ;;  %10104 = vpow2.f32 %v5646_v22  ;;  %v15108_v49 = vadd.f32 %v15035_v2, %v15018_v48  ;;  %v5683_v62 = vmul.f32 %v10077_v54, %v5682_v23  ;;  %v5826_v61 = vadd.f32 1.0, %v5825_v19 }
 0x48a   : > { %v5966_v53 = vadd.f32 1.0, %v15080_v31  ;;  %v15095_v40 = vpop.eup %10090  ;;  %19973 = vst [vmem:[#allocation30_spill] sm:$0xff] %v15103_v47  ;;  %v5846_v50 = vand.u32 2147483647, %v15059_v32  ;;  %v5701_v24 = vmul.f32 %v10079_v12, %v5700_v28  ;;  %v15114_v10 = vmul.f32 100.0, %v15103_v47 }
 0x48b   : > { %19974 = vst [vmem:[#allocation40_spill] sm:$0xff] %v15108_v49  ;;  %v5844_v59 = vadd.f32 1.0, %v5843_v5  ;;  %v5969_v23 = vmul.f32 -0.5, %v15080_v31  ;;  %v15125_v12 = vmul.f32 100.0, %v15108_v49  ;;  %v5687_v19 = vadd.f32 1.0, %v15069_v6 }
 0x48c   : > { %10106 = vlog2.f32 %v5966_v53  ;;  %19975 = vst [vmem:[#allocation57_spill] sm:$0xff] %v15114_v10  ;;  %v5827_v14 = vmul.f32 %v15053_v20, %v5826_v61  ;;  %vm15133_vm9 = vcmp.lt.f32.partialorder %v5846_v50, 0.0004427343 }
 0x48d   : > { %v10093_v9 = vpop.eup %10092  ;;  %10108 = vpow2.f32 %v5650_v34  ;;  %19976 = vst [vmem:[#allocation75_spill] sm:$0xff] %v15125_v12  ;;  %v5845_v20 = vmul.f32 %v15059_v32, %v5844_v59  ;;  %v5970_v50 = vadd.f32 1.0, %v5969_v23  ;;  %vm18959_vm1 = vcmp.gt.f32.partialorder %v15125_v12, 20.0 }
 0x48e   : > { %v10095_v8 = vpop.eup %10094  ;;  %v5680_v43 = vmul.f32 0.6931472, %v10093_v9  ;;  %10110 = vpow2.f32 %v5616_v0  ;;  %v5690_v32 = vmul.f32 -0.5, %v15069_v6  ;;  %v5537_v44 = vsel %vm18959_vm1, 0.0, %v15125_v12 }
 0x48f   : > { %v15111_v22 = vpop.eup %10096  ;;  %v5698_v60 = vmul.f32 0.6931472, %v10095_v8  ;;  %v5971_v4 = vmul.f32 %v15080_v31, %v5970_v50  ;;  %v5652_v33 = vmul.f32 1.442695, %v5537_v44 }
 0x490   : > { %v5686_v53 = vsel %vm15082_vm5, %v5683_v62, %v5680_v43  ;;  %v5984_v48 = vadd.f32 1.0, %v15111_v22  ;;  %v15119_v9 = vpop.eup %10098  ;;  %vm15129_vm5 = vcmp.lt.f32.partialorder %v5828_v37, 0.0004427343  ;;  %v5987_v8 = vmul.f32 -0.5, %v15111_v22 }
 0x491   : > { %v5704_v54 = vsel %vm15088_vm2, %v5701_v24, %v5698_v60  ;;  %v10101_v28 = vpop.eup %10100  ;;  %v6254_v39 = vmul.f32 0.01, %v5686_v53  ;;  %vm5471_vm2 = vcmp.gt.f32.partialorder %v15114_v10, 20.0  ;;  %v5972_v37 = vand.u32 2147483647, %v15080_v31 }
 0x492   : > { %10112 = vlog2.f32 %v5984_v48  ;;  %v10103_v60 = vpop.eup %10102  ;;  %v5824_v34 = vmul.f32 0.6931472, %v10101_v28  ;;  %v6256_v43 = vmul.f32 0.01, %v5704_v54  ;;  %v5535_v54 = vsel %vm5471_vm2, 0.0, %v15114_v10 }
 0x493   : > { %v5842_v62 = vmul.f32 0.6931472, %v10103_v60  ;;  %10114 = vlog2.f32 %v5687_v19  ;;  %v10105_v24 = vpop.eup %10104  ;;  %v15153_v28 = vsel %vm5422_vm14, %v14925_v11, %v6254_v39  ;;  %vm15180_vm14 = vcmp.lt.f32.partialorder %v5972_v37, 0.0004427343 }
 0x494   : > { %v5830_v61 = vsel %vm15129_vm5, %v5827_v14, %v5824_v34  ;;  %v5988_v14 = vadd.f32 1.0, %v5987_v8  ;;  %v6110_v19 = vadd.f32 1.0, %v10105_v24  ;;  %v15158_v5 = vsel %vm5424_vm11, %v14928_v45, %v6256_v43 }
 0x495   : > { %v6270_v53 = vmul.f32 0.01, %v5830_v61  ;;  %v5848_v48 = vsel %vm15133_vm9, %v5845_v20, %v5842_v62  ;;  %19981 = vst [vmem:[#allocation73_spill] sm:$0xff] %v15158_v5  ;;  %v5648_v45 = vmul.f32 1.442695, %v5535_v54  ;;  %v6113_v8 = vmul.f32 -0.5, %v10105_v24 }
 0x496   : > { %v10107_v59 = vpop.eup %10106  ;;  %v6272_v23 = vmul.f32 0.01, %v5848_v48  ;;  %10116 = vlog2.f32 %v6110_v19  ;;  %v5989_v20 = vmul.f32 %v15111_v22, %v5988_v14  ;;  %v5691_v48 = vadd.f32 1.0, %v5690_v32 }
 0x497   : > { %v15163_v0 = vsel %vm5438_vm6, %v14953_v38, %v6270_v53  ;;  %v5968_v60 = vmul.f32 0.6931472, %v10107_v59  ;;  %v10109_v11 = vpop.eup %10108  ;;  %v5831_v54 = vadd.f32 1.0, %v15095_v40  ;;  %v5834_v37 = vmul.f32 -0.5, %v15095_v40 }
 0x498   : > { %v9299_v39 = vpack.c.bf16 %v15163_v0, %v15153_v28  ;;  %v15173_v46 = vsel %vm5440_vm8, %v14956_v41, %v6272_v23  ;;  %v15175_v34 = vpop.eup %10110  ;;  %v6128_v43 = vadd.f32 1.0, %v10109_v11  ;;  %v5990_v41 = vand.u32 2147483647, %v15111_v22 }
 0x499   : > { %19982 = vst [vmem:[#allocation77_spill] sm:$0xff] %v15173_v46  ;;  %19983 = vst [vmem:[#allocation36_spill] sm:$0xff] %v15175_v34  ;;  %v5974_v53 = vsel %vm15180_vm14, %v5971_v4, %v5968_v60  ;;  %v6131_v50 = vmul.f32 -0.5, %v10109_v11  ;;  %v6114_v59 = vadd.f32 1.0, %v6113_v8  ;;  %v6116_v23 = vand.u32 2147483647, %v10105_v24 }
 0x49a   : > { %10118 = vlog2.f32 %v6128_v43  ;;  %v5693_v14 = vand.u32 2147483647, %v15069_v6  ;;  %v6286_v19 = vmul.f32 0.01, %v5974_v53  ;;  %vm15191_vm11 = vcmp.lt.f32.partialorder %v5990_v41, 0.0004427343 }
 0x49b   : > { %10120 = vpow2.f32 %v5648_v45  ;;  %v6134_v32 = vand.u32 2147483647, %v10109_v11  ;;  %v5708_v4 = vmul.f32 -0.5, %v15075_v29  ;;  %v6132_v8 = vadd.f32 1.0, %v6131_v50 }
 0x49c   : > { %v10113_v61 = vpop.eup %10112  ;;  %10122 = vlog2.f32 %v5831_v54  ;;  %v5692_v43 = vmul.f32 %v15069_v6, %v5691_v48  ;;  %v5835_v62 = vadd.f32 1.0, %v5834_v37  ;;  %v6115_v41 = vmul.f32 %v10105_v24, %v6114_v59 }
 0x49d   : > { %v5986_v31 = vmul.f32 0.6931472, %v10113_v61  ;;  %v10115_v22 = vpop.eup %10114  ;;  %10124 = vpow2.f32 %v15093_v1  ;;  %v5705_v61 = vadd.f32 1.0, %v15075_v29  ;;  %vm15201_vm6 = vcmp.lt.f32.partialorder %v6116_v23, 0.0004427343 }
 0x49e   : > { %10126 = vpow2.f32 %v5652_v33  ;;  %v5689_v45 = vmul.f32 0.6931472, %v10115_v22  ;;  %vm15205_vm8 = vcmp.lt.f32.partialorder %v5693_v14, 0.0004427343  ;;  %v15213_v54 = vsel %vm5454_vm13, %v14986_v51, %v6286_v19 }
 0x49f   : > { %v5992_v60 = vsel %vm15191_vm11, %v5989_v20, %v5986_v31  ;;  %v5837_v20 = vand.u32 2147483647, %v15095_v40  ;;  %19992 = vst [vmem:[#allocation63_spill] sm:$0xff] %v15213_v54  ;;  %vm15215_vm9 = vcmp.lt.f32.partialorder %v6134_v32, 0.0004427343  ;;  %v5709_v50 = vadd.f32 1.0, %v5708_v4 }
 0x4a0   : > { %v10117_v33 = vpop.eup %10116  ;;  %v6288_v6 = vmul.f32 0.01, %v5992_v60  ;;  %v5695_v24 = vsel %vm15205_vm8, %v5692_v43, %v5689_v45  ;;  %v5849_v37 = vadd.f32 1.0, %v15119_v9  ;;  %v5852_v59 = vmul.f32 -0.5, %v15119_v9 }
 0x4a1   : > { %v6112_v31 = vmul.f32 0.6931472, %v10117_v33  ;;  %v6133_v23 = vmul.f32 %v10109_v11, %v6132_v8  ;;  %v5836_v14 = vmul.f32 %v15095_v40, %v5835_v62  ;;  %10128 = vlog2.f32 %v5705_v61 }
 0x4a2   : > { %v5711_v51 = vand.u32 2147483647, %v15075_v29  ;;  %vm15227_vm13 = vcmp.lt.f32.partialorder %v5837_v20, 0.0004427343  ;;  %v6255_v44 = vmul.f32 0.01, %v5695_v24  ;;  %v15237_v40 = vsel %vm5456_vm12, %v15008_v35, %v6288_v6 }
 0x4a3   : > { %v6118_v22 = vsel %vm15201_vm6, %v6115_v41, %v6112_v31  ;;  %v5855_v32 = vand.u32 2147483647, %v15119_v9  ;;  %19998 = vst [vmem:[#allocation80_spill] sm:$0xff] %v15237_v40  ;;  %v5975_v4 = vadd.f32 1.0, %v15175_v34  ;;  %v15241_v62 = vmul.f32 %v15075_v29, %v5709_v50 }
 0x4a4   : > { %v10119_v13 = vpop.eup %10118  ;;  %v6302_v11 = vmul.f32 0.01, %v6118_v22  ;;  %10130 = vlog2.f32 %v5849_v37  ;;  %v5853_v61 = vadd.f32 1.0, %v5852_v59  ;;  %v5978_v41 = vmul.f32 -0.5, %v15175_v34 }
 0x4a5   : > { %v15232_v60 = vpop.eup %10120  ;;  %v6130_v45 = vmul.f32 0.6931472, %v10119_v13  ;;  %10132 = vlog2.f32 %v5975_v4  ;;  %vm15287_vm12 = vcmp.lt.f32.partialorder %v5711_v51, 0.0004427343 }
 0x4a6   : > { %19997 = vst [vmem:[#allocation79_spill] sm:$0xff] %v15232_v60  ;;  %v10123_v8 = vpop.eup %10122  ;;  %v15249_v35 = vsel %vm5470_vm15, %v15047_v15, %v6302_v11  ;;  %v6319_v15 = vsel %vm5423_vm10, %v14931_v55, %v6255_v44  ;;  %v6119_v50 = vadd.f32 1.0, %v15232_v60  ;;  %v6122_v55 = vmul.f32 -0.5, %v15232_v60 }
 0x4a7   : > { %v15244_v53 = vpop.eup %10124  ;;  %20000 = vst [vmem:[#allocation50_spill] sm:$0xff] %v15249_v35  ;;  %v6136_v42 = vsel %vm15215_vm9, %v6133_v23, %v6130_v45  ;;  %v5833_v29 = vmul.f32 0.6931472, %v10123_v8  ;;  %v5979_v45 = vadd.f32 1.0, %v5978_v41  ;;  %v15314_v41 = vmul.f32 %v15119_v9, %v5853_v61 }
 0x4a8   : > { %19999 = vst [vmem:[#allocation22_spill] sm:$0xff] %v15244_v53  ;;  %v15256_v33 = vpop.eup %10126  ;;  %v6304_v24 = vmul.f32 0.01, %v6136_v42  ;;  %10134 = vlog2.f32 %v6119_v50  ;;  %v15386_v26 = vmul.f32 -0.5, %v15244_v53 }
 0x4a9   : > { %20001 = vst [vmem:[#allocation46_spill] sm:$0xff] %v15256_v33  ;;  %v5839_v48 = vsel %vm15227_vm13, %v5836_v14, %v5833_v29  ;;  %v6123_v29 = vadd.f32 1.0, %v6122_v55  ;;  %20009 = vst [vmem:[#allocation92_spill] sm:$0xff] %v15314_v41 }
 0x4aa   : > { %v15275_v37 = vsel %vm5472_vm3, %v15050_v36, %v6304_v24  ;;  %v6271_v21 = vmul.f32 0.01, %v5839_v48  ;;  %v5993_v24 = vadd.f32 1.0, %v15244_v53  ;;  %vm15336_vm3 = vcmp.lt.f32.partialorder %v5855_v32, 0.0004427343 }
 0x4ab   : > { %v4810_v43 = vpop.f32.mrb[72].mxu0  ;;  %20003 = vst [vmem:[#allocation93_spill] sm:$0xff] %v15275_v37  ;;  %v10129_v4 = vpop.eup %10128 }
 0x4ac   : > { %v15254_v1 = vadd.f32 %v14922_v27, %v4810_v43  ;;  %v4812_v20 = vpop.f32.mrb[73].mxu0  ;;  %v6335_v11 = vsel %vm5439_vm7, %v14978_v25, %v6271_v21  ;;  %v15326_v21 = vmul.f32 %v15175_v34, %v5979_v45  ;;  %v15346_v45 = vmul.f32 %v15232_v60, %v6123_v29 }
 0x4ad   : > { %v15261_v31 = vadd.f32 %v14922_v27, %v4812_v20  ;;  %v9297_v43 = vpack.c.bf16 %v6335_v11, %v6319_v15 }
 0x4ae   : > { %v15267_v58 = vmul.f32 100.0, %v15254_v1  ;;  %v10131_v15 = vpop.eup %10130  ;;  %20011 = vst [vmem:[#allocation65_spill] sm:$0xff] %v15326_v21  ;;  %20016 = vst [vmem:[#allocation60_spill] sm:$0xff] %v15346_v45 }
 0x4af   : > { %20002 = vst [vmem:[#allocation87_spill] sm:$0xff] %v15261_v31  ;;  %v15278_v59 = vmul.f32 100.0, %v15261_v31  ;;  %v4816_v23 = vpop.f32.mrb[74].mxu0  ;;  %9298 = vmatprep.subr.bf16.mxu0 %v9297_v43 }
 0x4b0   : > { %vm5426_vm10 = vcmp.gt.f32.partialorder %v15267_v58, 20.0  ;;  %v15285_v14 = vadd.f32 %v14936_v56, %v4816_v23  ;;  %v4818_v22 = vpop.f32.mrb[75].mxu0  ;;  %v5707_v23 = vmul.f32 0.6931472, %v10129_v4  ;;  %9300 = vmatpush1.bf16.msra.mxu0 %v9299_v39  ;;  %v15348_v4 = vpop.eup %10132 }
 0x4b1   : > { %20004 = vst [vmem:[#allocation90_spill] sm:$0xff] %v15278_v59  ;;  %v5490_v19 = vsel %vm5426_vm10, 0.0, %v15267_v58  ;;  %v15296_v44 = vadd.f32 %v14936_v56, %v4818_v22  ;;  %vm18950_vm15 = vcmp.gt.f32.partialorder %v15278_v59, 20.0  ;;  %20017 = vst [vmem:[#allocation98_spill] sm:$0xff] %v15348_v4 }
 0x4b2   : > { %v5558_v8 = vmul.f32 1.442695, %v5490_v19  ;;  %v15302_v51 = vmul.f32 100.0, %v15285_v14  ;;  %v5491_v61 = vsel %vm18950_vm15, 0.0, %v15278_v59  ;;  %v20012_v19 = vmov 0 }
 0x4b3   : > { %20007 = vst [vmem:[#allocation34_spill] sm:$0xff] %v15296_v44  ;;  %v15306_v42 = vmul.f32 100.0, %v15296_v44  ;;  %v4822_v20 = vpop.f32.mrb[76].mxu0  ;;  %v20013_v19 = vsel %vm15336_vm3, 4294967295, %v20012_v19 }
 0x4b4   : > { %10136 = vpow2.f32 %v5558_v8  ;;  %vm5442_vm7 = vcmp.gt.f32.partialorder %v15302_v51, 20.0  ;;  %v15311_v25 = vadd.f32 %v14965_v3, %v4822_v20  ;;  %v4824_v57 = vpop.f32.mrb[77].mxu0  ;;  %20014 = vst [vmem:[#allocation51_spill] sm:$0xff] %v20013_v19  ;;  %v5560_v20 = vmul.f32 1.442695, %v5491_v61 }
 0x4b5   : > { %20008 = vst [vmem:[#allocation78_spill] sm:$0xff] %v15306_v42  ;;  %v5506_v48 = vsel %vm5442_vm7, 0.0, %v15302_v51  ;;  %v15320_v50 = vadd.f32 %v14965_v3, %v4824_v57  ;;  %vm18945_vm5 = vcmp.gt.f32.partialorder %v15306_v42, 20.0  ;;  %10138 = vlog2.f32 %v5993_v24 }
 0x4b6   : > { %v5590_v55 = vmul.f32 1.442695, %v5506_v48  ;;  %v15332_v22 = vmul.f32 100.0, %v15311_v25  ;;  %v5713_v24 = vsel %vm15287_vm12, %v15241_v62, %v5707_v23  ;;  %v5507_v13 = vsel %vm18945_vm5, 0.0, %v15306_v42  ;;  %v15388_v23 = vpop.eup %10134 }
 0x4b7   : > { %20010 = vst [vmem:[#allocation94_spill] sm:$0xff] %v15320_v50  ;;  %v4899_v0 = vpop.f32.mrb[72].mxu1  ;;  %v15343_v39 = vmul.f32 100.0, %v15320_v50  ;;  %v4828_v11 = vpop.f32.mrb[78].mxu0  ;;  %20021 = vst [vmem:[#allocation97_spill] sm:$0xff] %v15388_v23 }
 0x4b8   : > { %v15351_v9 = vadd.f32 %v14922_v27, %v4899_v0  ;;  %v4901_v32 = vpop.f32.mrb[73].mxu1  ;;  %10140 = vpow2.f32 %v5590_v55  ;;  %vm5458_vm14 = vcmp.gt.f32.partialorder %v15332_v22, 20.0  ;;  %v15355_v8 = vadd.f32 %v15035_v2, %v4828_v11  ;;  %v15357_v43 = vpop.f32.mrb[79].mxu0 }
 0x4b9   : > { %20015 = vst [vmem:[#allocation33_spill] sm:$0xff] %v15343_v39  ;;  %v15360_v57 = vadd.f32 %v14922_v27, %v4901_v32  ;;  %v5522_v29 = vsel %vm5458_vm14, 0.0, %v15332_v22  ;;  %v15374_v11 = vmul.f32 0.6931472, %v10131_v15  ;;  %vm18937_vm11 = vcmp.gt.f32.partialorder %v15343_v39, 20.0 }
 0x4ba   : > { %v15369_v48 = vmul.f32 100.0, %v15351_v9  ;;  %v5622_v55 = vmul.f32 1.442695, %v5522_v29  ;;  %v15372_v0 = vmul.f32 100.0, %v15355_v8  ;;  %v15404_v38 = vmul.f32 0.01, %v5713_v24 }
 0x4bb   : > { %20018 = vst [vmem:[#allocation42_spill] sm:$0xff] %v15360_v57  ;;  %20019 = vst [vmem:[#allocation67_spill] sm:$0xff] %v15374_v11  ;;  %v15377_v61 = vmul.f32 100.0, %v15360_v57  ;;  %v4905_v32 = vpop.f32.mrb[74].mxu1  ;;  %v5523_v57 = vsel %vm18937_vm11, 0.0, %v15343_v39 }
 0x4bc   : > { %v15383_v62 = vpop.f32.mrb[80].mxu0  ;;  %vm5428_vm6 = vcmp.gt.f32.partialorder %v15369_v48, 20.0  ;;  %v15392_v15 = vadd.f32 %v14936_v56, %v4905_v32  ;;  %v4907_v29 = vpop.f32.mrb[75].mxu1  ;;  %10142 = vpow2.f32 %v5622_v55  ;;  %vm5474_vm8 = vcmp.gt.f32.partialorder %v15372_v0, 20.0 }
 0x4bd   : > { %20020 = vst [vmem:[#allocation96_spill] sm:$0xff] %v15377_v61  ;;  %v15395_v6 = vpop.f32.mrb[81].mxu0  ;;  %v5492_v28 = vsel %vm5428_vm6, 0.0, %v15369_v48  ;;  %vm18942_vm9 = vcmp.gt.f32.partialorder %v15377_v61, 20.0  ;;  %v15402_v36 = vadd.f32 %v14936_v56, %v4907_v29  ;;  %10144 = vpow2.f32 %v5560_v20 }
 0x4be   : > { %v15406_v50 = vpop.eup %10136  ;;  %v5562_v32 = vmul.f32 1.442695, %v5492_v28  ;;  %v15409_v55 = vmul.f32 100.0, %v15392_v15  ;;  %v5592_v44 = vmul.f32 1.442695, %v5507_v13  ;;  %v5538_v29 = vsel %vm5474_vm8, 0.0, %v15372_v0 }
 0x4bf   : > { %20022 = vst [vmem:[#allocation31_spill] sm:$0xff] %v15402_v36  ;;  %v5714_v42 = vadd.f32 1.0, %v15406_v50  ;;  %v5493_v20 = vsel %vm18942_vm9, 0.0, %v15377_v61  ;;  %v15427_v24 = vmul.f32 100.0, %v15402_v36  ;;  %v4911_v13 = vpop.f32.mrb[76].mxu1  ;;  %v15431_v59 = vpop.eup %10138  ;;  %v5717_v31 = vmul.f32 -0.5, %v15406_v50 }
 0x4c0   : > { %10146 = vpow2.f32 %v5562_v32  ;;  %vm5444_vm13 = vcmp.gt.f32.partialorder %v15409_v55, 20.0  ;;  %v15429_v39 = vpop.f32.mrb[82].mxu0  ;;  %20024 = vst [vmem:[#allocation71_spill] sm:$0xff] %v15431_v59  ;;  %v5624_v28 = vmul.f32 1.442695, %v5523_v57  ;;  %v4913_v40 = vpop.f32.mrb[77].mxu1  ;;  %v15441_v36 = vadd.f32 %v14965_v3, %v4911_v13 }
 0x4c1   : > { %20023 = vst [vmem:[#allocation100_spill] sm:$0xff] %v15427_v24  ;;  %10148 = vlog2.f32 %v5714_v42  ;;  %v5508_v32 = vsel %vm5444_vm13, 0.0, %v15409_v55  ;;  %v15437_v61 = vpop.f32.mrb[83].mxu0  ;;  %vm18939_vm12 = vcmp.gt.f32.partialorder %v15427_v24, 20.0  ;;  %v5654_v49 = vmul.f32 1.442695, %v5538_v29 }
 0x4c2   : > { %v10141_v37 = vpop.eup %10140  ;;  %v5594_v12 = vmul.f32 1.442695, %v5508_v32  ;;  %v5720_v42 = vand.u32 2147483647, %v15406_v50  ;;  %v5564_v30 = vmul.f32 1.442695, %v5493_v20  ;;  %10150 = vpow2.f32 %v5592_v44 }
 0x4c3   : > { %v5858_v54 = vadd.f32 1.0, %v10141_v37  ;;  %v4917_v35 = vpop.f32.mrb[78].mxu1  ;;  %v5509_v57 = vsel %vm18939_vm12, 0.0, %v15427_v24  ;;  %v15448_v10 = vmul.f32 100.0, %v15441_v36  ;;  %v15451_v32 = vadd.f32 %v14965_v3, %v4913_v40 }
 0x4c4   : > { %10152 = vpow2.f32 %v5594_v12  ;;  %v4919_v13 = vpop.f32.mrb[79].mxu1  ;;  %v15453_v47 = vpop.f32.mrb[84].mxu0  ;;  %v5718_v29 = vadd.f32 1.0, %v5717_v31  ;;  %v5861_v20 = vmul.f32 -0.5, %v10141_v37  ;;  %v15457_v44 = vadd.f32 %v15035_v2, %v15357_v43 }
 0x4c5   : > { %20025 = vst [vmem:[#allocation39_spill] sm:$0xff] %v15451_v32  ;;  %10154 = vlog2.f32 %v5858_v54  ;;  %v15459_v12 = vpop.f32.mrb[85].mxu0  ;;  %vm5460_vm11 = vcmp.gt.f32.partialorder %v15448_v10, 20.0  ;;  %v15465_v24 = vmul.f32 100.0, %v15451_v32  ;;  %v15468_v40 = vadd.f32 %v15035_v2, %v4917_v35 }
 0x4c6   : > { %20026 = vst [vmem:[#allocation83_spill] sm:$0xff] %v15457_v44  ;;  %v15461_v63 = vpop.eup %10142  ;;  %10156 = vpow2.f32 %v5654_v49  ;;  %vm15470_vm12 = vcmp.lt.f32.partialorder %v5720_v42, 0.0004427343  ;;  %v5596_v31 = vmul.f32 1.442695, %v5509_v57  ;;  %v5524_v49 = vsel %vm5460_vm11, 0.0, %v15448_v10 }
 0x4c7   : > { %20027 = vst [vmem:[#allocation89_spill] sm:$0xff] %v15465_v24  ;;  %v6002_v43 = vadd.f32 1.0, %v15461_v63  ;;  %10158 = vpow2.f32 %v5624_v28  ;;  %v15475_v17 = vpop.f32.mrb[80].mxu1  ;;  %v15477_v33 = vpop.eup %10144  ;;  %vm18956_vm9 = vcmp.gt.f32.partialorder %v15465_v24, 20.0  ;;  %v15484_v35 = vmul.f32 100.0, %v15468_v40 }
 0x4c8   : > { %20030 = vst [vmem:[#allocation21_spill] sm:$0xff] %v15477_v33  ;;  %10160 = vpow2.f32 %v5564_v30  ;;  %v15486_v42 = vpop.f32.mrb[81].mxu1  ;;  %v5862_v57 = vadd.f32 1.0, %v5861_v20  ;;  %v5864_v32 = vand.u32 2147483647, %v10141_v37  ;;  %v5719_v30 = vmul.f32 %v15406_v50, %v5718_v29 }
 0x4c9   : > { %10162 = vlog2.f32 %v6002_v43  ;;  %v5626_v28 = vmul.f32 1.442695, %v5524_v49  ;;  %v15488_v59 = vpop.f32.mrb[86].mxu0  ;;  %v6005_v33 = vmul.f32 -0.5, %v15461_v63  ;;  %vm5476_vm5 = vcmp.gt.f32.partialorder %v15484_v35, 20.0 }
 0x4ca   : > { %20031 = vst [vmem:[#allocation54_spill] sm:$0xff] %v15488_v59  ;;  %v10147_v45 = vpop.eup %10146  ;;  %v15494_v21 = vmul.f32 100.0, %v15457_v44  ;;  %10164 = vpow2.f32 %v5596_v31  ;;  %v6008_v20 = vand.u32 2147483647, %v15461_v63  ;;  %v5525_v43 = vsel %vm18956_vm9, 0.0, %v15465_v24  ;;  %v15502_v60 = vpop.f32.mrb[87].mxu0 }
 0x4cb   : > { %v10149_v23 = vpop.eup %10148  ;;  %v5732_v4 = vadd.f32 1.0, %v10147_v45  ;;  %v15500_v49 = vpop.f32.mrb[82].mxu1  ;;  %20033 = vst [vmem:[#allocation53_spill] sm:$0xff] %v15502_v60  ;;  %v5735_v29 = vmul.f32 -0.5, %v10147_v45  ;;  %10166 = vpow2.f32 %v5626_v28  ;;  %v5540_v44 = vsel %vm5476_vm5, 0.0, %v15484_v35 }
 0x4cc   : > { %20032 = vst [vmem:[#allocation58_spill] sm:$0xff] %v15494_v21  ;;  %v5716_v50 = vmul.f32 0.6931472, %v10149_v23  ;;  %v15507_v34 = vpop.f32.mrb[83].mxu1  ;;  %v15509_v31 = vpop.eup %10150  ;;  %v5863_v5 = vmul.f32 %v10141_v37, %v5862_v57  ;;  %vm15511_vm15 = vcmp.lt.f32.partialorder %v5864_v32, 0.0004427343  ;;  %v15660_v22 = vadd.f32 %v14922_v27, %v15395_v6 }
 0x4cd   : > { %20034 = vst [vmem:[#allocation84_spill] sm:$0xff] %v15509_v31  ;;  %10168 = vlog2.f32 %v5732_v4  ;;  %v5658_v24 = vmul.f32 1.442695, %v5540_v44  ;;  %v15515_v16 = vpop.f32.mrb[88].mxu0  ;;  %v5738_v18 = vand.u32 2147483647, %v10147_v45  ;;  %v15529_v44 = vadd.f32 %v15035_v2, %v4919_v13 }
 0x4ce   : > { %20037 = vst [vmem:[#allocation99_spill] sm:$0xff] %v15515_v16  ;;  %v10153_v23 = vpop.eup %10152  ;;  %v5722_v28 = vsel %vm15470_vm12, %v5719_v30, %v5716_v50  ;;  %v6006_v11 = vadd.f32 1.0, %v6005_v33  ;;  %vm18970_vm9 = vcmp.gt.f32.partialorder %v15494_v21, 20.0  ;;  %v15520_v41 = vpop.f32.mrb[89].mxu0  ;;  %vm15522_vm1 = vcmp.lt.f32.partialorder %v6008_v20, 0.0004427343 }
 0x4cf   : > { %20038 = vst [vmem:[#allocation103_spill] sm:$0xff] %v15520_v41  ;;  %v10155_v31 = vpop.eup %10154  ;;  %v5876_v4 = vadd.f32 1.0, %v10153_v23  ;;  %v15526_v32 = vmul.f32 1.442695, %v5525_v43  ;;  %20041 = vst [vmem:[#allocation56_spill] sm:$0xff] %v15529_v44  ;;  %v15531_v57 = vpop.f32.mrb[84].mxu1  ;;  %10170 = vpow2.f32 %v5658_v24 }
 0x4d0   : > { %v15533_v54 = vpop.eup %10156  ;;  %v5736_v33 = vadd.f32 1.0, %v5735_v29  ;;  %v5860_v30 = vmul.f32 0.6931472, %v10155_v31  ;;  %v5879_v50 = vmul.f32 -0.5, %v10153_v23  ;;  %v6258_v16 = vmul.f32 0.01, %v5722_v28 }
 0x4d1   : > { %v15535_v41 = vpop.eup %10158  ;;  %10172 = vlog2.f32 %v5876_v4  ;;  %v6146_v20 = vadd.f32 1.0, %v15533_v54  ;;  %v5539_v43 = vsel %vm18970_vm9, 0.0, %v15494_v21  ;;  %v15541_v13 = vpop.f32.mrb[85].mxu1  ;;  %vm15547_vm12 = vcmp.lt.f32.partialorder %v5738_v18, 0.0004427343  ;;  %20061 = vst [vmem:[#allocation62_spill] sm:$0xff] %v15660_v22 }
 0x4d2   : > { %20042 = vst [vmem:[#allocation25_spill] sm:$0xff] %v15535_v41  ;;  %v15543_v19 = vpop.f32.mrb[90].mxu0  ;;  %v15545_v53 = vpop.eup %10160  ;;  %v5866_v24 = vsel %vm15511_vm15, %v5863_v5, %v5860_v30  ;;  %v5882_v31 = vand.u32 2147483647, %v10153_v23  ;;  %v6007_v28 = vmul.f32 %v15461_v63, %v6006_v11  ;;  %v6149_v60 = vmul.f32 -0.5, %v15533_v54 }
 0x4d3   : > { %20043 = vst [vmem:[#allocation37_spill] sm:$0xff] %v15543_v19  ;;  %20044 = vst [vmem:[#allocation76_spill] sm:$0xff] %v15545_v53  ;;  %v15554_v4 = vpop.f32.mrb[91].mxu0  ;;  %v10163_v41 = vpop.eup %10162  ;;  %v6274_v21 = vmul.f32 0.01, %v5866_v24  ;;  %10174 = vlog2.f32 %v6146_v20  ;;  %v15558_v19 = vmul.f32 100.0, %v15529_v44  ;;  %v5737_v53 = vmul.f32 %v10147_v45, %v5736_v33 }
 0x4d4   : > { %20047 = vst [vmem:[#allocation64_spill] sm:$0xff] %v15554_v4  ;;  %v15560_v18 = vpop.f32.mrb[86].mxu1  ;;  %v5880_v2 = vadd.f32 1.0, %v5879_v50  ;;  %v6004_v59 = vmul.f32 0.6931472, %v10163_v41  ;;  %v15566_v63 = vpop.eup %10164  ;;  %v15571_v11 = vsel %vm5426_vm10, %v15254_v1, %v6258_v16  ;;  %v15580_v45 = vadd.f32 %v14922_v27, %v15383_v62 }
 0x4d5   : > { %20048 = vst [vmem:[#allocation68_spill] sm:$0xff] %v15558_v19  ;;  %v15562_v46 = vmul.f32 1.442695, %v5539_v43  ;;  %v15564_v5 = vpop.f32.mrb[87].mxu1  ;;  %20049 = vst [vmem:[#allocation91_spill] sm:$0xff] %v15566_v63  ;;  %v15576_v30 = vsel %vm5442_vm7, %v15285_v14, %v6274_v21  ;;  %v15584_v41 = vadd.f32 %v14922_v27, %v15475_v17  ;;  %v15586_v33 = vpop.f32.mrb[92].mxu0 }
 0x4d6   : > { %20050 = vst [vmem:[#allocation88_spill] sm:$0xff] %v15571_v11  ;;  %20051 = vst [vmem:[#allocation85_spill] sm:$0xff] %v15576_v30  ;;  %v15588_v50 = vpop.eup %10166  ;;  %v6010_v1 = vsel %vm15522_vm1, %v6007_v28, %v6004_v59  ;;  %v6152_v58 = vand.u32 2147483647, %v15533_v54  ;;  %vm5477_vm10 = vcmp.gt.f32.partialorder %v15558_v19, 20.0  ;;  %v15596_v14 = vpop.f32.mrb[93].mxu0  ;;  %v5881_v24 = vmul.f32 %v10153_v23, %v5880_v2 }
 0x4d7   : > { %20052 = vst [vmem:[#allocation41_spill] sm:$0xff] %v15586_v33  ;;  %20053 = vst [vmem:[#allocation102_spill] sm:$0xff] %v15596_v14  ;;  %v10169_v51 = vpop.eup %10168  ;;  %vm15598_vm15 = vcmp.lt.f32.partialorder %v5882_v31, 0.0004427343  ;;  %v6020_v21 = vadd.f32 1.0, %v15588_v50  ;;  %v6023_v62 = vmul.f32 -0.5, %v15588_v50 }
 0x4d8   : > { %v6150_v20 = vadd.f32 1.0, %v6149_v60  ;;  %v5734_v43 = vmul.f32 0.6931472, %v10169_v51  ;;  %v15605_v59 = vmul.f32 100.0, %v15580_v45  ;;  %v15608_v37 = vmul.f32 100.0, %v15584_v41  ;;  %v15613_v44 = vpop.f32.mrb[88].mxu1 }
 0x4d9   : > { %v6290_v28 = vmul.f32 0.01, %v6010_v1  ;;  %10176 = vlog2.f32 %v6020_v21  ;;  %v6024_v16 = vadd.f32 1.0, %v6023_v62  ;;  %v5541_v31 = vsel %vm5477_vm10, 0.0, %v15558_v19  ;;  %v15615_v11 = vpop.f32.mrb[94].mxu0  ;;  %v15617_v60 = vpop.eup %10170 }
 0x4da   : > { %20056 = vst [vmem:[#allocation35_spill] sm:$0xff] %v15615_v11  ;;  %v5740_v2 = vsel %vm15547_vm12, %v5737_v53, %v5734_v43  ;;  %vm15621_vm1 = vcmp.lt.f32.partialorder %v6152_v58, 0.0004427343  ;;  %vm5430_vm7 = vcmp.gt.f32.partialorder %v15605_v59, 20.0  ;;  %vm5432_vm9 = vcmp.gt.f32.partialorder %v15608_v37, 20.0  ;;  %v15627_v1 = vpop.f32.mrb[89].mxu1 }
 0x4db   : > { %v15629_v51 = vpop.f32.mrb[95].mxu0  ;;  %v10173_v21 = vpop.eup %10172  ;;  %v6260_v62 = vmul.f32 0.01, %v5740_v2  ;;  %v6026_v19 = vand.u32 2147483647, %v15588_v50  ;;  %v6151_v30 = vmul.f32 %v15533_v54, %v6150_v20  ;;  %v6164_v53 = vadd.f32 1.0, %v15617_v60 }
 0x4dc   : > { %20059 = vst [vmem:[#allocation43_spill] sm:$0xff] %v15629_v51  ;;  %v15634_v29 = vpop.f32.mrb[90].mxu1  ;;  %v5878_v58 = vmul.f32 0.6931472, %v10173_v21  ;;  %v5660_v43 = vmul.f32 1.442695, %v5541_v31  ;;  %v15645_v2 = vsel %vm5458_vm14, %v15311_v25, %v6290_v28  ;;  %v6025_v54 = vmul.f32 %v15588_v50, %v6024_v16 }
 0x4dd   : > { %20060 = vst [vmem:[#allocation19_spill] sm:$0xff] %v15634_v29  ;;  %v5494_v63 = vsel %vm5430_vm7, 0.0, %v15605_v59  ;;  %v5496_v51 = vsel %vm5432_vm9, 0.0, %v15608_v37  ;;  %v10175_v11 = vpop.eup %10174  ;;  %10178 = vlog2.f32 %v6164_v53  ;;  %v15648_v21 = vpop.f32.mrb[91].mxu1  ;;  %v6167_v33 = vmul.f32 -0.5, %v15617_v60  ;;  %v20100_v37 = vld [vmem:[#allocation103_spill] sm:$0xff] }
 0x4de   : > { %v5566_v20 = vmul.f32 1.442695, %v5494_v63  ;;  %v5884_v31 = vsel %vm15598_vm15, %v5881_v24, %v5878_v58  ;;  %v6148_v14 = vmul.f32 0.6931472, %v10175_v11  ;;  %v5570_v4 = vmul.f32 1.442695, %v5496_v51 }
 0x4df   : > { %v15656_v29 = vsel %vm5428_vm6, %v15351_v9, %v6260_v62  ;;  %v6276_v25 = vmul.f32 0.01, %v5884_v31  ;;  %v15662_v63 = vpop.f32.mrb[92].mxu1  ;;  %v15668_v11 = vadd.f32 %v14922_v27, %v15486_v42  ;;  %v15672_v9 = vadd.f32 %v14936_v56, %v15429_v39 }
 0x4e0   : > { %10180 = vpow2.f32 %v5566_v20  ;;  %v6154_v50 = vsel %vm15621_vm1, %v6151_v30, %v6148_v14  ;;  %v15674_v48 = vpop.f32.mrb[93].mxu1  ;;  %v15682_v17 = vmul.f32 100.0, %v15660_v22  ;;  %v6170_v39 = vand.u32 2147483647, %v15617_v60 }
 0x4e1   : > { %10182 = vpow2.f32 %v5570_v4  ;;  %20062 = vst [vmem:[#allocation48_spill] sm:$0xff] %v15668_v11  ;;  %v15679_v6 = vsel %vm5444_vm13, %v15392_v15, %v6276_v25  ;;  %v6306_v16 = vmul.f32 0.01, %v6154_v50  ;;  %v15686_v4 = vadd.f32 %v14936_v56, %v15500_v49 }
 0x4e2   : > { %20063 = vst [vmem:[#allocation52_spill] sm:$0xff] %v15682_v17  ;;  %v15692_v30 = vmul.f32 100.0, %v15668_v11  ;;  %v15695_v55 = vmul.f32 100.0, %v15672_v9  ;;  %v6168_v24 = vadd.f32 1.0, %v6167_v33  ;;  %vm18981_vm14 = vcmp.gt.f32.partialorder %v15682_v17, 20.0 }
 0x4e3   : > { %v10177_v15 = vpop.eup %10176  ;;  %v15700_v14 = vsel %vm5474_vm8, %v15355_v8, %v6306_v16  ;;  %v15704_v49 = vmul.f32 100.0, %v15686_v4  ;;  %v15706_v28 = vpop.f32.mrb[94].mxu1  ;;  %v5495_v62 = vsel %vm18981_vm14, 0.0, %v15682_v17  ;;  %vm15716_vm8 = vcmp.lt.f32.partialorder %v6026_v19, 0.0004427343 }
 0x4e4   : > { %20064 = vst [vmem:[#allocation101_spill] sm:$0xff] %v15692_v30  ;;  %v6022_v23 = vmul.f32 0.6931472, %v10177_v15  ;;  %vm18976_vm6 = vcmp.gt.f32.partialorder %v15692_v30, 20.0  ;;  %v15714_v8 = vpop.f32.mrb[95].mxu1  ;;  %10184 = vpow2.f32 %v15526_v32  ;;  %vm5446_vm13 = vcmp.gt.f32.partialorder %v15695_v55, 20.0 }
 0x4e5   : > { %vm5448_vm12 = vcmp.gt.f32.partialorder %v15704_v49, 20.0  ;;  %v5497_v53 = vsel %vm18976_vm6, 0.0, %v15692_v30  ;;  %v5510_v19 = vsel %vm5446_vm13, 0.0, %v15695_v55  ;;  %v15733_v58 = vadd.f32 %v14936_v56, %v15437_v61 }
 0x4e6   : > { %v6028_v33 = vsel %vm15716_vm8, %v6025_v54, %v6022_v23  ;;  %10186 = vpow2.f32 %v15562_v46  ;;  %v5568_v20 = vmul.f32 1.442695, %v5495_v62  ;;  %v5598_v31 = vmul.f32 1.442695, %v5510_v19 }
 0x4e7   : > { %20067 = vst [vmem:[#allocation20_spill] sm:$0xff] %v15733_v58  ;;  %v10179_v32 = vpop.eup %10178  ;;  %v5512_v54 = vsel %vm5448_vm12, 0.0, %v15704_v49  ;;  %v6169_v50 = vmul.f32 %v15617_v60, %v6168_v24  ;;  %vm6171_vm15 = vcmp.lt.f32.partialorder %v6170_v39, 0.0004427343  ;;  %10188 = vpow2.f32 %v5660_v43 }
 0x4e8   : > { %v6166_v25 = vmul.f32 0.6931472, %v10179_v32  ;;  %v6292_v15 = vmul.f32 0.01, %v6028_v33  ;;  %v5572_v23 = vmul.f32 1.442695, %v5497_v53  ;;  %10190 = vpow2.f32 %v5598_v31 }
 0x4e9   : > { %v15744_v61 = vadd.f32 %v14936_v56, %v15507_v34  ;;  %v5602_v19 = vmul.f32 1.442695, %v5512_v54  ;;  %v15750_v32 = vmul.f32 100.0, %v15733_v58  ;;  %10192 = vpow2.f32 %v5568_v20 }
 0x4ea   : > { %v15740_v16 = vpop.eup %10180  ;;  %v6172_v62 = vsel %vm6171_vm15, %v6169_v50, %v6166_v25  ;;  %v15755_v39 = vadd.f32 %v14965_v3, %v15453_v47  ;;  %v15759_v34 = vadd.f32 %v14965_v3, %v15531_v57  ;;  %v15765_v24 = vsel %vm5425_vm4, %v14934_v7, %v15404_v38  ;;  %v20083_v7 = vld [vmem:[#allocation53_spill] sm:$0xff] }
 0x4eb   : > { %20068 = vst [vmem:[#allocation23_spill] sm:$0xff] %v15744_v61  ;;  %v15746_v46 = vpop.eup %10182  ;;  %v5750_v0 = vadd.f32 1.0, %v15740_v16  ;;  %20069 = vst [vmem:[#allocation95_spill] sm:$0xff] %v15750_v32  ;;  %v6308_v60 = vmul.f32 0.01, %v6172_v62  ;;  %v15768_v33 = vadd.f32 1.0, %v15386_v26  ;;  %v15773_v53 = vsel %vm5460_vm11, %v15441_v36, %v6292_v15 }
 0x4ec   : > { %v5768_v43 = vadd.f32 1.0, %v15746_v46  ;;  %20070 = vst [vmem:[#allocation32_spill] sm:$0xff] %v15773_v53  ;;  %v5753_v57 = vmul.f32 -0.5, %v15740_v16  ;;  %vm18978_vm4 = vcmp.gt.f32.partialorder %v15750_v32, 20.0  ;;  %v15785_v52 = vmul.f32 100.0, %v15744_v61  ;;  %v20075_v15 = vld [vmem:[#allocation54_spill] sm:$0xff] }
 0x4ed   : > { %10194 = vlog2.f32 %v5750_v0  ;;  %v15778_v47 = vsel %vm5476_vm5, %v15468_v40, %v6308_v60  ;;  %v5756_v38 = vand.u32 2147483647, %v15740_v16  ;;  %v5771_v36 = vmul.f32 -0.5, %v15746_v46 }
 0x4ee   : > { %20071 = vst [vmem:[#allocation44_spill] sm:$0xff] %v15778_v47  ;;  %10196 = vlog2.f32 %v5768_v43  ;;  %20072 = vst [vmem:[#allocation45_spill] sm:$0xff] %v15785_v52  ;;  %v15787_v10 = vpop.eup %10184  ;;  %v15792_v26 = vmul.f32 100.0, %v15755_v39  ;;  %v5774_v40 = vand.u32 2147483647, %v15746_v46  ;;  %v15796_v35 = vmul.f32 100.0, %v15759_v34 }
 0x4ef   : > { %10198 = vpow2.f32 %v5602_v19  ;;  %v15800_v20 = vadd.f32 %v14965_v3, %v15459_v12  ;;  %v15804_v31 = vadd.f32 %v14965_v3, %v15541_v13  ;;  %v5754_v25 = vadd.f32 1.0, %v5753_v57 }
 0x4f0   : > { %10200 = vpow2.f32 %v5572_v23  ;;  %v15806_v54 = vpop.eup %10186  ;;  %v5511_v50 = vsel %vm18978_vm4, 0.0, %v15750_v32  ;;  %vm5462_vm5 = vcmp.gt.f32.partialorder %v15792_v26, 20.0  ;;  %v20076_v23 = vld [vmem:[#allocation70_spill] sm:$0xff]  ;;  %vm5449_vm11 = vcmp.gt.f32.partialorder %v15785_v52, 20.0 }
 0x4f1   : > { %20073 = vst [vmem:[#allocation72_spill] sm:$0xff] %v15800_v20  ;;  %20074 = vst [vmem:[#allocation59_spill] sm:$0xff] %v15804_v31  ;;  %v15814_v62 = vadd.f32 %v20076_v23, %v20075_v15  ;;  %v15816_v0 = vpop.eup %10188  ;;  %v5526_v12 = vsel %vm5462_vm5, 0.0, %v15792_v26  ;;  %vm5464_vm1 = vcmp.gt.f32.partialorder %v15796_v35, 20.0  ;;  %v15824_v13 = vmul.f32 100.0, %v15800_v20 }
 0x4f2   : > { %v10191_v19 = vpop.eup %10190  ;;  %v5630_v60 = vmul.f32 1.442695, %v5526_v12  ;;  %v5528_v43 = vsel %vm5464_vm1, 0.0, %v15796_v35  ;;  %v15830_v57 = vmul.f32 100.0, %v15804_v31  ;;  %vm15835_vm8 = vcmp.lt.f32.partialorder %v5756_v38, 0.0004427343 }
 0x4f3   : > { %20077 = vst [vmem:[#allocation66_spill] sm:$0xff] %v15824_v13  ;;  %v15833_v15 = vmul.f32 100.0, %v15814_v62  ;;  %v5772_v51 = vadd.f32 1.0, %v5771_v36  ;;  %v5894_v42 = vadd.f32 1.0, %v10191_v19  ;;  %v5634_v20 = vmul.f32 1.442695, %v5528_v43  ;;  %v15839_v61 = vpop.eup %10192 }
 0x4f4   : > { %20078 = vst [vmem:[#allocation55_spill] sm:$0xff] %v15830_v57  ;;  %v5600_v12 = vmul.f32 1.442695, %v5511_v50  ;;  %10202 = vpow2.f32 %v5630_v60  ;;  %vm5463_vm15 = vcmp.gt.f32.partialorder %v15824_v13, 20.0  ;;  %vm15843_vm4 = vcmp.lt.f32.partialorder %v5774_v40, 0.0004427343 }
 0x4f5   : > { %vm5478_vm6 = vcmp.gt.f32.partialorder %v15833_v15, 20.0  ;;  %10204 = vlog2.f32 %v5894_v42  ;;  %v5897_v38 = vmul.f32 -0.5, %v10191_v19  ;;  %v5513_v36 = vsel %vm5449_vm11, 0.0, %v15785_v52 }
 0x4f6   : > { %v5755_v50 = vmul.f32 %v15740_v16, %v5754_v25  ;;  %10206 = vpow2.f32 %v5634_v20  ;;  %vm18990_vm14 = vcmp.gt.f32.partialorder %v15830_v57, 20.0  ;;  %v5773_v40 = vmul.f32 %v15746_v46, %v5772_v51 }
 0x4f7   : > { %v10195_v31 = vpop.eup %10194  ;;  %v5527_v42 = vsel %vm5463_vm15, 0.0, %v15824_v13  ;;  %v5542_v58 = vsel %vm5478_vm6, 0.0, %v15833_v15  ;;  %10208 = vpow2.f32 %v5600_v12  ;;  %v5898_v25 = vadd.f32 1.0, %v5897_v38 }
 0x4f8   : > { %v10197_v43 = vpop.eup %10196  ;;  %v5752_v11 = vmul.f32 0.6931472, %v10195_v31  ;;  %v5604_v31 = vmul.f32 1.442695, %v5513_v36  ;;  %v5529_v51 = vsel %vm18990_vm14, 0.0, %v15830_v57  ;;  %v15874_v12 = vadd.f32 %v20076_v23, %v20083_v7  ;;  %v20086_v36 = vld [vmem:[#allocation22_spill] sm:$0xff] }
 0x4f9   : > { %v10199_v60 = vpop.eup %10198  ;;  %v5770_v32 = vmul.f32 0.6931472, %v10197_v43  ;;  %v5900_v43 = vand.u32 2147483647, %v10191_v19  ;;  %v5662_v46 = vmul.f32 1.442695, %v5542_v58  ;;  %v15878_v58 = vadd.f32 %v20076_v23, %v15564_v5 }
 0x4fa   : > { %v15859_v52 = vpop.eup %10200  ;;  %v5758_v16 = vsel %vm15835_vm8, %v5755_v50, %v5752_v11  ;;  %v5912_v20 = vadd.f32 1.0, %v10199_v60  ;;  %v5915_v13 = vmul.f32 -0.5, %v10199_v60  ;;  %v5918_v17 = vand.u32 2147483647, %v10199_v60  ;;  %20084 = vst [vmem:[#allocation13_spill] sm:$0xff] %v15874_v12 }
 0x4fb   : > { %v5632_v22 = vmul.f32 1.442695, %v5527_v42  ;;  %v6262_v53 = vmul.f32 0.01, %v5758_v16  ;;  %v5776_v47 = vsel %vm15843_vm4, %v5773_v40, %v5770_v32  ;;  %v15870_v11 = vadd.f32 %v20076_v23, %v15560_v18  ;;  %20085 = vst [vmem:[#allocation26_spill] sm:$0xff] %v15878_v58 }
 0x4fc   : > { %10210 = vlog2.f32 %v5912_v20  ;;  %v5636_v38 = vmul.f32 1.442695, %v5529_v51  ;;  %v15882_v50 = vmul.f32 %v20086_v36, %v15768_v33  ;;  %v5899_v30 = vmul.f32 %v10191_v19, %v5898_v25  ;;  %v20095_v25 = vld [vmem:[#allocation92_spill] sm:$0xff] }
 0x4fd   : > { %10212 = vpow2.f32 %v5662_v46  ;;  %vm15884_vm4 = vcmp.lt.f32.partialorder %v5900_v43, 0.0004427343  ;;  %v15889_v18 = vmul.f32 100.0, %v15870_v11  ;;  %v6264_v42 = vmul.f32 0.01, %v5776_v47  ;;  %v20096_v43 = vld [vmem:[#allocation67_spill] sm:$0xff] }
 0x4fe   : > { %10214 = vpow2.f32 %v5604_v31  ;;  %v15891_v40 = vpop.eup %10202  ;;  %v5916_v16 = vadd.f32 1.0, %v5915_v13  ;;  %vm15893_vm8 = vcmp.lt.f32.partialorder %v5918_v17, 0.0004427343  ;;  %v15900_v19 = vsel %vm5430_vm7, %v15580_v45, %v6262_v53  ;;  %v20099_v53 = vld [vmem:[#allocation99_spill] sm:$0xff] }
 0x4ff   : > { %10216 = vpow2.f32 %v5632_v22  ;;  %v10205_v33 = vpop.eup %10204  ;;  %20091 = vst [vmem:[#allocation24_spill] sm:$0xff] %v15900_v19  ;;  %v6038_v20 = vadd.f32 1.0, %v15891_v40  ;;  %vm5480_vm14 = vcmp.gt.f32.partialorder %v15889_v18, 20.0  ;;  %v15905_v31 = vmul.f32 100.0, %v15874_v12 }
 0x500   : > { %v15907_v47 = vpop.eup %10206  ;;  %v5896_v17 = vmul.f32 0.6931472, %v10205_v33  ;;  %10218 = vpow2.f32 %v5636_v38  ;;  %v5544_v22 = vsel %vm5480_vm14, 0.0, %v15889_v18  ;;  %v15913_v13 = vmul.f32 100.0, %v15878_v58 }
 0x501   : > { %20092 = vst [vmem:[#allocation27_spill] sm:$0xff] %v15905_v31  ;;  %10220 = vlog2.f32 %v6038_v20  ;;  %v6041_v45 = vmul.f32 -0.5, %v15891_v40  ;;  %v6056_v59 = vadd.f32 1.0, %v15907_v47  ;;  %v20097_v51 = vsel %vm15336_vm3, %v20095_v25, %v20096_v43  ;;  %v15922_v7 = vpop.eup %10208 }
 0x502   : > { %20093 = vst [vmem:[#allocation11_spill] sm:$0xff] %v15913_v13  ;;  %v6273_v46 = vmul.f32 0.01, %v20097_v51  ;;  %v15927_v38 = vsel %vm5432_vm9, %v15584_v41, %v6264_v42  ;;  %v5902_v33 = vsel %vm15884_vm4, %v5899_v30, %v5896_v17  ;;  %v5917_v20 = vmul.f32 %v10199_v60, %v5916_v16  ;;  %v20102_v16 = vld [vmem:[#allocation86_spill] sm:$0xff] }
 0x503   : > { %20098 = vst [vmem:[#allocation14_spill] sm:$0xff] %v15927_v38  ;;  %v5666_v58 = vmul.f32 1.442695, %v5544_v22  ;;  %v6278_v57 = vmul.f32 0.01, %v5902_v33  ;;  %10222 = vlog2.f32 %v6056_v59  ;;  %vm19000_vm7 = vcmp.gt.f32.partialorder %v15905_v31, 20.0 }
 0x504   : > { %v15934_v25 = vadd.f32 %v14922_v27, %v20099_v53  ;;  %vm18999_vm3 = vcmp.gt.f32.partialorder %v15913_v13, 20.0  ;;  %v15939_v41 = vadd.f32 %v14922_v27, %v15613_v44  ;;  %v15943_v60 = vadd.f32 %v14922_v27, %v20100_v37 }
 0x505   : > { %10224 = vpow2.f32 %v5666_v58  ;;  %v15948_v30 = vsel %vm5446_vm13, %v15672_v9, %v6278_v57  ;;  %v6042_v42 = vadd.f32 1.0, %v6041_v45  ;;  %v6337_v58 = vsel %vm5441_vm0, %v20102_v16, %v6273_v46 }
 0x506   : > { %v10211_v43 = vpop.eup %10210  ;;  %20101 = vst [vmem:[#allocation29_spill] sm:$0xff] %v15943_v60  ;;  %v6044_v59 = vand.u32 2147483647, %v15891_v40  ;;  %v5543_v51 = vsel %vm19000_vm7, 0.0, %v15905_v31  ;;  %v15961_v9 = vadd.f32 %v14922_v27, %v15627_v1  ;;  %v6059_v45 = vmul.f32 -0.5, %v15907_v47 }
 0x507   : > { %v5914_v32 = vmul.f32 0.6931472, %v10211_v43  ;;  %v10213_v22 = vpop.eup %10212  ;;  %v6062_v46 = vand.u32 2147483647, %v15907_v47  ;;  %v5545_v37 = vsel %vm18999_vm3, 0.0, %v15913_v13  ;;  %v9305_v27 = vpack.c.bf16 %v6337_v58, %v15765_v24 }
 0x508   : > { %20104 = vst [vmem:[#allocation47_spill] sm:$0xff] %v15961_v9  ;;  %v15963_v55 = vpop.eup %10214  ;;  %v6182_v33 = vadd.f32 1.0, %v10213_v22  ;;  %v15976_v1 = vmul.f32 100.0, %v15934_v25  ;;  %v6043_v5 = vmul.f32 %v15891_v40, %v6042_v42  ;;  %v15991_v24 = vmul.f32 100.0, %v15943_v60 }
 0x509   : > { %v5920_v57 = vsel %vm15893_vm8, %v5917_v20, %v5914_v32  ;;  %v15969_v53 = vpop.eup %10216  ;;  %v5664_v20 = vmul.f32 1.442695, %v5543_v51  ;;  %v15980_v32 = vmul.f32 100.0, %v15939_v41  ;;  %9306 = vmatprep.subr.bf16.mxu1 %v9305_v27  ;;  %v5668_v58 = vmul.f32 1.442695, %v5545_v37  ;;  %v20107_v51 = vld [vmem:[#allocation77_spill] sm:$0xff] }
 0x50a   : > { %v6280_v43 = vmul.f32 0.01, %v5920_v57  ;;  %10226 = vlog2.f32 %v6182_v33  ;;  %v15982_v16 = vpop.eup %10218  ;;  %v6185_v57 = vmul.f32 -0.5, %v10213_v22  ;;  %vm5434_vm0 = vcmp.gt.f32.partialorder %v15976_v1, 20.0  ;;  %20106 = vst [vmem:[#allocation16_spill] sm:$0xff] %v15991_v24  ;;  %v20108_v33 = vld [vmem:[#allocation73_spill] sm:$0xff] }
 0x50b   : > { %v10221_v40 = vpop.eup %10220  ;;  %v20109_v44 = vpack.c.bf16 %v20107_v51, %v20108_v33  ;;  %vm5436_vm9 = vcmp.gt.f32.partialorder %v15980_v32, 20.0  ;;  %10228 = vpow2.f32 %v5664_v20  ;;  %vm18998_vm13 = vcmp.gt.f32.partialorder %v15991_v24, 20.0  ;;  %v20110_v51 = vld [vmem:[#allocation37_spill] sm:$0xff] }
 0x50c   : > { %v15987_v17 = vsel %vm5448_vm12, %v15686_v4, %v6280_v43  ;;  %v5498_v4 = vsel %vm5434_vm0, 0.0, %v15976_v1  ;;  %v6040_v49 = vmul.f32 0.6931472, %v10221_v40  ;;  %v6060_v43 = vadd.f32 1.0, %v6059_v45 }
 0x50d   : > { %20105 = vst [vmem:[#allocation17_spill] sm:$0xff] %v15987_v17  ;;  %9308 = vmatpush1.bf16.msra.mxu1 %v20109_v44  ;;  %v5574_v27 = vmul.f32 1.442695, %v5498_v4  ;;  %v5500_v60 = vsel %vm5436_vm9, 0.0, %v15980_v32  ;;  %v10223_v13 = vpop.eup %10222  ;;  %v16008_v44 = vadd.f32 %v14936_v56, %v20110_v51  ;;  %v6186_v42 = vadd.f32 1.0, %v6185_v57 }
 0x50e   : > { %v5578_v37 = vmul.f32 1.442695, %v5500_v60  ;;  %v6188_v31 = vand.u32 2147483647, %v10213_v22  ;;  %v16013_v45 = vmul.f32 100.0, %v15961_v9  ;;  %v5499_v57 = vsel %vm18998_vm13, 0.0, %v15991_v24 }
 0x50f   : > { %v16010_v33 = vpop.eup %10224  ;;  %10230 = vpow2.f32 %v5574_v27  ;;  %vm16015_vm12 = vcmp.lt.f32.partialorder %v6044_v59, 0.0004427343  ;;  %vm16019_vm4 = vcmp.lt.f32.partialorder %v6062_v46, 0.0004427343  ;;  %v16030_v59 = vmul.f32 100.0, %v16008_v44  ;;  %v20116_v9 = vld [vmem:[#allocation36_spill] sm:$0xff] }
 0x510   : > { %20111 = vst [vmem:[#allocation49_spill] sm:$0xff] %v16013_v45  ;;  %v6200_v20 = vadd.f32 1.0, %v16010_v33  ;;  %10232 = vpow2.f32 %v5668_v58  ;;  %v6046_v4 = vsel %vm16015_vm12, %v6043_v5, %v6040_v49  ;;  %v6058_v27 = vmul.f32 0.6931472, %v10223_v13  ;;  %v20139_v58 = vld [vmem:[#allocation71_spill] sm:$0xff] }
 0x511   : > { %10234 = vpow2.f32 %v5578_v37  ;;  %v6061_v46 = vmul.f32 %v15907_v47, %v6060_v43  ;;  %v6203_v51 = vmul.f32 -0.5, %v16010_v33  ;;  %v20117_v12 = vand.u32 2147483647, %v20116_v9 }
 0x512   : > { %10236 = vlog2.f32 %v6200_v20  ;;  %v6187_v5 = vmul.f32 %v10213_v22, %v6186_v42  ;;  %vm16040_vm12 = vcmp.lt.f32.partialorder %v6188_v31, 0.0004427343  ;;  %vm19016_vm13 = vcmp.gt.f32.partialorder %v16013_v45, 20.0  ;;  %v20123_v22 = vld [vmem:[#allocation79_spill] sm:$0xff] }
 0x513   : > { %vm16036_vm8 = vcmp.lt.f32.partialorder %v20117_v12, 0.0004427343  ;;  %vm5450_vm3 = vcmp.gt.f32.partialorder %v16030_v59, 20.0  ;;  %v6294_v47 = vmul.f32 0.01, %v6046_v4  ;;  %v20122_v12 = vld [vmem:[#allocation19_spill] sm:$0xff]  ;;  %v6064_v38 = vsel %vm16019_vm4, %v6061_v46, %v6058_v27 }
 0x514   : > { %v10227_v13 = vpop.eup %10226  ;;  %v5576_v43 = vmul.f32 1.442695, %v5499_v57  ;;  %v5514_v9 = vsel %vm5450_vm3, 0.0, %v16030_v59  ;;  %v16051_v37 = vadd.f32 %v14936_v56, %v20122_v12  ;;  %v20124_v31 = vand.u32 2147483647, %v20123_v22  ;;  %v20127_v4 = vld [vmem:[#allocation64_spill] sm:$0xff] }
 0x515   : > { %v6184_v40 = vmul.f32 0.6931472, %v10227_v13  ;;  %v6206_v20 = vand.u32 2147483647, %v16010_v33  ;;  %v5606_v24 = vmul.f32 1.442695, %v5514_v9  ;;  %v16062_v57 = vadd.f32 %v14936_v56, %v20127_v4  ;;  %v16079_v60 = vpop.eup %10228 }
 0x516   : > { %vm16055_vm7 = vcmp.lt.f32.partialorder %v20124_v31, 0.0004427343  ;;  %v6204_v17 = vadd.f32 1.0, %v6203_v51  ;;  %v5501_v12 = vsel %vm19016_vm13, 0.0, %v16013_v45  ;;  %v16070_v22 = vmul.f32 100.0, %v16051_v37  ;;  %v20130_v31 = vld [vmem:[#allocation98_spill] sm:$0xff] }
 0x517   : > { %20128 = vst [vmem:[#allocation74_spill] sm:$0xff] %v16062_v57  ;;  %v6190_v13 = vsel %vm16040_vm12, %v6187_v5, %v6184_v40  ;;  %10238 = vpow2.f32 %v5606_v24  ;;  %v16076_v9 = vadd.f32 %v14936_v56, %v15648_v21  ;;  %v5977_v4 = vmul.f32 0.6931472, %v20130_v31  ;;  %v20133_v21 = vld [vmem:[#allocation97_spill] sm:$0xff] }
 0x518   : > { %v16084_v27 = vsel %vm5462_vm5, %v15755_v39, %v6294_v47  ;;  %v6310_v46 = vmul.f32 0.01, %v6190_v13  ;;  %vm5452_vm4 = vcmp.gt.f32.partialorder %v16070_v22, 20.0  ;;  %v16088_v51 = vmul.f32 100.0, %v16062_v57 }
 0x519   : > { %20129 = vst [vmem:[#allocation12_spill] sm:$0xff] %v16076_v9  ;;  %20131 = vst [vmem:[#allocation15_spill] sm:$0xff] %v16084_v27  ;;  %v10231_v24 = vpop.eup %10230  ;;  %v6296_v5 = vmul.f32 0.01, %v6064_v38  ;;  %10240 = vpow2.f32 %v5576_v43  ;;  %v5516_v56 = vsel %vm5452_vm4, 0.0, %v16070_v22  ;;  %v6205_v26 = vmul.f32 %v16010_v33, %v6204_v17 }
 0x51a   : > { %20132 = vst [vmem:[#allocation38_spill] sm:$0xff] %v16088_v51  ;;  %v6121_v49 = vmul.f32 0.6931472, %v20133_v21  ;;  %v16094_v40 = vpop.eup %10232  ;;  %v16099_v39 = vsel %vm5478_vm6, %v15814_v62, %v6310_v46  ;;  %v5786_v47 = vadd.f32 1.0, %v10231_v24  ;;  %v5580_v13 = vmul.f32 1.442695, %v5501_v12 }
 0x51b   : > { %20134 = vst [vmem:[#allocation18_spill] sm:$0xff] %v16099_v39  ;;  %v10235_v31 = vpop.eup %10234  ;;  %v5610_v43 = vmul.f32 1.442695, %v5516_v56  ;;  %v16105_v45 = vmul.f32 100.0, %v16076_v9  ;;  %v20136_v21 = vld [vmem:[#allocation65_spill] sm:$0xff]  ;;  %v5789_v62 = vmul.f32 -0.5, %v10231_v24  ;;  %v16117_v56 = vsel %vm5464_vm1, %v15759_v34, %v6296_v5 }
 0x51c   : > { %v5983_v57 = vsel %vm16036_vm8, %v20136_v21, %v5977_v4  ;;  %v10237_v19 = vpop.eup %10236  ;;  %10242 = vlog2.f32 %v5786_v47  ;;  %v5804_v15 = vadd.f32 1.0, %v10235_v31  ;;  %vm5451_vm6 = vcmp.gt.f32.partialorder %v16088_v51, 20.0  ;;  %v20137_v12 = vld [vmem:[#allocation60_spill] sm:$0xff]  ;;  %20138 = vst [vmem:[#allocation70_spill] sm:$0xff] %v16117_v56  ;;  %v20151_v56 = vld [vmem:[#allocation41_spill] sm:$0xff] }
 0x51d   : > { %20135 = vst [vmem:[#allocation54_spill] sm:$0xff] %v16105_v45  ;;  %v6202_v17 = vmul.f32 0.6931472, %v10237_v19  ;;  %v5792_v33 = vand.u32 2147483647, %v10231_v24  ;;  %10244 = vpow2.f32 %v5610_v43  ;;  %v6127_v46 = vsel %vm16055_vm7, %v20137_v12, %v6121_v49 }
 0x51e   : > { %vm6207_vm5 = vcmp.lt.f32.partialorder %v6206_v20, 0.0004427343  ;;  %10246 = vpow2.f32 %v5580_v13  ;;  %v5995_v4 = vmul.f32 0.6931472, %v20139_v58  ;;  %v5515_v19 = vsel %vm5451_vm6, 0.0, %v16088_v51  ;;  %v20142_v20 = vld [vmem:[#allocation46_spill] sm:$0xff] }
 0x51f   : > { %v6208_v47 = vsel %vm6207_vm5, %v6205_v26, %v6202_v17  ;;  %10248 = vlog2.f32 %v5804_v15  ;;  %v6287_v43 = vmul.f32 0.01, %v5983_v57  ;;  %v5790_v38 = vadd.f32 1.0, %v5789_v62 }
 0x520   : > { %v6312_v21 = vmul.f32 0.01, %v6208_v47  ;;  %v5807_v42 = vmul.f32 -0.5, %v10235_v31  ;;  %v6303_v49 = vmul.f32 0.01, %v6127_v46  ;;  %vm19015_vm1 = vcmp.gt.f32.partialorder %v16105_v45, 20.0 }
 0x521   : > { %v10239_v12 = vpop.eup %10238  ;;  %vm16123_vm7 = vcmp.lt.f32.partialorder %v5792_v33, 0.0004427343  ;;  %v5999_v34 = vand.u32 2147483647, %v20086_v36  ;;  %v6137_v5 = vadd.f32 1.0, %v20142_v20  ;;  %v20144_v33 = vld [vmem:[#allocation61_spill] sm:$0xff]  ;;  %v5791_v18 = vmul.f32 %v10231_v24, %v5790_v38 }
 0x522   : > { %v16133_v26 = vsel %vm5480_vm14, %v15870_v11, %v6312_v21  ;;  %v5810_v57 = vand.u32 2147483647, %v10235_v31  ;;  %v5930_v13 = vadd.f32 1.0, %v10239_v12  ;;  %v5933_v62 = vmul.f32 -0.5, %v10239_v12  ;;  %v20145_v46 = vld [vmem:[#allocation81_spill] sm:$0xff]  ;;  %v20147_v36 = vld [vmem:[#allocation30_spill] sm:$0xff] }
 0x523   : > { %20143 = vst [vmem:[#allocation53_spill] sm:$0xff] %v16133_v26  ;;  %v16135_v15 = vpop.eup %10240  ;;  %vm20146_vm8 = vcmp.gt.f32.partialorder %v20145_v46, 20.0  ;;  %v6367_v9 = vsel %vm5471_vm2, %v20147_v36, %v6303_v49  ;;  %10250 = vlog2.f32 %v6137_v5  ;;  %v5808_v11 = vadd.f32 1.0, %v5807_v42  ;;  %v20167_v26 = vld [vmem:[#allocation35_spill] sm:$0xff] }
 0x524   : > { %v6351_v58 = vsel %vm20146_vm8, %v20144_v33, %v6287_v43  ;;  %10252 = vlog2.f32 %v5930_v13  ;;  %v5936_v51 = vand.u32 2147483647, %v10239_v12  ;;  %vm16145_vm14 = vcmp.lt.f32.partialorder %v5999_v34, 0.0004427343  ;;  %v20153_v34 = vld [vmem:[#allocation63_spill] sm:$0xff] }
 0x525   : > { %v9301_v21 = vpack.c.bf16 %v6367_v9, %v6351_v58  ;;  %v6140_v17 = vmul.f32 -0.5, %v20142_v20  ;;  %v16152_v46 = vadd.f32 %v14965_v3, %v20151_v56  ;;  %v5934_v33 = vadd.f32 1.0, %v5933_v62  ;;  %v20152_v56 = vld [vmem:[#allocation50_spill] sm:$0xff] }
 0x526   : > { %v10243_v43 = vpop.eup %10242  ;;  %v16154_v47 = vmul.f32 1.442695, %v5515_v19  ;;  %v16159_v24 = vsel %vm19015_vm1, 0.0, %v16105_v45  ;;  %v6001_v9 = vsel %vm16145_vm14, %v15882_v50, %v5995_v4  ;;  %v6143_v49 = vand.u32 2147483647, %v20142_v20 }
 0x527   : > { %9302 = vmatprep.subr.bf16.mxu0 %v9301_v21  ;;  %v10245_v38 = vpop.eup %10244  ;;  %v5788_v42 = vmul.f32 0.6931472, %v10243_v43  ;;  %v20154_v5 = vpack.c.bf16 %v20152_v56, %v20153_v34  ;;  %v16169_v19 = vmul.f32 100.0, %v16152_v46  ;;  %v16173_v13 = vadd.f32 %v14965_v3, %v15662_v63  ;;  %v20178_v43 = vld [vmem:[#allocation75_spill] sm:$0xff] }
 0x528   : > { %v16175_v62 = vpop.eup %10246  ;;  %v16177_v58 = vmul.f32 %v10235_v31, %v5808_v11  ;;  %vm16179_vm2 = vcmp.lt.f32.partialorder %v5810_v57, 0.0004427343  ;;  %v5948_v27 = vadd.f32 1.0, %v10245_v38  ;;  %v6141_v4 = vadd.f32 1.0, %v6140_v17  ;;  %v16190_v11 = vld [vmem:[#allocation5 + $0x80] sm:$0xff] }
 0x529   : > { %9304 = vmatpush1.bf16.msra.mxu0 %v20154_v5  ;;  %20155 = vst [vmem:[#allocation22_spill] sm:$0xff] %v16175_v62  ;;  %v10249_v36 = vpop.eup %10248  ;;  %v5794_v21 = vsel %vm16123_vm7, %v5791_v18, %v5788_v42  ;;  %vm16185_vm12 = vcmp.lt.f32.partialorder %v5936_v51, 0.0004427343  ;;  %v5951_v63 = vmul.f32 -0.5, %v10245_v38  ;;  %vm5466_vm5 = vcmp.gt.f32.partialorder %v16169_v19, 20.0 }
 0x52a   : > { %v5935_v56 = vmul.f32 %v10239_v12, %v5934_v33  ;;  %10254 = vlog2.f32 %v5948_v27  ;;  %v5954_v31 = vand.u32 2147483647, %v10245_v38  ;;  %v6289_v57 = vmul.f32 0.01, %v6001_v9  ;;  %v20163_v12 = vld [vmem:[#allocation102_spill] sm:$0xff] }
 0x52b   : > { %vm20160_vm8 = vcmask 261120   ;;  %vm16194_vm14 = vcmp.lt.f32.partialorder %v6143_v49, 0.0004427343  ;;  %v5530_v51 = vsel %vm5466_vm5, 0.0, %v16169_v19  ;;  %v16202_v35 = vmul.f32 100.0, %v16173_v13 }
 0x52c   : > { %9098 = vmatmul.mubr.msk.f32.vlgmr.msra.gmra.mrb[96].mxu0 %vm20160_vm8, %v16190_v11  ;;  %v16206_v18 = vadd.f32 %v14965_v3, %v20163_v12  ;;  %v20165_v33 = vmov 0.0   ;;  %v6266_v9 = vmul.f32 0.01, %v5794_v21  ;;  %v5806_v42 = vmul.f32 0.6931472, %v10249_v36 }
 0x52d   : > { %6484 = vmatprep.mubr.f32.mxu0 %v20165_v33  ;;  %v6142_v49 = vmul.f32 %v20142_v20, %v6141_v4  ;;  %v5638_v34 = vmul.f32 1.442695, %v5530_v51  ;;  %v10251_v5 = vpop.eup %10250  ;;  %v5952_v27 = vadd.f32 1.0, %v5951_v63  ;;  %vm5468_vm7 = vcmp.gt.f32.partialorder %v16202_v35, 20.0  ;;  %v16226_v4 = vld [vmem:[#allocation5 + $0x88] sm:$0xff] }
 0x52e   : > { %20164 = vst [vmem:[#allocation51_spill] sm:$0xff] %v16206_v18  ;;  %v16213_v45 = vadd.f32 %v14965_v3, %v15674_v48  ;;  %v16217_v39 = vadd.f32 %v20076_v23, %v20167_v26  ;;  %v10253_v12 = vpop.eup %10252  ;;  %vm16219_vm8 = vcmp.lt.f32.partialorder %v5954_v31, 0.0004427343  ;;  %v6139_v36 = vmul.f32 0.6931472, %v10251_v5  ;;  %v20171_v48 = vld [vmem:[#allocation82_spill] sm:$0xff] }
 0x52f   : > { %10256 = vpow2.f32 %v5638_v34  ;;  %v5532_v20 = vsel %vm5468_vm7, 0.0, %v16202_v35  ;;  %vm20170_vm1 = vcmask 261120   ;;  %v5932_v3 = vmul.f32 0.6931472, %v10253_v12  ;;  %v20172_v26 = vld [vmem:[#allocation28_spill] sm:$0xff] }
 0x530   : > { %20166 = vst [vmem:[#allocation92_spill] sm:$0xff] %v16213_v45  ;;  %9099 = vmatmul.mubr.msk.f32.gmra.mrb[98].mxu0 %vm20170_vm1, %v16226_v4  ;;  %vm20173_vm13 = vcmp.gt.f32.partialorder %v20172_v26, 20.0  ;;  %v5642_v63 = vmul.f32 1.442695, %v5532_v20  ;;  %v16234_v31 = vmul.f32 100.0, %v16206_v18  ;;  %v5812_v51 = vsel %vm16179_vm2, %v16177_v58, %v5806_v42  ;;  %v16260_v42 = vld [vmem:[#allocation5 + $0x90] sm:$0xff] }
 0x531   : > { %v6353_v21 = vsel %vm20173_vm13, %v20171_v48, %v6289_v57  ;;  %6490 = vmatprep.mubr.f32.mxu0 %v20165_v33  ;;  %v6145_v34 = vsel %vm16194_vm14, %v6142_v49, %v6139_v36  ;;  %v16243_v5 = vmul.f32 100.0, %v16217_v39  ;;  %v16247_v12 = vadd.f32 %v20076_v23, %v15706_v28  ;;  %v20177_v28 = vld [vmem:[#allocation40_spill] sm:$0xff]  ;;  %v20181_v36 = vld [vmem:[#allocation43_spill] sm:$0xff] }
 0x532   : > { %20174 = vst [vmem:[#allocation67_spill] sm:$0xff] %v16234_v31  ;;  %v5938_v57 = vsel %vm16185_vm12, %v5935_v56, %v5932_v3  ;;  %v6305_v20 = vmul.f32 0.01, %v6145_v34  ;;  %10258 = vpow2.f32 %v5642_v63  ;;  %v16252_v48 = vmul.f32 100.0, %v16213_v45 }
 0x533   : > { %v16257_v58 = vsel %vm5434_vm0, %v15934_v25, %v6266_v9  ;;  %v6282_v50 = vmul.f32 0.01, %v5938_v57  ;;  %v5953_v17 = vmul.f32 %v10245_v38, %v5952_v27  ;;  %vm5482_vm13 = vcmp.gt.f32.partialorder %v16243_v5, 20.0 }
 0x534   : > { %20175 = vst [vmem:[#allocation99_spill] sm:$0xff] %v16252_v48  ;;  %20176 = vst [vmem:[#allocation103_spill] sm:$0xff] %v16257_v58  ;;  %9100 = vmatmul.mubr.msk.f32.gmra.mrb[100].mxu0 %vm20170_vm1, %v16260_v42  ;;  %vm20179_vm2 = vcmp.gt.f32.partialorder %v20178_v43, 20.0  ;;  %vm5467_vm12 = vcmp.gt.f32.partialorder %v16234_v31, 20.0  ;;  %v5546_v25 = vsel %vm5482_vm13, 0.0, %v16243_v5  ;;  %v16272_v1 = vmul.f32 100.0, %v16247_v12  ;;  %v10255_v38 = vpop.eup %10254 }
 0x535   : > { %v6369_v56 = vsel %vm20179_vm2, %v20177_v28, %v6305_v20  ;;  %6496 = vmatprep.mubr.f32.mxu0 %v20165_v33  ;;  %v16278_v9 = vsel %vm5450_vm3, %v16008_v44, %v6282_v50  ;;  %v5670_v27 = vmul.f32 1.442695, %v5546_v25  ;;  %v16282_v3 = vadd.f32 %v20076_v23, %v20181_v36  ;;  %vm20184_vm3 = vmmov %vm20170_vm1  ;;  %v20185_v20 = vld [vmem:[#allocation93_spill] sm:$0xff]  ;;  %v20186_v50 = vld [vmem:[#allocation80_spill] sm:$0xff] }
 0x536   : > { %20180 = vst [vmem:[#allocation86_spill] sm:$0xff] %v16278_v9  ;;  %v9309_v49 = vpack.c.bf16 %v6369_v56, %v6353_v21  ;;  %v5950_v63 = vmul.f32 0.6931472, %v10255_v38  ;;  %vm19031_vm0 = vcmp.gt.f32.partialorder %v16252_v48, 20.0  ;;  %vm5484_vm14 = vcmp.gt.f32.partialorder %v16272_v1, 20.0  ;;  %v16294_v21 = vld [vmem:[#allocation5 + $0x98] sm:$0xff] }
 0x537   : > { %20182 = vst [vmem:[#allocation69_spill] sm:$0xff] %v16282_v3  ;;  %v6268_v34 = vmul.f32 0.01, %v5812_v51  ;;  %v5531_v44 = vsel %vm5467_vm12, 0.0, %v16234_v31  ;;  %10260 = vpow2.f32 %v5670_v27  ;;  %v5548_v59 = vsel %vm5484_vm14, 0.0, %v16272_v1  ;;  %20183 = vst [vmem:[#allocation77_spill] sm:$0xff] %v16294_v21 }
 0x538   : > { %9310 = vmatprep.subr.bf16.mxu1 %v9309_v49  ;;  %9101 = vmatmul.mubr.msk.f32.gmra.mrb[102].mxu0 %vm20184_vm3, %v16294_v21  ;;  %v5956_v57 = vsel %vm16219_vm8, %v5953_v17, %v5950_v63  ;;  %v5612_v51 = vmul.f32 1.442695, %v16159_v24  ;;  %v20187_v28 = vpack.c.bf16 %v20185_v20, %v20186_v50  ;;  %v5674_v43 = vmul.f32 1.442695, %v5548_v59  ;;  %v20188_v56 = vld [vmem:[#allocation21_spill] sm:$0xff]  ;;  %vm20192_vm8 = vmmov %vm20170_vm1 }
 0x539   : > { %v5723_v25 = vadd.f32 1.0, %v20188_v56  ;;  %6656 = vmatprep.mubr.f32.mxu0 %v20165_v33  ;;  %v10257_v38 = vpop.eup %10256  ;;  %v6284_v49 = vmul.f32 0.01, %v5956_v57  ;;  %10262 = vpow2.f32 %v16154_v47  ;;  %v5533_v62 = vsel %vm19031_vm0, 0.0, %v16252_v48  ;;  %v20228_v5 = vld [vmem:[#allocation85_spill] sm:$0xff] }
 0x53a   : > { %9312 = vmatpush1.bf16.msra.mxu1 %v20187_v28  ;;  %v16311_v17 = vmul.f32 100.0, %v16282_v3  ;;  %v6074_v24 = vadd.f32 1.0, %v10257_v38  ;;  %v5640_v27 = vmul.f32 1.442695, %v5531_v44  ;;  %10264 = vpow2.f32 %v5674_v43 }
 0x53b   : > { %v16316_v36 = vsel %vm5436_vm9, %v15939_v41, %v6268_v34  ;;  %v16321_v63 = vsel %vm5452_vm4, %v16051_v37, %v6284_v49  ;;  %v6077_v47 = vmul.f32 -0.5, %v10257_v38  ;;  %10266 = vlog2.f32 %v5723_v25  ;;  %vm20194_vm4 = vmmov %vm20170_vm1 }
 0x53c   : > { %20189 = vst [vmem:[#allocation73_spill] sm:$0xff] %v16311_v17  ;;  %20190 = vst [vmem:[#allocation37_spill] sm:$0xff] %v16316_v36  ;;  %v16325_v59 = vpop.eup %10258  ;;  %10268 = vlog2.f32 %v6074_v24  ;;  %v5644_v57 = vmul.f32 1.442695, %v5533_v62  ;;  %vm19035_vm9 = vcmp.gt.f32.partialorder %v16311_v17, 20.0  ;;  %v16334_v32 = vadd.f32 %v20076_v23, %v15714_v8  ;;  %v20195_v8 = vld [vmem:[#allocation84_spill] sm:$0xff] }
 0x53d   : > { %20191 = vst [vmem:[#allocation36_spill] sm:$0xff] %v16321_v63  ;;  %9102 = vmatmul.mubr.msk.f32.vlgmr.msra.gmra.mrb[96].mxu1 %vm20192_vm8, %v16190_v11  ;;  %10270 = vpow2.f32 %v5612_v51  ;;  %v6092_v41 = vadd.f32 1.0, %v16325_v59  ;;  %v6080_v37 = vand.u32 2147483647, %v10257_v38  ;;  %v5726_v22 = vmul.f32 -0.5, %v20188_v56  ;;  %v20196_v62 = vld [vmem:[#allocation76_spill] sm:$0xff] }
 0x53e   : > { %6573 = vmatprep.mubr.f32.mxu1 %v20165_v33  ;;  %20193 = vst [vmem:[#allocation19_spill] sm:$0xff] %v16334_v32  ;;  %10272 = vpow2.f32 %v5640_v27  ;;  %v6078_v34 = vadd.f32 1.0, %v6077_v47  ;;  %v5729_v20 = vand.u32 2147483647, %v20188_v56  ;;  %v6095_v51 = vmul.f32 -0.5, %v16325_v59 }
 0x53f   : > { %10274 = vlog2.f32 %v6092_v41  ;;  %v5547_v50 = vsel %vm19035_vm9, 0.0, %v16311_v17  ;;  %v5867_v23 = vadd.f32 1.0, %v20195_v8  ;;  %v6098_v43 = vand.u32 2147483647, %v16325_v59 }
 0x540   : > { %10276 = vpow2.f32 %v5644_v57  ;;  %v16348_v25 = vmul.f32 100.0, %v16334_v32  ;;  %v5870_v49 = vmul.f32 -0.5, %v20195_v8  ;;  %v5741_v24 = vadd.f32 1.0, %v20196_v62 }
 0x541   : > { %9103 = vmatmul.mubr.msk.f32.gmra.mrb[98].mxu1 %vm20194_vm4, %v16226_v4  ;;  %v10261_v28 = vpop.eup %10260  ;;  %vm16352_vm1 = vcmp.lt.f32.partialorder %v6080_v37, 0.0004427343  ;;  %v5727_v41 = vadd.f32 1.0, %v5726_v22  ;;  %10278 = vlog2.f32 %v5867_v23  ;;  %v6079_v26 = vmul.f32 %v10257_v38, %v6078_v34  ;;  %vm20205_vm4 = vmmov %vm20184_vm3 }
 0x542   : > { %6579 = vmatprep.mubr.f32.mxu1 %v20165_v33  ;;  %v6218_v47 = vadd.f32 1.0, %v10261_v28  ;;  %v6221_v57 = vmul.f32 -0.5, %v10261_v28  ;;  %v16358_v48 = vmul.f32 1.442695, %v5547_v50  ;;  %vm16360_vm2 = vcmp.lt.f32.partialorder %v5729_v20, 0.0004427343 }
 0x543   : > { %v16356_v44 = vpop.eup %10262  ;;  %10280 = vlog2.f32 %v5741_v24  ;;  %v6096_v45 = vadd.f32 1.0, %v6095_v51  ;;  %v5873_v17 = vand.u32 2147483647, %v20195_v8  ;;  %v5744_v22 = vmul.f32 -0.5, %v20196_v62 }
 0x544   : > { %20199 = vst [vmem:[#allocation79_spill] sm:$0xff] %v16356_v44  ;;  %v10265_v37 = vpop.eup %10264  ;;  %10282 = vlog2.f32 %v6218_v47  ;;  %v6224_v34 = vand.u32 2147483647, %v10261_v28  ;;  %v5871_v23 = vadd.f32 1.0, %v5870_v49  ;;  %vm16369_vm8 = vcmp.lt.f32.partialorder %v6098_v43, 0.0004427343 }
 0x545   : > { %9104 = vmatmul.mubr.msk.f32.gmra.mrb[100].mxu1 %vm20184_vm3, %v16260_v42  ;;  %v10267_v38 = vpop.eup %10266  ;;  %v6236_v50 = vadd.f32 1.0, %v10265_v37  ;;  %v6239_v20 = vmul.f32 -0.5, %v10265_v37  ;;  %v6222_v31 = vadd.f32 1.0, %v6221_v57  ;;  %v5728_v51 = vmul.f32 %v20188_v56, %v5727_v41 }
 0x546   : > { %6585 = vmatprep.mubr.f32.mxu1 %v20165_v33  ;;  %v10269_v3 = vpop.eup %10268  ;;  %v5725_v18 = vmul.f32 0.6931472, %v10267_v38  ;;  %v6242_v63 = vand.u32 2147483647, %v10265_v37  ;;  %v5747_v58 = vand.u32 2147483647, %v20196_v62 }
 0x547   : > { %v16374_v47 = vpop.eup %10270  ;;  %v6076_v36 = vmul.f32 0.6931472, %v10269_v3  ;;  %10284 = vlog2.f32 %v6236_v50  ;;  %v6240_v43 = vadd.f32 1.0, %v6239_v20  ;;  %v5745_v57 = vadd.f32 1.0, %v5744_v22  ;;  %v20207_v38 = vld [vmem:[#allocation91_spill] sm:$0xff] }
 0x548   : > { %20204 = vst [vmem:[#allocation64_spill] sm:$0xff] %v16374_v47  ;;  %v16379_v49 = vpop.eup %10272  ;;  %v5731_v9 = vsel %vm16360_vm2, %v5728_v51, %v5725_v18  ;;  %v5885_v44 = vadd.f32 1.0, %v20207_v38  ;;  %v6097_v3 = vmul.f32 %v16325_v59, %v6096_v45  ;;  %vm16386_vm3 = vcmp.lt.f32.partialorder %v6224_v34, 0.0004427343  ;;  %v20213_v51 = vld [vmem:[#allocation25_spill] sm:$0xff] }
 0x549   : > { %9105 = vmatmul.mubr.msk.f32.gmra.mrb[102].mxu1 %vm20205_vm4, %v16294_v21  ;;  %20206 = vst [vmem:[#allocation98_spill] sm:$0xff] %v16379_v49  ;;  %v10275_v56 = vpop.eup %10274  ;;  %v5872_v50 = vmul.f32 %v20195_v8, %v5871_v23  ;;  %vm16391_vm4 = vcmp.lt.f32.partialorder %v5873_v17, 0.0004427343  ;;  %v6223_v22 = vmul.f32 %v10261_v28, %v6222_v31  ;;  %v5888_v20 = vmul.f32 -0.5, %v20207_v38 }
 0x54a   : > { %6745 = vmatprep.mubr.f32.mxu1 %v20165_v33  ;;  %v16395_v32 = vpop.eup %10276  ;;  %v6094_v18 = vmul.f32 0.6931472, %v10275_v56  ;;  %10286 = vlog2.f32 %v5885_v44  ;;  %v6082_v45 = vsel %vm16352_vm1, %v6079_v26, %v6076_v36  ;;  %v6259_v59 = vmul.f32 0.01, %v5731_v9 }
 0x54b   : > { %20212 = vst [vmem:[#allocation97_spill] sm:$0xff] %v16395_v32  ;;  %v5891_v34 = vand.u32 2147483647, %v20207_v38  ;;  %v6011_v47 = vadd.f32 1.0, %v20213_v51  ;;  %v10279_v8 = vpop.eup %10278  ;;  %v6241_v17 = vmul.f32 %v10265_v37, %v6240_v43  ;;  %vm16402_vm2 = vcmp.lt.f32.partialorder %v6242_v63, 0.0004427343 }
 0x54c   : > { %v5746_v56 = vmul.f32 %v20196_v62, %v5745_v57  ;;  %vm16407_vm0 = vcmp.lt.f32.partialorder %v5747_v58, 0.0004427343  ;;  %v6100_v9 = vsel %vm16369_vm8, %v6097_v3, %v6094_v18  ;;  %v5869_v26 = vmul.f32 0.6931472, %v10279_v8  ;;  %v20218_v62 = vld [vmem:[#allocation87_spill] sm:$0xff]  ;;  %v20219_v57 = vld [vmem:[#allocation90_spill] sm:$0xff] }
 0x54d   : > { %v10281_v44 = vpop.eup %10280  ;;  %10288 = vlog2.f32 %v6011_v47  ;;  %v6014_v36 = vmul.f32 -0.5, %v20213_v51  ;;  %v6298_v27 = vmul.f32 0.01, %v6082_v45  ;;  %v5889_v37 = vadd.f32 1.0, %v5888_v20 }
 0x54e   : > { %v10283_v28 = vpop.eup %10282  ;;  %v5743_v63 = vmul.f32 0.6931472, %v10281_v44  ;;  %v6155_v43 = vadd.f32 1.0, %v15806_v54  ;;  %v5875_v58 = vsel %vm16391_vm4, %v5872_v50, %v5869_v26  ;;  %vm20220_vm1 = vcmp.gt.f32.partialorder %v20219_v57, 20.0  ;;  %v20223_v44 = vld [vmem:[#allocation34_spill] sm:$0xff] }
 0x54f   : > { %v6220_v32 = vmul.f32 0.6931472, %v10283_v28  ;;  %v6323_v21 = vsel %vm20220_vm1, %v20218_v62, %v6259_v59  ;;  %vm16420_vm9 = vcmp.lt.f32.partialorder %v5891_v34, 0.0004427343  ;;  %v6300_v47 = vmul.f32 0.01, %v6100_v9 }
 0x550   : > { %v6275_v3 = vmul.f32 0.01, %v5875_v58  ;;  %v6017_v18 = vand.u32 2147483647, %v20213_v51  ;;  %10290 = vlog2.f32 %v6155_v43  ;;  %vm5485_vm8 = vcmp.gt.f32.partialorder %v16348_v25, 20.0  ;;  %v20224_v9 = vld [vmem:[#allocation78_spill] sm:$0xff] }
 0x551   : > { %v10285_v20 = vpop.eup %10284  ;;  %v6226_v45 = vsel %vm16386_vm3, %v6223_v22, %v6220_v32  ;;  %v5749_v49 = vsel %vm16407_vm0, %v5746_v56, %v5743_v63  ;;  %v6015_v50 = vadd.f32 1.0, %v6014_v36  ;;  %v6029_v59 = vadd.f32 1.0, %v15787_v10 }
 0x552   : > { %v6314_v34 = vmul.f32 0.01, %v6226_v45  ;;  %v6238_v8 = vmul.f32 0.6931472, %v10285_v20  ;;  %vm20225_vm4 = vcmp.gt.f32.partialorder %v20224_v9, 20.0  ;;  %v6158_v28 = vmul.f32 -0.5, %v15806_v54 }
 0x553   : > { %v6339_v26 = vsel %vm20225_vm4, %v20223_v44, %v6275_v3  ;;  %v16438_v41 = vsel %vm5466_vm5, %v16152_v46, %v6298_v27  ;;  %v5890_v22 = vmul.f32 %v20207_v38, %v5889_v37  ;;  %10292 = vlog2.f32 %v6029_v59  ;;  %v20231_v20 = vld [vmem:[#allocation42_spill] sm:$0xff]  ;;  %v20232_v45 = vld [vmem:[#allocation96_spill] sm:$0xff] }
 0x554   : > { %v9313_v32 = vpack.c.bf16 %v6339_v26, %v6323_v21  ;;  %v10287_v56 = vpop.eup %10286  ;;  %v16444_v31 = vsel %vm5482_vm13, %v16217_v39, %v6314_v34  ;;  %v6244_v36 = vsel %vm16402_vm2, %v6241_v17, %v6238_v8  ;;  %v6261_v63 = vmul.f32 0.01, %v5749_v49  ;;  %v20229_v17 = vld [vmem:[#allocation88_spill] sm:$0xff] }
 0x555   : > { %vm16448_vm0 = vcmp.lt.f32.partialorder %v6017_v18, 0.0004427343  ;;  %v9351_v46 = vpack.c.bf16 %v16444_v31, %v16438_v41  ;;  %v6316_v19 = vmul.f32 0.01, %v6244_v36  ;;  %v5887_v21 = vmul.f32 0.6931472, %v10287_v56 }
 0x556   : > { %9314 = vmatprep.subr.bf16.mxu0 %v9313_v32  ;;  %v6173_v38 = vadd.f32 1.0, %v15816_v0  ;;  %v16458_v39 = vsel %vm5468_vm7, %v16173_v13, %v6300_v47  ;;  %v20230_v23 = vpack.c.bf16 %v20228_v5, %v20229_v17  ;;  %v6016_v27 = vmul.f32 %v20213_v51, %v6015_v50  ;;  %v20234_v50 = vld [vmem:[#allocation31_spill] sm:$0xff]  ;;  %v20235_v59 = vld [vmem:[#allocation100_spill] sm:$0xff]  ;;  %v10608_v41 = vld [vmem:[#allocation5 + $0x80] sm:$0xff] }
 0x557   : > { %v6159_v37 = vadd.f32 1.0, %v6158_v28  ;;  %v6032_v58 = vmul.f32 -0.5, %v15787_v10  ;;  %v10289_v62 = vpop.eup %10288  ;;  %v16468_v57 = vsel %vm5484_vm14, %v16247_v12, %v6316_v19  ;;  %v5893_v35 = vsel %vm16420_vm9, %v5890_v22, %v5887_v21  ;;  %v20252_v19 = vld [vmem:[#allocation89_spill] sm:$0xff] }
 0x558   : > { %9316 = vmatpush1.bf16.msra.mxu0 %v20230_v23  ;;  %10294 = vlog2.f32 %v6173_v38  ;;  %v5759_v13 = vadd.f32 1.0, %v15839_v61  ;;  %v9359_v47 = vpack.c.bf16 %v16468_v57, %v16458_v39  ;;  %v6277_v3 = vmul.f32 0.01, %v5893_v35  ;;  %v20240_v35 = vld [vmem:[#allocation94_spill] sm:$0xff]  ;;  %v16790_v39 = vpop.permute.xlu1 %6393 }
 0x559   : > { %v6013_v51 = vmul.f32 0.6931472, %v10289_v62  ;;  %v6161_v18 = vand.u32 2147483647, %v15806_v54  ;;  %vm20233_vm5 = vcmp.gt.f32.partialorder %v20232_v45, 20.0  ;;  %v6176_v1 = vmul.f32 -0.5, %v15816_v0 }
 0x55a   : > { %v6325_v49 = vsel %vm20233_vm5, %v20231_v20, %v6261_v63  ;;  %v6035_v12 = vand.u32 2147483647, %v15787_v10  ;;  %10296 = vlog2.f32 %v5759_v13  ;;  %v10291_v24 = vpop.eup %10290  ;;  %vm20236_vm7 = vcmp.gt.f32.partialorder %v20235_v59, 20.0  ;;  %v20241_v13 = vld [vmem:[#allocation33_spill] sm:$0xff] }
 0x55b   : > { %v6341_v34 = vsel %vm20236_vm7, %v20234_v50, %v6277_v3  ;;  %v6019_v8 = vsel %vm16448_vm0, %v6016_v27, %v6013_v51  ;;  %v6033_v44 = vadd.f32 1.0, %v6032_v58  ;;  %v5903_v9 = vadd.f32 1.0, %v15922_v7  ;;  %v20243_v51 = vld [vmem:[#allocation83_spill] sm:$0xff] }
 0x55c   : > { %v9321_v26 = vpack.c.bf16 %v6341_v34, %v6325_v49  ;;  %v6157_v28 = vmul.f32 0.6931472, %v10291_v24  ;;  %v6160_v32 = vmul.f32 %v15806_v54, %v6159_v37  ;;  %v5762_v22 = vmul.f32 -0.5, %v15839_v61 }
 0x55d   : > { %v5549_v56 = vsel %vm5485_vm8, 0.0, %v16348_v25  ;;  %vm6162_vm13 = vcmp.lt.f32.partialorder %v6161_v18, 0.0004427343  ;;  %v6291_v36 = vmul.f32 0.01, %v6019_v8  ;;  %10298 = vlog2.f32 %v5903_v9  ;;  %v10293_v63 = vpop.eup %10292  ;;  %v20244_v18 = vld [vmem:[#allocation58_spill] sm:$0xff] }
 0x55e   : > { %9322 = vmatprep.subr.bf16.mxu1 %v9321_v26  ;;  %v6163_v43 = vsel %vm6162_vm13, %v6160_v32, %v6157_v28  ;;  %vm16492_vm14 = vcmp.lt.f32.partialorder %v6035_v12, 0.0004427343  ;;  %v6177_v21 = vadd.f32 1.0, %v6176_v1  ;;  %v5777_v38 = vadd.f32 1.0, %v15859_v52 }
 0x55f   : > { %v20239_v54 = vpack.c.bf16 %v15679_v6, %v15656_v29  ;;  %v6307_v5 = vmul.f32 0.01, %v6163_v43  ;;  %v6031_v17 = vmul.f32 0.6931472, %v10293_v63  ;;  %v6034_v23 = vmul.f32 %v15787_v10, %v6033_v44  ;;  %v20251_v43 = vld [vmem:[#allocation39_spill] sm:$0xff] }
 0x560   : > { %v6179_v27 = vand.u32 2147483647, %v15816_v0  ;;  %v5763_v37 = vadd.f32 1.0, %v5762_v22  ;;  %v5765_v58 = vand.u32 2147483647, %v15839_v61  ;;  %v5906_v62 = vmul.f32 -0.5, %v15922_v7 }
 0x561   : > { %9324 = vmatpush1.bf16.msra.mxu1 %v20239_v54  ;;  %10300 = vlog2.f32 %v5777_v38  ;;  %vm20242_vm9 = vcmp.gt.f32.partialorder %v20241_v13, 20.0  ;;  %vm20245_vm3 = vcmp.gt.f32.partialorder %v20244_v18, 20.0  ;;  %v6037_v6 = vsel %vm16492_vm14, %v6034_v23, %v6031_v17  ;;  %v20254_v38 = vld [vmem:[#allocation56_spill] sm:$0xff] }
 0x562   : > { %v6355_v3 = vsel %vm20242_vm9, %v20240_v35, %v6291_v36  ;;  %v6371_v29 = vsel %vm20245_vm3, %v20243_v51, %v6307_v5  ;;  %v5921_v10 = vadd.f32 1.0, %v15963_v55  ;;  %v10295_v20 = vpop.eup %10294  ;;  %10302 = vpow2.f32 %v16358_v48 }
 0x563   : > { %v5676_v45 = vmul.f32 1.442695, %v5549_v56  ;;  %v9317_v49 = vpack.c.bf16 %v6371_v29, %v6355_v3  ;;  %v6178_v12 = vmul.f32 %v15816_v0, %v6177_v21  ;;  %v6175_v1 = vmul.f32 0.6931472, %v10295_v20  ;;  %v20259_v20 = vld [vmem:[#allocation44_spill] sm:$0xff] }
 0x564   : > { %v5909_v24 = vand.u32 2147483647, %v15922_v7  ;;  %v5780_v50 = vmul.f32 -0.5, %v15859_v52  ;;  %10304 = vlog2.f32 %v5921_v10  ;;  %v10297_v59 = vpop.eup %10296  ;;  %vm6180_vm2 = vcmp.lt.f32.partialorder %v6179_v27, 0.0004427343 }
 0x565   : > { %9318 = vmatprep.subr.bf16.mxu0 %v9317_v49  ;;  %v6293_v34 = vmul.f32 0.01, %v6037_v6  ;;  %v5907_v8 = vadd.f32 1.0, %v5906_v62  ;;  %v6047_v44 = vadd.f32 1.0, %v15969_v53  ;;  %v6181_v9 = vsel %vm6180_vm2, %v6178_v12, %v6175_v1  ;;  %v20260_v49 = vld [vmem:[#allocation32_spill] sm:$0xff] }
 0x566   : > { %v20246_v48 = vpack.c.bf16 %v15700_v14, %v15645_v2  ;;  %v5761_v26 = vmul.f32 0.6931472, %v10297_v59  ;;  %v5764_v0 = vmul.f32 %v15839_v61, %v5763_v37  ;;  %vm16522_vm1 = vcmp.lt.f32.partialorder %v5765_v58, 0.0004427343 }
 0x567   : > { %v6309_v32 = vmul.f32 0.01, %v6181_v9  ;;  %v5783_v22 = vand.u32 2147483647, %v15859_v52  ;;  %v5924_v56 = vmul.f32 -0.5, %v15963_v55  ;;  %10306 = vlog2.f32 %v6047_v44  ;;  %v10299_v36 = vpop.eup %10298  ;;  %v20266_v44 = vld [vmem:[#allocation20_spill] sm:$0xff] }
 0x568   : > { %9320 = vmatpush1.bf16.msra.mxu0 %v20246_v48  ;;  %v5767_v63 = vsel %vm16522_vm1, %v5764_v0, %v5761_v26  ;;  %vm16530_vm4 = vcmp.lt.f32.partialorder %v5909_v24, 0.0004427343  ;;  %v5781_v14 = vadd.f32 1.0, %v5780_v50  ;;  %v6191_v61 = vadd.f32 1.0, %v16079_v60  ;;  %v20267_v9 = vld [vmem:[#allocation95_spill] sm:$0xff] }
 0x569   : > { %vm20253_vm0 = vcmp.gt.f32.partialorder %v20252_v19, 20.0  ;;  %v6373_v5 = vsel %vm5477_vm10, %v20254_v38, %v6309_v32  ;;  %vm20256_vm5 = vcmask 261120   ;;  %v5905_v17 = vmul.f32 0.6931472, %v10299_v36 }
 0x56a   : > { %v6357_v21 = vsel %vm20253_vm0, %v20251_v43, %v6293_v34  ;;  %v5908_v23 = vmul.f32 %v15922_v7, %v5907_v8  ;;  %v6263_v37 = vmul.f32 0.01, %v5767_v63  ;;  %v6050_v58 = vmul.f32 -0.5, %v15969_v53  ;;  %vm20262_vm10 = vmmov %vm20256_vm5  ;;  %v20264_v34 = vld [vmem:[#allocation52_spill] sm:$0xff] }
 0x56b   : > { %9106 = vmatmul.mubr.msk.f32.vlgmr.msra.gmra.mrb[104].mxu0 %vm20256_vm5, %v16190_v11  ;;  %v9325_v27 = vpack.c.bf16 %v6373_v5, %v6357_v21  ;;  %10308 = vlog2.f32 %v6191_v61  ;;  %v10301_v62 = vpop.eup %10300  ;;  %vm16548_vm7 = vcmp.lt.f32.partialorder %v5783_v22, 0.0004427343  ;;  %v5925_v3 = vadd.f32 1.0, %v5924_v56  ;;  %vm20269_vm9 = vmmov %vm20256_vm5  ;;  %v20272_v43 = vld [vmem:[#allocation24_spill] sm:$0xff] }
 0x56c   : > { %6662 = vmatprep.mubr.f32.mxu0 %v20165_v33  ;;  %v5911_v35 = vsel %vm16530_vm4, %v5908_v23, %v5905_v17  ;;  %v6065_v51 = vadd.f32 1.0, %v15982_v16  ;;  %v5779_v18 = vmul.f32 0.6931472, %v10301_v62  ;;  %v5782_v29 = vmul.f32 %v15859_v52, %v5781_v14  ;;  %v16555_v10 = vpop.eup %10302  ;;  %v20263_v52 = vld [vmem:[#allocation62_spill] sm:$0xff]  ;;  %vm20274_vm1 = vmmov %vm20256_vm5  ;;  %v20275_v23 = vld [vmem:[#allocation79_spill] sm:$0xff] }
 0x56d   : > { %9326 = vmatprep.subr.bf16.mxu1 %v9325_v27  ;;  %v6279_v7 = vmul.f32 0.01, %v5911_v35  ;;  %v5927_v6 = vand.u32 2147483647, %v15963_v55  ;;  %v20261_v12 = vpack.c.bf16 %v20259_v20, %v20260_v49  ;;  %v6053_v1 = vand.u32 2147483647, %v15969_v53  ;;  %vm20276_vm4 = vmmov %vm20274_vm1 }
 0x56e   : > { %v6194_v24 = vmul.f32 -0.5, %v16079_v60  ;;  %10310 = vlog2.f32 %v6065_v51  ;;  %v6209_v50 = vadd.f32 1.0, %v16094_v40  ;;  %v10305_v59 = vpop.eup %10304  ;;  %vm20265_vm13 = vcmp.gt.f32.partialorder %v20264_v34, 20.0  ;;  %v20280_v62 = vld [vmem:[#allocation23_spill] sm:$0xff]  ;;  %v20287_v34 = vld [vmem:[#allocation17_spill] sm:$0xff] }
 0x56f   : > { %9328 = vmatpush1.bf16.msra.mxu1 %v20261_v12  ;;  %9107 = vmatmul.mubr.msk.f32.gmra.mrb[106].mxu0 %vm20262_vm10, %v16226_v4  ;;  %v6327_v8 = vsel %vm20265_vm13, %v20263_v52, %v6263_v37  ;;  %vm20268_vm14 = vcmp.gt.f32.partialorder %v20267_v9, 20.0  ;;  %v5785_v26 = vsel %vm16548_vm7, %v5782_v29, %v5779_v18  ;;  %v6051_v0 = vadd.f32 1.0, %v6050_v58  ;;  %v20278_v58 = vld [vmem:[#allocation101_spill] sm:$0xff]  ;;  %vm20290_vm10 = vmmov %vm20274_vm1 }
 0x570   : > { %v6343_v48 = vsel %vm20268_vm14, %v20266_v44, %v6279_v7  ;;  %6668 = vmatprep.mubr.f32.mxu0 %v20165_v33  ;;  %10312 = vpow2.f32 %v5676_v45  ;;  %v5923_v32 = vmul.f32 0.6931472, %v10305_v59  ;;  %v5926_v22 = vmul.f32 %v15963_v55, %v5925_v3  ;;  %v20282_v12 = vld [vmem:[#allocation77_spill] sm:$0xff]  ;;  %v20286_v59 = vld [vmem:[#allocation22_spill] sm:$0xff] }
 0x571   : > { %v9329_v28 = vpack.c.bf16 %v6343_v48, %v6327_v8  ;;  %vm5928_vm3 = vcmp.lt.f32.partialorder %v5927_v6, 0.0004427343  ;;  %v6265_v56 = vmul.f32 0.01, %v5785_v26  ;;  %v6068_v36 = vmul.f32 -0.5, %v15982_v16  ;;  %v10307_v63 = vpop.eup %10306  ;;  %v20294_v14 = vld [vmem:[#allocation13_spill] sm:$0xff] }
 0x572   : > { %9110 = vmatmul.mubr.msk.f32.vlgmr.msra.gmra.mrb[104].mxu1 %vm20269_vm9, %v16190_v11  ;;  %10314 = vlog2.f32 %v6209_v50  ;;  %v5929_v2 = vsel %vm5928_vm3, %v5926_v22, %v5923_v32  ;;  %vm16579_vm2 = vcmp.lt.f32.partialorder %v6053_v1, 0.0004427343  ;;  %v6195_v45 = vadd.f32 1.0, %v6194_v24  ;;  %v20291_v22 = vld [vmem:[#allocation64_spill] sm:$0xff] }
 0x573   : > { %6751 = vmatprep.mubr.f32.mxu1 %v20165_v33  ;;  %9330 = vmatprep.subr.bf16.mxu0 %v9329_v28  ;;  %v5795_v55 = vadd.f32 1.0, %v16135_v15  ;;  %v6281_v61 = vmul.f32 0.01, %v5929_v2  ;;  %v20273_v19 = vpack.c.bf16 %v15948_v30, %v20272_v43  ;;  %v6049_v21 = vmul.f32 0.6931472, %v10307_v63  ;;  %v20277_v30 = vld [vmem:[#allocation48_spill] sm:$0xff] }
 0x574   : > { %v6052_v38 = vmul.f32 %v15969_v53, %v6051_v0  ;;  %v6197_v54 = vand.u32 2147483647, %v16079_v60  ;;  %9108 = vmatmul.mubr.msk.f32.gmra.mrb[108].mxu0 %vm20274_vm1, %v16260_v42  ;;  %v6071_v5 = vand.u32 2147483647, %v15982_v16  ;;  %v6212_v17 = vmul.f32 -0.5, %v16094_v40  ;;  %v20292_v63 = vld [vmem:[#allocation72_spill] sm:$0xff] }
 0x575   : > { %9332 = vmatpush1.bf16.msra.mxu0 %v20273_v19  ;;  %10316 = vlog2.f32 %v5795_v55  ;;  %v5939_v27 = vadd.f32 1.0, %v20275_v23  ;;  %v10309_v37 = vpop.eup %10308  ;;  %vm20279_vm0 = vcmp.gt.f32.partialorder %v20278_v58, 20.0  ;;  %v6345_v13 = vsel %vm5449_vm11, %v20280_v62, %v6281_v61  ;;  %6674 = vmatprep.mubr.f32.mxu0 %v20165_v33  ;;  %vm20283_vm11 = vmmov %vm20274_vm1 }
 0x576   : > { %9111 = vmatmul.mubr.msk.f32.gmra.mrb[106].mxu1 %vm20276_vm4, %v16226_v4  ;;  %v6329_v53 = vsel %vm20279_vm0, %v20277_v30, %v6265_v56  ;;  %v6055_v3 = vsel %vm16579_vm2, %v6052_v38, %v6049_v21  ;;  %v6069_v51 = vadd.f32 1.0, %v6068_v36  ;;  %v6193_v18 = vmul.f32 0.6931472, %v10309_v37 }
 0x577   : > { %v9337_v7 = vpack.c.bf16 %v6345_v13, %v6329_v53  ;;  %6757 = vmatprep.mubr.f32.mxu1 %v20165_v33  ;;  %v6196_v29 = vmul.f32 %v16079_v60, %v6195_v45  ;;  %v5798_v6 = vmul.f32 -0.5, %v16135_v15  ;;  %vm6198_vm5 = vcmp.lt.f32.partialorder %v6197_v54, 0.0004427343  ;;  %v20288_v60 = vld [vmem:[#allocation14_spill] sm:$0xff]  ;;  %v20295_v45 = vld [vmem:[#allocation27_spill] sm:$0xff] }
 0x578   : > { %v6295_v20 = vmul.f32 0.01, %v6055_v3  ;;  %10318 = vlog2.f32 %v5939_v27  ;;  %v10311_v49 = vpop.eup %10310  ;;  %9109 = vmatmul.mubr.msk.f32.gmra.mrb[110].mxu0 %vm20283_vm11, %v20282_v12  ;;  %vm16610_vm7 = vcmp.lt.f32.partialorder %v6071_v5, 0.0004427343  ;;  %v6213_v50 = vadd.f32 1.0, %v6212_v17  ;;  %v20297_v17 = vld [vmem:[#allocation98_spill] sm:$0xff] }
 0x579   : > { %9338 = vmatprep.subr.bf16.mxu1 %v9337_v7  ;;  %v6199_v1 = vsel %vm6198_vm5, %v6196_v29, %v6193_v18  ;;  %v5813_v52 = vadd.f32 1.0, %v20286_v59  ;;  %v20289_v8 = vpack.c.bf16 %v20287_v34, %v20288_v60  ;;  %v6067_v9 = vmul.f32 0.6931472, %v10311_v49  ;;  %6834 = vmatprep.mubr.f32.mxu0 %v20165_v33  ;;  %v20300_v13 = vld [vmem:[#allocation15_spill] sm:$0xff]  ;;  %vm20316_vm5 = vmmov %vm20274_vm1 }
 0x57a   : > { %v6311_v44 = vmul.f32 0.01, %v6199_v1  ;;  %v6070_v48 = vmul.f32 %v15982_v16, %v6069_v51  ;;  %v6215_v26 = vand.u32 2147483647, %v16094_v40  ;;  %v16621_v0 = vpop.eup %10312  ;;  %9112 = vmatmul.mubr.msk.f32.gmra.mrb[108].mxu1 %vm20290_vm10, %v16260_v42  ;;  %v5799_v28 = vadd.f32 1.0, %v5798_v6  ;;  %v20304_v49 = vld [vmem:[#allocation59_spill] sm:$0xff] }
 0x57b   : > { %9340 = vmatpush1.bf16.msra.mxu1 %v20289_v8  ;;  %v5942_v32 = vmul.f32 -0.5, %v20275_v23  ;;  %10320 = vlog2.f32 %v5813_v52  ;;  %v5957_v56 = vadd.f32 1.0, %v20291_v22  ;;  %6763 = vmatprep.mubr.f32.mxu1 %v20165_v33  ;;  %v6359_v2 = vsel %vm5463_vm15, %v20292_v63, %v6295_v20  ;;  %vm20298_vm15 = vmmov %vm20274_vm1  ;;  %v20305_v1 = vld [vmem:[#allocation55_spill] sm:$0xff]  ;;  %v20310_v8 = vld [vmem:[#allocation97_spill] sm:$0xff] }
 0x57c   : > { %v10315_v36 = vpop.eup %10314  ;;  %vm20296_vm13 = vcmp.gt.f32.partialorder %v20295_v45, 20.0  ;;  %v6073_v61 = vsel %vm16610_vm7, %v6070_v48, %v6067_v9  ;;  %v5801_v43 = vand.u32 2147483647, %v16135_v15  ;;  %v6214_v38 = vmul.f32 %v16094_v40, %v6213_v50  ;;  %v20299_v40 = vld [vmem:[#allocation18_spill] sm:$0xff]  ;;  %v20308_v52 = vld [vmem:[#allocation11_spill] sm:$0xff]  ;;  %vm20322_vm7 = vmmov %vm20274_vm1 }
 0x57d   : > { %v6375_v55 = vsel %vm20296_vm13, %v20294_v14, %v6311_v44  ;;  %v6211_v21 = vmul.f32 0.6931472, %v10315_v36  ;;  %v5816_v54 = vmul.f32 -0.5, %v20286_v59  ;;  %vm6216_vm14 = vcmp.lt.f32.partialorder %v6215_v26, 0.0004427343  ;;  %v20307_v50 = vld [vmem:[#allocation26_spill] sm:$0xff] }
 0x57e   : > { %v9333_v19 = vpack.c.bf16 %v6375_v55, %v6359_v2  ;;  %v6297_v5 = vmul.f32 0.01, %v6073_v61  ;;  %10322 = vlog2.f32 %v5957_v56  ;;  %v6083_v27 = vadd.f32 1.0, %v20297_v17  ;;  %9113 = vmatmul.mubr.msk.f32.gmra.mrb[110].mxu1 %vm20298_vm15, %v20282_v12  ;;  %v20313_v2 = vld [vmem:[#allocation53_spill] sm:$0xff]  ;;  %v20314_v14 = vld [vmem:[#allocation70_spill] sm:$0xff] }
 0x57f   : > { %v10317_v37 = vpop.eup %10316  ;;  %v6217_v30 = vsel %vm6216_vm14, %v6214_v38, %v6211_v21  ;;  %v5800_v58 = vmul.f32 %v16135_v15, %v5799_v28  ;;  %v5943_v53 = vadd.f32 1.0, %v5942_v32  ;;  %v5945_v62 = vand.u32 2147483647, %v20275_v23  ;;  %6923 = vmatprep.mubr.f32.mxu1 %v20165_v33  ;;  %vm20329_vm14 = vmmov %vm20274_vm1 }
 0x580   : > { %9334 = vmatprep.subr.bf16.mxu0 %v9333_v19  ;;  %v6313_v35 = vmul.f32 0.01, %v6217_v30  ;;  %v20301_v3 = vpack.c.bf16 %v20299_v40, %v20300_v13  ;;  %v5797_v51 = vmul.f32 0.6931472, %v10317_v37  ;;  %vm16648_vm9 = vcmp.lt.f32.partialorder %v5801_v43, 0.0004427343 }
 0x581   : > { %10324 = vlog2.f32 %v6083_v27  ;;  %v5817_v18 = vadd.f32 1.0, %v5816_v54  ;;  %v5819_v29 = vand.u32 2147483647, %v20286_v59  ;;  %v5960_v15 = vmul.f32 -0.5, %v20291_v22  ;;  %v20317_v27 = vld [vmem:[#allocation29_spill] sm:$0xff]  ;;  %v20318_v37 = vld [vmem:[#allocation16_spill] sm:$0xff] }
 0x582   : > { %9336 = vmatpush1.bf16.msra.mxu0 %v20301_v3  ;;  %v6227_v6 = vadd.f32 1.0, %v16555_v10  ;;  %v10319_v20 = vpop.eup %10318  ;;  %vm20306_vm3 = vcmp.gt.f32.partialorder %v20305_v1, 20.0  ;;  %vm20309_vm2 = vcmp.gt.f32.partialorder %v20308_v52, 20.0  ;;  %v5803_v60 = vsel %vm16648_vm9, %v5800_v58, %v5797_v51  ;;  %v20320_v58 = vld [vmem:[#allocation74_spill] sm:$0xff] }
 0x583   : > { %v6361_v24 = vsel %vm20306_vm3, %v20304_v49, %v6297_v5  ;;  %v6377_v34 = vsel %vm20309_vm2, %v20307_v50, %v6313_v35  ;;  %v6101_v44 = vadd.f32 1.0, %v20310_v8  ;;  %v5941_v48 = vmul.f32 0.6931472, %v10319_v20  ;;  %v20324_v1 = vld [vmem:[#allocation86_spill] sm:$0xff]  ;;  %vm20336_vm3 = vmmov %vm20274_vm1 }
 0x584   : > { %v9341_v9 = vpack.c.bf16 %v6377_v34, %v6361_v24  ;;  %v5944_v26 = vmul.f32 %v20275_v23, %v5943_v53  ;;  %v6086_v28 = vmul.f32 -0.5, %v20297_v17  ;;  %vm5946_vm4 = vcmp.lt.f32.partialorder %v5945_v62, 0.0004427343 }
 0x585   : > { %9114 = vmatmul.mubr.msk.f32.vlgmr.msra.gmra.mrb[112].mxu0 %vm20274_vm1, %v16190_v11  ;;  %v6267_v32 = vmul.f32 0.01, %v5803_v60  ;;  %10326 = vlog2.f32 %v6227_v6  ;;  %v10321_v56 = vpop.eup %10320  ;;  %vm16669_vm0 = vcmp.lt.f32.partialorder %v5819_v29, 0.0004427343  ;;  %v5961_v16 = vadd.f32 1.0, %v5960_v15 }
 0x586   : > { %6840 = vmatprep.mubr.f32.mxu0 %v20165_v33  ;;  %9342 = vmatprep.subr.bf16.mxu1 %v9341_v9  ;;  %v5947_v36 = vsel %vm5946_vm4, %v5944_v26, %v5941_v48  ;;  %10328 = vlog2.f32 %v6101_v44  ;;  %v20315_v45 = vpack.c.bf16 %v20313_v2, %v20314_v14  ;;  %v5815_v55 = vmul.f32 0.6931472, %v10321_v56  ;;  %v20330_v9 = vld [vmem:[#allocation47_spill] sm:$0xff]  ;;  %v20331_v48 = vld [vmem:[#allocation49_spill] sm:$0xff] }
 0x587   : > { %v6283_v23 = vmul.f32 0.01, %v5947_v36  ;;  %v5818_v61 = vmul.f32 %v20286_v59, %v5817_v18  ;;  %v5963_v43 = vand.u32 2147483647, %v20291_v22  ;;  %v6087_v19 = vadd.f32 1.0, %v6086_v28  ;;  %v20333_v28 = vld [vmem:[#allocation12_spill] sm:$0xff] }
 0x588   : > { %9344 = vmatpush1.bf16.msra.mxu1 %v20315_v45  ;;  %v6089_v21 = vand.u32 2147483647, %v20297_v17  ;;  %v6230_v38 = vmul.f32 -0.5, %v16555_v10  ;;  %v6245_v54 = vadd.f32 1.0, %v16621_v0  ;;  %v10323_v5 = vpop.eup %10322  ;;  %vm20319_vm11 = vcmp.gt.f32.partialorder %v20318_v37, 20.0 }
 0x589   : > { %9115 = vmatmul.mubr.msk.f32.gmra.mrb[114].mxu0 %vm20316_vm5, %v16226_v4  ;;  %v6331_v30 = vsel %vm20319_vm11, %v20317_v27, %v6267_v32  ;;  %v6347_v59 = vsel %vm5451_vm6, %v20320_v58, %v6283_v23  ;;  %v5821_v62 = vsel %vm16669_vm0, %v5818_v61, %v5815_v55  ;;  %v6104_v35 = vmul.f32 -0.5, %v20310_v8  ;;  %vm20323_vm6 = vmmov %vm20274_vm1  ;;  %v20334_v32 = vld [vmem:[#allocation54_spill] sm:$0xff]  ;;  %v20343_v58 = vld [vmem:[#allocation73_spill] sm:$0xff] }
 0x58a   : > { %6846 = vmatprep.mubr.f32.mxu0 %v20165_v33  ;;  %v9345_v40 = vpack.c.bf16 %v6347_v59, %v6331_v30  ;;  %v5959_v13 = vmul.f32 0.6931472, %v10323_v5  ;;  %v5962_v3 = vmul.f32 %v20291_v22, %v5961_v16  ;;  %10330 = vlog2.f32 %v6245_v54  ;;  %v20325_v22 = vld [vmem:[#allocation103_spill] sm:$0xff]  ;;  %v20342_v30 = vld [vmem:[#allocation69_spill] sm:$0xff]  ;;  %vm20345_vm5 = vmmov %vm20274_vm1 }
 0x58b   : > { %9118 = vmatmul.mubr.msk.f32.vlgmr.msra.gmra.mrb[112].mxu1 %vm20322_vm7, %v16190_v11  ;;  %v10325_v51 = vpop.eup %10324  ;;  %vm5964_vm10 = vcmp.lt.f32.partialorder %v5963_v43, 0.0004427343  ;;  %v6269_v7 = vmul.f32 0.01, %v5821_v62  ;;  %v6233_v18 = vand.u32 2147483647, %v16555_v10  ;;  %v6088_v6 = vmul.f32 %v20297_v17, %v6087_v19  ;;  %vm20350_vm7 = vmmov %vm20274_vm1 }
 0x58c   : > { %6929 = vmatprep.mubr.f32.mxu1 %v20165_v33  ;;  %9346 = vmatprep.subr.bf16.mxu0 %v9345_v40  ;;  %v5965_v29 = vsel %vm5964_vm10, %v5962_v3, %v5959_v13  ;;  %v6085_v15 = vmul.f32 0.6931472, %v10325_v51  ;;  %v6231_v20 = vadd.f32 1.0, %v6230_v38  ;;  %v20326_v24 = vpack.c.bf16 %v20324_v1, %v20325_v22  ;;  %v20337_v19 = vld [vmem:[#allocation36_spill] sm:$0xff]  ;;  %v20340_v5 = vld [vmem:[#allocation51_spill] sm:$0xff]  ;;  %vm20351_vm10 = vmmov %vm20274_vm1 }
 0x58d   : > { %9116 = vmatmul.mubr.msk.f32.gmra.mrb[116].mxu0 %vm20323_vm6, %v16260_v42  ;;  %v6285_v49 = vmul.f32 0.01, %v5965_v29  ;;  %vm16705_vm13 = vcmp.lt.f32.partialorder %v6089_v21, 0.0004427343  ;;  %v6105_v52 = vadd.f32 1.0, %v6104_v35  ;;  %v6248_v34 = vmul.f32 -0.5, %v16621_v0  ;;  %vm20352_vm6 = vmmov %vm20274_vm1 }
 0x58e   : > { %9348 = vmatpush1.bf16.msra.mxu0 %v20326_v24  ;;  %6852 = vmatprep.mubr.f32.mxu0 %v20165_v33  ;;  %v6091_v17 = vsel %vm16705_vm13, %v6088_v6, %v6085_v15  ;;  %v6107_v60 = vand.u32 2147483647, %v20310_v8  ;;  %vm20332_vm15 = vcmp.gt.f32.partialorder %v20331_v48, 20.0  ;;  %vm20335_vm9 = vcmp.gt.f32.partialorder %v20334_v32, 20.0  ;;  %v20338_v21 = vld [vmem:[#allocation37_spill] sm:$0xff]  ;;  %v20346_v51 = vld [vmem:[#allocation92_spill] sm:$0xff]  ;;  %vm20354_vm13 = vmmov %vm20274_vm1 }
 0x58f   : > { %9119 = vmatmul.mubr.msk.f32.gmra.mrb[114].mxu1 %vm20329_vm14, %v16226_v4  ;;  %v10327_v44 = vpop.eup %10326  ;;  %v6333_v26 = vsel %vm20332_vm15, %v20330_v9, %v6269_v7  ;;  %v6349_v56 = vsel %vm20335_vm9, %v20333_v28, %v6285_v49  ;;  %v6232_v2 = vmul.f32 %v16555_v10, %v6231_v20  ;;  %vm6234_vm2 = vcmp.lt.f32.partialorder %v6233_v18, 0.0004427343  ;;  %v20347_v7 = vld [vmem:[#allocation99_spill] sm:$0xff]  ;;  %vm20355_vm14 = vmmov %vm20274_vm1 }
 0x590   : > { %6935 = vmatprep.mubr.f32.mxu1 %v20165_v33  ;;  %v10329_v36 = vpop.eup %10328  ;;  %v9353_v63 = vpack.c.bf16 %v6349_v56, %v6333_v26  ;;  %v6229_v16 = vmul.f32 0.6931472, %v10327_v44  ;;  %v6299_v14 = vmul.f32 0.01, %v6091_v17  ;;  %v6106_v23 = vmul.f32 %v20310_v8, %v6105_v52  ;;  %vm20356_vm15 = vmmov %vm20274_vm1  ;;  %v16828_v26 = vpop.permute.xlu1 %6403 }
 0x591   : > { %9117 = vmatmul.mubr.msk.f32.gmra.mrb[118].mxu0 %vm20336_vm3, %v20282_v12  ;;  %v6103_v45 = vmul.f32 0.6931472, %v10329_v36  ;;  %v6249_v55 = vadd.f32 1.0, %v6248_v34  ;;  %vm6108_vm4 = vcmp.lt.f32.partialorder %v6107_v60, 0.0004427343  ;;  %v20339_v38 = vpack.c.bf16 %v20337_v19, %v20338_v21  ;;  %vm20357_vm9 = vmmov %vm20274_vm1 }
 0x592   : > { %7012 = vmatprep.mubr.f32.mxu0 %v20165_v33  ;;  %9354 = vmatprep.subr.bf16.mxu1 %v9353_v63  ;;  %v6235_v61 = vsel %vm6234_vm2, %v6232_v2, %v6229_v16  ;;  %v6251_v43 = vand.u32 2147483647, %v16621_v0  ;;  %v6363_v37 = vsel %vm5467_vm12, %v20340_v5, %v6299_v14  ;;  %vm20344_vm0 = vcmp.gt.f32.partialorder %v20343_v58, 20.0 }
 0x593   : > { %9120 = vmatmul.mubr.msk.f32.gmra.mrb[116].mxu1 %vm20274_vm1, %v16260_v42  ;;  %v6315_v10 = vmul.f32 0.01, %v6235_v61  ;;  %v6109_v54 = vsel %vm6108_vm4, %v6106_v23, %v6103_v45  ;;  %v6250_v62 = vmul.f32 %v16621_v0, %v6249_v55  ;;  %vm20348_vm12 = vcmp.gt.f32.partialorder %v20347_v7, 20.0  ;;  %v20349_v0 = vld [vmem:[#allocation19_spill] sm:$0xff] }
 0x594   : > { %9356 = vmatpush1.bf16.msra.mxu1 %v20339_v38  ;;  %6941 = vmatprep.mubr.f32.mxu1 %v20165_v33  ;;  %v10331_v8 = vpop.eup %10330  ;;  %vm6252_vm11 = vcmp.lt.f32.partialorder %v6251_v43, 0.0004427343  ;;  %v6301_v40 = vmul.f32 0.01, %v6109_v54 }
 0x595   : > { %v6379_v53 = vsel %vm20344_vm0, %v20342_v30, %v6315_v10  ;;  %v6247_v59 = vmul.f32 0.6931472, %v10331_v8 }
 0x596   : > { %v9349_v35 = vpack.c.bf16 %v6379_v53, %v6363_v37  ;;  %v6365_v18 = vsel %vm20348_vm12, %v20346_v51, %v6301_v40 }
 0x597   : > { %9121 = vmatmul.mubr.msk.f32.gmra.mrb[118].mxu1 %vm20345_vm5, %v20282_v12  ;;  %v6253_v13 = vsel %vm6252_vm11, %v6250_v62, %v6247_v59 }
 0x598   : > { %7101 = vmatprep.mubr.f32.mxu1 %v20165_v33  ;;  %9350 = vmatprep.subr.bf16.mxu0 %v9349_v35  ;;  %v6317_v3 = vmul.f32 0.01, %v6253_v13 }
 0x599   : > { %9352 = vmatpush1.bf16.msra.mxu0 %v9351_v46 }
 0x59a   : > { %v6381_v29 = vsel %vm5485_vm8, %v20349_v0, %v6317_v3  ;;  %vm20353_vm8 = vmmov %vm20274_vm1 }
 0x59b   : > { %v9357_v15 = vpack.c.bf16 %v6381_v29, %v6365_v18 }
 0x59c   : > { %9122 = vmatmul.mubr.msk.f32.vlgmr.msra.gmra.mrb[120].mxu0 %vm20350_vm7, %v16190_v11  ;;  %v16779_v11 = vpop.permute.xlu0 %6388 }
 0x59d   : > { %9358 = vmatprep.subr.bf16.mxu1 %v9357_v15  ;;  %7018 = vmatprep.mubr.f32.mxu0 %v20165_v33 }
 0x59e   : > { %9360 = vmatpush1.bf16.msra.mxu1 %v9359_v47 }
 0x5a0   : > { %9123 = vmatmul.mubr.msk.f32.gmra.mrb[122].mxu0 %vm20351_vm10, %v16226_v4  ;;  %v16808_v24 = vpop.permute.xlu0 %6398 }
 0x5a1   : > { %9126 = vmatmul.mubr.msk.f32.vlgmr.msra.gmra.mrb[120].mxu1 %vm20352_vm6, %v10608_v41  ;;  %7024 = vmatprep.mubr.f32.mxu0 %v20165_v33 }
 0x5a2   : > { %7107 = vmatprep.mubr.f32.mxu1 %v20165_v33 }
 0x5a4   : > { %9124 = vmatmul.mubr.msk.f32.gmra.mrb[124].mxu0 %vm20353_vm8, %v16260_v42 }
 0x5a5   : > { %9127 = vmatmul.mubr.msk.f32.gmra.mrb[122].mxu1 %vm20354_vm13, %v16226_v4  ;;  %7030 = vmatprep.mubr.f32.mxu0 %v20165_v33 }
 0x5a6   : > { %7113 = vmatprep.mubr.f32.mxu1 %v20165_v33 }
 0x5a8   : > { %9125 = vmatmul.mubr.msk.f32.gmra.mrb[126].mxu0 %vm20355_vm14, %v20282_v12 }
 0x5a9   : > { %9128 = vmatmul.mubr.msk.f32.gmra.mrb[124].mxu1 %vm20356_vm15, %v16260_v42  ;;  %8230 = vmatprep.mubr.f32.mxu0 %v20165_v33 }
 0x5aa   : > { %7119 = vmatprep.mubr.f32.mxu1 %v20165_v33 }
 0x5ad   : > { %9129 = vmatmul.mubr.msk.f32.gmra.mrb[126].mxu1 %vm20357_vm9, %v20282_v12 }
 0x5ae   : > { %8307 = vmatprep.mubr.f32.mxu1 %v20165_v33 }
 0x5ff   : > { %v6480_v4 = vpop.f32.mrb[96].mxu0 }
 0x600   : > { %v16782_v25 = vadd.f32 %v6480_v4, %v16779_v11  ;;  %v6482_v31 = vpop.f32.mrb[97].mxu0 }
 0x601   : > { %v16785_v46 = vadd.f32 %v6482_v31, %v16779_v11 }
 0x602   : > { %v16788_v42 = vmul.f32 100.0, %v16782_v25 }
 0x603   : > { %v6486_v57 = vpop.f32.mrb[98].mxu0  ;;  %v16794_v47 = vmul.f32 100.0, %v16785_v46 }
 0x604   : > { %vm7190_vm3 = vcmp.gt.f32.partialorder %v16788_v42, 20.0  ;;  %v16797_v12 = vadd.f32 %v6486_v57, %v16790_v39  ;;  %v6488_v6 = vpop.f32.mrb[99].mxu0 }
 0x605   : > { %v7254_v20 = vsel %vm7190_vm3, 0.0, %v16788_v42  ;;  %v16803_v49 = vadd.f32 %v6488_v6, %v16790_v39  ;;  %vm7191_vm2 = vcmp.gt.f32.partialorder %v16794_v47, 20.0 }
 0x606   : > { %v7318_v1 = vmul.f32 1.442695, %v7254_v20  ;;  %v16806_v22 = vmul.f32 100.0, %v16797_v12  ;;  %v7255_v28 = vsel %vm7191_vm2, 0.0, %v16794_v47 }
 0x607   : > { %v16811_v50 = vmul.f32 100.0, %v16803_v49  ;;  %v6492_v52 = vpop.f32.mrb[100].mxu0  ;;  %v7320_v14 = vmul.f32 1.442695, %v7255_v28 }
 0x608   : > { %10332 = vpow2.f32 %v7318_v1  ;;  %vm7206_vm1 = vcmp.gt.f32.partialorder %v16806_v22, 20.0  ;;  %v16816_v34 = vadd.f32 %v6492_v52, %v16808_v24  ;;  %v6494_v17 = vpop.f32.mrb[101].mxu0 }
 0x609   : > { %v7270_v60 = vsel %vm7206_vm1, 0.0, %v16806_v22  ;;  %vm7207_vm4 = vcmp.gt.f32.partialorder %v16811_v50, 20.0  ;;  %v16823_v44 = vadd.f32 %v6494_v17, %v16808_v24 }
 0x60a   : > { %v7350_v9 = vmul.f32 1.442695, %v7270_v60  ;;  %v16826_v48 = vmul.f32 100.0, %v16816_v34  ;;  %v7271_v36 = vsel %vm7207_vm4, 0.0, %v16811_v50 }
 0x60b   : > { %20358 = vst [vmem:[#allocation65_spill] sm:$0xff] %v16823_v44  ;;  %v16834_v32 = vmul.f32 100.0, %v16823_v44  ;;  %v6498_v56 = vpop.f32.mrb[102].mxu0  ;;  %v7352_v61 = vmul.f32 1.442695, %v7271_v36 }
 0x60c   : > { %10334 = vpow2.f32 %v7350_v9  ;;  %vm7222_vm0 = vcmp.gt.f32.partialorder %v16826_v48, 20.0  ;;  %v16841_v63 = vadd.f32 %v6498_v56, %v16828_v26  ;;  %v6500_v16 = vpop.f32.mrb[103].mxu0 }
 0x60d   : > { %20359 = vst [vmem:[#allocation60_spill] sm:$0xff] %v16834_v32  ;;  %v7286_v2 = vsel %vm7222_vm0, 0.0, %v16826_v48  ;;  %vm7223_vm5 = vcmp.gt.f32.partialorder %v16834_v32, 20.0  ;;  %v16869_v27 = vadd.f32 %v6500_v16, %v16828_v26 }
 0x60e   : > { %v7382_v45 = vmul.f32 1.442695, %v7286_v2  ;;  %v16848_v23 = vmul.f32 100.0, %v16841_v63  ;;  %v7287_v21 = vsel %vm7223_vm5, 0.0, %v16834_v32 }
 0x60f   : > { %20361 = vst [vmem:[#allocation46_spill] sm:$0xff] %v16869_v27  ;;  %v7384_v53 = vmul.f32 1.442695, %v7287_v21  ;;  %v16891_v7 = vmul.f32 100.0, %v16869_v27 }
 0x610   : > { %v6569_v55 = vpop.f32.mrb[96].mxu1  ;;  %10336 = vpow2.f32 %v7382_v45  ;;  %vm7238_vm11 = vcmp.gt.f32.partialorder %v16848_v23, 20.0 }
 0x611   : > { %v16851_v43 = vadd.f32 %v6569_v55, %v16779_v11  ;;  %v6571_v19 = vpop.f32.mrb[97].mxu1  ;;  %v7302_v10 = vsel %vm7238_vm11, 0.0, %v16848_v23  ;;  %10338 = vpow2.f32 %v7320_v14  ;;  %20364 = vst [vmem:[#allocation30_spill] sm:$0xff] %v16891_v7  ;;  %vm19116_vm6 = vcmp.gt.f32.partialorder %v16891_v7, 20.0 }
 0x612   : > { %v16858_v38 = vadd.f32 %v6571_v19, %v16779_v11  ;;  %v16863_v54 = vpop.eup %10332  ;;  %v7414_v5 = vmul.f32 1.442695, %v7302_v10  ;;  %10340 = vpow2.f32 %v7352_v61  ;;  %v7303_v10 = vsel %vm19116_vm6, 0.0, %v16891_v7 }
 0x613   : > { %v16866_v8 = vmul.f32 100.0, %v16851_v43  ;;  %v7446_v37 = vadd.f32 1.0, %v16863_v54  ;;  %v7449_v18 = vmul.f32 -0.5, %v16863_v54  ;;  %v7452_v52 = vand.u32 2147483647, %v16863_v54 }
 0x614   : > { %20360 = vst [vmem:[#allocation71_spill] sm:$0xff] %v16858_v38  ;;  %v16873_v30 = vmul.f32 100.0, %v16858_v38  ;;  %v6575_v58 = vpop.f32.mrb[98].mxu1  ;;  %10342 = vpow2.f32 %v7414_v5 }
 0x615   : > { %vm7192_vm12 = vcmp.gt.f32.partialorder %v16866_v8, 20.0  ;;  %v16877_v59 = vadd.f32 %v6575_v58, %v16790_v39  ;;  %v6577_v62 = vpop.f32.mrb[99].mxu1  ;;  %10344 = vlog2.f32 %v7446_v37  ;;  %v7450_v1 = vadd.f32 1.0, %v7449_v18 }
 0x616   : > { %20362 = vst [vmem:[#allocation61_spill] sm:$0xff] %v16873_v30  ;;  %v7256_v35 = vsel %vm7192_vm12, 0.0, %v16866_v8  ;;  %v16882_v40 = vpop.eup %10334  ;;  %v16888_v51 = vadd.f32 %v6577_v62, %v16790_v39  ;;  %vm7193_vm7 = vcmp.gt.f32.partialorder %v16873_v30, 20.0  ;;  %10346 = vpow2.f32 %v7384_v53 }
 0x617   : > { %v7322_v13 = vmul.f32 1.442695, %v7256_v35  ;;  %v16885_v3 = vmul.f32 100.0, %v16877_v59  ;;  %v7590_v0 = vadd.f32 1.0, %v16882_v40  ;;  %v7257_v57 = vsel %vm7193_vm7, 0.0, %v16873_v30 }
 0x618   : > { %20363 = vst [vmem:[#allocation81_spill] sm:$0xff] %v16888_v51  ;;  %v6581_v29 = vpop.f32.mrb[100].mxu1  ;;  %v16901_v4 = vmul.f32 100.0, %v16888_v51  ;;  %v7593_v28 = vmul.f32 -0.5, %v16882_v40  ;;  %v7324_v14 = vmul.f32 1.442695, %v7257_v57  ;;  %v7451_v37 = vmul.f32 %v16863_v54, %v7450_v1 }
 0x619   : > { %10348 = vpow2.f32 %v7322_v13  ;;  %vm7208_vm10 = vcmp.gt.f32.partialorder %v16885_v3, 20.0  ;;  %v6583_v15 = vpop.f32.mrb[101].mxu1  ;;  %v16909_v20 = vadd.f32 %v6581_v29, %v16808_v24  ;;  %v7596_v19 = vand.u32 2147483647, %v16882_v40 }
 0x61a   : > { %10350 = vlog2.f32 %v7590_v0  ;;  %v7272_v41 = vsel %vm7208_vm10, 0.0, %v16885_v3  ;;  %20365 = vst [vmem:[#allocation57_spill] sm:$0xff] %v16901_v4  ;;  %v16903_v31 = vpop.eup %10336  ;;  %vm7209_vm8 = vcmp.gt.f32.partialorder %v16901_v4, 20.0  ;;  %v16928_v55 = vadd.f32 %v6583_v15, %v16808_v24 }
 0x61b   : > { %v7354_v6 = vmul.f32 1.442695, %v7272_v41  ;;  %v7734_v17 = vadd.f32 1.0, %v16903_v31  ;;  %v16915_v9 = vpop.eup %10338  ;;  %v7273_v56 = vsel %vm7209_vm8, 0.0, %v16901_v4  ;;  %v16922_v36 = vmul.f32 100.0, %v16909_v20 }
 0x61c   : > { %v6587_v60 = vpop.f32.mrb[102].mxu1  ;;  %v16924_v2 = vpop.eup %10340  ;;  %v7737_v45 = vmul.f32 -0.5, %v16903_v31  ;;  %20366 = vst [vmem:[#allocation41_spill] sm:$0xff] %v16928_v55  ;;  %v7356_v58 = vmul.f32 1.442695, %v7273_v56  ;;  %v16945_v62 = vmul.f32 100.0, %v16928_v55 }
 0x61d   : > { %10352 = vpow2.f32 %v7354_v6  ;;  %v6589_v16 = vpop.f32.mrb[103].mxu1  ;;  %vm7224_vm13 = vcmp.gt.f32.partialorder %v16922_v36, 20.0  ;;  %v16935_v21 = vadd.f32 %v6587_v60, %v16828_v26  ;;  %v7594_v13 = vadd.f32 1.0, %v7593_v28 }
 0x61e   : > { %10354 = vlog2.f32 %v7734_v17  ;;  %v16930_v61 = vpop.eup %10342  ;;  %v7288_v53 = vsel %vm7224_vm13, 0.0, %v16922_v36  ;;  %20367 = vst [vmem:[#allocation50_spill] sm:$0xff] %v16945_v62  ;;  %vm16950_vm14 = vcmp.lt.f32.partialorder %v7452_v52, 0.0004427343  ;;  %v7738_v54 = vadd.f32 1.0, %v7737_v45 }
 0x61f   : > { %v10345_v5 = vpop.eup %10344  ;;  %v7386_v18 = vmul.f32 1.442695, %v7288_v53  ;;  %v7878_v0 = vadd.f32 1.0, %v16930_v61  ;;  %10356 = vpow2.f32 %v7324_v14  ;;  %v7416_v41 = vmul.f32 1.442695, %v7303_v10 }
 0x620   : > { %v7448_v35 = vmul.f32 0.6931472, %v10345_v5  ;;  %v16948_v29 = vpop.eup %10346  ;;  %vm16956_vm15 = vcmp.lt.f32.partialorder %v7596_v19, 0.0004427343  ;;  %v16961_v17 = vmul.f32 100.0, %v16935_v21  ;;  %vm19036_vm9 = vcmp.gt.f32.partialorder %v16945_v62, 20.0 }
 0x621   : > { %20368 = vst [vmem:[#allocation63_spill] sm:$0xff] %v16948_v29  ;;  %10358 = vpow2.f32 %v7386_v18  ;;  %v7881_v28 = vmul.f32 -0.5, %v16930_v61  ;;  %v7595_v14 = vmul.f32 %v16882_v40, %v7594_v13  ;;  %v16967_v45 = vadd.f32 %v6589_v16, %v16828_v26 }
 0x622   : > { %v7454_v6 = vsel %vm16950_vm14, %v7451_v37, %v7448_v35  ;;  %10360 = vpow2.f32 %v7356_v58  ;;  %v7739_v10 = vmul.f32 %v16903_v31, %v7738_v54  ;;  %v7740_v5 = vand.u32 2147483647, %v16903_v31 }
 0x623   : > { %v10349_v57 = vpop.eup %10348  ;;  %10362 = vlog2.f32 %v7878_v0  ;;  %20373 = vst [vmem:[#allocation102_spill] sm:$0xff] %v16967_v45  ;;  %v8022_v19 = vmul.f32 0.01, %v7454_v6  ;;  %v7289_v53 = vsel %vm19036_vm9, 0.0, %v16945_v62  ;;  %v7884_v40 = vand.u32 2147483647, %v16930_v61 }
 0x624   : > { %v10351_v60 = vpop.eup %10350  ;;  %v7464_v52 = vadd.f32 1.0, %v10349_v57  ;;  %vm7240_vm14 = vcmp.gt.f32.partialorder %v16961_v17, 20.0  ;;  %v7467_v35 = vmul.f32 -0.5, %v10349_v57  ;;  %v7882_v0 = vadd.f32 1.0, %v7881_v28 }
 0x625   : > { %v7592_v56 = vmul.f32 0.6931472, %v10351_v60  ;;  %v7470_v15 = vand.u32 2147483647, %v10349_v57  ;;  %v7304_v31 = vsel %vm7240_vm14, 0.0, %v16961_v17  ;;  %v16982_v6 = vmul.f32 100.0, %v16967_v45 }
 0x626   : > { %10364 = vlog2.f32 %v7464_v52  ;;  %v16987_v1 = vsel %vm7190_vm3, %v16782_v25, %v8022_v19  ;;  %v7418_v52 = vmul.f32 1.442695, %v7304_v31  ;;  %vm16999_vm9 = vcmp.lt.f32.partialorder %v7740_v5, 0.0004427343 }
 0x627   : > { %v10353_v37 = vpop.eup %10352  ;;  %v7598_v58 = vsel %vm16956_vm15, %v7595_v14, %v7592_v56  ;;  %20374 = vst [vmem:[#allocation35_spill] sm:$0xff] %v16982_v6  ;;  %v7388_v14 = vmul.f32 1.442695, %v7289_v53  ;;  %vm19082_vm15 = vcmp.gt.f32.partialorder %v16982_v6, 20.0  ;;  %v7883_v22 = vmul.f32 %v16930_v61, %v7882_v0 }
 0x628   : > { %v10355_v16 = vpop.eup %10354  ;;  %v8038_v13 = vmul.f32 0.01, %v7598_v58  ;;  %v7608_v18 = vadd.f32 1.0, %v10353_v37  ;;  %v7611_v56 = vmul.f32 -0.5, %v10353_v37  ;;  %v7455_v19 = vadd.f32 1.0, %v16915_v9 }
 0x629   : > { %v7736_v54 = vmul.f32 0.6931472, %v10355_v16  ;;  %v16997_v58 = vpop.eup %10356  ;;  %v7468_v16 = vadd.f32 1.0, %v7467_v35  ;;  %vm17011_vm3 = vcmp.lt.f32.partialorder %v7470_v15, 0.0004427343  ;;  %v7458_v45 = vmul.f32 -0.5, %v16915_v9 }
 0x62a   : > { %v16992_v60 = vsel %vm7206_vm1, %v16797_v12, %v8038_v13  ;;  %10366 = vlog2.f32 %v7608_v18  ;;  %v7614_v5 = vand.u32 2147483647, %v10353_v37  ;;  %v7305_v18 = vsel %vm19082_vm15, 0.0, %v16982_v6 }
 0x62b   : > { %10368 = vpow2.f32 %v7418_v52  ;;  %v17003_v42 = vpop.eup %10358  ;;  %v7742_v12 = vsel %vm16999_vm9, %v7739_v10, %v7736_v54  ;;  %v7612_v10 = vadd.f32 1.0, %v7611_v56  ;;  %vm17019_vm1 = vcmp.lt.f32.partialorder %v7884_v40, 0.0004427343 }
 0x62c   : > { %10370 = vpow2.f32 %v7416_v41  ;;  %v17009_v53 = vpop.eup %10360  ;;  %v7752_v35 = vadd.f32 1.0, %v17003_v42  ;;  %v7599_v41 = vadd.f32 1.0, %v16924_v2  ;;  %v7469_v15 = vmul.f32 %v10349_v57, %v7468_v16 }
 0x62d   : > { %v10363_v31 = vpop.eup %10362  ;;  %10372 = vpow2.f32 %v7388_v14  ;;  %v8054_v54 = vmul.f32 0.01, %v7742_v12  ;;  %v7420_v28 = vmul.f32 1.442695, %v7305_v18  ;;  %vm17025_vm9 = vcmp.lt.f32.partialorder %v7614_v5, 0.0004427343 }
 0x62e   : > { %10374 = vlog2.f32 %v7752_v35  ;;  %v7880_v52 = vmul.f32 0.6931472, %v10363_v31  ;;  %v7755_v40 = vmul.f32 -0.5, %v17003_v42  ;;  %v7613_v14 = vmul.f32 %v10353_v37, %v7612_v10 }
 0x62f   : > { %10376 = vlog2.f32 %v7455_v19  ;;  %v7602_v12 = vmul.f32 -0.5, %v16924_v2  ;;  %v17038_v5 = vsel %vm7222_vm0, %v16816_v34, %v8054_v54  ;;  %v7758_v35 = vand.u32 2147483647, %v17003_v42 }
 0x630   : > { %v10365_v0 = vpop.eup %10364  ;;  %v7886_v56 = vsel %vm17019_vm1, %v7883_v22, %v7880_v52  ;;  %10378 = vlog2.f32 %v7599_v41  ;;  %20383 = vst [vmem:[#allocation82_spill] sm:$0xff] %v17038_v5  ;;  %v7461_v18 = vand.u32 2147483647, %v16915_v9  ;;  %v7476_v22 = vmul.f32 -0.5, %v16997_v58 }
 0x631   : > { %v7466_v25 = vmul.f32 0.6931472, %v10365_v0  ;;  %v8070_v16 = vmul.f32 0.01, %v7886_v56  ;;  %10380 = vpow2.f32 %v7420_v28  ;;  %v7459_v13 = vadd.f32 1.0, %v7458_v45 }
 0x632   : > { %v7756_v41 = vadd.f32 1.0, %v7755_v40  ;;  %v7605_v48 = vand.u32 2147483647, %v16924_v2  ;;  %v7603_v52 = vadd.f32 1.0, %v7602_v12  ;;  %vm17056_vm0 = vcmp.lt.f32.partialorder %v7461_v18, 0.0004427343 }
 0x633   : > { %v7472_v57 = vsel %vm17011_vm3, %v7469_v15, %v7466_v25  ;;  %v17046_v37 = vsel %vm7238_vm11, %v16841_v63, %v8070_v16  ;;  %v7473_v63 = vadd.f32 1.0, %v16997_v58  ;;  %v7477_v28 = vadd.f32 1.0, %v7476_v22 }
 0x634   : > { %v10367_v19 = vpop.eup %10366  ;;  %20384 = vst [vmem:[#allocation28_spill] sm:$0xff] %v17046_v37  ;;  %v8024_v61 = vmul.f32 0.01, %v7472_v57  ;;  %v7617_v25 = vadd.f32 1.0, %v17009_v53  ;;  %vm17063_vm11 = vcmp.lt.f32.partialorder %v7758_v35, 0.0004427343  ;;  %v7460_v57 = vmul.f32 %v16915_v9, %v7459_v13 }
 0x635   : > { %v7610_v31 = vmul.f32 0.6931472, %v10367_v19  ;;  %v10369_v10 = vpop.eup %10368  ;;  %v7757_v19 = vmul.f32 %v17003_v42, %v7756_v41  ;;  %v7604_v9 = vmul.f32 %v16924_v2, %v7603_v52  ;;  %vm17082_vm3 = vcmp.lt.f32.partialorder %v7605_v48, 0.0004427343 }
 0x636   : > { %v17051_v0 = vpop.eup %10370  ;;  %v7896_v54 = vadd.f32 1.0, %v10369_v10  ;;  %v7899_v6 = vmul.f32 -0.5, %v10369_v10  ;;  %v17071_v16 = vsel %vm7192_vm12, %v16851_v43, %v8024_v61  ;;  %v7902_v35 = vand.u32 2147483647, %v10369_v10 }
 0x637   : > { %20385 = vst [vmem:[#allocation40_spill] sm:$0xff] %v17051_v0  ;;  %v7616_v15 = vsel %vm17025_vm9, %v7613_v14, %v7610_v31  ;;  %v17061_v40 = vpop.eup %10372  ;;  %20391 = vst [vmem:[#allocation43_spill] sm:$0xff] %v17071_v16  ;;  %v7743_v45 = vadd.f32 1.0, %v16948_v29 }
 0x638   : > { %v8040_v23 = vmul.f32 0.01, %v7616_v15  ;;  %20388 = vst [vmem:[#allocation75_spill] sm:$0xff] %v17061_v40  ;;  %10382 = vlog2.f32 %v7896_v54  ;;  %v10375_v14 = vpop.eup %10374  ;;  %v7900_v61 = vadd.f32 1.0, %v7899_v6  ;;  %vm17093_vm12 = vcmp.lt.f32.partialorder %v7902_v35, 0.0004427343 }
 0x639   : > { %v10377_v18 = vpop.eup %10376  ;;  %10384 = vlog2.f32 %v7473_v63  ;;  %v7754_v42 = vmul.f32 0.6931472, %v10375_v14  ;;  %v7620_v63 = vmul.f32 -0.5, %v17009_v53 }
 0x63a   : > { %v17076_v12 = vsel %vm7208_vm10, %v16877_v59, %v8040_v23  ;;  %v10379_v43 = vpop.eup %10378  ;;  %v7457_v13 = vmul.f32 0.6931472, %v10377_v18  ;;  %v17087_v59 = vmul.f32 %v16997_v58, %v7477_v28  ;;  %10386 = vlog2.f32 %v7617_v25 }
 0x63b   : > { %20392 = vst [vmem:[#allocation93_spill] sm:$0xff] %v17076_v12  ;;  %v7601_v48 = vmul.f32 0.6931472, %v10379_v43  ;;  %v17103_v23 = vpop.eup %10380 }
 0x63c   : > { %v7463_v52 = vsel %vm17056_vm0, %v7460_v57, %v7457_v13  ;;  %20398 = vst [vmem:[#allocation21_spill] sm:$0xff] %v17103_v23  ;;  %v17116_v57 = vmul.f32 -0.5, %v16948_v29  ;;  %v7901_v13 = vmul.f32 %v10369_v10, %v7900_v61 }
 0x63d   : > { %v7607_v25 = vsel %vm17082_vm3, %v7604_v9, %v7601_v48  ;;  %v8023_v6 = vmul.f32 0.01, %v7463_v52 }
 0x63e   : > { %v6658_v8 = vpop.f32.mrb[104].mxu0  ;;  %v8039_v43 = vmul.f32 0.01, %v7607_v25 }
 0x63f   : > { %v17091_v41 = vadd.f32 %v6658_v8, %v16779_v11  ;;  %v6660_v2 = vpop.f32.mrb[105].mxu0  ;;  %v7760_v8 = vsel %vm17063_vm11, %v7757_v19, %v7754_v42  ;;  %v8087_v48 = vsel %vm7191_vm2, %v16785_v46, %v8023_v6 }
 0x640   : > { %v17098_v54 = vadd.f32 %v6660_v2, %v16779_v11  ;;  %v8103_v10 = vsel %vm7207_vm4, %v16803_v49, %v8039_v43  ;;  %v7621_v43 = vadd.f32 1.0, %v7620_v63 }
 0x641   : > { %v17106_v28 = vmul.f32 100.0, %v17091_v41  ;;  %v9361_v25 = vpack.c.bf16 %v8103_v10, %v8087_v48 }
 0x642   : > { %20397 = vst [vmem:[#allocation80_spill] sm:$0xff] %v17098_v54  ;;  %v17112_v35 = vmul.f32 100.0, %v17098_v54  ;;  %v6664_v18 = vpop.f32.mrb[106].mxu0  ;;  %v10383_v56 = vpop.eup %10382 }
 0x643   : > { %vm7194_vm10 = vcmp.gt.f32.partialorder %v17106_v28, 20.0  ;;  %v17122_v9 = vadd.f32 %v6664_v18, %v16790_v39  ;;  %v6666_v31 = vpop.f32.mrb[107].mxu0  ;;  %v8056_v18 = vmul.f32 0.01, %v7760_v8  ;;  %v7898_v34 = vmul.f32 0.6931472, %v10383_v56  ;;  %v17146_v49 = vpop.eup %10384  ;;  %9362 = vmatprep.subr.bf16.mxu0 %v9361_v25 }
 0x644   : > { %20399 = vst [vmem:[#allocation84_spill] sm:$0xff] %v17112_v35  ;;  %v7258_v2 = vsel %vm7194_vm10, 0.0, %v17106_v28  ;;  %vm19078_vm1 = vcmp.gt.f32.partialorder %v17112_v35, 20.0  ;;  %v17144_v50 = vadd.f32 %v6666_v31, %v16790_v39 }
 0x645   : > { %v7326_v19 = vmul.f32 1.442695, %v7258_v2  ;;  %v6747_v42 = vpop.f32.mrb[104].mxu1  ;;  %v7259_v61 = vsel %vm19078_vm1, 0.0, %v17112_v35  ;;  %v17138_v52 = vmul.f32 100.0, %v17122_v9  ;;  %v17152_v2 = vpop.eup %10386  ;;  %v7904_v8 = vsel %vm17093_vm12, %v7901_v13, %v7898_v34 }
 0x646   : > { %v17141_v47 = vadd.f32 %v6747_v42, %v16779_v11  ;;  %v6749_v46 = vpop.f32.mrb[105].mxu1  ;;  %20400 = vst [vmem:[#allocation76_spill] sm:$0xff] %v17144_v50  ;;  %v7328_v31 = vmul.f32 1.442695, %v7259_v61  ;;  %v8072_v42 = vmul.f32 0.01, %v7904_v8  ;;  %v17174_v13 = vsel %vm7224_vm13, %v16909_v20, %v8056_v18 }
 0x647   : > { %10388 = vpow2.f32 %v7326_v19  ;;  %v17149_v6 = vadd.f32 %v6749_v46, %v16779_v11  ;;  %vm7210_vm2 = vcmp.gt.f32.partialorder %v17138_v52, 20.0  ;;  %v6670_v56 = vpop.f32.mrb[108].mxu0  ;;  %v20402_v19 = vpack.c.bf16 %v16992_v60, %v16987_v1  ;;  %20404 = vst [vmem:[#allocation87_spill] sm:$0xff] %v17174_v13 }
 0x648   : > { %v17157_v48 = vmul.f32 100.0, %v17141_v47  ;;  %v7274_v10 = vsel %vm7210_vm2, 0.0, %v17138_v52  ;;  %v17169_v34 = vadd.f32 %v6670_v56, %v16808_v24  ;;  %v17181_v1 = vmul.f32 100.0, %v17144_v50  ;;  %v6672_v46 = vpop.f32.mrb[109].mxu0 }
 0x649   : > { %20401 = vst [vmem:[#allocation91_spill] sm:$0xff] %v17149_v6  ;;  %9364 = vmatpush1.bf16.msra.mxu0 %v20402_v19  ;;  %v17166_v63 = vmul.f32 100.0, %v17149_v6  ;;  %v7358_v25 = vmul.f32 1.442695, %v7274_v10  ;;  %v6753_v15 = vpop.f32.mrb[106].mxu1  ;;  %v17186_v8 = vsel %vm7240_vm14, %v16935_v21, %v8072_v42 }
 0x64a   : > { %vm7196_vm4 = vcmp.gt.f32.partialorder %v17157_v48, 20.0  ;;  %v17178_v61 = vadd.f32 %v6753_v15, %v16790_v39  ;;  %20405 = vst [vmem:[#allocation90_spill] sm:$0xff] %v17181_v1  ;;  %v6755_v60 = vpop.f32.mrb[107].mxu1  ;;  %20406 = vst [vmem:[#allocation34_spill] sm:$0xff] %v17186_v8  ;;  %v17204_v19 = vmul.f32 100.0, %v17169_v34  ;;  %v17210_v15 = vadd.f32 %v6672_v46, %v16808_v24 }
 0x64b   : > { %20403 = vst [vmem:[#allocation25_spill] sm:$0xff] %v17166_v63  ;;  %v7260_v20 = vsel %vm7196_vm4, 0.0, %v17157_v48  ;;  %vm19062_vm13 = vcmp.gt.f32.partialorder %v17166_v63, 20.0  ;;  %10390 = vpow2.f32 %v7358_v25  ;;  %v6676_v56 = vpop.f32.mrb[110].mxu0  ;;  %v17201_v17 = vadd.f32 %v6755_v60, %v16790_v39 }
 0x64c   : > { %v7330_v18 = vmul.f32 1.442695, %v7260_v20  ;;  %v17195_v10 = vmul.f32 100.0, %v17178_v61  ;;  %10392 = vlog2.f32 %v7743_v45  ;;  %v7261_v21 = vsel %vm19062_vm13, 0.0, %v17166_v63  ;;  %v17206_v42 = vpop.f32.mrb[111].mxu0  ;;  %20408 = vst [vmem:[#allocation85_spill] sm:$0xff] %v17210_v15 }
 0x64d   : > { %10394 = vpow2.f32 %v7328_v31  ;;  %20407 = vst [vmem:[#allocation78_spill] sm:$0xff] %v17201_v17  ;;  %v6759_v25 = vpop.f32.mrb[108].mxu1  ;;  %v7747_v45 = vadd.f32 1.0, %v17116_v57  ;;  %vm19069_vm9 = vcmp.gt.f32.partialorder %v17181_v1, 20.0  ;;  %v17218_v60 = vmul.f32 100.0, %v17201_v17 }
 0x64e   : > { %10396 = vpow2.f32 %v7330_v18  ;;  %vm7212_vm14 = vcmp.gt.f32.partialorder %v17195_v10, 20.0  ;;  %vm7226_vm0 = vcmp.gt.f32.partialorder %v17204_v19, 20.0  ;;  %v6761_v20 = vpop.f32.mrb[109].mxu1  ;;  %v7332_v18 = vmul.f32 1.442695, %v7261_v21 }
 0x64f   : > { %v7276_v31 = vsel %vm7212_vm14, 0.0, %v17195_v10  ;;  %20409 = vst [vmem:[#allocation88_spill] sm:$0xff] %v17218_v60  ;;  %v7290_v46 = vsel %vm7226_vm0, 0.0, %v17204_v19  ;;  %v17225_v57 = vadd.f32 %v6759_v25, %v16808_v24  ;;  %vm19060_vm11 = vcmp.gt.f32.partialorder %v17218_v60, 20.0 }
 0x650   : > { %v7362_v36 = vmul.f32 1.442695, %v7276_v31  ;;  %v7390_v14 = vmul.f32 1.442695, %v7290_v46  ;;  %v17229_v3 = vmul.f32 100.0, %v17210_v15  ;;  %v17232_v17 = vadd.f32 %v6761_v20, %v16808_v24 }
 0x651   : > { %v10389_v22 = vpop.eup %10388  ;;  %v7275_v21 = vsel %vm19069_vm9, 0.0, %v17181_v1  ;;  %v6765_v31 = vpop.f32.mrb[110].mxu1  ;;  %v17238_v25 = vmul.f32 %v17009_v53, %v7621_v43  ;;  %v17241_v46 = vmul.f32 100.0, %v17225_v57  ;;  %v17250_v20 = vmul.f32 %v16948_v29, %v7747_v45 }
 0x652   : > { %20410 = vst [vmem:[#allocation42_spill] sm:$0xff] %v17229_v3  ;;  %20411 = vst [vmem:[#allocation96_spill] sm:$0xff] %v17232_v17  ;;  %v7482_v63 = vadd.f32 1.0, %v10389_v22  ;;  %10398 = vpow2.f32 %v7362_v36  ;;  %v7485_v6 = vmul.f32 -0.5, %v10389_v22  ;;  %vm19055_vm3 = vcmp.gt.f32.partialorder %v17229_v3, 20.0  ;;  %v17244_v15 = vpop.f32.mrb[111].mxu1 }
 0x653   : > { %20412 = vst [vmem:[#allocation31_spill] sm:$0xff] %v17238_v25  ;;  %10400 = vpow2.f32 %v7390_v14  ;;  %v7277_v36 = vsel %vm19060_vm11, 0.0, %v17218_v60  ;;  %20413 = vst [vmem:[#allocation100_spill] sm:$0xff] %v17250_v20  ;;  %v7360_v14 = vmul.f32 1.442695, %v7275_v21  ;;  %vm7228_vm12 = vcmp.gt.f32.partialorder %v17241_v46, 20.0 }
 0x654   : > { %10402 = vlog2.f32 %v7482_v63  ;;  %v17255_v50 = vmul.f32 100.0, %v17232_v17  ;;  %v7488_v63 = vand.u32 2147483647, %v10389_v22  ;;  %v7291_v60 = vsel %vm19055_vm3, 0.0, %v17229_v3 }
 0x655   : > { %v10391_v1 = vpop.eup %10390  ;;  %10404 = vpow2.f32 %v7332_v18  ;;  %v17263_v45 = vadd.f32 %v6676_v56, %v16828_v26  ;;  %v7486_v21 = vadd.f32 1.0, %v7485_v6  ;;  %v7364_v8 = vmul.f32 1.442695, %v7277_v36 }
 0x656   : > { %20414 = vst [vmem:[#allocation94_spill] sm:$0xff] %v17255_v50  ;;  %v17257_v35 = vpop.eup %10392  ;;  %v7626_v54 = vadd.f32 1.0, %v10391_v1  ;;  %v7629_v13 = vmul.f32 -0.5, %v10391_v1  ;;  %v7292_v17 = vsel %vm7228_vm12, 0.0, %v17241_v46  ;;  %v7632_v33 = vand.u32 2147483647, %v10391_v1 }
 0x657   : > { %20415 = vst [vmem:[#allocation33_spill] sm:$0xff] %v17257_v35  ;;  %v17267_v18 = vpop.eup %10394  ;;  %v7394_v3 = vmul.f32 1.442695, %v7292_v17  ;;  %vm19064_vm3 = vcmp.gt.f32.partialorder %v17255_v50, 20.0  ;;  %v7392_v5 = vmul.f32 1.442695, %v7291_v60 }
 0x658   : > { %v17265_v43 = vpop.f32.mrb[112].mxu0  ;;  %20416 = vst [vmem:[#allocation83_spill] sm:$0xff] %v17267_v18  ;;  %v10397_v55 = vpop.eup %10396  ;;  %10406 = vlog2.f32 %v7626_v54  ;;  %v17276_v18 = vmul.f32 0.6931472, %v17146_v49  ;;  %v17279_v36 = vmul.f32 100.0, %v17263_v45  ;;  %v7630_v17 = vadd.f32 1.0, %v7629_v13 }
 0x659   : > { %v17272_v62 = vpop.f32.mrb[113].mxu0  ;;  %v7500_v56 = vadd.f32 1.0, %v10397_v55  ;;  %10408 = vpow2.f32 %v7360_v14  ;;  %v7503_v6 = vmul.f32 -0.5, %v10397_v55  ;;  %v17284_v7 = vmul.f32 0.6931472, %v17152_v2 }
 0x65a   : > { %10410 = vpow2.f32 %v7394_v3  ;;  %v7506_v54 = vand.u32 2147483647, %v10397_v55  ;;  %v7293_v60 = vsel %vm19064_vm3, 0.0, %v17255_v50  ;;  %v7487_v3 = vmul.f32 %v10389_v22, %v7486_v21 }
 0x65b   : > { %10412 = vlog2.f32 %v7500_v56  ;;  %vm17293_vm11 = vcmp.lt.f32.partialorder %v7488_v63, 0.0004427343  ;;  %vm17297_vm13 = vcmp.lt.f32.partialorder %v7632_v33, 0.0004427343  ;;  %vm7242_vm3 = vcmp.gt.f32.partialorder %v17279_v36, 20.0 }
 0x65c   : > { %v17281_v37 = vpop.f32.mrb[114].mxu0  ;;  %v17291_v49 = vpop.eup %10398  ;;  %10414 = vpow2.f32 %v7364_v8  ;;  %v17306_v50 = vadd.f32 %v6765_v31, %v16828_v26  ;;  %v7504_v21 = vadd.f32 1.0, %v7503_v6  ;;  %v7396_v44 = vmul.f32 1.442695, %v7293_v60 }
 0x65d   : > { %v17289_v14 = vpop.f32.mrb[115].mxu0  ;;  %v17301_v13 = vpop.eup %10400  ;;  %v7644_v56 = vadd.f32 1.0, %v17291_v49  ;;  %10416 = vpow2.f32 %v7392_v5  ;;  %v17313_v8 = vadd.f32 %v17206_v42, %v16828_v26  ;;  %vm17319_vm9 = vcmp.lt.f32.partialorder %v7506_v54, 0.0004427343 }
 0x65e   : > { %v6925_v2 = vpop.f32.mrb[112].mxu1  ;;  %v10403_v63 = vpop.eup %10402  ;;  %v7770_v33 = vadd.f32 1.0, %v17301_v13  ;;  %v7631_v31 = vmul.f32 %v10391_v1, %v7630_v17  ;;  %v7647_v6 = vmul.f32 -0.5, %v17291_v49  ;;  %v7773_v60 = vmul.f32 -0.5, %v17301_v13 }
 0x65f   : > { %v17308_v22 = vpop.f32.mrb[113].mxu1  ;;  %20421 = vst [vmem:[#allocation58_spill] sm:$0xff] %v17313_v8  ;;  %v17317_v40 = vpop.eup %10404  ;;  %v7484_v5 = vmul.f32 0.6931472, %v10403_v63  ;;  %10418 = vlog2.f32 %v7644_v56  ;;  %v7306_v42 = vsel %vm7242_vm3, 0.0, %v17279_v36  ;;  %v17335_v1 = vmul.f32 100.0, %v17306_v50 }
 0x660   : > { %v17315_v23 = vpop.f32.mrb[116].mxu0  ;;  %20422 = vst [vmem:[#allocation39_spill] sm:$0xff] %v17317_v40  ;;  %10420 = vlog2.f32 %v7770_v33  ;;  %v7422_v63 = vmul.f32 1.442695, %v7306_v42  ;;  %v17339_v17 = vadd.f32 %v17244_v15, %v16828_v26  ;;  %v7505_v40 = vmul.f32 %v10397_v55, %v7504_v21 }
 0x661   : > { %v17323_v35 = vpop.f32.mrb[117].mxu0  ;;  %v7490_v54 = vsel %vm17293_vm11, %v7487_v3, %v7484_v5  ;;  %v7650_v29 = vand.u32 2147483647, %v17291_v49  ;;  %10422 = vpow2.f32 %v7396_v44  ;;  %v17345_v16 = vmul.f32 100.0, %v17313_v8 }
 0x662   : > { %v17330_v0 = vpop.f32.mrb[114].mxu1  ;;  %20425 = vst [vmem:[#allocation89_spill] sm:$0xff] %v17339_v17  ;;  %v10407_v33 = vpop.eup %10406  ;;  %v7776_v42 = vand.u32 2147483647, %v17301_v13  ;;  %10424 = vpow2.f32 %v7422_v63  ;;  %vm7244_vm11 = vcmp.gt.f32.partialorder %v17335_v1, 20.0  ;;  %v7648_v21 = vadd.f32 1.0, %v7647_v6 }
 0x663   : > { %v17341_v56 = vpop.f32.mrb[115].mxu1  ;;  %20426 = vst [vmem:[#allocation56_spill] sm:$0xff] %v17345_v16  ;;  %v17349_v3 = vpop.eup %10408  ;;  %v7628_v5 = vmul.f32 0.6931472, %v10407_v33  ;;  %v8026_v55 = vmul.f32 0.01, %v7490_v54  ;;  %v17375_v25 = vadd.f32 %v17265_v43, %v16779_v11 }
 0x664   : > { %v17347_v27 = vpop.f32.mrb[118].mxu0  ;;  %20427 = vst [vmem:[#allocation68_spill] sm:$0xff] %v17349_v3  ;;  %v17355_v12 = vpop.eup %10410  ;;  %v7774_v44 = vadd.f32 1.0, %v7773_v60  ;;  %v7308_v8 = vsel %vm7244_vm11, 0.0, %v17335_v1  ;;  %vm19084_vm1 = vcmp.gt.f32.partialorder %v17345_v16, 20.0  ;;  %v17367_v51 = vmul.f32 100.0, %v17339_v17 }
 0x665   : > { %v17353_v15 = vpop.f32.mrb[119].mxu0  ;;  %v10413_v3 = vpop.eup %10412  ;;  %v7634_v33 = vsel %vm17297_vm13, %v7631_v31, %v7628_v5  ;;  %v7788_v63 = vadd.f32 1.0, %v17355_v12  ;;  %v7426_v38 = vmul.f32 1.442695, %v7308_v8  ;;  %vm17379_vm13 = vcmp.lt.f32.partialorder %v7650_v29, 0.0004427343 }
 0x666   : > { %v17360_v4 = vpop.f32.mrb[116].mxu1  ;;  %20428 = vst [vmem:[#allocation44_spill] sm:$0xff] %v17367_v51  ;;  %v17371_v6 = vpop.eup %10414  ;;  %v7502_v60 = vmul.f32 0.6931472, %v10413_v3  ;;  %v8042_v30 = vmul.f32 0.01, %v7634_v33  ;;  %v17388_v17 = vadd.f32 %v6925_v2, %v16779_v11  ;;  %v17393_v8 = vsel %vm7194_vm10, %v17091_v41, %v8026_v55 }
 0x667   : > { %v17369_v54 = vpop.f32.mrb[117].mxu1  ;;  %20429 = vst [vmem:[#allocation32_spill] sm:$0xff] %v17371_v6  ;;  %v17377_v32 = vpop.eup %10416  ;;  %vm17383_vm15 = vcmp.lt.f32.partialorder %v7776_v42, 0.0004427343  ;;  %10426 = vlog2.f32 %v7788_v63  ;;  %20435 = vst [vmem:[#allocation52_spill] sm:$0xff] %v17393_v8  ;;  %v7649_v33 = vmul.f32 %v17291_v49, %v7648_v21  ;;  %v7775_v41 = vmul.f32 %v17301_v13, %v7774_v44  ;;  %v20521_v49 = vld [vmem:[#allocation21_spill] sm:$0xff] }
 0x668   : > { %20430 = vst [vmem:[#allocation62_spill] sm:$0xff] %v17377_v32  ;;  %v7508_v43 = vsel %vm17319_vm9, %v7505_v40, %v7502_v60  ;;  %v17400_v29 = vsel %vm7210_vm2, %v17122_v9, %v8042_v30  ;;  %10428 = vpow2.f32 %v7426_v38  ;;  %v7307_v40 = vsel %vm19084_vm1, 0.0, %v17345_v16 }
 0x669   : > { %20436 = vst [vmem:[#allocation20_spill] sm:$0xff] %v17400_v29  ;;  %v10419_v42 = vpop.eup %10418  ;;  %v8028_v30 = vmul.f32 0.01, %v7508_v43  ;;  %vm19115_vm10 = vcmp.gt.f32.partialorder %v17367_v51, 20.0  ;;  %v17415_v38 = vmul.f32 100.0, %v17375_v25  ;;  %v7791_v55 = vmul.f32 -0.5, %v17355_v12 }
 0x66a   : > { %v17402_v3 = vpop.f32.mrb[118].mxu1  ;;  %v10421_v52 = vpop.eup %10420  ;;  %v7646_v9 = vmul.f32 0.6931472, %v10419_v42  ;;  %v20437_v20 = vand.u32 2147483647, %v16997_v58  ;;  %v17425_v21 = vmul.f32 100.0, %v17388_v17  ;;  %v17429_v44 = vadd.f32 %v17272_v62, %v16779_v11 }
 0x66b   : > { %v17411_v28 = vpop.f32.mrb[119].mxu1  ;;  %v7772_v13 = vmul.f32 0.6931472, %v10421_v52  ;;  %v17431_v63 = vpop.eup %10422  ;;  %v7794_v58 = vand.u32 2147483647, %v17355_v12  ;;  %vm7198_vm9 = vcmp.gt.f32.partialorder %v17415_v38, 20.0  ;;  %v17447_v31 = vsel %vm7196_vm4, %v17141_v47, %v8028_v30 }
 0x66c   : > { %vm17419_vm2 = vcmp.lt.f32.partialorder %v20437_v20, 0.0004427343  ;;  %20440 = vst [vmem:[#allocation95_spill] sm:$0xff] %v17429_v44  ;;  %20441 = vst [vmem:[#allocation24_spill] sm:$0xff] %v17431_v63  ;;  %v7652_v60 = vsel %vm17379_vm13, %v7649_v33, %v7646_v9  ;;  %v7424_v43 = vmul.f32 1.442695, %v7307_v40  ;;  %v10425_v42 = vpop.eup %10424  ;;  %v17453_v9 = vadd.f32 %v17308_v22, %v16779_v11 }
 0x66d   : > { %v8044_v52 = vmul.f32 0.01, %v7652_v60  ;;  %v7309_v20 = vsel %vm19115_vm10, 0.0, %v17367_v51  ;;  %v7262_v62 = vsel %vm7198_vm9, 0.0, %v17415_v38  ;;  %vm7200_vm1 = vcmp.gt.f32.partialorder %v17425_v21, 20.0  ;;  %20442 = vst [vmem:[#allocation79_spill] sm:$0xff] %v17447_v31 }
 0x66e   : > { %v7778_v33 = vsel %vm17383_vm15, %v7775_v41, %v7772_v13  ;;  %v7914_v40 = vadd.f32 1.0, %v10425_v42  ;;  %20443 = vst [vmem:[#allocation48_spill] sm:$0xff] %v17453_v9  ;;  %v7334_v2 = vmul.f32 1.442695, %v7262_v62  ;;  %v7264_v48 = vsel %vm7200_vm1, 0.0, %v17425_v21 }
 0x66f   : > { %v17458_v60 = vsel %vm7212_vm14, %v17178_v61, %v8044_v52  ;;  %v17464_v47 = vmul.f32 100.0, %v17429_v44  ;;  %v17466_v5 = vpop.f32.mrb[120].mxu0  ;;  %v7792_v22 = vadd.f32 1.0, %v7791_v55  ;;  %v7917_v30 = vmul.f32 -0.5, %v10425_v42 }
 0x670   : > { %20444 = vst [vmem:[#allocation101_spill] sm:$0xff] %v17458_v60  ;;  %10430 = vlog2.f32 %v7914_v40  ;;  %v17470_v13 = vpop.f32.mrb[121].mxu0  ;;  %vm17472_vm15 = vcmp.lt.f32.partialorder %v7794_v58, 0.0004427343  ;;  %v7338_v52 = vmul.f32 1.442695, %v7264_v48  ;;  %v17553_v63 = vadd.f32 %v17315_v23, %v16808_v24 }
 0x671   : > { %20445 = vst [vmem:[#allocation23_spill] sm:$0xff] %v17464_v47  ;;  %v10427_v61 = vpop.eup %10426  ;;  %10432 = vpow2.f32 %v7334_v2  ;;  %vm19101_vm4 = vcmp.gt.f32.partialorder %v17464_v47, 20.0  ;;  %v8058_v44 = vmul.f32 0.01, %v7778_v33  ;;  %v7428_v51 = vmul.f32 1.442695, %v7309_v20 }
 0x672   : > { %v17477_v62 = vpop.eup %10428  ;;  %10434 = vpow2.f32 %v7424_v43  ;;  %v17480_v55 = vmul.f32 100.0, %v17453_v9  ;;  %v7920_v41 = vand.u32 2147483647, %v10425_v42  ;;  %v7918_v43 = vadd.f32 1.0, %v7917_v30 }
 0x673   : > { %v17482_v40 = vpop.f32.mrb[122].mxu0  ;;  %v7932_v58 = vadd.f32 1.0, %v17477_v62  ;;  %10436 = vpow2.f32 %v7338_v52  ;;  %v7263_v20 = vsel %vm19101_vm4, 0.0, %v17464_v47  ;;  %v17499_v33 = vadd.f32 %v17281_v37, %v16790_v39 }
 0x674   : > { %20448 = vst [vmem:[#allocation45_spill] sm:$0xff] %v17480_v55  ;;  %v17489_v48 = vpop.f32.mrb[120].mxu1  ;;  %v17491_v16 = vpop.f32.mrb[123].mxu0  ;;  %vm19094_vm14 = vcmp.gt.f32.partialorder %v17480_v55, 20.0  ;;  %v7790_v9 = vmul.f32 0.6931472, %v10427_v61  ;;  %v7793_v2 = vmul.f32 %v17355_v12, %v7792_v22  ;;  %v17513_v37 = vadd.f32 %v17330_v0, %v16790_v39 }
 0x675   : > { %v17501_v52 = vpop.f32.mrb[121].mxu1  ;;  %10438 = vlog2.f32 %v7932_v58  ;;  %v7935_v31 = vmul.f32 -0.5, %v17477_v62  ;;  %v7265_v30 = vsel %vm19094_vm14, 0.0, %v17480_v55  ;;  %v17509_v47 = vmul.f32 100.0, %v17499_v33 }
 0x676   : > { %10440 = vpow2.f32 %v7428_v51  ;;  %v17520_v12 = vsel %vm7226_vm0, %v17169_v34, %v8058_v44  ;;  %vm17522_vm13 = vcmp.lt.f32.partialorder %v7920_v41, 0.0004427343  ;;  %v7336_v22 = vmul.f32 1.442695, %v7263_v20 }
 0x677   : > { %v17515_v60 = vpop.f32.mrb[124].mxu0  ;;  %20449 = vst [vmem:[#allocation77_spill] sm:$0xff] %v17520_v12  ;;  %v17528_v61 = vadd.f32 %v17289_v14, %v16790_v39  ;;  %v7919_v55 = vmul.f32 %v10425_v42, %v7918_v43  ;;  %v7938_v8 = vand.u32 2147483647, %v17477_v62  ;;  %vm7214_vm14 = vcmp.gt.f32.partialorder %v17509_v47, 20.0 }
 0x678   : > { %v17530_v58 = vpop.f32.mrb[122].mxu1  ;;  %v17532_v0 = vpop.f32.mrb[125].mxu0  ;;  %v17537_v34 = vmul.f32 100.0, %v17513_v37  ;;  %v7796_v44 = vsel %vm17472_vm15, %v7793_v2, %v7790_v9  ;;  %v7936_v41 = vadd.f32 1.0, %v7935_v31  ;;  %v7340_v14 = vmul.f32 1.442695, %v7265_v30 }
 0x679   : > { %20452 = vst [vmem:[#allocation22_spill] sm:$0xff] %v17528_v61  ;;  %20453 = vst [vmem:[#allocation17_spill] sm:$0xff] %v17532_v0  ;;  %v17539_v19 = vpop.f32.mrb[123].mxu1  ;;  %v7278_v20 = vsel %vm7214_vm14, 0.0, %v17509_v47  ;;  %v17549_v43 = vadd.f32 %v17341_v56, %v16790_v39  ;;  %10442 = vpow2.f32 %v7336_v22  ;;  %v17563_v30 = vmul.f32 100.0, %v17528_v61 }
 0x67a   : > { %v10431_v29 = vpop.eup %10430  ;;  %v7366_v42 = vmul.f32 1.442695, %v7278_v20  ;;  %vm7216_vm0 = vcmp.gt.f32.partialorder %v17537_v34, 20.0  ;;  %v8060_v32 = vmul.f32 0.01, %v7796_v44  ;;  %v17572_v6 = vadd.f32 %v17360_v4, %v16808_v24 }
 0x67b   : > { %20454 = vst [vmem:[#allocation14_spill] sm:$0xff] %v17549_v43  ;;  %v17555_v10 = vpop.f32.mrb[126].mxu0  ;;  %v17557_v31 = vpop.eup %10432  ;;  %v7916_v9 = vmul.f32 0.6931472, %v10431_v29  ;;  %v7280_v2 = vsel %vm7216_vm0, 0.0, %v17537_v34  ;;  %20456 = vst [vmem:[#allocation72_spill] sm:$0xff] %v17563_v30  ;;  %v7937_v0 = vmul.f32 %v17477_v62, %v7936_v41  ;;  %v17808_v34 = vadd.f32 %v17501_v52, %v16779_v11 }
 0x67c   : > { %20455 = vst [vmem:[#allocation64_spill] sm:$0xff] %v17555_v10  ;;  %v17565_v20 = vpop.f32.mrb[124].mxu1  ;;  %v17567_v56 = vpop.eup %10434  ;;  %v7518_v23 = vadd.f32 1.0, %v17557_v31  ;;  %10444 = vpow2.f32 %v7366_v42  ;;  %v7370_v44 = vmul.f32 1.442695, %v7280_v2  ;;  %v17584_v42 = vmul.f32 100.0, %v17549_v43 }
 0x67d   : > { %20457 = vst [vmem:[#allocation66_spill] sm:$0xff] %v17565_v20  ;;  %20458 = vst [vmem:[#allocation13_spill] sm:$0xff] %v17567_v56  ;;  %v17574_v29 = vpop.f32.mrb[125].mxu1  ;;  %v17576_v22 = vpop.f32.mrb[127].mxu0  ;;  %v7922_v61 = vsel %vm17522_vm13, %v7919_v55, %v7916_v9  ;;  %10446 = vpow2.f32 %v7340_v14  ;;  %v17587_v4 = vmul.f32 100.0, %v17553_v63  ;;  %vm19112_vm15 = vcmp.gt.f32.partialorder %v17563_v30, 20.0 }
 0x67e   : > { %20459 = vst [vmem:[#allocation27_spill] sm:$0xff] %v17574_v29  ;;  %20460 = vst [vmem:[#allocation98_spill] sm:$0xff] %v17576_v22  ;;  %v17578_v10 = vpop.eup %10436  ;;  %v8074_v56 = vmul.f32 0.01, %v7922_v61  ;;  %10448 = vlog2.f32 %v7518_v23  ;;  %v7521_v22 = vmul.f32 -0.5, %v17557_v31  ;;  %v17603_v14 = vmul.f32 100.0, %v17572_v6 }
 0x67f   : > { %20461 = vst [vmem:[#allocation18_spill] sm:$0xff] %v17584_v42  ;;  %v10439_v29 = vpop.eup %10438  ;;  %v7536_v20 = vadd.f32 1.0, %v17578_v10  ;;  %10450 = vpow2.f32 %v7370_v44  ;;  %v7524_v41 = vand.u32 2147483647, %v17557_v31  ;;  %v17610_v2 = vsel %vm7228_vm12, %v17225_v57, %v8060_v32  ;;  %20493 = vst [vmem:[#allocation86_spill] sm:$0xff] %v17808_v34 }
 0x680   : > { %v17592_v55 = vpop.f32.mrb[126].mxu1  ;;  %v17594_v62 = vpop.eup %10440  ;;  %v17599_v51 = vsel %vm7242_vm3, %v17263_v45, %v8074_v56  ;;  %v7934_v61 = vmul.f32 0.6931472, %v10439_v29  ;;  %20463 = vst [vmem:[#allocation59_spill] sm:$0xff] %v17610_v2  ;;  %vm7939_vm13 = vcmp.lt.f32.partialorder %v7938_v8, 0.0004427343 }
 0x681   : > { %20462 = vst [vmem:[#allocation15_spill] sm:$0xff] %v17599_v51  ;;  %v17605_v9 = vpop.f32.mrb[127].mxu1  ;;  %10452 = vlog2.f32 %v7536_v20  ;;  %v7279_v36 = vsel %vm19112_vm15, 0.0, %v17563_v30  ;;  %vm19110_vm3 = vcmp.gt.f32.partialorder %v17584_v42, 20.0  ;;  %vm7230_vm4 = vcmp.gt.f32.partialorder %v17587_v4, 20.0 }
 0x682   : > { %v7940_v45 = vsel %vm7939_vm13, %v7937_v0, %v7934_v61  ;;  %v7522_v29 = vadd.f32 1.0, %v7521_v22  ;;  %v7539_v46 = vmul.f32 -0.5, %v17578_v10  ;;  %v7294_v57 = vsel %vm7230_vm4, 0.0, %v17587_v4 }
 0x683   : > { %v8076_v56 = vmul.f32 0.01, %v7940_v45  ;;  %vm17623_vm12 = vcmp.lt.f32.partialorder %v7524_v41, 0.0004427343  ;;  %v7398_v8 = vmul.f32 1.442695, %v7294_v57  ;;  %v17630_v0 = vadd.f32 %v17323_v35, %v16808_v24  ;;  %v17636_v22 = vpop.eup %10442 }
 0x684   : > { %vm7232_vm13 = vcmp.gt.f32.partialorder %v17603_v14, 20.0  ;;  %v17634_v20 = vadd.f32 %v17369_v54, %v16808_v24  ;;  %v7281_v61 = vsel %vm19110_vm3, 0.0, %v17584_v42  ;;  %v17651_v41 = vadd.f32 %v17347_v27, %v16828_v26 }
 0x685   : > { %20466 = vst [vmem:[#allocation55_spill] sm:$0xff] %v17630_v0  ;;  %v17641_v44 = vsel %vm7244_vm11, %v17306_v50, %v8076_v56  ;;  %v7296_v35 = vsel %vm7232_vm13, 0.0, %v17603_v14  ;;  %10454 = vpow2.f32 %v7398_v8  ;;  %v17656_v50 = vmul.f32 100.0, %v17630_v0 }
 0x686   : > { %20467 = vst [vmem:[#allocation26_spill] sm:$0xff] %v17634_v20  ;;  %20468 = vst [vmem:[#allocation11_spill] sm:$0xff] %v17641_v44  ;;  %v10445_v54 = vpop.eup %10444  ;;  %v7402_v1 = vmul.f32 1.442695, %v7296_v35  ;;  %v7542_v57 = vand.u32 2147483647, %v17578_v10 }
 0x687   : > { %20469 = vst [vmem:[#allocation97_spill] sm:$0xff] %v17656_v50  ;;  %v17658_v56 = vpop.eup %10446  ;;  %v7662_v23 = vadd.f32 1.0, %v10445_v54  ;;  %v7665_v42 = vmul.f32 -0.5, %v10445_v54  ;;  %v7368_v43 = vmul.f32 1.442695, %v7279_v36  ;;  %v7540_v12 = vadd.f32 1.0, %v7539_v46 }
 0x688   : > { %20470 = vst [vmem:[#allocation53_spill] sm:$0xff] %v17658_v56  ;;  %v10449_v30 = vpop.eup %10448  ;;  %10456 = vpow2.f32 %v7402_v1  ;;  %vm19113_vm11 = vcmp.gt.f32.partialorder %v17656_v50, 20.0  ;;  %v17663_v27 = vmul.f32 100.0, %v17634_v20  ;;  %v7372_v45 = vmul.f32 1.442695, %v7281_v61 }
 0x689   : > { %v10451_v8 = vpop.eup %10450  ;;  %v7520_v35 = vmul.f32 0.6931472, %v10449_v30  ;;  %10458 = vlog2.f32 %v7662_v23  ;;  %v17666_v0 = vmul.f32 100.0, %v17651_v41  ;;  %v7666_v2 = vadd.f32 1.0, %v7665_v42 }
 0x68a   : > { %20471 = vst [vmem:[#allocation70_spill] sm:$0xff] %v17663_v27  ;;  %v7668_v44 = vand.u32 2147483647, %v10445_v54  ;;  %v7680_v51 = vadd.f32 1.0, %v10451_v8  ;;  %v7295_v36 = vsel %vm19113_vm11, 0.0, %v17656_v50  ;;  %v7523_v1 = vmul.f32 %v17557_v31, %v7522_v29 }
 0x68b   : > { %v10453_v46 = vpop.eup %10452  ;;  %vm17672_vm3 = vcmp.lt.f32.partialorder %v7542_v57, 0.0004427343  ;;  %10460 = vpow2.f32 %v7368_v43  ;;  %v17678_v30 = vadd.f32 %v17402_v3, %v16828_v26  ;;  %v7683_v42 = vmul.f32 -0.5, %v10451_v8 }
 0x68c   : > { %v7538_v23 = vmul.f32 0.6931472, %v10453_v46  ;;  %10462 = vlog2.f32 %v7680_v51  ;;  %vm19118_vm15 = vcmp.gt.f32.partialorder %v17663_v27, 20.0  ;;  %v20474_v61 = vand.u32 2147483647, %v17009_v53 }
 0x68d   : > { %v7526_v31 = vsel %vm17623_vm12, %v7523_v1, %v7520_v35  ;;  %v7686_v29 = vand.u32 2147483647, %v10451_v8  ;;  %v7400_v43 = vmul.f32 1.442695, %v7295_v36  ;;  %vm7246_vm10 = vcmp.gt.f32.partialorder %v17666_v0, 20.0 }
 0x68e   : > { %vm17683_vm11 = vcmp.lt.f32.partialorder %v20474_v61, 0.0004427343  ;;  %v7541_v3 = vmul.f32 %v17578_v10, %v7540_v12  ;;  %v7667_v57 = vmul.f32 %v10445_v54, %v7666_v2  ;;  %vm17691_vm6 = vcmp.lt.f32.partialorder %v7668_v44, 0.0004427343 }
 0x68f   : > { %10464 = vpow2.f32 %v7372_v45  ;;  %v7297_v53 = vsel %vm19118_vm15, 0.0, %v17663_v27  ;;  %v7310_v32 = vsel %vm7246_vm10, 0.0, %v17666_v0  ;;  %v17702_v35 = vmul.f32 100.0, %v17678_v30  ;;  %v10455_v10 = vpop.eup %10454 }
 0x690   : > { %v17706_v12 = vadd.f32 %v17353_v15, %v16828_v26  ;;  %v8030_v2 = vmul.f32 0.01, %v7526_v31  ;;  %v7544_v44 = vsel %vm17672_vm3, %v7541_v3, %v7538_v23  ;;  %v7684_v54 = vadd.f32 1.0, %v7683_v42 }
 0x691   : > { %v7430_v45 = vmul.f32 1.442695, %v7310_v32  ;;  %vm17710_vm12 = vcmp.lt.f32.partialorder %v7686_v29, 0.0004427343  ;;  %v7806_v46 = vadd.f32 1.0, %v10455_v10  ;;  %10466 = vpow2.f32 %v7400_v43 }
 0x692   : > { %20479 = vst [vmem:[#allocation29_spill] sm:$0xff] %v17706_v12  ;;  %v17716_v1 = vadd.f32 %v17411_v28, %v16828_v26  ;;  %v17718_v61 = vpop.eup %10456  ;;  %v7809_v15 = vmul.f32 -0.5, %v10455_v10  ;;  %v7404_v27 = vmul.f32 1.442695, %v7297_v53  ;;  %vm7248_vm15 = vcmp.gt.f32.partialorder %v17702_v35, 20.0 }
 0x693   : > { %10468 = vpow2.f32 %v7430_v45  ;;  %v10459_v20 = vpop.eup %10458  ;;  %v8032_v23 = vmul.f32 0.01, %v7544_v44  ;;  %v7824_v42 = vadd.f32 1.0, %v17718_v61  ;;  %v17723_v31 = vmul.f32 100.0, %v17706_v12  ;;  %v20484_v45 = vld [vmem:[#allocation31_spill] sm:$0xff] }
 0x694   : > { %20482 = vst [vmem:[#allocation16_spill] sm:$0xff] %v17716_v1  ;;  %10470 = vlog2.f32 %v7806_v46  ;;  %v17728_v28 = vsel %vm7198_vm9, %v17375_v25, %v8030_v2  ;;  %v7664_v29 = vmul.f32 0.6931472, %v10459_v20  ;;  %v7812_v43 = vand.u32 2147483647, %v10455_v10 }
 0x695   : > { %v7312_v3 = vsel %vm7248_vm15, 0.0, %v17702_v35  ;;  %v17733_v53 = vpop.eup %10460  ;;  %10472 = vlog2.f32 %v7824_v42  ;;  %v17736_v44 = vmul.f32 100.0, %v17716_v1  ;;  %v7625_v38 = vsel %vm17683_vm11, %v20484_v45, %v17284_v7 }
 0x696   : > { %v7434_v32 = vmul.f32 1.442695, %v7312_v3  ;;  %v10463_v25 = vpop.eup %10462  ;;  %v7670_v2 = vsel %vm17691_vm6, %v7667_v57, %v7664_v29  ;;  %v7685_v46 = vmul.f32 %v10451_v8, %v7684_v54  ;;  %v7810_v20 = vadd.f32 1.0, %v7809_v15  ;;  %v20490_v54 = vld [vmem:[#allocation81_spill] sm:$0xff] }
 0x697   : > { %20483 = vst [vmem:[#allocation74_spill] sm:$0xff] %v17736_v44  ;;  %10474 = vpow2.f32 %v7404_v27  ;;  %v8046_v12 = vmul.f32 0.01, %v7670_v2  ;;  %v7682_v56 = vmul.f32 0.6931472, %v10463_v25  ;;  %vm7247_vm9 = vcmp.gt.f32.partialorder %v17723_v31, 20.0 }
 0x698   : > { %10476 = vpow2.f32 %v7434_v32  ;;  %v17750_v3 = vsel %vm7200_vm1, %v17388_v17, %v8032_v23  ;;  %vm17752_vm3 = vcmp.lt.f32.partialorder %v7812_v43, 0.0004427343  ;;  %v20487_v50 = vsel %vm17419_vm2, %v17087_v59, %v17276_v18 }
 0x699   : > { %v17745_v42 = vpop.eup %10464  ;;  %v8025_v27 = vmul.f32 0.01, %v20487_v50  ;;  %v8041_v8 = vmul.f32 0.01, %v7625_v38  ;;  %v17764_v57 = vsel %vm7214_vm14, %v17499_v33, %v8046_v12  ;;  %v7688_v17 = vsel %vm17710_vm12, %v7685_v46, %v7682_v56  ;;  %v20488_v33 = vld [vmem:[#allocation71_spill] sm:$0xff] }
 0x69a   : > { %v7827_v21 = vmul.f32 -0.5, %v17718_v61  ;;  %vm7249_vm6 = vcmp.gt.f32.partialorder %v17736_v44, 20.0  ;;  %v8048_v51 = vmul.f32 0.01, %v7688_v17  ;;  %v7830_v59 = vand.u32 2147483647, %v17718_v61 }
 0x69b   : > { %v7311_v18 = vsel %vm7247_vm9, 0.0, %v17723_v31  ;;  %v17776_v47 = vpop.eup %10466  ;;  %v8089_v56 = vsel %vm7193_vm7, %v20488_v33, %v8025_v27  ;;  %v8105_v15 = vsel %vm7209_vm8, %v20490_v54, %v8041_v8  ;;  %v17786_v23 = vadd.f32 %v17466_v5, %v16779_v11 }
 0x69c   : > { %v17790_v29 = vadd.f32 %v17489_v48, %v16779_v11  ;;  %v17795_v32 = vsel %vm7216_vm0, %v17513_v37, %v8048_v51  ;;  %v7313_v45 = vsel %vm7249_vm6, 0.0, %v17736_v44  ;;  %v9369_v38 = vpack.c.bf16 %v8105_v15, %v8089_v56 }
 0x69d   : > { %v10469_v43 = vpop.eup %10468  ;;  %v17802_v25 = vadd.f32 %v17470_v13, %v16779_v11  ;;  %v7811_v2 = vmul.f32 %v10455_v10, %v7810_v20  ;;  %v7432_v50 = vmul.f32 1.442695, %v7311_v18  ;;  %v17811_v27 = vmul.f32 100.0, %v17786_v23  ;;  %v20494_v10 = vld [vmem:[#allocation93_spill] sm:$0xff]  ;;  %v20495_v20 = vld [vmem:[#allocation43_spill] sm:$0xff] }
 0x69e   : > { %v10471_v5 = vpop.eup %10470  ;;  %v7950_v46 = vadd.f32 1.0, %v10469_v43  ;;  %9370 = vmatprep.subr.bf16.mxu1 %v9369_v38  ;;  %v17814_v8 = vmul.f32 100.0, %v17790_v29  ;;  %v7828_v17 = vadd.f32 1.0, %v7827_v21  ;;  %v7953_v51 = vmul.f32 -0.5, %v10469_v43  ;;  %v20509_v38 = vld [vmem:[#allocation40_spill] sm:$0xff] }
 0x69f   : > { %20492 = vst [vmem:[#allocation38_spill] sm:$0xff] %v17802_v25  ;;  %v7808_v37 = vmul.f32 0.6931472, %v10471_v5  ;;  %v10473_v13 = vpop.eup %10472  ;;  %v7436_v33 = vmul.f32 1.442695, %v7313_v45  ;;  %v20496_v12 = vpack.c.bf16 %v20494_v10, %v20495_v20  ;;  %vm7202_vm7 = vcmp.gt.f32.partialorder %v17811_v27, 20.0 }
 0x6a0   : > { %10478 = vlog2.f32 %v7950_v46  ;;  %v7956_v52 = vand.u32 2147483647, %v10469_v43  ;;  %vm7204_vm8 = vcmp.gt.f32.partialorder %v17814_v8, 20.0  ;;  %v17824_v18 = vmul.f32 100.0, %v17802_v25 }
 0x6a1   : > { %9372 = vmatpush1.bf16.msra.mxu1 %v20496_v12  ;;  %v17819_v11 = vpop.eup %10474  ;;  %v7814_v21 = vsel %vm17752_vm3, %v7811_v2, %v7808_v37  ;;  %v7266_v54 = vsel %vm7202_vm7, 0.0, %v17811_v27  ;;  %v7268_v36 = vsel %vm7204_vm8, 0.0, %v17814_v8  ;;  %v17835_v15 = vmul.f32 100.0, %v17808_v34 }
 0x6a2   : > { %20497 = vst [vmem:[#allocation103_spill] sm:$0xff] %v17824_v18  ;;  %v10477_v56 = vpop.eup %10476  ;;  %v7826_v45 = vmul.f32 0.6931472, %v10473_v13  ;;  %vm17837_vm1 = vcmp.lt.f32.partialorder %v7830_v59, 0.0004427343  ;;  %10480 = vpow2.f32 %v7432_v50  ;;  %v7829_v7 = vmul.f32 %v17718_v61, %v7828_v17 }
 0x6a3   : > { %20498 = vst [vmem:[#allocation47_spill] sm:$0xff] %v17835_v15  ;;  %v7968_v5 = vadd.f32 1.0, %v10477_v56  ;;  %10482 = vpow2.f32 %v7436_v33  ;;  %v7342_v2 = vmul.f32 1.442695, %v7266_v54  ;;  %v7346_v46 = vmul.f32 1.442695, %v7268_v36 }
 0x6a4   : > { %v8062_v37 = vmul.f32 0.01, %v7814_v21  ;;  %v7954_v10 = vadd.f32 1.0, %v7953_v51  ;;  %vm7203_vm2 = vcmp.gt.f32.partialorder %v17824_v18, 20.0  ;;  %vm17843_vm14 = vcmp.lt.f32.partialorder %v7956_v52, 0.0004427343 }
 0x6a5   : > { %10484 = vlog2.f32 %v7968_v5  ;;  %v7267_v59 = vsel %vm7203_vm2, 0.0, %v17824_v18  ;;  %vm7205_vm0 = vcmp.gt.f32.partialorder %v17835_v15, 20.0  ;;  %v7832_v61 = vsel %vm17837_vm1, %v7829_v7, %v7826_v45  ;;  %v20505_v36 = vld [vmem:[#allocation63_spill] sm:$0xff] }
 0x6a6   : > { %10486 = vpow2.f32 %v7342_v2  ;;  %v7971_v50 = vmul.f32 -0.5, %v10477_v56  ;;  %v7344_v13 = vmul.f32 1.442695, %v7267_v59  ;;  %v7269_v17 = vsel %vm7205_vm0, 0.0, %v17835_v15 }
 0x6a7   : > { %10488 = vpow2.f32 %v7346_v46  ;;  %v17858_v51 = vadd.f32 %v17482_v40, %v16790_v39  ;;  %v17862_v33 = vadd.f32 %v17530_v58, %v16790_v39  ;;  %v17866_v12 = vadd.f32 %v17491_v16, %v16790_v39 }
 0x6a8   : > { %v17871_v52 = vsel %vm7230_vm4, %v17553_v63, %v8062_v37  ;;  %v7955_v21 = vmul.f32 %v10469_v43, %v7954_v10  ;;  %v7974_v54 = vand.u32 2147483647, %v10477_v56  ;;  %v20506_v45 = vand.u32 2147483647, %v20505_v36 }
 0x6a9   : > { %20503 = vst [vmem:[#allocation49_spill] sm:$0xff] %v17866_v12  ;;  %20504 = vst [vmem:[#allocation12_spill] sm:$0xff] %v17871_v52  ;;  %v7887_v58 = vadd.f32 1.0, %v20509_v38  ;;  %v8064_v7 = vmul.f32 0.01, %v7832_v61  ;;  %v17881_v16 = vmul.f32 100.0, %v17858_v51  ;;  %v17893_v37 = vadd.f32 %v17539_v19, %v16790_v39 }
 0x6aa   : > { %vm17875_vm11 = vcmp.lt.f32.partialorder %v20506_v45, 0.0004427343  ;;  %v10479_v5 = vpop.eup %10478  ;;  %v17884_v2 = vmul.f32 100.0, %v17862_v33  ;;  %v17887_v63 = vmul.f32 100.0, %v17866_v12  ;;  %v7972_v43 = vadd.f32 1.0, %v7971_v50  ;;  %v20512_v50 = vld [vmem:[#allocation33_spill] sm:$0xff] }
 0x6ab   : > { %v7952_v4 = vmul.f32 0.6931472, %v10479_v5  ;;  %v7348_v46 = vmul.f32 1.442695, %v7269_v17  ;;  %10490 = vlog2.f32 %v7887_v58  ;;  %vm7218_vm4 = vcmp.gt.f32.partialorder %v17881_v16, 20.0  ;;  %20511 = vst [vmem:[#allocation36_spill] sm:$0xff] %v17893_v37 }
 0x6ac   : > { %20510 = vst [vmem:[#allocation54_spill] sm:$0xff] %v17887_v63  ;;  %10492 = vpow2.f32 %v7344_v13  ;;  %vm7220_vm12 = vcmp.gt.f32.partialorder %v17884_v2, 20.0  ;;  %v17895_v10 = vpop.eup %10480  ;;  %v7282_v61 = vsel %vm7218_vm4, 0.0, %v17881_v16  ;;  %vm7219_vm3 = vcmp.gt.f32.partialorder %v17887_v63, 20.0 }
 0x6ad   : > { %v7958_v59 = vsel %vm17843_vm14, %v7955_v21, %v7952_v4  ;;  %v7745_v13 = vmul.f32 0.6931472, %v20512_v50  ;;  %v17904_v17 = vpop.eup %10482  ;;  %v7374_v45 = vmul.f32 1.442695, %v7282_v61  ;;  %v7284_v39 = vsel %vm7220_vm12, 0.0, %v17884_v2 }
 0x6ae   : > { %v8078_v36 = vmul.f32 0.01, %v7958_v59  ;;  %v7890_v19 = vmul.f32 -0.5, %v20509_v38  ;;  %v17913_v21 = vsel %vm7232_vm13, %v17572_v6, %v8064_v7  ;;  %v7973_v58 = vmul.f32 %v10477_v56, %v7972_v43  ;;  %v20518_v43 = vld [vmem:[#allocation100_spill] sm:$0xff] }
 0x6af   : > { %v10485_v20 = vpop.eup %10484  ;;  %20513 = vst [vmem:[#allocation37_spill] sm:$0xff] %v17913_v21  ;;  %vm17915_vm1 = vcmp.lt.f32.partialorder %v7974_v54, 0.0004427343  ;;  %10494 = vpow2.f32 %v7348_v46  ;;  %v17925_v50 = vmul.f32 100.0, %v17893_v37  ;;  %v7378_v54 = vmul.f32 1.442695, %v7284_v39 }
 0x6b0   : > { %v10487_v4 = vpop.eup %10486  ;;  %v17922_v59 = vsel %vm7246_vm10, %v17651_v41, %v8078_v36  ;;  %v7970_v61 = vmul.f32 0.6931472, %v10485_v20  ;;  %10496 = vpow2.f32 %v7374_v45  ;;  %v7283_v7 = vsel %vm7219_vm3, 0.0, %v17887_v63 }
 0x6b1   : > { %20516 = vst [vmem:[#allocation51_spill] sm:$0xff] %v17922_v59  ;;  %20517 = vst [vmem:[#allocation67_spill] sm:$0xff] %v17925_v50  ;;  %v10489_v14 = vpop.eup %10488  ;;  %v7554_v56 = vadd.f32 1.0, %v10487_v4  ;;  %v7751_v46 = vsel %vm17875_vm11, %v20518_v43, %v7745_v13  ;;  %v7891_v36 = vadd.f32 1.0, %v7890_v19  ;;  %v7893_v20 = vand.u32 2147483647, %v20509_v38 }
 0x6b2   : > { %v7976_v0 = vsel %vm17915_vm1, %v7973_v58, %v7970_v61  ;;  %v7572_v41 = vadd.f32 1.0, %v10489_v14  ;;  %v17940_v39 = vadd.f32 %v17515_v60, %v16808_v24  ;;  %v7557_v6 = vmul.f32 -0.5, %v10487_v4 }
 0x6b3   : > { %v8080_v45 = vmul.f32 0.01, %v7976_v0  ;;  %10498 = vlog2.f32 %v7554_v56  ;;  %v7376_v48 = vmul.f32 1.442695, %v7283_v7  ;;  %vm19131_vm10 = vcmp.gt.f32.partialorder %v17925_v50, 20.0 }
 0x6b4   : > { %10500 = vlog2.f32 %v7572_v41  ;;  %v7560_v13 = vand.u32 2147483647, %v10487_v4  ;;  %v7575_v19 = vmul.f32 -0.5, %v10489_v14  ;;  %v7578_v61 = vand.u32 2147483647, %v10489_v14 }
 0x6b5   : > { %v10491_v58 = vpop.eup %10490  ;;  %v17946_v40 = vsel %vm7248_vm15, %v17678_v30, %v8080_v45  ;;  %10502 = vpow2.f32 %v7378_v54  ;;  %v7892_v7 = vmul.f32 %v20509_v38, %v7891_v36  ;;  %v7285_v0 = vsel %vm19131_vm10, 0.0, %v17925_v50  ;;  %v20520_v30 = vld [vmem:[#allocation75_spill] sm:$0xff] }
 0x6b6   : > { %20519 = vst [vmem:[#allocation69_spill] sm:$0xff] %v17946_v40  ;;  %v17948_v5 = vpop.eup %10492  ;;  %v7889_v56 = vmul.f32 0.6931472, %v10491_v58  ;;  %vm7894_vm13 = vcmp.lt.f32.partialorder %v7893_v20, 0.0004427343  ;;  %v7761_v41 = vadd.f32 1.0, %v20520_v30 }
 0x6b7   : > { %v8055_v35 = vmul.f32 0.01, %v7751_v46  ;;  %v7558_v43 = vadd.f32 1.0, %v7557_v6  ;;  %v7764_v54 = vmul.f32 -0.5, %v20520_v30  ;;  %v7905_v37 = vadd.f32 1.0, %v20521_v49 }
 0x6b8   : > { %v7895_v45 = vsel %vm7894_vm13, %v7892_v7, %v7889_v56  ;;  %vm17961_vm15 = vcmp.lt.f32.partialorder %v7560_v13, 0.0004427343  ;;  %v7576_v38 = vadd.f32 1.0, %v7575_v19  ;;  %10504 = vlog2.f32 %v7761_v41  ;;  %v20526_v13 = vld [vmem:[#allocation65_spill] sm:$0xff]  ;;  %v20528_v19 = vld [vmem:[#allocation46_spill] sm:$0xff] }
 0x6b9   : > { %v17959_v15 = vpop.eup %10494  ;;  %v8071_v36 = vmul.f32 0.01, %v7895_v45  ;;  %vm17965_vm14 = vcmp.lt.f32.partialorder %v7578_v61, 0.0004427343  ;;  %v17969_v6 = vmul.f32 1.442695, %v7285_v0  ;;  %10506 = vlog2.f32 %v7905_v37 }
 0x6ba   : > { %v10497_v60 = vpop.eup %10496  ;;  %v7767_v20 = vand.u32 2147483647, %v20520_v30  ;;  %v7908_v56 = vmul.f32 -0.5, %v20521_v49  ;;  %v8119_v34 = vsel %vm7223_vm5, %v20526_v13, %v8055_v35  ;;  %v20529_v45 = vld [vmem:[#allocation30_spill] sm:$0xff]  ;;  %v7765_v61 = vadd.f32 1.0, %v7764_v54 }
 0x6bb   : > { %v7698_v7 = vadd.f32 1.0, %v10497_v60  ;;  %vm20530_vm11 = vcmp.gt.f32.partialorder %v20529_v45, 20.0  ;;  %v7701_v63 = vmul.f32 -0.5, %v10497_v60  ;;  %10508 = vpow2.f32 %v7376_v48  ;;  %v20539_v45 = vld [vmem:[#allocation17_spill] sm:$0xff] }
 0x6bc   : > { %v8135_v41 = vsel %vm20530_vm11, %v20528_v19, %v8071_v36  ;;  %v7911_v0 = vand.u32 2147483647, %v20521_v49  ;;  %v7559_v25 = vmul.f32 %v10487_v4, %v7558_v43  ;;  %v7577_v37 = vmul.f32 %v10489_v14, %v7576_v38  ;;  %v20531_v36 = vld [vmem:[#allocation66_spill] sm:$0xff]  ;;  %v20534_v14 = vld [vmem:[#allocation28_spill] sm:$0xff] }
 0x6bd   : > { %v9365_v12 = vpack.c.bf16 %v8135_v41, %v8119_v34  ;;  %v10499_v18 = vpop.eup %10498  ;;  %10510 = vlog2.f32 %v7698_v7  ;;  %v17981_v21 = vmul.f32 100.0, %v17940_v39  ;;  %v7704_v35 = vand.u32 2147483647, %v10497_v60  ;;  %v20535_v43 = vld [vmem:[#allocation82_spill] sm:$0xff] }
 0x6be   : > { %v10501_v40 = vpop.eup %10500  ;;  %v7556_v50 = vmul.f32 0.6931472, %v10499_v18  ;;  %v7909_v13 = vadd.f32 1.0, %v7908_v56  ;;  %v17985_v54 = vadd.f32 %v20531_v36, %v16808_v24  ;;  %v7766_v19 = vmul.f32 %v20520_v30, %v7765_v61 }
 0x6bf   : > { %9366 = vmatprep.subr.bf16.mxu0 %v9365_v12  ;;  %v10503_v48 = vpop.eup %10502  ;;  %v7574_v34 = vmul.f32 0.6931472, %v10501_v40  ;;  %vm17988_vm5 = vcmp.lt.f32.partialorder %v7767_v20, 0.0004427343  ;;  %v20536_v38 = vpack.c.bf16 %v20534_v14, %v20535_v43  ;;  %vm7234_vm1 = vcmp.gt.f32.partialorder %v17981_v21, 20.0 }
 0x6c0   : > { %v7702_v18 = vadd.f32 1.0, %v7701_v63  ;;  %v7716_v12 = vadd.f32 1.0, %v10503_v48  ;;  %v7719_v56 = vmul.f32 -0.5, %v10503_v48  ;;  %vm17996_vm13 = vcmp.lt.f32.partialorder %v7911_v0, 0.0004427343  ;;  %v18021_v0 = vld [vmem:[#allocation5 + $0xa0] sm:$0xff] }
 0x6c1   : > { %9368 = vmatpush1.bf16.msra.mxu0 %v20536_v38  ;;  %v7562_v40 = vsel %vm17961_vm15, %v7559_v25, %v7556_v50  ;;  %v7298_v30 = vsel %vm7234_vm1, 0.0, %v17981_v21  ;;  %v18006_v20 = vmul.f32 100.0, %v17985_v54  ;;  %v18010_v41 = vadd.f32 %v20539_v45, %v16808_v24  ;;  %v20543_v25 = vld [vmem:[#allocation27_spill] sm:$0xff]  ;;  %v20601_v21 = vld [vmem:[#allocation76_spill] sm:$0xff] }
 0x6c2   : > { %vm18012_vm11 = vcmp.lt.f32.partialorder %v7704_v35, 0.0004427343  ;;  %10512 = vlog2.f32 %v7716_v12  ;;  %v7910_v61 = vmul.f32 %v20521_v49, %v7909_v13  ;;  %v18019_v58 = vadd.f32 %v20543_v25, %v16808_v24  ;;  %v10505_v50 = vpop.eup %10504 }
 0x6c3   : > { %20540 = vst [vmem:[#allocation73_spill] sm:$0xff] %v18010_v41  ;;  %vm20545_vm15 = vcmask 261120   ;;  %v7580_v36 = vsel %vm17965_vm14, %v7577_v37, %v7574_v34  ;;  %v7722_v35 = vand.u32 2147483647, %v10503_v48  ;;  %v7406_v14 = vmul.f32 1.442695, %v7298_v30  ;;  %v10507_v49 = vpop.eup %10506 }
 0x6c4   : > { %20544 = vst [vmem:[#allocation92_spill] sm:$0xff] %v18019_v58  ;;  %9130 = vmatmul.mubr.msk.f32.vlgmr.msra.gmra.mrb[128].mxu0 %vm20545_vm15, %v18021_v0  ;;  %vm7236_vm10 = vcmp.gt.f32.partialorder %v18006_v20, 20.0  ;;  %v20546_v43 = vmov 0.0   ;;  %v8034_v13 = vmul.f32 0.01, %v7562_v40  ;;  %v7720_v38 = vadd.f32 1.0, %v7719_v56  ;;  %vm20549_vm14 = vmmov %vm20545_vm15 }
 0x6c5   : > { %8236 = vmatprep.mubr.f32.mxu0 %v20546_v43  ;;  %v7763_v24 = vmul.f32 0.6931472, %v10505_v50  ;;  %v7300_v12 = vsel %vm7236_vm10, 0.0, %v18006_v20  ;;  %v7907_v45 = vmul.f32 0.6931472, %v10507_v49  ;;  %10514 = vpow2.f32 %v7406_v14  ;;  %v18035_v37 = vpop.eup %10508  ;;  %v20548_v56 = vld [vmem:[#allocation64_spill] sm:$0xff] }
 0x6c6   : > { %v7410_v25 = vmul.f32 1.442695, %v7300_v12  ;;  %v18033_v46 = vmul.f32 100.0, %v18010_v41  ;;  %v8036_v34 = vmul.f32 0.01, %v7580_v36  ;;  %v7703_v30 = vmul.f32 %v10497_v60, %v7702_v18 }
 0x6c7   : > { %v7769_v44 = vsel %vm17988_vm5, %v7766_v19, %v7763_v24  ;;  %v18041_v40 = vadd.f32 %v20548_v56, %v16828_v26  ;;  %v18043_v50 = vld [vmem:[#allocation5 + $0xa8] sm:$0x1]  ;;  %v10511_v14 = vpop.eup %10510  ;;  %vm18047_vm15 = vcmp.lt.f32.partialorder %v7722_v35, 0.0004427343  ;;  %v7913_v60 = vsel %vm17996_vm13, %v7910_v61, %v7907_v45  ;;  %v20554_v61 = vld [vmem:[#allocation41_spill] sm:$0xff] }
 0x6c8   : > { %20547 = vst [vmem:[#allocation99_spill] sm:$0xff] %v18033_v46  ;;  %9131 = vmatmul.mubr.msk.f32.gmra.mrb[130].mxu0 %vm20549_vm14, %v18043_v50  ;;  %v8057_v18 = vmul.f32 0.01, %v7769_v44  ;;  %10516 = vpow2.f32 %v7410_v25  ;;  %v7700_v19 = vmul.f32 0.6931472, %v10511_v14  ;;  %v18055_v36 = vmul.f32 100.0, %v18019_v58 }
 0x6c9   : > { %8384 = vmatprep.mubr.f32.mxu0 %v20546_v43  ;;  %v8073_v4 = vmul.f32 0.01, %v7913_v60  ;;  %v18058_v24 = vmul.f32 100.0, %v18041_v40  ;;  %v18063_v35 = vsel %vm7202_vm7, %v17786_v23, %v8034_v13  ;;  %v7721_v12 = vmul.f32 %v10503_v48, %v7720_v38  ;;  %v20555_v45 = vld [vmem:[#allocation50_spill] sm:$0xff]  ;;  %v20558_v14 = vld [vmem:[#allocation35_spill] sm:$0xff] }
 0x6ca   : > { %20552 = vst [vmem:[#allocation19_spill] sm:$0xff] %v18055_v36  ;;  %20553 = vst [vmem:[#allocation31_spill] sm:$0xff] %v18063_v35  ;;  %vm7235_vm5 = vcmp.gt.f32.partialorder %v18033_v46, 20.0  ;;  %v18068_v44 = vadd.f32 %v17592_v55, %v16828_v26  ;;  %v7706_v7 = vsel %vm18012_vm11, %v7703_v30, %v7700_v19  ;;  %vm20556_vm13 = vcmp.gt.f32.partialorder %v20555_v45, 20.0  ;;  %v20557_v56 = vld [vmem:[#allocation102_spill] sm:$0xff] }
 0x6cb   : > { %v8121_v25 = vsel %vm20556_vm13, %v20554_v61, %v8057_v18  ;;  %vm20559_vm14 = vcmp.gt.f32.partialorder %v20558_v14, 20.0  ;;  %vm7250_vm7 = vcmp.gt.f32.partialorder %v18058_v24, 20.0  ;;  %v8050_v23 = vmul.f32 0.01, %v7706_v7  ;;  %v20560_v30 = vld [vmem:[#allocation98_spill] sm:$0xff]  ;;  %v20564_v7 = vld [vmem:[#allocation83_spill] sm:$0xff] }
 0x6cc   : > { %v8137_v27 = vsel %vm20559_vm14, %v20557_v56, %v8073_v4  ;;  %v7314_v55 = vsel %vm7250_vm7, 0.0, %v18058_v24  ;;  %v18083_v13 = vmul.f32 100.0, %v18068_v44  ;;  %v10513_v63 = vpop.eup %10512  ;;  %vm19144_vm11 = vcmp.gt.f32.partialorder %v18055_v36, 20.0  ;;  %v20566_v56 = vld [vmem:[#allocation87_spill] sm:$0xff] }
 0x6cd   : > { %v9373_v48 = vpack.c.bf16 %v8137_v27, %v8121_v25  ;;  %v7438_v38 = vmul.f32 1.442695, %v7314_v55  ;;  %v18088_v60 = vadd.f32 %v20560_v30, %v16828_v26  ;;  %v18092_v18 = vadd.f32 %v17605_v9, %v16828_v26  ;;  %v20565_v25 = vld [vmem:[#allocation34_spill] sm:$0xff] }
 0x6ce   : > { %v18097_v19 = vsel %vm7218_vm4, %v17858_v51, %v8050_v23  ;;  %v7718_v4 = vmul.f32 0.6931472, %v10513_v63  ;;  %vm7252_vm13 = vcmp.gt.f32.partialorder %v18083_v13, 20.0  ;;  %v7491_v61 = vadd.f32 1.0, %v20564_v7 }
 0x6cf   : > { %20561 = vst [vmem:[#allocation71_spill] sm:$0xff] %v18088_v60  ;;  %20562 = vst [vmem:[#allocation61_spill] sm:$0xff] %v18092_v18  ;;  %9374 = vmatprep.subr.bf16.mxu1 %v9373_v48  ;;  %v20567_v14 = vpack.c.bf16 %v20565_v25, %v20566_v56  ;;  %v7299_v26 = vsel %vm7235_vm5, 0.0, %v18033_v46  ;;  %10518 = vpow2.f32 %v7438_v38  ;;  %v7316_v9 = vsel %vm7252_vm13, 0.0, %v18083_v13  ;;  %v10515_v51 = vpop.eup %10514 }
 0x6d0   : > { %20563 = vst [vmem:[#allocation81_spill] sm:$0xff] %v18097_v19  ;;  %v7724_v16 = vsel %vm18047_vm15, %v7721_v12, %v7718_v4  ;;  %v7301_v27 = vsel %vm19144_vm11, 0.0, %v18055_v36  ;;  %v7442_v23 = vmul.f32 1.442695, %v7316_v9  ;;  %10520 = vlog2.f32 %v7491_v61  ;;  %v20589_v19 = vld [vmem:[#allocation62_spill] sm:$0xff] }
 0x6d1   : > { %9376 = vmatpush1.bf16.msra.mxu1 %v20567_v14  ;;  %v8052_v48 = vmul.f32 0.01, %v7724_v16  ;;  %v7842_v55 = vadd.f32 1.0, %v10515_v51  ;;  %v7845_v63 = vmul.f32 -0.5, %v10515_v51  ;;  %v18118_v30 = vmul.f32 100.0, %v18088_v60 }
 0x6d2   : > { %v10517_v38 = vpop.eup %10516  ;;  %v18123_v25 = vsel %vm7204_vm8, %v17790_v29, %v8036_v34  ;;  %vm20570_vm4 = vcmask 261120   ;;  %10522 = vpow2.f32 %v7442_v23  ;;  %v18128_v49 = vmul.f32 100.0, %v18092_v18 }
 0x6d3   : > { %20568 = vst [vmem:[#allocation57_spill] sm:$0xff] %v18118_v30  ;;  %20569 = vst [vmem:[#allocation93_spill] sm:$0xff] %v18123_v25  ;;  %v7494_v12 = vmul.f32 -0.5, %v20564_v7  ;;  %v18134_v4 = vsel %vm7220_vm12, %v17862_v33, %v8052_v48  ;;  %10524 = vlog2.f32 %v7842_v55  ;;  %v7408_v61 = vmul.f32 1.442695, %v7299_v26  ;;  %v20574_v26 = vld [vmem:[#allocation68_spill] sm:$0xff] }
 0x6d4   : > { %9132 = vmatmul.mubr.msk.f32.vlgmr.msra.gmra.mrb[128].mxu1 %vm20570_vm4, %v18021_v0  ;;  %20571 = vst [vmem:[#allocation43_spill] sm:$0xff] %v18128_v49  ;;  %20572 = vst [vmem:[#allocation63_spill] sm:$0xff] %v18134_v4  ;;  %v7412_v56 = vmul.f32 1.442695, %v7301_v27  ;;  %v7846_v8 = vadd.f32 1.0, %v7845_v63  ;;  %v7860_v14 = vadd.f32 1.0, %v10517_v38  ;;  %10526 = vpow2.f32 %v17969_v6 }
 0x6d5   : > { %8313 = vmatprep.mubr.f32.mxu1 %v20546_v43  ;;  %v7848_v34 = vand.u32 2147483647, %v10515_v51  ;;  %v7863_v9 = vmul.f32 -0.5, %v10517_v38  ;;  %vm7251_vm8 = vcmp.gt.f32.partialorder %v18118_v30, 20.0  ;;  %v7866_v2 = vand.u32 2147483647, %v10517_v38  ;;  %vm20573_vm15 = vmmov %vm20570_vm4 }
 0x6d6   : > { %10528 = vlog2.f32 %v7860_v14  ;;  %vm19142_vm12 = vcmp.gt.f32.partialorder %v18128_v49, 20.0  ;;  %v7495_v33 = vadd.f32 1.0, %v7494_v12  ;;  %v7635_v16 = vadd.f32 1.0, %v20574_v26 }
 0x6d7   : > { %10530 = vpow2.f32 %v7408_v61  ;;  %v7847_v27 = vmul.f32 %v10515_v51, %v7846_v8  ;;  %vm18146_vm14 = vcmp.lt.f32.partialorder %v7848_v34, 0.0004427343  ;;  %v7497_v6 = vand.u32 2147483647, %v20564_v7  ;;  %v20577_v61 = vld [vmem:[#allocation39_spill] sm:$0xff] }
 0x6d8   : > { %9133 = vmatmul.mubr.msk.f32.gmra.mrb[130].mxu1 %vm20573_vm15, %v18043_v50  ;;  %10532 = vpow2.f32 %v7412_v56  ;;  %v7864_v55 = vadd.f32 1.0, %v7863_v9  ;;  %v7315_v63 = vsel %vm7251_vm8, 0.0, %v18118_v30  ;;  %v7317_v12 = vsel %vm19142_vm12, 0.0, %v18128_v49 }
 0x6d9   : > { %8461 = vmatprep.mubr.f32.mxu1 %v20546_v43  ;;  %v10519_v48 = vpop.eup %10518  ;;  %v7509_v14 = vadd.f32 1.0, %v20577_v61  ;;  %vm18158_vm4 = vcmp.lt.f32.partialorder %v7866_v2, 0.0004427343  ;;  %v7496_v29 = vmul.f32 %v20564_v7, %v7495_v33  ;;  %10534 = vlog2.f32 %v7635_v16 }
 0x6da   : > { %v10521_v51 = vpop.eup %10520  ;;  %v7986_v56 = vadd.f32 1.0, %v10519_v48  ;;  %v7989_v34 = vmul.f32 -0.5, %v10519_v48  ;;  %v7638_v45 = vmul.f32 -0.5, %v20574_v26  ;;  %v7641_v18 = vand.u32 2147483647, %v20574_v26 }
 0x6db   : > { %v7493_v9 = vmul.f32 0.6931472, %v10521_v51  ;;  %10536 = vlog2.f32 %v7509_v14  ;;  %v7992_v49 = vand.u32 2147483647, %v10519_v48  ;;  %vm18165_vm15 = vcmp.lt.f32.partialorder %v7497_v6, 0.0004427343 }
 0x6dc   : > { %v10523_v36 = vpop.eup %10522  ;;  %10538 = vlog2.f32 %v7986_v56  ;;  %v7512_v2 = vmul.f32 -0.5, %v20577_v61  ;;  %v7990_v60 = vadd.f32 1.0, %v7989_v34  ;;  %v18170_v7 = vmul.f32 1.442695, %v7315_v63 }
 0x6dd   : > { %v10525_v30 = vpop.eup %10524  ;;  %v8004_v46 = vadd.f32 1.0, %v10523_v36  ;;  %v7499_v33 = vsel %vm18165_vm15, %v7496_v29, %v7493_v9  ;;  %v7865_v51 = vmul.f32 %v10517_v38, %v7864_v55  ;;  %v8007_v14 = vmul.f32 -0.5, %v10523_v36  ;;  %v20586_v38 = vld [vmem:[#allocation32_spill] sm:$0xff] }
 0x6de   : > { %v7844_v16 = vmul.f32 0.6931472, %v10525_v30  ;;  %v18174_v41 = vmul.f32 1.442695, %v7317_v12  ;;  %v18176_v56 = vpop.eup %10526  ;;  %v8010_v6 = vand.u32 2147483647, %v10523_v36 }
 0x6df   : > { %10540 = vlog2.f32 %v8004_v46  ;;  %v7639_v25 = vadd.f32 1.0, %v7638_v45  ;;  %vm18178_vm12 = vcmp.lt.f32.partialorder %v7641_v18, 0.0004427343  ;;  %vm18182_vm11 = vcmp.lt.f32.partialorder %v7992_v49, 0.0004427343 }
 0x6e0   : > { %v10529_v34 = vpop.eup %10528  ;;  %v8027_v58 = vmul.f32 0.01, %v7499_v33  ;;  %v7513_v30 = vadd.f32 1.0, %v7512_v2  ;;  %v7653_v29 = vadd.f32 1.0, %v20586_v38  ;;  %v7850_v46 = vsel %vm18146_vm14, %v7847_v27, %v7844_v16  ;;  %v20592_v16 = vld [vmem:[#allocation80_spill] sm:$0xff] }
 0x6e1   : > { %v18187_v55 = vpop.eup %10530  ;;  %v7862_v12 = vmul.f32 0.6931472, %v10529_v34  ;;  %v7991_v45 = vmul.f32 %v10519_v48, %v7990_v60  ;;  %v7515_v18 = vand.u32 2147483647, %v20577_v61  ;;  %v8008_v35 = vadd.f32 1.0, %v8007_v14  ;;  %v20593_v14 = vld [vmem:[#allocation84_spill] sm:$0xff] }
 0x6e2   : > { %20587 = vst [vmem:[#allocation40_spill] sm:$0xff] %v18187_v55  ;;  %v18192_v9 = vpop.eup %10532  ;;  %10542 = vlog2.f32 %v7653_v29  ;;  %v7656_v49 = vmul.f32 -0.5, %v20586_v38  ;;  %v7779_v33 = vadd.f32 1.0, %v20589_v19  ;;  %vm18198_vm15 = vcmp.lt.f32.partialorder %v8010_v6, 0.0004427343 }
 0x6e3   : > { %20588 = vst [vmem:[#allocation33_spill] sm:$0xff] %v18192_v9  ;;  %v7868_v2 = vsel %vm18158_vm4, %v7865_v51, %v7862_v12  ;;  %v7640_v27 = vmul.f32 %v20574_v26, %v7639_v25  ;;  %v7659_v60 = vand.u32 2147483647, %v20586_v38  ;;  %v10535_v23 = vpop.eup %10534  ;;  %v8066_v48 = vmul.f32 0.01, %v7850_v46  ;;  %v20597_v25 = vld [vmem:[#allocation13_spill] sm:$0xff] }
 0x6e4   : > { %vm20594_vm14 = vcmp.gt.f32.partialorder %v20593_v14, 20.0  ;;  %v7514_v29 = vmul.f32 %v20577_v61, %v7513_v30  ;;  %10544 = vlog2.f32 %v7779_v33  ;;  %v7637_v8 = vmul.f32 0.6931472, %v10535_v23 }
 0x6e5   : > { %v8091_v34 = vsel %vm20594_vm14, %v20592_v16, %v8027_v58  ;;  %v10537_v9 = vpop.eup %10536  ;;  %vm18208_vm4 = vcmp.lt.f32.partialorder %v7515_v18, 0.0004427343  ;;  %v7782_v6 = vmul.f32 -0.5, %v20589_v19  ;;  %v7923_v26 = vadd.f32 1.0, %v20597_v25 }
 0x6e6   : > { %v10539_v12 = vpop.eup %10538  ;;  %v8068_v52 = vmul.f32 0.01, %v7868_v2  ;;  %v8009_v46 = vmul.f32 %v10523_v36, %v8008_v35  ;;  %v7511_v59 = vmul.f32 0.6931472, %v10537_v9  ;;  %v7657_v55 = vadd.f32 1.0, %v7656_v49  ;;  %v20600_v2 = vld [vmem:[#allocation24_spill] sm:$0xff] }
 0x6e7   : > { %v7988_v14 = vmul.f32 0.6931472, %v10539_v12  ;;  %v7643_v61 = vsel %vm18178_vm12, %v7640_v27, %v7637_v8  ;;  %vm18216_vm14 = vcmp.lt.f32.partialorder %v7659_v60, 0.0004427343  ;;  %10546 = vlog2.f32 %v7923_v26  ;;  %v20605_v12 = vld [vmem:[#allocation52_spill] sm:$0xff] }
 0x6e8   : > { %v18223_v30 = vsel %vm7234_vm1, %v17940_v39, %v8066_v48  ;;  %v8043_v18 = vmul.f32 0.01, %v7643_v61  ;;  %v7785_v33 = vand.u32 2147483647, %v20589_v19  ;;  %v7926_v36 = vmul.f32 -0.5, %v20597_v25  ;;  %v20602_v39 = vld [vmem:[#allocation90_spill] sm:$0xff] }
 0x6e9   : > { %v10541_v35 = vpop.eup %10540  ;;  %v7994_v4 = vsel %vm18182_vm11, %v7991_v45, %v7988_v14  ;;  %v7517_v9 = vsel %vm18208_vm4, %v7514_v29, %v7511_v59  ;;  %v7783_v49 = vadd.f32 1.0, %v7782_v6  ;;  %v7797_v27 = vadd.f32 1.0, %v20600_v2 }
 0x6ea   : > { %v8082_v60 = vmul.f32 0.01, %v7994_v4  ;;  %v8006_v23 = vmul.f32 0.6931472, %v10541_v35  ;;  %vm20603_vm1 = vcmp.gt.f32.partialorder %v20602_v39, 20.0  ;;  %v7800_v16 = vmul.f32 -0.5, %v20600_v2 }
 0x6eb   : > { %v8107_v48 = vsel %vm20603_vm1, %v20601_v21, %v8043_v18  ;;  %v18239_v8 = vsel %vm7236_vm10, %v17985_v54, %v8068_v52  ;;  %v7658_v45 = vmul.f32 %v20586_v38, %v7657_v55  ;;  %10548 = vlog2.f32 %v7797_v27  ;;  %v20610_v27 = vld [vmem:[#allocation25_spill] sm:$0xff]  ;;  %v20613_v21 = vld [vmem:[#allocation88_spill] sm:$0xff] }
 0x6ec   : > { %v9377_v63 = vpack.c.bf16 %v8107_v48, %v8091_v34  ;;  %v10543_v59 = vpop.eup %10542  ;;  %v18245_v29 = vsel %vm7250_vm7, %v18041_v40, %v8082_v60  ;;  %v8012_v51 = vsel %vm18198_vm15, %v8009_v46, %v8006_v23  ;;  %v8029_v6 = vmul.f32 0.01, %v7517_v9  ;;  %v20604_v34 = vld [vmem:[#allocation20_spill] sm:$0xff]  ;;  %v20612_v23 = vld [vmem:[#allocation78_spill] sm:$0xff] }
 0x6ed   : > { %v7927_v26 = vadd.f32 1.0, %v7926_v36  ;;  %v9415_v20 = vpack.c.bf16 %v18245_v29, %v18223_v30  ;;  %v8084_v52 = vmul.f32 0.01, %v8012_v51  ;;  %v7655_v54 = vmul.f32 0.6931472, %v10543_v59  ;;  %v18548_v30 = vpop.permute.xlu0 %8154 }
 0x6ee   : > { %9378 = vmatprep.subr.bf16.mxu0 %v9377_v63  ;;  %v7941_v38 = vadd.f32 1.0, %v17594_v62  ;;  %v10545_v55 = vpop.eup %10544  ;;  %v20606_v14 = vpack.c.bf16 %v20604_v34, %v20605_v12  ;;  %v7784_v40 = vmul.f32 %v20589_v19, %v7783_v49  ;;  %vm18256_vm10 = vcmp.lt.f32.partialorder %v7785_v33, 0.0004427343  ;;  %v20609_v49 = vld [vmem:[#allocation91_spill] sm:$0xff]  ;;  %v20617_v34 = vld [vmem:[#allocation53_spill] sm:$0xff] }
 0x6ef   : > { %v7929_v24 = vand.u32 2147483647, %v20597_v25  ;;  %v7801_v46 = vadd.f32 1.0, %v7800_v16  ;;  %v18264_v61 = vsel %vm7252_vm13, %v18068_v44, %v8084_v52  ;;  %v7661_v18 = vsel %vm18216_vm14, %v7658_v45, %v7655_v54 }
 0x6f0   : > { %9380 = vmatpush1.bf16.msra.mxu0 %v20606_v14  ;;  %v7781_v36 = vmul.f32 0.6931472, %v10545_v55  ;;  %10550 = vlog2.f32 %v7941_v38  ;;  %v9423_v19 = vpack.c.bf16 %v18264_v61, %v18239_v8  ;;  %v8045_v33 = vmul.f32 0.01, %v7661_v18  ;;  %v20618_v14 = vld [vmem:[#allocation101_spill] sm:$0xff] }
 0x6f1   : > { %v7928_v35 = vmul.f32 %v20597_v25, %v7927_v26  ;;  %v7803_v4 = vand.u32 2147483647, %v20600_v2  ;;  %v10547_v9 = vpop.eup %10546  ;;  %vm20611_vm7 = vcmp.gt.f32.partialorder %v20610_v27, 20.0  ;;  %v7944_v58 = vmul.f32 -0.5, %v17594_v62  ;;  %v20621_v18 = vld [vmem:[#allocation85_spill] sm:$0xff] }
 0x6f2   : > { %v8093_v13 = vsel %vm20611_vm7, %v20609_v49, %v8029_v6  ;;  %v7787_v44 = vsel %vm18256_vm10, %v7784_v40, %v7781_v36  ;;  %v7527_v60 = vadd.f32 1.0, %v17636_v22  ;;  %vm20614_vm11 = vcmp.gt.f32.partialorder %v20613_v21, 20.0  ;;  %v20622_v36 = vld [vmem:[#allocation42_spill] sm:$0xff] }
 0x6f3   : > { %v8109_v39 = vsel %vm20614_vm11, %v20612_v23, %v8045_v33  ;;  %v7925_v48 = vmul.f32 0.6931472, %v10547_v9  ;;  %vm7930_vm13 = vcmp.lt.f32.partialorder %v7929_v24, 0.0004427343  ;;  %v7530_v25 = vmul.f32 -0.5, %v17636_v22 }
 0x6f4   : > { %v9385_v16 = vpack.c.bf16 %v8109_v39, %v8093_v13  ;;  %v8059_v63 = vmul.f32 0.01, %v7787_v44  ;;  %v7802_v45 = vmul.f32 %v20600_v2, %v7801_v46  ;;  %10552 = vlog2.f32 %v7527_v60  ;;  %v20619_v2 = vld [vmem:[#allocation79_spill] sm:$0xff] }
 0x6f5   : > { %v7931_v59 = vsel %vm7930_vm13, %v7928_v35, %v7925_v48  ;;  %vm18284_vm12 = vcmp.lt.f32.partialorder %v7803_v4, 0.0004427343  ;;  %v7671_v6 = vadd.f32 1.0, %v17733_v53  ;;  %v7674_v26 = vmul.f32 -0.5, %v17733_v53  ;;  %v10549_v52 = vpop.eup %10548  ;;  %v20624_v35 = vld [vmem:[#allocation58_spill] sm:$0xff]  ;;  %v20625_v4 = vld [vmem:[#allocation56_spill] sm:$0xff] }
 0x6f6   : > { %9386 = vmatprep.subr.bf16.mxu1 %v9385_v16  ;;  %v8075_v54 = vmul.f32 0.01, %v7931_v59  ;;  %v7945_v38 = vadd.f32 1.0, %v7944_v58  ;;  %v7947_v55 = vand.u32 2147483647, %v17594_v62  ;;  %v7545_v12 = vadd.f32 1.0, %v20617_v34 }
 0x6f7   : > { %v20620_v40 = vpack.c.bf16 %v20618_v14, %v20619_v2  ;;  %v7799_v1 = vmul.f32 0.6931472, %v10549_v52  ;;  %v7531_v24 = vadd.f32 1.0, %v7530_v25  ;;  %v7533_v46 = vand.u32 2147483647, %v17636_v22  ;;  %v20636_v2 = vld [vmem:[#allocation96_spill] sm:$0xff] }
 0x6f8   : > { %10554 = vlog2.f32 %v7671_v6  ;;  %vm20623_vm15 = vcmp.gt.f32.partialorder %v20622_v36, 20.0  ;;  %vm20626_vm4 = vcmp.gt.f32.partialorder %v20625_v4, 20.0  ;;  %v7677_v49 = vand.u32 2147483647, %v17733_v53  ;;  %v20641_v36 = vld [vmem:[#allocation44_spill] sm:$0xff]  ;;  %v20654_v6 = vld [vmem:[#allocation23_spill] sm:$0xff] }
 0x6f9   : > { %9388 = vmatpush1.bf16.msra.mxu1 %v20620_v40  ;;  %v8123_v33 = vsel %vm20623_vm15, %v20621_v18, %v8059_v63  ;;  %v8139_v9 = vsel %vm20626_vm4, %v20624_v35, %v8075_v54  ;;  %10556 = vlog2.f32 %v7545_v12  ;;  %v7805_v13 = vsel %vm18284_vm12, %v7802_v45, %v7799_v1  ;;  %v20629_v63 = vld [vmem:[#allocation15_spill] sm:$0xff]  ;;  %v20630_v45 = vld [vmem:[#allocation77_spill] sm:$0xff]  ;;  %v20637_v40 = vld [vmem:[#allocation94_spill] sm:$0xff] }
 0x6fa   : > { %10558 = vpow2.f32 %v18170_v7  ;;  %v9381_v27 = vpack.c.bf16 %v8139_v9, %v8123_v33  ;;  %v7675_v44 = vadd.f32 1.0, %v7674_v26  ;;  %v10551_v58 = vpop.eup %10550  ;;  %v7946_v60 = vmul.f32 %v17594_v62, %v7945_v38  ;;  %v20640_v18 = vld [vmem:[#allocation89_spill] sm:$0xff] }
 0x6fb   : > { %vm18307_vm14 = vcmp.lt.f32.partialorder %v7947_v55, 0.0004427343  ;;  %v7548_v21 = vmul.f32 -0.5, %v20617_v34  ;;  %v7689_v39 = vadd.f32 1.0, %v17745_v42  ;;  %v7943_v48 = vmul.f32 0.6931472, %v10551_v58 }
 0x6fc   : > { %9382 = vmatprep.subr.bf16.mxu0 %v9381_v27  ;;  %v8061_v25 = vmul.f32 0.01, %v7805_v13  ;;  %v7692_v7 = vmul.f32 -0.5, %v17745_v42  ;;  %v7815_v16 = vadd.f32 1.0, %v17776_v47  ;;  %v20631_v59 = vpack.c.bf16 %v20629_v63, %v20630_v45  ;;  %v20649_v63 = vld [vmem:[#allocation59_spill] sm:$0xff] }
 0x6fd   : > { %v7532_v62 = vmul.f32 %v17636_v22, %v7531_v24  ;;  %vm18319_vm1 = vcmp.lt.f32.partialorder %v7533_v46, 0.0004427343  ;;  %vm18323_vm10 = vcmp.lt.f32.partialorder %v7677_v49, 0.0004427343  ;;  %10560 = vlog2.f32 %v7689_v39 }
 0x6fe   : > { %9384 = vmatpush1.bf16.msra.mxu0 %v20631_v59  ;;  %v7949_v26 = vsel %vm18307_vm14, %v7946_v60, %v7943_v48  ;;  %v7676_v52 = vmul.f32 %v17733_v53, %v7675_v44  ;;  %v7551_v54 = vand.u32 2147483647, %v20617_v34  ;;  %10562 = vlog2.f32 %v7815_v16  ;;  %v10553_v38 = vpop.eup %10552 }
 0x6ff   : > { %v8077_v55 = vmul.f32 0.01, %v7949_v26  ;;  %v7549_v22 = vadd.f32 1.0, %v7548_v21  ;;  %v7695_v12 = vand.u32 2147483647, %v17745_v42  ;;  %v7959_v14 = vadd.f32 1.0, %v17895_v10 }
 0x700   : > { %vm20638_vm7 = vcmp.gt.f32.partialorder %v20637_v40, 20.0  ;;  %vm20639_vm11 = vcmask 261120   ;;  %v7529_v24 = vmul.f32 0.6931472, %v10553_v38  ;;  %v7693_v46 = vadd.f32 1.0, %v7692_v7 }
 0x701   : > { %v8125_v1 = vsel %vm20638_vm7, %v20636_v2, %v8061_v25  ;;  %9134 = vmatmul.mubr.msk.f32.vlgmr.msra.gmra.mrb[132].mxu0 %vm20639_vm11, %v18021_v0  ;;  %v7833_v53 = vadd.f32 1.0, %v17819_v11  ;;  %vm20642_vm13 = vcmp.gt.f32.partialorder %v20641_v36, 20.0  ;;  %v7818_v35 = vmul.f32 -0.5, %v17776_v47  ;;  %vm20645_vm15 = vmmov %vm20639_vm11 }
 0x702   : > { %v8141_v33 = vsel %vm20642_vm13, %v20640_v18, %v8077_v55  ;;  %8390 = vmatprep.mubr.f32.mxu0 %v20546_v43  ;;  %v7821_v4 = vand.u32 2147483647, %v17776_v47  ;;  %10564 = vlog2.f32 %v7959_v14  ;;  %v10555_v9 = vpop.eup %10554  ;;  %v7535_v27 = vsel %vm18319_vm1, %v7532_v62, %v7529_v24  ;;  %v20658_v24 = vld [vmem:[#allocation72_spill] sm:$0xff] }
 0x703   : > { %v9389_v49 = vpack.c.bf16 %v8141_v33, %v8125_v1  ;;  %v7962_v13 = vmul.f32 -0.5, %v17895_v10  ;;  %10566 = vlog2.f32 %v7833_v53  ;;  %v10557_v44 = vpop.eup %10556  ;;  %v7673_v58 = vmul.f32 0.6931472, %v10555_v9  ;;  %v20657_v1 = vld [vmem:[#allocation22_spill] sm:$0xff] }
 0x704   : > { %v8031_v60 = vmul.f32 0.01, %v7535_v27  ;;  %v7550_v23 = vmul.f32 %v20617_v34, %v7549_v22  ;;  %vm18349_vm12 = vcmp.lt.f32.partialorder %v7551_v54, 0.0004427343  ;;  %v18353_v39 = vpop.eup %10558  ;;  %v7547_v48 = vmul.f32 0.6931472, %v10557_v44 }
 0x705   : > { %9390 = vmatprep.subr.bf16.mxu1 %v9389_v49  ;;  %9135 = vmatmul.mubr.msk.f32.gmra.mrb[134].mxu0 %vm20645_vm15, %v18043_v50  ;;  %v7694_v25 = vmul.f32 %v17745_v42, %v7693_v46  ;;  %vm18358_vm4 = vcmp.lt.f32.partialorder %v7695_v12, 0.0004427343  ;;  %v7836_v16 = vmul.f32 -0.5, %v17819_v11  ;;  %v20648_v34 = vld [vmem:[#allocation11_spill] sm:$0xff]  ;;  %v7679_v59 = vsel %vm18323_vm10, %v7676_v52, %v7673_v58  ;;  %vm20656_vm10 = vmmov %vm20639_vm11 }
 0x706   : > { %v20650_v45 = vpack.c.bf16 %v20648_v34, %v20649_v63  ;;  %v7819_v62 = vadd.f32 1.0, %v7818_v35  ;;  %v7965_v51 = vand.u32 2147483647, %v17895_v10  ;;  %v7977_v26 = vadd.f32 1.0, %v17904_v17  ;;  %8538 = vmatprep.mubr.f32.mxu0 %v20546_v43  ;;  %v20653_v12 = vld [vmem:[#allocation95_spill] sm:$0xff]  ;;  %vm20662_vm13 = vmmov %vm20656_vm10 }
 0x707   : > { %v8047_v42 = vmul.f32 0.01, %v7679_v59  ;;  %v7553_v54 = vsel %vm18349_vm12, %v7550_v23, %v7547_v48  ;;  %vm18373_vm14 = vcmp.lt.f32.partialorder %v7821_v4, 0.0004427343  ;;  %v7963_v55 = vadd.f32 1.0, %v7962_v13  ;;  %v10561_v22 = vpop.eup %10560  ;;  %v20663_v48 = vld [vmem:[#allocation48_spill] sm:$0xff] }
 0x708   : > { %9392 = vmatpush1.bf16.msra.mxu1 %v20650_v45  ;;  %vm20655_vm1 = vcmp.gt.f32.partialorder %v20654_v6, 20.0  ;;  %v7837_v14 = vadd.f32 1.0, %v7836_v16  ;;  %10568 = vlog2.f32 %v7977_v26  ;;  %v7980_v2 = vmul.f32 -0.5, %v17904_v17  ;;  %v10563_v40 = vpop.eup %10562  ;;  %v20667_v45 = vld [vmem:[#allocation14_spill] sm:$0xff] }
 0x709   : > { %v8095_v52 = vsel %vm20655_vm1, %v20653_v12, %v8031_v60  ;;  %vm20659_vm7 = vcmp.gt.f32.partialorder %v20658_v24, 20.0  ;;  %v7691_v53 = vmul.f32 0.6931472, %v10561_v22  ;;  %v8033_v18 = vmul.f32 0.01, %v7553_v54  ;;  %v20668_v59 = vld [vmem:[#allocation18_spill] sm:$0xff] }
 0x70a   : > { %v8111_v46 = vsel %vm20659_vm7, %v20657_v1, %v8047_v42  ;;  %v7563_v36 = vadd.f32 1.0, %v17948_v5  ;;  %v7817_v35 = vmul.f32 0.6931472, %v10563_v40  ;;  %v7820_v4 = vmul.f32 %v17776_v47, %v7819_v62  ;;  %v20676_v1 = vld [vmem:[#allocation29_spill] sm:$0xff]  ;;  %vm20688_vm7 = vmmov %vm20662_vm13 }
 0x70b   : > { %9136 = vmatmul.mubr.msk.f32.vlgmr.msra.gmra.mrb[132].mxu1 %vm20656_vm10, %v18021_v0  ;;  %v9393_v33 = vpack.c.bf16 %v8111_v46, %v8095_v52  ;;  %vm18389_vm11 = vcmp.lt.f32.partialorder %v7965_v51, 0.0004427343  ;;  %v7697_v49 = vsel %vm18358_vm4, %v7694_v25, %v7691_v53  ;;  %v7964_v27 = vmul.f32 %v17895_v10, %v7963_v55  ;;  %v20664_v25 = vld [vmem:[#allocation45_spill] sm:$0xff] }
 0x70c   : > { %8467 = vmatprep.mubr.f32.mxu1 %v20546_v43  ;;  %v7839_v13 = vand.u32 2147483647, %v17819_v11  ;;  %10570 = vlog2.f32 %v7563_v36  ;;  %v10565_v44 = vpop.eup %10564  ;;  %v8049_v58 = vmul.f32 0.01, %v7697_v49  ;;  %v7823_v60 = vsel %vm18373_vm14, %v7820_v4, %v7817_v35  ;;  %v20679_v4 = vld [vmem:[#allocation40_spill] sm:$0xff] }
 0x70d   : > { %9394 = vmatprep.subr.bf16.mxu0 %v9393_v33  ;;  %v7981_v23 = vadd.f32 1.0, %v7980_v2  ;;  %v7707_v47 = vadd.f32 1.0, %v18035_v37  ;;  %v10567_v21 = vpop.eup %10566  ;;  %vm20665_vm12 = vcmp.gt.f32.partialorder %v20664_v25, 20.0  ;;  %v20666_v7 = vpack.c.bf16 %v17764_v57, %v17728_v28  ;;  %v20674_v2 = vld [vmem:[#allocation97_spill] sm:$0xff] }
 0x70e   : > { %v8097_v10 = vsel %vm20665_vm12, %v20663_v48, %v8033_v18  ;;  %v7961_v16 = vmul.f32 0.6931472, %v10565_v44  ;;  %v7838_v34 = vmul.f32 %v17819_v11, %v7837_v14  ;;  %v7566_v63 = vmul.f32 -0.5, %v17948_v5  ;;  %v20673_v14 = vld [vmem:[#allocation55_spill] sm:$0xff]  ;;  %vm20700_vm12 = vmmov %vm20688_vm7 }
 0x70f   : > { %9137 = vmatmul.mubr.msk.f32.gmra.mrb[134].mxu1 %vm20662_vm13, %v18043_v50  ;;  %9396 = vmatpush1.bf16.msra.mxu0 %v20666_v7  ;;  %vm20669_vm15 = vcmp.gt.f32.partialorder %v20668_v59, 20.0  ;;  %v8063_v51 = vmul.f32 0.01, %v7823_v60  ;;  %v7835_v26 = vmul.f32 0.6931472, %v10567_v21  ;;  %10572 = vlog2.f32 %v7707_v47  ;;  %v20683_v47 = vld [vmem:[#allocation26_spill] sm:$0xff]  ;;  %vm20695_vm13 = vmmov %vm20688_vm7 }
 0x710   : > { %v8113_v62 = vsel %vm20669_vm15, %v20667_v45, %v8049_v58  ;;  %8615 = vmatprep.mubr.f32.mxu1 %v20546_v43  ;;  %10574 = vpow2.f32 %v18174_v41  ;;  %v7967_v28 = vsel %vm18389_vm11, %v7964_v27, %v7961_v16  ;;  %vm18417_vm4 = vcmp.lt.f32.partialorder %v7839_v13, 0.0004427343  ;;  %v20680_v27 = vld [vmem:[#allocation51_spill] sm:$0xff]  ;;  %v20681_v13 = vld [vmem:[#allocation12_spill] sm:$0xff]  ;;  %v20684_v21 = vld [vmem:[#allocation70_spill] sm:$0xff] }
 0x711   : > { %v9401_v42 = vpack.c.bf16 %v8113_v62, %v8097_v10  ;;  %v8079_v11 = vmul.f32 0.01, %v7967_v28  ;;  %v7841_v54 = vsel %vm18417_vm4, %v7838_v34, %v7835_v26  ;;  %v7983_v38 = vand.u32 2147483647, %v17904_v17  ;;  %v20686_v16 = vld [vmem:[#allocation16_spill] sm:$0xff] }
 0x712   : > { %v7982_v55 = vmul.f32 %v17904_v17, %v7981_v23  ;;  %v7569_v22 = vand.u32 2147483647, %v17948_v5  ;;  %v7710_v41 = vmul.f32 -0.5, %v18035_v37  ;;  %v7581_v12 = vadd.f32 1.0, %v17959_v15  ;;  %v10569_v6 = vpop.eup %10568 }
 0x713   : > { %9402 = vmatprep.subr.bf16.mxu1 %v9401_v42  ;;  %v20672_v52 = vpack.c.bf16 %v17795_v32, %v17750_v3  ;;  %vm20675_vm14 = vcmp.gt.f32.partialorder %v20674_v2, 20.0  ;;  %v8143_v24 = vsel %vm7247_vm9, %v20676_v1, %v8079_v11  ;;  %v7567_v17 = vadd.f32 1.0, %v7566_v63 }
 0x714   : > { %v8127_v40 = vsel %vm20675_vm14, %v20673_v14, %v8063_v51  ;;  %v7725_v46 = vadd.f32 1.0, %v18176_v56  ;;  %v7979_v18 = vmul.f32 0.6931472, %v10569_v6  ;;  %v8065_v36 = vmul.f32 0.01, %v7841_v54 }
 0x715   : > { %9404 = vmatpush1.bf16.msra.mxu1 %v20672_v52  ;;  %v9397_v53 = vpack.c.bf16 %v8143_v24, %v8127_v40  ;;  %10576 = vlog2.f32 %v7581_v12  ;;  %vm7984_vm1 = vcmp.lt.f32.partialorder %v7983_v38, 0.0004427343  ;;  %v7584_v33 = vmul.f32 -0.5, %v17959_v15  ;;  %v20693_v12 = vld [vmem:[#allocation37_spill] sm:$0xff] }
 0x716   : > { %10578 = vlog2.f32 %v7725_v46  ;;  %v10571_v3 = vpop.eup %10570  ;;  %v7985_v32 = vsel %vm7984_vm1, %v7982_v55, %v7979_v18  ;;  %vm18439_vm10 = vcmp.lt.f32.partialorder %v7569_v22, 0.0004427343  ;;  %v7711_v31 = vadd.f32 1.0, %v7710_v41  ;;  %v20691_v55 = vld [vmem:[#allocation33_spill] sm:$0xff]  ;;  %v20715_v18 = vld [vmem:[#allocation71_spill] sm:$0xff] }
 0x717   : > { %9398 = vmatprep.subr.bf16.mxu0 %v9397_v53  ;;  %v7851_v9 = vadd.f32 1.0, %v20679_v4  ;;  %v8081_v49 = vmul.f32 0.01, %v7985_v32  ;;  %v20682_v44 = vpack.c.bf16 %v20680_v27, %v20681_v13  ;;  %v7565_v58 = vmul.f32 0.6931472, %v10571_v3  ;;  %v20692_v41 = vld [vmem:[#allocation69_spill] sm:$0xff] }
 0x718   : > { %v7568_v60 = vmul.f32 %v17948_v5, %v7567_v17  ;;  %v7713_v23 = vand.u32 2147483647, %v18035_v37  ;;  %vm20685_vm9 = vcmp.gt.f32.partialorder %v20684_v21, 20.0  ;;  %v7587_v25 = vand.u32 2147483647, %v17959_v15  ;;  %v20696_v53 = vld [vmem:[#allocation38_spill] sm:$0xff] }
 0x719   : > { %9400 = vmatpush1.bf16.msra.mxu0 %v20682_v44  ;;  %v8129_v48 = vsel %vm20685_vm9, %v20683_v47, %v8065_v36  ;;  %v7728_v10 = vmul.f32 -0.5, %v18176_v56  ;;  %10580 = vlog2.f32 %v7851_v9  ;;  %v10573_v7 = vpop.eup %10572  ;;  %v8145_v63 = vsel %vm7249_vm6, %v20686_v16, %v8081_v49  ;;  %v20701_v21 = vld [vmem:[#allocation81_spill] sm:$0xff] }
 0x71a   : > { %v7571_v45 = vsel %vm18439_vm10, %v7568_v60, %v7565_v58  ;;  %v7585_v5 = vadd.f32 1.0, %v7584_v33  ;;  %v7995_v59 = vadd.f32 1.0, %v18353_v39  ;;  %v18460_v62 = vpop.eup %10574  ;;  %v9405_v51 = vpack.c.bf16 %v8145_v63, %v8129_v48  ;;  %v20702_v48 = vld [vmem:[#allocation31_spill] sm:$0xff]  ;;  %v20705_v63 = vld [vmem:[#allocation86_spill] sm:$0xff] }
 0x71b   : > { %v7709_v26 = vmul.f32 0.6931472, %v10573_v7  ;;  %v7712_v42 = vmul.f32 %v18035_v37, %v7711_v31  ;;  %v7854_v28 = vmul.f32 -0.5, %v20679_v4  ;;  %vm7714_vm6 = vcmp.lt.f32.partialorder %v7713_v23, 0.0004427343 }
 0x71c   : > { %9138 = vmatmul.mubr.msk.f32.vlgmr.msra.gmra.mrb[136].mxu0 %vm20688_vm7, %v18021_v0  ;;  %v8035_v57 = vmul.f32 0.01, %v7571_v45  ;;  %10582 = vlog2.f32 %v7995_v59  ;;  %9406 = vmatprep.subr.bf16.mxu1 %v9405_v51  ;;  %vm18467_vm11 = vcmp.lt.f32.partialorder %v7587_v25, 0.0004427343  ;;  %v7729_v38 = vadd.f32 1.0, %v7728_v10  ;;  %v20707_v59 = vld [vmem:[#allocation36_spill] sm:$0xff] }
 0x71d   : > { %8544 = vmatprep.mubr.f32.mxu0 %v20546_v43  ;;  %v7715_v11 = vsel %vm7714_vm6, %v7712_v42, %v7709_v26  ;;  %v7869_v22 = vadd.f32 1.0, %v20691_v55  ;;  %v20694_v6 = vpack.c.bf16 %v20692_v41, %v20693_v12  ;;  %v7586_v52 = vmul.f32 %v17959_v15, %v7585_v5  ;;  %v20698_v15 = vld [vmem:[#allocation49_spill] sm:$0xff]  ;;  %v20708_v51 = vld [vmem:[#allocation67_spill] sm:$0xff] }
 0x71e   : > { %v8051_v37 = vmul.f32 0.01, %v7715_v11  ;;  %v7731_v14 = vand.u32 2147483647, %v18176_v56  ;;  %v8013_v2 = vadd.f32 1.0, %v18460_v62  ;;  %v7855_v1 = vadd.f32 1.0, %v7854_v28 }
 0x71f   : > { %9408 = vmatpush1.bf16.msra.mxu1 %v20694_v6  ;;  %v10577_v40 = vpop.eup %10576  ;;  %v7857_v24 = vand.u32 2147483647, %v20679_v4  ;;  %v7998_v17 = vmul.f32 -0.5, %v18353_v39  ;;  %10584 = vlog2.f32 %v7869_v22  ;;  %v8099_v36 = vsel %vm7203_vm2, %v20696_v53, %v8035_v57 }
 0x720   : > { %9139 = vmatmul.mubr.msk.f32.gmra.mrb[138].mxu0 %vm20695_vm13, %v18043_v50  ;;  %v10579_v46 = vpop.eup %10578  ;;  %v8115_v3 = vsel %vm7219_vm3, %v20698_v15, %v8051_v37  ;;  %v7583_v32 = vmul.f32 0.6931472, %v10577_v40  ;;  %10586 = vlog2.f32 %v8013_v2  ;;  %v7730_v9 = vmul.f32 %v18176_v56, %v7729_v38  ;;  %vm20704_vm3 = vmmov %vm20688_vm7  ;;  %v20710_v37 = vld [vmem:[#allocation63_spill] sm:$0xff] }
 0x721   : > { %8692 = vmatprep.mubr.f32.mxu0 %v20546_v43  ;;  %v9409_v35 = vpack.c.bf16 %v8115_v3, %v8099_v36  ;;  %v7727_v31 = vmul.f32 0.6931472, %v10579_v46  ;;  %v7872_v49 = vmul.f32 -0.5, %v20691_v55  ;;  %vm7732_vm2 = vcmp.lt.f32.partialorder %v7731_v14, 0.0004427343  ;;  %vm20725_vm7 = vmmov %vm20704_vm3 }
 0x722   : > { %9140 = vmatmul.mubr.msk.f32.vlgmr.msra.gmra.mrb[136].mxu1 %vm20700_vm12, %v18021_v0  ;;  %v7589_v27 = vsel %vm18467_vm11, %v7586_v52, %v7583_v32  ;;  %v7999_v60 = vadd.f32 1.0, %v7998_v17  ;;  %v8016_v23 = vmul.f32 -0.5, %v18460_v62  ;;  %v20703_v25 = vpack.c.bf16 %v20701_v21, %v20702_v48  ;;  %v20711_v52 = vld [vmem:[#allocation93_spill] sm:$0xff]  ;;  %vm20726_vm6 = vmmov %vm20704_vm3 }
 0x723   : > { %8621 = vmatprep.mubr.f32.mxu1 %v20546_v43  ;;  %v10581_v13 = vpop.eup %10580  ;;  %9410 = vmatprep.subr.bf16.mxu0 %v9409_v35  ;;  %v7733_v44 = vsel %vm7732_vm2, %v7730_v9, %v7727_v31  ;;  %v8037_v58 = vmul.f32 0.01, %v7589_v27  ;;  %v7856_v10 = vmul.f32 %v20679_v4, %v7855_v1  ;;  %v8001_v7 = vand.u32 2147483647, %v18353_v39  ;;  %v20713_v17 = vld [vmem:[#allocation73_spill] sm:$0xff]  ;;  %v20718_v9 = vld [vmem:[#allocation19_spill] sm:$0xff] }
 0x724   : > { %v8053_v47 = vmul.f32 0.01, %v7733_v44  ;;  %9412 = vmatpush1.bf16.msra.mxu0 %v20703_v25  ;;  %v7853_v56 = vmul.f32 0.6931472, %v10581_v13  ;;  %vm7858_vm15 = vcmp.lt.f32.partialorder %v7857_v24, 0.0004427343  ;;  %v8000_v11 = vmul.f32 %v18353_v39, %v7999_v60 }
 0x725   : > { %v7873_v16 = vadd.f32 1.0, %v7872_v49  ;;  %v8101_v5 = vsel %vm7205_vm0, %v20705_v63, %v8037_v58  ;;  %vm20709_vm4 = vcmp.gt.f32.partialorder %v20708_v51, 20.0  ;;  %v7875_v28 = vand.u32 2147483647, %v20691_v55  ;;  %v20720_v49 = vld [vmem:[#allocation61_spill] sm:$0xff]  ;;  %v20721_v27 = vld [vmem:[#allocation43_spill] sm:$0xff] }
 0x726   : > { %9141 = vmatmul.mubr.msk.f32.gmra.mrb[138].mxu1 %vm20704_vm3, %v18043_v50  ;;  %v10583_v34 = vpop.eup %10582  ;;  %v8117_v26 = vsel %vm20709_vm4, %v20707_v59, %v8053_v47  ;;  %v7859_v42 = vsel %vm7858_vm15, %v7856_v10, %v7853_v56  ;;  %v8017_v54 = vadd.f32 1.0, %v8016_v23  ;;  %vm8002_vm14 = vcmp.lt.f32.partialorder %v8001_v7, 0.0004427343 }
 0x727   : > { %8769 = vmatprep.mubr.f32.mxu1 %v20546_v43  ;;  %v9417_v4 = vpack.c.bf16 %v8117_v26, %v8101_v5  ;;  %v7997_v57 = vmul.f32 0.6931472, %v10583_v34  ;;  %v8067_v38 = vmul.f32 0.01, %v7859_v42  ;;  %v8019_v22 = vand.u32 2147483647, %v18460_v62 }
 0x728   : > { %v20712_v14 = vpack.c.bf16 %v20710_v37, %v20711_v52  ;;  %v7874_v1 = vmul.f32 %v20691_v55, %v7873_v16  ;;  %vm7876_vm0 = vcmp.lt.f32.partialorder %v7875_v28, 0.0004427343  ;;  %v8018_v39 = vmul.f32 %v18460_v62, %v8017_v54  ;;  %v20717_v55 = vld [vmem:[#allocation92_spill] sm:$0xff] }
 0x729   : > { %v10585_v41 = vpop.eup %10584  ;;  %9418 = vmatprep.subr.bf16.mxu1 %v9417_v4  ;;  %v8003_v12 = vsel %vm8002_vm14, %v8000_v11, %v7997_v57  ;;  %v8131_v53 = vsel %vm7235_vm5, %v20713_v17, %v8067_v38  ;;  %vm8020_vm1 = vcmp.lt.f32.partialorder %v8019_v22, 0.0004427343  ;;  %vm20719_vm10 = vcmp.gt.f32.partialorder %v20718_v9, 20.0  ;;  %vm20723_vm5 = vmmov %vm20704_vm3 }
 0x72a   : > { %v10587_v6 = vpop.eup %10586  ;;  %9420 = vmatpush1.bf16.msra.mxu1 %v20712_v14  ;;  %v8083_v2 = vmul.f32 0.01, %v8003_v12  ;;  %v7871_v40 = vmul.f32 0.6931472, %v10585_v41  ;;  %vm20722_vm9 = vcmp.gt.f32.partialorder %v20721_v27, 20.0 }
 0x72b   : > { %v8015_v24 = vmul.f32 0.6931472, %v10587_v6 }
 0x72c   : > { %v8147_v15 = vsel %vm7251_vm8, %v20715_v18, %v8083_v2  ;;  %v7877_v33 = vsel %vm7876_vm0, %v7874_v1, %v7871_v40  ;;  %vm20724_vm8 = vmmov %vm20704_vm3 }
 0x72d   : > { %v9413_v3 = vpack.c.bf16 %v8147_v15, %v8131_v53  ;;  %v8021_v32 = vsel %vm8020_vm1, %v8018_v39, %v8015_v24  ;;  %v8069_v35 = vmul.f32 0.01, %v7877_v33 }
 0x72e   : > { %v8085_v31 = vmul.f32 0.01, %v8021_v32 }
 0x72f   : > { %9414 = vmatprep.subr.bf16.mxu0 %v9413_v3  ;;  %v8133_v62 = vsel %vm20719_vm10, %v20717_v55, %v8069_v35 }
 0x730   : > { %v8149_v13 = vsel %vm20722_vm9, %v20720_v49, %v8085_v31  ;;  %9416 = vmatpush1.bf16.msra.mxu0 %v9415_v20 }
 0x731   : > { %v9421_v44 = vpack.c.bf16 %v8149_v13, %v8133_v62 }
 0x733   : > { %9422 = vmatprep.subr.bf16.mxu1 %v9421_v44  ;;  %9142 = vmatmul.mubr.msk.f32.vlgmr.msra.gmra.mrb[140].mxu0 %vm20723_vm5, %v18021_v0 }
 0x734   : > { %9424 = vmatpush1.bf16.msra.mxu1 %v9423_v19  ;;  %8698 = vmatprep.mubr.f32.mxu0 %v20546_v43 }
 0x737   : > { %9144 = vmatmul.mubr.msk.f32.vlgmr.msra.gmra.mrb[140].mxu1 %vm20724_vm8, %v18021_v0  ;;  %9143 = vmatmul.mubr.msk.f32.gmra.mrb[142].mxu0 %vm20725_vm7, %v18043_v50  ;;  %v18555_v0 = vpop.permute.xlu1 %8159 }
 0x738   : > { %8775 = vmatprep.mubr.f32.mxu1 %v20546_v43 }
 0x73b   : > { %9145 = vmatmul.mubr.msk.f32.gmra.mrb[142].mxu1 %vm20726_vm6, %v18043_v50 }
 0x797   : > { %v8232_v29 = vpop.f32.mrb[128].mxu0 }
 0x798   : > { %v8233_v8 = vadd.f32 %v8232_v29, %v18548_v30  ;;  %v8234_v20 = vpop.f32.mrb[129].mxu0 }
 0x799   : > { %v8235_v61 = vadd.f32 %v8234_v20, %v18548_v30 }
 0x79a   : > { %8782 = vst [vmem:[%s18552_s17] sm:$0xff] %v8233_v8 }
 0x79b   : > { %8783 = vst [vmem:[%s18552_s17 + $0x8] sm:$0xff] %v8235_v61  ;;  %v8238_v43 = vpop.f32.mrb[130].mxu0 }
 0x79c   : > { %v8239_v50 = vadd.f32 %v8238_v43, %v18555_v0  ;;  %v8240_v19 = vpop.f32.mrb[131].mxu0 }
 0x79d   : > { %v8241_v58 = vadd.f32 %v8240_v19, %v18555_v0 }
 0x79e   : > { %8798 = vst [vmem:[%s18552_s17 + $0x80] sm:$0x1] %v8239_v50 }
 0x79f   : > { %8799 = vst [vmem:[%s18552_s17 + $0x88] sm:$0x1] %v8241_v58 }
 0x7a7   : > { %v8309_v60 = vpop.f32.mrb[128].mxu1 }
 0x7a8   : > { %v8310_v23 = vadd.f32 %v8309_v60, %v18548_v30  ;;  %v8311_v47 = vpop.f32.mrb[129].mxu1 }
 0x7a9   : > { %v8312_v21 = vadd.f32 %v8311_v47, %v18548_v30 }
 0x7aa   : > { %8784 = vst [vmem:[%s18552_s17 + $0x10] sm:$0xff] %v8310_v23 }
 0x7ab   : > { %8785 = vst [vmem:[%s18552_s17 + $0x18] sm:$0xff] %v8312_v21  ;;  %v8315_v48 = vpop.f32.mrb[130].mxu1 }
 0x7ac   : > { %v8316_v25 = vadd.f32 %v8315_v48, %v18555_v0  ;;  %v8317_v56 = vpop.f32.mrb[131].mxu1 }
 0x7ad   : > { %v8318_v10 = vadd.f32 %v8317_v56, %v18555_v0 }
 0x7ae   : > { %8800 = vst [vmem:[%s18552_s17 + $0x90] sm:$0x1] %v8316_v25 }
 0x7af   : > { %8801 = vst [vmem:[%s18552_s17 + $0x98] sm:$0x1] %v8318_v10 }
 0x7d4   : > { %v8386_v7 = vpop.f32.mrb[132].mxu0 }
 0x7d5   : > { %v8387_v16 = vadd.f32 %v8386_v7, %v18548_v30  ;;  %v8388_v34 = vpop.f32.mrb[133].mxu0 }
 0x7d6   : > { %v8389_v63 = vadd.f32 %v8388_v34, %v18548_v30 }
 0x7d7   : > { %8786 = vst [vmem:[%s18552_s17 + $0x20] sm:$0xff] %v8387_v16 }
 0x7d8   : > { %8787 = vst [vmem:[%s18552_s17 + $0x28] sm:$0xff] %v8389_v63  ;;  %v8392_v45 = vpop.f32.mrb[134].mxu0 }
 0x7d9   : > { %v8393_v5 = vadd.f32 %v8392_v45, %v18555_v0  ;;  %v8394_v59 = vpop.f32.mrb[135].mxu0 }
 0x7da   : > { %v8395_v51 = vadd.f32 %v8394_v59, %v18555_v0 }
 0x7db   : > { %8802 = vst [vmem:[%s18552_s17 + $0xa0] sm:$0x1] %v8393_v5 }
 0x7dc   : > { %8803 = vst [vmem:[%s18552_s17 + $0xa8] sm:$0x1] %v8395_v51 }
 0x7de   : > { %v8463_v26 = vpop.f32.mrb[132].mxu1 }
 0x7df   : > { %v8464_v42 = vadd.f32 %v8463_v26, %v18548_v30  ;;  %v8465_v28 = vpop.f32.mrb[133].mxu1 }
 0x7e0   : > { %v8466_v4 = vadd.f32 %v8465_v28, %v18548_v30 }
 0x7e1   : > { %8788 = vst [vmem:[%s18552_s17 + $0x30] sm:$0xff] %v8464_v42 }
 0x7e2   : > { %8789 = vst [vmem:[%s18552_s17 + $0x38] sm:$0xff] %v8466_v4  ;;  %v8469_v57 = vpop.f32.mrb[134].mxu1 }
 0x7e3   : > { %v8470_v11 = vadd.f32 %v8469_v57, %v18555_v0  ;;  %v8471_v54 = vpop.f32.mrb[135].mxu1 }
 0x7e4   : > { %v8472_v38 = vadd.f32 %v8471_v54, %v18555_v0 }
 0x7e5   : > { %8804 = vst [vmem:[%s18552_s17 + $0xb0] sm:$0x1] %v8470_v11 }
 0x7e6   : > { %8805 = vst [vmem:[%s18552_s17 + $0xb8] sm:$0x1] %v8472_v38 }
 0x7ef   : > { %v8540_v22 = vpop.f32.mrb[136].mxu0 }
 0x7f0   : > { %v8541_v41 = vadd.f32 %v8540_v22, %v18548_v30  ;;  %v8542_v12 = vpop.f32.mrb[137].mxu0 }
 0x7f1   : > { %v8543_v6 = vadd.f32 %v8542_v12, %v18548_v30 }
 0x7f2   : > { %8790 = vst [vmem:[%s18552_s17 + $0x40] sm:$0xff] %v8541_v41 }
 0x7f3   : > { %8791 = vst [vmem:[%s18552_s17 + $0x48] sm:$0xff] %v8543_v6  ;;  %v8546_v37 = vpop.f32.mrb[138].mxu0 }
 0x7f4   : > { %v8547_v52 = vadd.f32 %v8546_v37, %v18555_v0  ;;  %v8548_v14 = vpop.f32.mrb[139].mxu0 }
 0x7f5   : > { %v8617_v2 = vpop.f32.mrb[136].mxu1  ;;  %v8549_v40 = vadd.f32 %v8548_v14, %v18555_v0 }
 0x7f6   : > { %v8618_v1 = vadd.f32 %v8617_v2, %v18548_v30  ;;  %v8619_v24 = vpop.f32.mrb[137].mxu1  ;;  %8806 = vst [vmem:[%s18552_s17 + $0xc0] sm:$0x1] %v8547_v52 }
 0x7f7   : > { %v8620_v39 = vadd.f32 %v8619_v24, %v18548_v30  ;;  %8807 = vst [vmem:[%s18552_s17 + $0xc8] sm:$0x1] %v8549_v40 }
 0x7f8   : > { %8792 = vst [vmem:[%s18552_s17 + $0x50] sm:$0xff] %v8618_v1 }
 0x7f9   : > { %8793 = vst [vmem:[%s18552_s17 + $0x58] sm:$0xff] %v8620_v39  ;;  %v8623_v17 = vpop.f32.mrb[138].mxu1 }
 0x7fa   : > { %v8624_v46 = vadd.f32 %v8623_v17, %v18555_v0  ;;  %v8625_v53 = vpop.f32.mrb[139].mxu1 }
 0x7fb   : > { %v8626_v18 = vadd.f32 %v8625_v53, %v18555_v0 }
 0x7fc   : > { %8808 = vst [vmem:[%s18552_s17 + $0xd0] sm:$0x1] %v8624_v46 }
 0x7fd   : > { %8809 = vst [vmem:[%s18552_s17 + $0xd8] sm:$0x1] %v8626_v18 }
 0x806   : > { %v8694_v36 = vpop.f32.mrb[140].mxu0 }
 0x807   : > { %v8695_v15 = vadd.f32 %v8694_v36, %v18548_v30  ;;  %v8696_v33 = vpop.f32.mrb[141].mxu0 }
 0x808   : > { %v8697_v3 = vadd.f32 %v8696_v33, %v18548_v30 }
 0x809   : > { %8794 = vst [vmem:[%s18552_s17 + $0x60] sm:$0xff] %v8695_v15 }
 0x80a   : > { %v8771_v32 = vpop.f32.mrb[140].mxu1  ;;  %8795 = vst [vmem:[%s18552_s17 + $0x68] sm:$0xff] %v8697_v3  ;;  %v8700_v35 = vpop.f32.mrb[142].mxu0 }
 0x80b   : > { %v8772_v31 = vadd.f32 %v8771_v32, %v18548_v30  ;;  %v8773_v55 = vpop.f32.mrb[141].mxu1  ;;  %v8701_v9 = vadd.f32 %v8700_v35, %v18555_v0  ;;  %v8702_v62 = vpop.f32.mrb[143].mxu0 }
 0x80c   : > { %v8774_v49 = vadd.f32 %v8773_v55, %v18548_v30  ;;  %v8703_v27 = vadd.f32 %v8702_v62, %v18555_v0 }
 0x80d   : > { %8796 = vst [vmem:[%s18552_s17 + $0x70] sm:$0xff] %v8772_v31  ;;  %8810 = vst [vmem:[%s18552_s17 + $0xe0] sm:$0x1] %v8701_v9 }
 0x80e   : > { %8797 = vst [vmem:[%s18552_s17 + $0x78] sm:$0xff] %v8774_v49  ;;  %v8777_v13 = vpop.f32.mrb[142].mxu1  ;;  %8811 = vst [vmem:[%s18552_s17 + $0xe8] sm:$0x1] %v8703_v27 }
 0x80f   : > { %v8778_v44 = vadd.f32 %v8777_v13, %v18555_v0  ;;  %v8779_v29 = vpop.f32.mrb[143].mxu1 }
 0x810   : > { %v8780_v30 = vadd.f32 %v8779_v29, %v18555_v0 }
 0x811   : > { %8812 = vst [vmem:[%s18552_s17 + $0xf0] sm:$0x1] %v8778_v44 }
 0x812   : > { %8813 = vst [vmem:[%s18552_s17 + $0xf8] sm:$0x1] %v8780_v30 }
 0x813   : > { %10682 = shalt.err (!%p10679_p7)
}
 0x814   : > { %s10683_s7 = scalar_lea.hbm %s18619_s30, 4096  ;;  %s10687_s25 = scalar_lea.hbm %s18670_s2, 16384 }
 0x815   : > { %p10684_p9 = scmp.ne.s32.totalorder %s18619_s30, %s10683_s7  ;;  %p10688_p0 = scmp.lt.u32.totalorder %s18619_s30, %s18670_s2 }
 0x816   : > { %p10689_p10 = scmp.lt.u32.totalorder %s10687_s25, %s10683_s7  ;;  %p10691_p1 = scmp.lt.u32.totalorder %s10683_s7, %s18619_s30 }
 0x817   : > { %p10685_p11 = pnand %p10684_p9, %p10850_p12 }
 0x818   : > { %p10690_p2 = por %p10689_p10, %p10688_p0 }
 0x819   : > { %p10686_p5 = pneg %p10685_p11 }
 0x81a   : > { %p10692_p4 = por %p10691_p1, %p10690_p2 }
 0x81c   : > { %p10693_p6 = pnand %p10692_p4, %p10686_p5 }
 0x81e   : > { %10696 = shalt.err (!%p10693_p6)
}
 0x81f   : > { %s10749_s29 = smov 2048   ;;  %s10750_s15 = smov 8192  }
 0x820   : > { %s10751_s17 = smov 128  }
 0x821   : > { %9495 = dma.vmem_to_hbm [thread:$0]  (%p10850_p12), %s18622_s22, 4096, %s18619_s30, %s8815_s13, %s10749_s29, %s10750_s15, %s10751_s17  }
 0x822 PF: > { %p9512_p8 = scmp.ge.s32.totalorder %s10739_s12, 2  ;;  %s8843_s27 = sand.u32 1, %s10727_s9  }
 0x823   : > { %p20727_p13 = scmp.ne.s32.totalorder %s19153_s16, 0  ;;  %s8844_s23 = scalar_lea.sflag [#allocation4], %s8843_s27 }
 0x825   : > { %p9506_p3 = pnand %p9512_p8, %p20727_p13 }
 0x827   : > { %10722 = dma.done.wait (!%p9506_p3), %s8844_s23, 4096  }
 0x828   : > { %10724 = vsyncadd (!%p9506_p3), %s8844_s23, 4294963200  ;;  %p16_p7 = scmp.ge.s32.totalorder %s10820_s21, 6   ;;  %s20728_s9 = smov %s10731_s10 }
 0x829   : > { %s20729_s10 = smov %s10735_s11  ;;  %s20730_s11 = smov %s10846_s8 }
 0x82a   : > { %s20731_s12 = smov %s10820_s21  ;;  %18 = sbr.rel (!%p16_p7) target bundleno = 6 (0x6), region = 77 }
 0x831   :  { %8849 = vsyncpa [#allocation3], 1 }
 0x832   :  { %8851 = vsyncpa [#allocation3 + $0x1], 1 }
 0x833   :  { %8852 = vsyncpa [#allocation6], 1 }
 0x834   :  { %8853 = vsyncpa [#allocation4], 1 }
 0x835   :  { %8855 = vsyncpa [#allocation4 + $0x1], 1 }

</bundles_post_ra>
